<compile_context>
chip_gen: v7x
topology: tpu7x:2x2x1
jax: 0.10.0
libtpu: 0.0.40
codegen_flags: <defaults>
</compile_context>

<pallas_src>
import math
import functools

import jax
import jax.numpy as jnp
from jax.experimental import pallas as pl
from jax.experimental.pallas import tpu as pltpu


def _gelu_tanh(x):
    # TODO(synk): PyTorch's 'gelu' activation in nn.Transformer layers and the
    # output head is exact erf-GELU; the tanh approximation is used here per
    # the performance feedback (EUP path, fewer VALU slots) — max deviation is
    # ~1e-3 on activations.
    c = 0.7978845608028654  # sqrt(2/pi)
    return 0.5 * x * (1.0 + jnp.tanh(c * (x + 0.044715 * x * x * x)))


# ----------------------------------------------------------------------------
# The fused whole-model kernel (one grid step = B / n_cores batch elements).
# ----------------------------------------------------------------------------
def _model_kernel(src_ref, tgt_ref, pe_ref, glue_ref,
                  enc_mats_ref, enc_w2_ref, enc_vecs_ref,
                  dec_mats_ref, dec_w2_ref, dec_vecs_ref,
                  head_ref, o_ref, *, num_heads, eps):
    E = pe_ref.shape[-1]
    Bp, s_enc = src_ref.shape[0], src_ref.shape[1]
    s_dec = tgt_ref.shape[1]
    n_enc = enc_mats_ref.shape[0]
    n_dec = dec_mats_ref.shape[0]
    dh = E // num_heads
    scale = 1.0 / math.sqrt(dh)
    f32 = jnp.float32

    def mm(a, b):
        return jnp.dot(a, b, preferred_element_type=f32)

    def layer_norm(x, g, b):
        mean = jnp.mean(x, axis=-1, keepdims=True)
        var = jnp.mean(jnp.square(x - mean), axis=-1, keepdims=True)
        return (x - mean) * jax.lax.rsqrt(var + eps) * g + b

    # Per-head lane masks over the E dim (hoisted constants).
    lane = jax.lax.broadcasted_iota(jnp.int32, (1, E), 1)
    head_masks = [((lane >= h * dh) & (lane < (h + 1) * dh)).astype(f32)
                  for h in range(num_heads)]

    def attention(q, k, v, wo, bo, mask):
        # q: (S_q, E); k, v: (S_k, E).  Heads separated by masking the E
        # (lane) dim -> no K=8 matmuls and no 8-lane slicing; per-head output
        # projection folded into one (E, E) projection of the summed contexts.
        q = q * scale
        ctx = None
        for hm in head_masks:
            s = jax.lax.dot_general(q * hm, k, (((1,), (1,)), ((), ())),
                                    preferred_element_type=f32)
            if mask is not None:
                s = s + mask
            s = s - jnp.max(s, axis=-1, keepdims=True)
            p = jnp.exp(s)
            p = p / jnp.sum(p, axis=-1, keepdims=True)   # exact softmax (parity)
            c = mm(p, v * hm)                            # only head-h cols nonzero
            ctx = c if ctx is None else ctx + c
        return mm(ctx, wo) + bo

    def self_attn(x, S, wqkv, bqkv, wo, bo, mask):
        qkv = mm(x, wqkv) + bqkv                         # fused QKV: (Bp*S, 3E)
        outs = []
        for b in range(Bp):
            r = b * S
            q = qkv[r:r + S, 0:E]
            k = qkv[r:r + S, E:2 * E]
            v = qkv[r:r + S, 2 * E:3 * E]
            outs.append(attention(q, k, v, wo, bo, mask))
        return outs[0] if Bp == 1 else jnp.concatenate(outs, axis=0)

    def cross_attn(x, mem, wq, bq, wkv, bkv, wo, bo):
        q_all = mm(x, wq) + bq                           # (Bp*s_dec, E)
        kv = mm(mem, wkv) + bkv                          # fused KV: (Bp*s_enc, 2E)
        outs = []
        for b in range(Bp):
            q = q_all[b * s_dec:(b + 1) * s_dec]
            k = kv[b * s_enc:(b + 1) * s_enc, 0:E]
            v = kv[b * s_enc:(b + 1) * s_enc, E:2 * E]
            outs.append(attention(q, k, v, wo, bo, None))
        return outs[0] if Bp == 1 else jnp.concatenate(outs, axis=0)

    def ffn(x, w1, b1, w2, b2):
        return mm(_gelu_tanh(mm(x, w1) + b1), w2) + b2

    # ---------- embed raw values in-kernel (pre-kernel glue folded in) ------
    vp_w = glue_ref[0:1, :]                              # (1, E)
    in_add = glue_ref[1:1 + s_enc, :]                    # (s_enc, E)
    out_add = glue_ref[1 + s_enc:1 + s_enc + s_dec, :]   # (s_dec, E)
    pe = pe_ref[...]                                     # (Bp, 1, E)

    x = (src_ref[...] * vp_w + in_add + pe).reshape(Bp * s_enc, E)
    y = (tgt_ref[...] * vp_w + out_add + pe).reshape(Bp * s_dec, E)

    # ---------------- encoder (norm_first, GELU, dropout=0) -----------------
    for l in range(n_enc):
        g1 = enc_vecs_ref[l, 0:E]
        b1 = enc_vecs_ref[l, E:2 * E]
        g2 = enc_vecs_ref[l, 2 * E:3 * E]
        b2 = enc_vecs_ref[l, 3 * E:4 * E]
        bqkv = enc_vecs_ref[l, 4 * E:7 * E]
        bo = enc_vecs_ref[l, 7 * E:8 * E]
        bf1 = enc_vecs_ref[l, 8 * E:12 * E]
        bf2 = enc_vecs_ref[l, 12 * E:13 * E]
        wqkv = enc_mats_ref[l, :, 0:3 * E]
        wo = enc_mats_ref[l, :, 3 * E:4 * E]
        w1 = enc_mats_ref[l, :, 4 * E:8 * E]
        w2 = enc_w2_ref[l]

        h = layer_norm(x, g1, b1)
        x = x + self_attn(h, s_enc, wqkv, bqkv, wo, bo, None)
        h = layer_norm(x, g2, b2)
        x = x + ffn(h, w1, bf1, w2, bf2)
    memory = x

    # ---------------- decoder (causal self-attn + cross-attn) ---------------
    row_i = jax.lax.broadcasted_iota(jnp.int32, (s_dec, s_dec), 0)
    col_i = jax.lax.broadcasted_iota(jnp.int32, (s_dec, s_dec), 1)
    causal = jnp.where(row_i >= col_i, 0.0, -1e30).astype(f32)

    for l in range(n_dec):
        g1 = dec_vecs_ref[l, 0:E]
        b1 = dec_vecs_ref[l, E:2 * E]
        g2 = dec_vecs_ref[l, 2 * E:3 * E]
        b2 = dec_vecs_ref[l, 3 * E:4 * E]
        g3 = dec_vecs_ref[l, 4 * E:5 * E]
        b3 = dec_vecs_ref[l, 5 * E:6 * E]
        sa_bqkv = dec_vecs_ref[l, 6 * E:9 * E]
        sa_bo = dec_vecs_ref[l, 9 * E:10 * E]
        ca_bq = dec_vecs_ref[l, 10 * E:11 * E]
        ca_bkv = dec_vecs_ref[l, 11 * E:13 * E]
        ca_bo = dec_vecs_ref[l, 13 * E:14 * E]
        bf1 = dec_vecs_ref[l, 14 * E:18 * E]
        bf2 = dec_vecs_ref[l, 18 * E:19 * E]
        sa_wqkv = dec_mats_ref[l, :, 0:3 * E]
        sa_wo = dec_mats_ref[l, :, 3 * E:4 * E]
        ca_wq = dec_mats_ref[l, :, 4 * E:5 * E]
        ca_wkv = dec_mats_ref[l, :, 5 * E:7 * E]
        ca_wo = dec_mats_ref[l, :, 7 * E:8 * E]
        w1 = dec_mats_ref[l, :, 8 * E:12 * E]
        w2 = dec_w2_ref[l]

        h = layer_norm(y, g1, b1)
        y = y + self_attn(h, s_dec, sa_wqkv, sa_bqkv, sa_wo, sa_bo, causal)
        h = layer_norm(y, g2, b2)
        y = y + cross_attn(h, memory, ca_wq, ca_bq, ca_wkv, ca_bkv, ca_wo, ca_bo)
        h = layer_norm(y, g3, b3)
        y = y + ffn(h, w1, bf1, w2, bf2)

    # ---------------- output head: Linear -> GELU -> Linear -----------------
    out_w1 = head_ref[0:E, :]                            # (E, E//2)
    out_b1 = head_ref[E, :]                              # (E//2,)
    out_w2 = head_ref[E + 1:E + 2, :]                    # (1, E//2)
    out_b2 = head_ref[E + 2:E + 3, 0:1]                  # (1, 1)
    h = _gelu_tanh(mm(y, out_w1) + out_b1)               # (Bp*s_dec, E//2)
    # Transposed final matmul -> lane-dense (1, Bp*s_dec) row, stored as slab.
    row = jax.lax.dot_general(out_w2, h, (((1,), (1,)), ((), ())),
                              preferred_element_type=f32)
    o_ref[...] = (row + out_b2).reshape(Bp, 1, s_dec).astype(o_ref.dtype)


# ----------------------------------------------------------------------------
# Parameter init (per-layer stacked weights, QKV / KV pre-fused).
# ----------------------------------------------------------------------------
def init_params(key, cfg):
    E = cfg["embed_dim"]
    Le = cfg["num_encoder_layers"]
    Ld = cfg["num_decoder_layers"]
    keys = iter(jax.random.split(key, 64))

    def nrm(shape):
        return jax.random.normal(next(keys), shape, jnp.float32) * 0.02

    def zeros(shape):
        return jnp.zeros(shape, jnp.float32)

    def ones(shape):
        return jnp.ones(shape, jnp.float32)

    enc = {
        "ln1_g": ones((Le, E)), "ln1_b": zeros((Le, E)),
        "wqkv": nrm((Le, E, 3 * E)), "bqkv": zeros((Le, 3 * E)),
        "wo": nrm((Le, E, E)), "bo": zeros((Le, E)),
        "ln2_g": ones((Le, E)), "ln2_b": zeros((Le, E)),
        "w1": nrm((Le, E, 4 * E)), "b1": zeros((Le, 4 * E)),
        "w2": nrm((Le, 4 * E, E)), "b2": zeros((Le, E)),
    }
    dec = {
        "ln1_g": ones((Ld, E)), "ln1_b": zeros((Ld, E)),
        "sa_wqkv": nrm((Ld, E, 3 * E)), "sa_bqkv": zeros((Ld, 3 * E)),
        "sa_wo": nrm((Ld, E, E)), "sa_bo": zeros((Ld, E)),
        "ln2_g": ones((Ld, E)), "ln2_b": zeros((Ld, E)),
        "ca_wq": nrm((Ld, E, E)), "ca_bq": zeros((Ld, E)),
        "ca_wkv": nrm((Ld, E, 2 * E)), "ca_bkv": zeros((Ld, 2 * E)),
        "ca_wo": nrm((Ld, E, E)), "ca_bo": zeros((Ld, E)),
        "ln3_g": ones((Ld, E)), "ln3_b": zeros((Ld, E)),
        "w1": nrm((Ld, E, 4 * E)), "b1": zeros((Ld, 4 * E)),
        "w2": nrm((Ld, 4 * E, E)), "b2": zeros((Ld, E)),
    }
    return {
        # value_projection: nn.Linear(1, E)
        "vp_w": nrm((E,)), "vp_b": zeros((E,)),
        # CrossMarketCompoundEmbedding
        "price_embed": nrm((1, E // 4)), "size_embed": nrm((1, E // 4)),
        "exchange_embed": nrm((4, E // 4)), "pair_embed": nrm((5, E // 4)),
        # BinancePerpOutputEmbedding
        "perp_price_embed": nrm((1, E // 2)), "perp_size_embed": nrm((1, E // 2)),
        "enc": enc, "dec": dec,
        # output head: Linear(E, E//2) -> GELU -> Linear(E//2, 1)
        "out_w1": nrm((E, E // 2)), "out_b1": zeros((E // 2,)),
        "out_w2": nrm((E // 2, 1)), "out_b2": zeros((1,)),
    }
    # NOTE: cross_market_attention is declared in __init__ but never used in
    # forward(), so it is intentionally omitted.


def positional_encoding_table(n, d_model):
    position = jnp.arange(n, dtype=jnp.float32)[:, None]
    div_term = jnp.exp(jnp.arange(0, d_model, 2, dtype=jnp.float32) *
                       (-math.log(10000.0) / d_model))
    pe = jnp.zeros((n, d_model), jnp.float32)
    pe = pe.at[:, 0::2].set(jnp.sin(position * div_term))
    pe = pe.at[:, 1::2].set(jnp.cos(position * div_term))
    return pe


# ----------------------------------------------------------------------------
# One-time packing of all weights into a handful of kernel operands.
# ----------------------------------------------------------------------------
def pack_params(params, cfg, batch_size, context_len, target_len):
    E = cfg["embed_dim"]
    Fin = cfg["num_input_features"]
    Fout = cfg["num_target_features"]
    enc, dec = params["enc"], params["dec"]

    # Feature embeddings (reproduce reference quirks: exchange idx = i % 3 on a
    # 4-row table, pair idx = i % 4 on a 5-row table).
    idx_in = jnp.arange(Fin)
    in_embed = jnp.concatenate([
        jnp.broadcast_to(params["price_embed"][0], (Fin, E // 4)),
        jnp.broadcast_to(params["size_embed"][0], (Fin, E // 4)),
        params["exchange_embed"][idx_in % 3],
        params["pair_embed"][idx_in % 4],
    ], axis=-1)                                                   # (Fin, E)
    out_embed = jnp.broadcast_to(
        jnp.concatenate([params["perp_price_embed"][0], params["perp_size_embed"][0]]),
        (Fout, E))                                                # (Fout, E)

    # Additive terms folded together: value-proj bias + feature embed (tiled
    # over time).  The per-batch-element positional term stays separate.
    in_add = jnp.tile(in_embed, (context_len, 1)) + params["vp_b"]   # (S_enc, E)
    out_add = jnp.tile(out_embed, (target_len, 1)) + params["vp_b"]  # (S_dec, E)
    glue = jnp.concatenate([params["vp_w"].reshape(1, E), in_add, out_add], axis=0)

    # Reference PositionalEncoding indexes pe[:x.size(0)] on a batch-first
    # tensor -> each *batch element* b gets pe[b] added at every position.
    pe = positional_encoding_table(batch_size, E).reshape(batch_size, 1, E)

    enc_mats = jnp.concatenate([enc["wqkv"], enc["wo"], enc["w1"]], axis=-1)
    enc_vecs = jnp.concatenate([enc["ln1_g"], enc["ln1_b"], enc["ln2_g"], enc["ln2_b"],
                                enc["bqkv"], enc["bo"], enc["b1"], enc["b2"]], axis=-1)
    dec_mats = jnp.concatenate([dec["sa_wqkv"], dec["sa_wo"], dec["ca_wq"],
                                dec["ca_wkv"], dec["ca_wo"], dec["w1"]], axis=-1)
    dec_vecs = jnp.concatenate([dec["ln1_g"], dec["ln1_b"], dec["ln2_g"], dec["ln2_b"],
                                dec["ln3_g"], dec["ln3_b"], dec["sa_bqkv"], dec["sa_bo"],
                                dec["ca_bq"], dec["ca_bkv"], dec["ca_bo"],
                                dec["b1"], dec["b2"]], axis=-1)
    head = jnp.concatenate([
        params["out_w1"],                                  # (E, E//2)
        params["out_b1"].reshape(1, E // 2),
        params["out_w2"].reshape(1, E // 2),
        jnp.concatenate([params["out_b2"].reshape(1, 1),
                         jnp.zeros((1, E // 2 - 1), jnp.float32)], axis=-1),
    ], axis=0)                                             # (E+3, E//2)

    return dict(glue=glue, pe=pe,
                enc_mats=enc_mats, enc_w2=enc["w2"], enc_vecs=enc_vecs,
                dec_mats=dec_mats, dec_w2=dec["w2"], dec_vecs=dec_vecs,
                head=head)


# ----------------------------------------------------------------------------
# Forward: a single fused pallas_call (embeddings + encoder + decoder + head).
# ----------------------------------------------------------------------------
def forward(packed, src, tgt, cfg):
    B, Tctx, Fin = src.shape
    _, Ttgt, Fout = tgt.shape
    E = cfg["embed_dim"]
    H = cfg["num_heads"]
    S_enc = Tctx * Fin
    S_dec = Ttgt * Fout
    assert E % H == 0
    assert packed["pe"].shape[0] == B, "pack_params() must be built for this batch"

    src_vals = src.reshape(B, S_enc, 1).astype(jnp.float32)
    tgt_vals = tgt.reshape(B, S_dec, 1).astype(jnp.float32)

    # 2-wide "parallel" grid: one half-batch per step (keeps both v7x
    # TensorCores busy); dense matmuls batched over (B/2 * S, E) rows.
    n_cores = 2 if (B >= 2 and B % 2 == 0) else 1
    Bp = B // n_cores

    def full_spec(arr):
        nd = arr.ndim
        return pl.BlockSpec(arr.shape, lambda c: (0,) * nd)

    kernel = functools.partial(_model_kernel, num_heads=H, eps=1e-5)
    out = pl.pallas_call(
        kernel,
        out_shape=jax.ShapeDtypeStruct((B, 1, S_dec), jnp.float32),
        grid=(n_cores,),
        in_specs=[
            pl.BlockSpec((Bp, S_enc, 1), lambda c: (c, 0, 0)),
            pl.BlockSpec((Bp, S_dec, 1), lambda c: (c, 0, 0)),
            pl.BlockSpec((Bp, 1, E), lambda c: (c, 0, 0)),
            full_spec(packed["glue"]),
            full_spec(packed["enc_mats"]),
            full_spec(packed["enc_w2"]),
            full_spec(packed["enc_vecs"]),
            full_spec(packed["dec_mats"]),
            full_spec(packed["dec_w2"]),
            full_spec(packed["dec_vecs"]),
            full_spec(packed["head"]),
        ],
        out_specs=pl.BlockSpec((Bp, 1, S_dec), lambda c: (c, 0, 0)),
        compiler_params=pltpu.CompilerParams(
            dimension_semantics=("parallel",),
        ),
    )(src_vals, tgt_vals, packed["pe"], packed["glue"],
      packed["enc_mats"], packed["enc_w2"], packed["enc_vecs"],
      packed["dec_mats"], packed["dec_w2"], packed["dec_vecs"],
      packed["head"])

    return out.reshape(B, Ttgt, Fout)


# ----------------------------------------------------------------------------

if __name__ == "__main__":
    cfg = dict(embed_dim=32, num_heads=4, num_encoder_layers=2, num_decoder_layers=2,
               dropout=0.0, target_len=3, num_input_features=8, num_target_features=4)

    key = jax.random.PRNGKey(0)
    kp, ks, kt = jax.random.split(key, 3)
    params = init_params(kp, cfg)

    B, Tctx = 2, 4
    src = jax.random.normal(ks, (B, Tctx, cfg["num_input_features"]), jnp.float32)
    tgt = jax.random.normal(kt, (B, cfg["target_len"], cfg["num_target_features"]), jnp.float32)

    # Pack weights ONCE (outside the per-call hot path).
    packed = pack_params(params, cfg, B, Tctx, cfg["target_len"])

    fwd = jax.jit(lambda pk, s, t: forward(pk, s, t, cfg))
    out = fwd(packed, src, tgt)
    jax.block_until_ready(out)

    assert out.shape == (B, cfg["target_len"], cfg["num_target_features"])
    assert bool(jnp.all(jnp.isfinite(out)))
    print("KERNEL_OK")
</pallas_src>

<mosaic_0001>
module attributes {stable_mosaic.version = 11 : i64} {
  func.func @_model_kernel(%arg0: i32, %arg1: memref<1x32x1xf32, #tpu.memory_space<vmem>>, %arg2: memref<1x12x1xf32, #tpu.memory_space<vmem>>, %arg3: memref<1x1x32xf32, #tpu.memory_space<vmem>>, %arg4: memref<45x32xf32, #tpu.memory_space<vmem>>, %arg5: memref<2x32x256xf32, #tpu.memory_space<vmem>>, %arg6: memref<2x128x32xf32, #tpu.memory_space<vmem>>, %arg7: memref<2x416xf32, #tpu.memory_space<vmem>>, %arg8: memref<2x32x384xf32, #tpu.memory_space<vmem>>, %arg9: memref<2x128x32xf32, #tpu.memory_space<vmem>>, %arg10: memref<2x608xf32, #tpu.memory_space<vmem>>, %arg11: memref<35x16xf32, #tpu.memory_space<vmem>>, %arg12: memref<1x1x12xf32, #tpu.memory_space<vmem>>) attributes {dimension_semantics = [#tpu.dimension_semantics<parallel>], iteration_bounds = array<i64: 2>, scalar_prefetch = 0 : i64, scratch_operands = 0 : i64, tpu.core_type = #tpu.core_type<tc>, window_params = [{transform_indices = @transform_0, window_bounds = array<i64: 1, 32, 1>}, {transform_indices = @transform_1, window_bounds = array<i64: 1, 12, 1>}, {transform_indices = @transform_2, window_bounds = array<i64: 1, 1, 32>}, {pipeline_mode = #tpu.pipeline_mode<synchronous>, transform_indices = @transform_3, window_bounds = array<i64: 45, 32>}, {pipeline_mode = #tpu.pipeline_mode<synchronous>, transform_indices = @transform_4, window_bounds = array<i64: 2, 32, 256>}, {pipeline_mode = #tpu.pipeline_mode<synchronous>, transform_indices = @transform_5, window_bounds = array<i64: 2, 128, 32>}, {pipeline_mode = #tpu.pipeline_mode<synchronous>, transform_indices = @transform_6, window_bounds = array<i64: 2, 416>}, {pipeline_mode = #tpu.pipeline_mode<synchronous>, transform_indices = @transform_7, window_bounds = array<i64: 2, 32, 384>}, {pipeline_mode = #tpu.pipeline_mode<synchronous>, transform_indices = @transform_8, window_bounds = array<i64: 2, 128, 32>}, {pipeline_mode = #tpu.pipeline_mode<synchronous>, transform_indices = @transform_9, window_bounds = array<i64: 2, 608>}, {pipeline_mode = #tpu.pipeline_mode<synchronous>, transform_indices = @transform_10, window_bounds = array<i64: 35, 16>}, {transform_indices = @transform_11, window_bounds = array<i64: 1, 1, 12>}]} {
    %0 = tpu.iota {dimensions = array<i32: 1>} : vector<1x32xi32>
    %c0_i32 = arith.constant 0 : i32
    %1 = vector.broadcast %c0_i32 : i32 to vector<1x32xi32>
    %2 = arith.cmpi sge, %0, %1 : vector<1x32xi32>
    %c8_i32 = arith.constant 8 : i32
    %3 = vector.broadcast %c8_i32 : i32 to vector<1x32xi32>
    %4 = arith.cmpi slt, %0, %3 : vector<1x32xi32>
    %5 = arith.andi %2, %4 : vector<1x32xi1>
    %6 = arith.extui %5 : vector<1x32xi1> to vector<1x32xi32>
    %7 = arith.sitofp %6 : vector<1x32xi32> to vector<1x32xf32>
    %c8_i32_0 = arith.constant 8 : i32
    %8 = vector.broadcast %c8_i32_0 : i32 to vector<1x32xi32>
    %9 = arith.cmpi sge, %0, %8 : vector<1x32xi32>
    %c16_i32 = arith.constant 16 : i32
    %10 = vector.broadcast %c16_i32 : i32 to vector<1x32xi32>
    %11 = arith.cmpi slt, %0, %10 : vector<1x32xi32>
    %12 = arith.andi %9, %11 : vector<1x32xi1>
    %13 = arith.extui %12 : vector<1x32xi1> to vector<1x32xi32>
    %14 = arith.sitofp %13 : vector<1x32xi32> to vector<1x32xf32>
    %c16_i32_1 = arith.constant 16 : i32
    %15 = vector.broadcast %c16_i32_1 : i32 to vector<1x32xi32>
    %16 = arith.cmpi sge, %0, %15 : vector<1x32xi32>
    %c24_i32 = arith.constant 24 : i32
    %17 = vector.broadcast %c24_i32 : i32 to vector<1x32xi32>
    %18 = arith.cmpi slt, %0, %17 : vector<1x32xi32>
    %19 = arith.andi %16, %18 : vector<1x32xi1>
    %20 = arith.extui %19 : vector<1x32xi1> to vector<1x32xi32>
    %21 = arith.sitofp %20 : vector<1x32xi32> to vector<1x32xf32>
    %c24_i32_2 = arith.constant 24 : i32
    %22 = vector.broadcast %c24_i32_2 : i32 to vector<1x32xi32>
    %23 = arith.cmpi sge, %0, %22 : vector<1x32xi32>
    %c32_i32 = arith.constant 32 : i32
    %24 = vector.broadcast %c32_i32 : i32 to vector<1x32xi32>
    %25 = arith.cmpi slt, %0, %24 : vector<1x32xi32>
    %26 = arith.andi %23, %25 : vector<1x32xi1>
    %27 = arith.extui %26 : vector<1x32xi1> to vector<1x32xi32>
    %28 = arith.sitofp %27 : vector<1x32xi32> to vector<1x32xf32>
    %c0 = arith.constant 0 : index
    %c0_3 = arith.constant 0 : index
    %29 = vector.load %arg4[%c0, %c0_3] : memref<45x32xf32, #tpu.memory_space<vmem>>, vector<1x32xf32>
    %c1 = arith.constant 1 : index
    %c0_4 = arith.constant 0 : index
    %30 = vector.load %arg4[%c1, %c0_4] : memref<45x32xf32, #tpu.memory_space<vmem>>, vector<32x32xf32>
    %c33 = arith.constant 33 : index
    %c0_5 = arith.constant 0 : index
    %31 = vector.load %arg4[%c33, %c0_5] : memref<45x32xf32, #tpu.memory_space<vmem>>, vector<12x32xf32>
    %c0_6 = arith.constant 0 : index
    %c0_7 = arith.constant 0 : index
    %c0_8 = arith.constant 0 : index
    %32 = vector.load %arg3[%c0_6, %c0_7, %c0_8] : memref<1x1x32xf32, #tpu.memory_space<vmem>>, vector<1x1x32xf32>
    %c0_9 = arith.constant 0 : index
    %c0_10 = arith.constant 0 : index
    %c0_11 = arith.constant 0 : index
    %33 = vector.load %arg1[%c0_9, %c0_10, %c0_11] : memref<1x32x1xf32, #tpu.memory_space<vmem>>, vector<1x32x1xf32>
    %34 = vector.shape_cast %29 : vector<1x32xf32> to vector<1x1x32xf32>
    %35 = vector.broadcast %33 : vector<1x32x1xf32> to vector<1x32x32xf32>
    %36 = vector.broadcast %34 : vector<1x1x32xf32> to vector<1x32x32xf32>
    %37 = arith.mulf %35, %36 : vector<1x32x32xf32>
    %38 = vector.shape_cast %30 : vector<32x32xf32> to vector<1x32x32xf32>
    %39 = arith.addf %37, %38 : vector<1x32x32xf32>
    %40 = vector.broadcast %32 : vector<1x1x32xf32> to vector<1x32x32xf32>
    %41 = arith.addf %39, %40 : vector<1x32x32xf32>
    %42 = vector.shape_cast %41 : vector<1x32x32xf32> to vector<32x32xf32>
    %c0_12 = arith.constant 0 : index
    %c0_13 = arith.constant 0 : index
    %c0_14 = arith.constant 0 : index
    %43 = vector.load %arg2[%c0_12, %c0_13, %c0_14] : memref<1x12x1xf32, #tpu.memory_space<vmem>>, vector<1x12x1xf32>
    %44 = vector.shape_cast %29 : vector<1x32xf32> to vector<1x1x32xf32>
    %45 = vector.broadcast %43 : vector<1x12x1xf32> to vector<1x12x32xf32>
    %46 = vector.broadcast %44 : vector<1x1x32xf32> to vector<1x12x32xf32>
    %47 = arith.mulf %45, %46 : vector<1x12x32xf32>
    %48 = vector.shape_cast %31 : vector<12x32xf32> to vector<1x12x32xf32>
    %49 = arith.addf %47, %48 : vector<1x12x32xf32>
    %50 = vector.broadcast %32 : vector<1x1x32xf32> to vector<1x12x32xf32>
    %51 = arith.addf %49, %50 : vector<1x12x32xf32>
    %52 = vector.shape_cast %51 : vector<1x12x32xf32> to vector<12x32xf32>
    %c0_15 = arith.constant 0 : index
    %c0_16 = arith.constant 0 : index
    %53 = vector.load %arg7[%c0_15, %c0_16] : memref<2x416xf32, #tpu.memory_space<vmem>>, vector<1x32xf32>
    %54 = vector.shape_cast %53 : vector<1x32xf32> to vector<32xf32>
    %c0_17 = arith.constant 0 : index
    %c32 = arith.constant 32 : index
    %55 = vector.load %arg7[%c0_17, %c32] : memref<2x416xf32, #tpu.memory_space<vmem>>, vector<1x32xf32>
    %56 = vector.shape_cast %55 : vector<1x32xf32> to vector<32xf32>
    %c0_18 = arith.constant 0 : index
    %c64 = arith.constant 64 : index
    %57 = vector.load %arg7[%c0_18, %c64] : memref<2x416xf32, #tpu.memory_space<vmem>>, vector<1x32xf32>
    %58 = vector.shape_cast %57 : vector<1x32xf32> to vector<32xf32>
    %c0_19 = arith.constant 0 : index
    %c96 = arith.constant 96 : index
    %59 = vector.load %arg7[%c0_19, %c96] : memref<2x416xf32, #tpu.memory_space<vmem>>, vector<1x32xf32>
    %60 = vector.shape_cast %59 : vector<1x32xf32> to vector<32xf32>
    %c0_20 = arith.constant 0 : index
    %c128 = arith.constant 128 : index
    %61 = vector.load %arg7[%c0_20, %c128] : memref<2x416xf32, #tpu.memory_space<vmem>>, vector<1x96xf32>
    %62 = vector.shape_cast %61 : vector<1x96xf32> to vector<96xf32>
    %c0_21 = arith.constant 0 : index
    %c224 = arith.constant 224 : index
    %63 = vector.load %arg7[%c0_21, %c224] : memref<2x416xf32, #tpu.memory_space<vmem>>, vector<1x32xf32>
    %64 = vector.shape_cast %63 : vector<1x32xf32> to vector<32xf32>
    %c0_22 = arith.constant 0 : index
    %c256 = arith.constant 256 : index
    %65 = vector.load %arg7[%c0_22, %c256] : memref<2x416xf32, #tpu.memory_space<vmem>>, vector<1x128xf32>
    %66 = vector.shape_cast %65 : vector<1x128xf32> to vector<128xf32>
    %c0_23 = arith.constant 0 : index
    %c384 = arith.constant 384 : index
    %67 = vector.load %arg7[%c0_23, %c384] : memref<2x416xf32, #tpu.memory_space<vmem>>, vector<1x32xf32>
    %68 = vector.shape_cast %67 : vector<1x32xf32> to vector<32xf32>
    %c0_24 = arith.constant 0 : index
    %c0_25 = arith.constant 0 : index
    %c0_26 = arith.constant 0 : index
    %69 = vector.load %arg5[%c0_24, %c0_25, %c0_26] : memref<2x32x256xf32, #tpu.memory_space<vmem>>, vector<1x32x96xf32>
    %70 = vector.shape_cast %69 : vector<1x32x96xf32> to vector<32x96xf32>
    %c0_27 = arith.constant 0 : index
    %c0_28 = arith.constant 0 : index
    %c96_29 = arith.constant 96 : index
    %71 = vector.load %arg5[%c0_27, %c0_28, %c96_29] : memref<2x32x256xf32, #tpu.memory_space<vmem>>, vector<1x32x32xf32>
    %72 = vector.shape_cast %71 : vector<1x32x32xf32> to vector<32x32xf32>
    %c0_30 = arith.constant 0 : index
    %c0_31 = arith.constant 0 : index
    %c128_32 = arith.constant 128 : index
    %73 = vector.load %arg5[%c0_30, %c0_31, %c128_32] : memref<2x32x256xf32, #tpu.memory_space<vmem>>, vector<1x32x128xf32>
    %74 = vector.shape_cast %73 : vector<1x32x128xf32> to vector<32x128xf32>
    %c0_33 = arith.constant 0 : index
    %c0_34 = arith.constant 0 : index
    %c0_35 = arith.constant 0 : index
    %75 = vector.load %arg6[%c0_33, %c0_34, %c0_35] : memref<2x128x32xf32, #tpu.memory_space<vmem>>, vector<1x128x32xf32>
    %76 = vector.shape_cast %75 : vector<1x128x32xf32> to vector<128x32xf32>
    %cst = arith.constant dense<0.000000e+00> : vector<32xf32>
    %77 = vector.multi_reduction <add>, %42, %cst [1] : vector<32x32xf32> to vector<32xf32>
    %78 = vector.shape_cast %77 : vector<32xf32> to vector<32x1xf32>
    %cst_36 = arith.constant 3.200000e+01 : f32
    %79 = vector.broadcast %cst_36 : f32 to vector<32x1xf32>
    %80 = arith.divf %78, %79 : vector<32x1xf32>
    %81 = vector.broadcast %80 : vector<32x1xf32> to vector<32x32xf32>
    %82 = arith.subf %42, %81 : vector<32x32xf32>
    %83 = arith.mulf %82, %82 : vector<32x32xf32>
    %cst_37 = arith.constant dense<0.000000e+00> : vector<32xf32>
    %84 = vector.multi_reduction <add>, %83, %cst_37 [1] : vector<32x32xf32> to vector<32xf32>
    %85 = vector.shape_cast %84 : vector<32xf32> to vector<32x1xf32>
    %cst_38 = arith.constant 3.200000e+01 : f32
    %86 = vector.broadcast %cst_38 : f32 to vector<32x1xf32>
    %87 = arith.divf %85, %86 : vector<32x1xf32>
    %88 = vector.broadcast %80 : vector<32x1xf32> to vector<32x32xf32>
    %89 = arith.subf %42, %88 : vector<32x32xf32>
    %cst_39 = arith.constant 9.99999974E-6 : f32
    %90 = vector.broadcast %cst_39 : f32 to vector<32x1xf32>
    %91 = arith.addf %87, %90 : vector<32x1xf32>
    %92 = math.rsqrt %91 : vector<32x1xf32>
    %93 = vector.broadcast %92 : vector<32x1xf32> to vector<32x32xf32>
    %94 = arith.mulf %89, %93 : vector<32x32xf32>
    %95 = vector.shape_cast %54 : vector<32xf32> to vector<1x32xf32>
    %96 = vector.broadcast %95 : vector<1x32xf32> to vector<32x32xf32>
    %97 = arith.mulf %94, %96 : vector<32x32xf32>
    %98 = vector.shape_cast %56 : vector<32xf32> to vector<1x32xf32>
    %99 = vector.broadcast %98 : vector<1x32xf32> to vector<32x32xf32>
    %100 = arith.addf %97, %99 : vector<32x32xf32>
    %cst_40 = arith.constant dense<0.000000e+00> : vector<32x96xf32>
    %101 = tpu.matmul %100, %70, %cst_40 {dimension_numbers = #tpu.dot_dimension_numbers<[1], [0], [0], [1], [0, 0, 1, 1], [], []>} : vector<32x32xf32>, vector<32x96xf32>, vector<32x96xf32> -> vector<32x96xf32>
    %102 = vector.shape_cast %62 : vector<96xf32> to vector<1x96xf32>
    %103 = vector.broadcast %102 : vector<1x96xf32> to vector<32x96xf32>
    %104 = arith.addf %101, %103 : vector<32x96xf32>
    %105 = vector.extract_strided_slice %104 {offsets = [0, 0], sizes = [32, 32], strides = [1, 1]} : vector<32x96xf32> to vector<32x32xf32>
    %106 = vector.extract_strided_slice %104 {offsets = [0, 32], sizes = [32, 32], strides = [1, 1]} : vector<32x96xf32> to vector<32x32xf32>
    %107 = vector.extract_strided_slice %104 {offsets = [0, 64], sizes = [32, 32], strides = [1, 1]} : vector<32x96xf32> to vector<32x32xf32>
    %cst_41 = arith.constant 0.353553385 : f32
    %108 = vector.broadcast %cst_41 : f32 to vector<32x32xf32>
    %109 = arith.mulf %105, %108 : vector<32x32xf32>
    %110 = vector.broadcast %7 : vector<1x32xf32> to vector<32x32xf32>
    %111 = arith.mulf %109, %110 : vector<32x32xf32>
    %cst_42 = arith.constant dense<0.000000e+00> : vector<32x32xf32>
    %112 = tpu.matmul %111, %106, %cst_42 {dimension_numbers = #tpu.dot_dimension_numbers<[1], [1], [0], [0], [0, 0, 1, 0], [], []>} : vector<32x32xf32>, vector<32x32xf32>, vector<32x32xf32> -> vector<32x32xf32>
    %cst_43 = arith.constant dense<0xFF800000> : vector<32xf32>
    %113 = vector.multi_reduction <maximumf>, %112, %cst_43 [1] : vector<32x32xf32> to vector<32xf32>
    %114 = vector.shape_cast %113 : vector<32xf32> to vector<32x1xf32>
    %115 = vector.broadcast %114 : vector<32x1xf32> to vector<32x32xf32>
    %116 = arith.subf %112, %115 : vector<32x32xf32>
    %117 = math.exp %116 : vector<32x32xf32>
    %cst_44 = arith.constant dense<0.000000e+00> : vector<32xf32>
    %118 = vector.multi_reduction <add>, %117, %cst_44 [1] : vector<32x32xf32> to vector<32xf32>
    %119 = vector.shape_cast %118 : vector<32xf32> to vector<32x1xf32>
    %120 = vector.broadcast %119 : vector<32x1xf32> to vector<32x32xf32>
    %121 = arith.divf %117, %120 : vector<32x32xf32>
    %122 = vector.broadcast %7 : vector<1x32xf32> to vector<32x32xf32>
    %123 = arith.mulf %107, %122 : vector<32x32xf32>
    %cst_45 = arith.constant dense<0.000000e+00> : vector<32x32xf32>
    %124 = tpu.matmul %121, %123, %cst_45 {dimension_numbers = #tpu.dot_dimension_numbers<[1], [0], [0], [1], [0, 0, 1, 1], [], []>} : vector<32x32xf32>, vector<32x32xf32>, vector<32x32xf32> -> vector<32x32xf32>
    %125 = vector.broadcast %14 : vector<1x32xf32> to vector<32x32xf32>
    %126 = arith.mulf %109, %125 : vector<32x32xf32>
    %cst_46 = arith.constant dense<0.000000e+00> : vector<32x32xf32>
    %127 = tpu.matmul %126, %106, %cst_46 {dimension_numbers = #tpu.dot_dimension_numbers<[1], [1], [0], [0], [0, 0, 1, 0], [], []>} : vector<32x32xf32>, vector<32x32xf32>, vector<32x32xf32> -> vector<32x32xf32>
    %cst_47 = arith.constant dense<0xFF800000> : vector<32xf32>
    %128 = vector.multi_reduction <maximumf>, %127, %cst_47 [1] : vector<32x32xf32> to vector<32xf32>
    %129 = vector.shape_cast %128 : vector<32xf32> to vector<32x1xf32>
    %130 = vector.broadcast %129 : vector<32x1xf32> to vector<32x32xf32>
    %131 = arith.subf %127, %130 : vector<32x32xf32>
    %132 = math.exp %131 : vector<32x32xf32>
    %cst_48 = arith.constant dense<0.000000e+00> : vector<32xf32>
    %133 = vector.multi_reduction <add>, %132, %cst_48 [1] : vector<32x32xf32> to vector<32xf32>
    %134 = vector.shape_cast %133 : vector<32xf32> to vector<32x1xf32>
    %135 = vector.broadcast %134 : vector<32x1xf32> to vector<32x32xf32>
    %136 = arith.divf %132, %135 : vector<32x32xf32>
    %137 = vector.broadcast %14 : vector<1x32xf32> to vector<32x32xf32>
    %138 = arith.mulf %107, %137 : vector<32x32xf32>
    %cst_49 = arith.constant dense<0.000000e+00> : vector<32x32xf32>
    %139 = tpu.matmul %136, %138, %cst_49 {dimension_numbers = #tpu.dot_dimension_numbers<[1], [0], [0], [1], [0, 0, 1, 1], [], []>} : vector<32x32xf32>, vector<32x32xf32>, vector<32x32xf32> -> vector<32x32xf32>
    %140 = arith.addf %124, %139 : vector<32x32xf32>
    %141 = vector.broadcast %21 : vector<1x32xf32> to vector<32x32xf32>
    %142 = arith.mulf %109, %141 : vector<32x32xf32>
    %cst_50 = arith.constant dense<0.000000e+00> : vector<32x32xf32>
    %143 = tpu.matmul %142, %106, %cst_50 {dimension_numbers = #tpu.dot_dimension_numbers<[1], [1], [0], [0], [0, 0, 1, 0], [], []>} : vector<32x32xf32>, vector<32x32xf32>, vector<32x32xf32> -> vector<32x32xf32>
    %cst_51 = arith.constant dense<0xFF800000> : vector<32xf32>
    %144 = vector.multi_reduction <maximumf>, %143, %cst_51 [1] : vector<32x32xf32> to vector<32xf32>
    %145 = vector.shape_cast %144 : vector<32xf32> to vector<32x1xf32>
    %146 = vector.broadcast %145 : vector<32x1xf32> to vector<32x32xf32>
    %147 = arith.subf %143, %146 : vector<32x32xf32>
    %148 = math.exp %147 : vector<32x32xf32>
    %cst_52 = arith.constant dense<0.000000e+00> : vector<32xf32>
    %149 = vector.multi_reduction <add>, %148, %cst_52 [1] : vector<32x32xf32> to vector<32xf32>
    %150 = vector.shape_cast %149 : vector<32xf32> to vector<32x1xf32>
    %151 = vector.broadcast %150 : vector<32x1xf32> to vector<32x32xf32>
    %152 = arith.divf %148, %151 : vector<32x32xf32>
    %153 = vector.broadcast %21 : vector<1x32xf32> to vector<32x32xf32>
    %154 = arith.mulf %107, %153 : vector<32x32xf32>
    %cst_53 = arith.constant dense<0.000000e+00> : vector<32x32xf32>
    %155 = tpu.matmul %152, %154, %cst_53 {dimension_numbers = #tpu.dot_dimension_numbers<[1], [0], [0], [1], [0, 0, 1, 1], [], []>} : vector<32x32xf32>, vector<32x32xf32>, vector<32x32xf32> -> vector<32x32xf32>
    %156 = arith.addf %140, %155 : vector<32x32xf32>
    %157 = vector.broadcast %28 : vector<1x32xf32> to vector<32x32xf32>
    %158 = arith.mulf %109, %157 : vector<32x32xf32>
    %cst_54 = arith.constant dense<0.000000e+00> : vector<32x32xf32>
    %159 = tpu.matmul %158, %106, %cst_54 {dimension_numbers = #tpu.dot_dimension_numbers<[1], [1], [0], [0], [0, 0, 1, 0], [], []>} : vector<32x32xf32>, vector<32x32xf32>, vector<32x32xf32> -> vector<32x32xf32>
    %cst_55 = arith.constant dense<0xFF800000> : vector<32xf32>
    %160 = vector.multi_reduction <maximumf>, %159, %cst_55 [1] : vector<32x32xf32> to vector<32xf32>
    %161 = vector.shape_cast %160 : vector<32xf32> to vector<32x1xf32>
    %162 = vector.broadcast %161 : vector<32x1xf32> to vector<32x32xf32>
    %163 = arith.subf %159, %162 : vector<32x32xf32>
    %164 = math.exp %163 : vector<32x32xf32>
    %cst_56 = arith.constant dense<0.000000e+00> : vector<32xf32>
    %165 = vector.multi_reduction <add>, %164, %cst_56 [1] : vector<32x32xf32> to vector<32xf32>
    %166 = vector.shape_cast %165 : vector<32xf32> to vector<32x1xf32>
    %167 = vector.broadcast %166 : vector<32x1xf32> to vector<32x32xf32>
    %168 = arith.divf %164, %167 : vector<32x32xf32>
    %169 = vector.broadcast %28 : vector<1x32xf32> to vector<32x32xf32>
    %170 = arith.mulf %107, %169 : vector<32x32xf32>
    %cst_57 = arith.constant dense<0.000000e+00> : vector<32x32xf32>
    %171 = tpu.matmul %168, %170, %cst_57 {dimension_numbers = #tpu.dot_dimension_numbers<[1], [0], [0], [1], [0, 0, 1, 1], [], []>} : vector<32x32xf32>, vector<32x32xf32>, vector<32x32xf32> -> vector<32x32xf32>
    %172 = arith.addf %156, %171 : vector<32x32xf32>
    %cst_58 = arith.constant dense<0.000000e+00> : vector<32x32xf32>
    %173 = tpu.matmul %172, %72, %cst_58 {dimension_numbers = #tpu.dot_dimension_numbers<[1], [0], [0], [1], [0, 0, 1, 1], [], []>} : vector<32x32xf32>, vector<32x32xf32>, vector<32x32xf32> -> vector<32x32xf32>
    %174 = vector.shape_cast %64 : vector<32xf32> to vector<1x32xf32>
    %175 = vector.broadcast %174 : vector<1x32xf32> to vector<32x32xf32>
    %176 = arith.addf %173, %175 : vector<32x32xf32>
    %177 = arith.addf %42, %176 : vector<32x32xf32>
    %cst_59 = arith.constant dense<0.000000e+00> : vector<32xf32>
    %178 = vector.multi_reduction <add>, %177, %cst_59 [1] : vector<32x32xf32> to vector<32xf32>
    %179 = vector.shape_cast %178 : vector<32xf32> to vector<32x1xf32>
    %cst_60 = arith.constant 3.200000e+01 : f32
    %180 = vector.broadcast %cst_60 : f32 to vector<32x1xf32>
    %181 = arith.divf %179, %180 : vector<32x1xf32>
    %182 = vector.broadcast %181 : vector<32x1xf32> to vector<32x32xf32>
    %183 = arith.subf %177, %182 : vector<32x32xf32>
    %184 = arith.mulf %183, %183 : vector<32x32xf32>
    %cst_61 = arith.constant dense<0.000000e+00> : vector<32xf32>
    %185 = vector.multi_reduction <add>, %184, %cst_61 [1] : vector<32x32xf32> to vector<32xf32>
    %186 = vector.shape_cast %185 : vector<32xf32> to vector<32x1xf32>
    %cst_62 = arith.constant 3.200000e+01 : f32
    %187 = vector.broadcast %cst_62 : f32 to vector<32x1xf32>
    %188 = arith.divf %186, %187 : vector<32x1xf32>
    %189 = vector.broadcast %181 : vector<32x1xf32> to vector<32x32xf32>
    %190 = arith.subf %177, %189 : vector<32x32xf32>
    %cst_63 = arith.constant 9.99999974E-6 : f32
    %191 = vector.broadcast %cst_63 : f32 to vector<32x1xf32>
    %192 = arith.addf %188, %191 : vector<32x1xf32>
    %193 = math.rsqrt %192 : vector<32x1xf32>
    %194 = vector.broadcast %193 : vector<32x1xf32> to vector<32x32xf32>
    %195 = arith.mulf %190, %194 : vector<32x32xf32>
    %196 = vector.shape_cast %58 : vector<32xf32> to vector<1x32xf32>
    %197 = vector.broadcast %196 : vector<1x32xf32> to vector<32x32xf32>
    %198 = arith.mulf %195, %197 : vector<32x32xf32>
    %199 = vector.shape_cast %60 : vector<32xf32> to vector<1x32xf32>
    %200 = vector.broadcast %199 : vector<1x32xf32> to vector<32x32xf32>
    %201 = arith.addf %198, %200 : vector<32x32xf32>
    %cst_64 = arith.constant dense<0.000000e+00> : vector<32x128xf32>
    %202 = tpu.matmul %201, %74, %cst_64 {dimension_numbers = #tpu.dot_dimension_numbers<[1], [0], [0], [1], [0, 0, 1, 1], [], []>} : vector<32x32xf32>, vector<32x128xf32>, vector<32x128xf32> -> vector<32x128xf32>
    %203 = vector.shape_cast %66 : vector<128xf32> to vector<1x128xf32>
    %204 = vector.broadcast %203 : vector<1x128xf32> to vector<32x128xf32>
    %205 = arith.addf %202, %204 : vector<32x128xf32>
    %cst_65 = arith.constant 5.000000e-01 : f32
    %206 = vector.broadcast %cst_65 : f32 to vector<32x128xf32>
    %207 = arith.mulf %206, %205 : vector<32x128xf32>
    %cst_66 = arith.constant 4.471500e-02 : f32
    %208 = vector.broadcast %cst_66 : f32 to vector<32x128xf32>
    %209 = arith.mulf %208, %205 : vector<32x128xf32>
    %210 = arith.mulf %209, %205 : vector<32x128xf32>
    %211 = arith.mulf %210, %205 : vector<32x128xf32>
    %212 = arith.addf %205, %211 : vector<32x128xf32>
    %cst_67 = arith.constant 0.797884583 : f32
    %213 = vector.broadcast %cst_67 : f32 to vector<32x128xf32>
    %214 = arith.mulf %213, %212 : vector<32x128xf32>
    %215 = math.tanh %214 : vector<32x128xf32>
    %cst_68 = arith.constant 1.000000e+00 : f32
    %216 = vector.broadcast %cst_68 : f32 to vector<32x128xf32>
    %217 = arith.addf %216, %215 : vector<32x128xf32>
    %218 = arith.mulf %207, %217 : vector<32x128xf32>
    %cst_69 = arith.constant dense<0.000000e+00> : vector<32x32xf32>
    %219 = tpu.matmul %218, %76, %cst_69 {dimension_numbers = #tpu.dot_dimension_numbers<[1], [0], [0], [1], [0, 0, 1, 1], [], []>} : vector<32x128xf32>, vector<128x32xf32>, vector<32x32xf32> -> vector<32x32xf32>
    %220 = vector.shape_cast %68 : vector<32xf32> to vector<1x32xf32>
    %221 = vector.broadcast %220 : vector<1x32xf32> to vector<32x32xf32>
    %222 = arith.addf %219, %221 : vector<32x32xf32>
    %223 = arith.addf %177, %222 : vector<32x32xf32>
    %c1_70 = arith.constant 1 : index
    %c0_71 = arith.constant 0 : index
    %224 = vector.load %arg7[%c1_70, %c0_71] : memref<2x416xf32, #tpu.memory_space<vmem>>, vector<1x32xf32>
    %225 = vector.shape_cast %224 : vector<1x32xf32> to vector<32xf32>
    %c1_72 = arith.constant 1 : index
    %c32_73 = arith.constant 32 : index
    %226 = vector.load %arg7[%c1_72, %c32_73] : memref<2x416xf32, #tpu.memory_space<vmem>>, vector<1x32xf32>
    %227 = vector.shape_cast %226 : vector<1x32xf32> to vector<32xf32>
    %c1_74 = arith.constant 1 : index
    %c64_75 = arith.constant 64 : index
    %228 = vector.load %arg7[%c1_74, %c64_75] : memref<2x416xf32, #tpu.memory_space<vmem>>, vector<1x32xf32>
    %229 = vector.shape_cast %228 : vector<1x32xf32> to vector<32xf32>
    %c1_76 = arith.constant 1 : index
    %c96_77 = arith.constant 96 : index
    %230 = vector.load %arg7[%c1_76, %c96_77] : memref<2x416xf32, #tpu.memory_space<vmem>>, vector<1x32xf32>
    %231 = vector.shape_cast %230 : vector<1x32xf32> to vector<32xf32>
    %c1_78 = arith.constant 1 : index
    %c128_79 = arith.constant 128 : index
    %232 = vector.load %arg7[%c1_78, %c128_79] : memref<2x416xf32, #tpu.memory_space<vmem>>, vector<1x96xf32>
    %233 = vector.shape_cast %232 : vector<1x96xf32> to vector<96xf32>
    %c1_80 = arith.constant 1 : index
    %c224_81 = arith.constant 224 : index
    %234 = vector.load %arg7[%c1_80, %c224_81] : memref<2x416xf32, #tpu.memory_space<vmem>>, vector<1x32xf32>
    %235 = vector.shape_cast %234 : vector<1x32xf32> to vector<32xf32>
    %c1_82 = arith.constant 1 : index
    %c256_83 = arith.constant 256 : index
    %236 = vector.load %arg7[%c1_82, %c256_83] : memref<2x416xf32, #tpu.memory_space<vmem>>, vector<1x128xf32>
    %237 = vector.shape_cast %236 : vector<1x128xf32> to vector<128xf32>
    %c1_84 = arith.constant 1 : index
    %c384_85 = arith.constant 384 : index
    %238 = vector.load %arg7[%c1_84, %c384_85] : memref<2x416xf32, #tpu.memory_space<vmem>>, vector<1x32xf32>
    %239 = vector.shape_cast %238 : vector<1x32xf32> to vector<32xf32>
    %c1_86 = arith.constant 1 : index
    %c0_87 = arith.constant 0 : index
    %c0_88 = arith.constant 0 : index
    %240 = vector.load %arg5[%c1_86, %c0_87, %c0_88] : memref<2x32x256xf32, #tpu.memory_space<vmem>>, vector<1x32x96xf32>
    %241 = vector.shape_cast %240 : vector<1x32x96xf32> to vector<32x96xf32>
    %c1_89 = arith.constant 1 : index
    %c0_90 = arith.constant 0 : index
    %c96_91 = arith.constant 96 : index
    %242 = vector.load %arg5[%c1_89, %c0_90, %c96_91] : memref<2x32x256xf32, #tpu.memory_space<vmem>>, vector<1x32x32xf32>
    %243 = vector.shape_cast %242 : vector<1x32x32xf32> to vector<32x32xf32>
    %c1_92 = arith.constant 1 : index
    %c0_93 = arith.constant 0 : index
    %c128_94 = arith.constant 128 : index
    %244 = vector.load %arg5[%c1_92, %c0_93, %c128_94] : memref<2x32x256xf32, #tpu.memory_space<vmem>>, vector<1x32x128xf32>
    %245 = vector.shape_cast %244 : vector<1x32x128xf32> to vector<32x128xf32>
    %c1_95 = arith.constant 1 : index
    %c0_96 = arith.constant 0 : index
    %c0_97 = arith.constant 0 : index
    %246 = vector.load %arg6[%c1_95, %c0_96, %c0_97] : memref<2x128x32xf32, #tpu.memory_space<vmem>>, vector<1x128x32xf32>
    %247 = vector.shape_cast %246 : vector<1x128x32xf32> to vector<128x32xf32>
    %cst_98 = arith.constant dense<0.000000e+00> : vector<32xf32>
    %248 = vector.multi_reduction <add>, %223, %cst_98 [1] : vector<32x32xf32> to vector<32xf32>
    %249 = vector.shape_cast %248 : vector<32xf32> to vector<32x1xf32>
    %cst_99 = arith.constant 3.200000e+01 : f32
    %250 = vector.broadcast %cst_99 : f32 to vector<32x1xf32>
    %251 = arith.divf %249, %250 : vector<32x1xf32>
    %252 = vector.broadcast %251 : vector<32x1xf32> to vector<32x32xf32>
    %253 = arith.subf %223, %252 : vector<32x32xf32>
    %254 = arith.mulf %253, %253 : vector<32x32xf32>
    %cst_100 = arith.constant dense<0.000000e+00> : vector<32xf32>
    %255 = vector.multi_reduction <add>, %254, %cst_100 [1] : vector<32x32xf32> to vector<32xf32>
    %256 = vector.shape_cast %255 : vector<32xf32> to vector<32x1xf32>
    %cst_101 = arith.constant 3.200000e+01 : f32
    %257 = vector.broadcast %cst_101 : f32 to vector<32x1xf32>
    %258 = arith.divf %256, %257 : vector<32x1xf32>
    %259 = vector.broadcast %251 : vector<32x1xf32> to vector<32x32xf32>
    %260 = arith.subf %223, %259 : vector<32x32xf32>
    %cst_102 = arith.constant 9.99999974E-6 : f32
    %261 = vector.broadcast %cst_102 : f32 to vector<32x1xf32>
    %262 = arith.addf %258, %261 : vector<32x1xf32>
    %263 = math.rsqrt %262 : vector<32x1xf32>
    %264 = vector.broadcast %263 : vector<32x1xf32> to vector<32x32xf32>
    %265 = arith.mulf %260, %264 : vector<32x32xf32>
    %266 = vector.shape_cast %225 : vector<32xf32> to vector<1x32xf32>
    %267 = vector.broadcast %266 : vector<1x32xf32> to vector<32x32xf32>
    %268 = arith.mulf %265, %267 : vector<32x32xf32>
    %269 = vector.shape_cast %227 : vector<32xf32> to vector<1x32xf32>
    %270 = vector.broadcast %269 : vector<1x32xf32> to vector<32x32xf32>
    %271 = arith.addf %268, %270 : vector<32x32xf32>
    %cst_103 = arith.constant dense<0.000000e+00> : vector<32x96xf32>
    %272 = tpu.matmul %271, %241, %cst_103 {dimension_numbers = #tpu.dot_dimension_numbers<[1], [0], [0], [1], [0, 0, 1, 1], [], []>} : vector<32x32xf32>, vector<32x96xf32>, vector<32x96xf32> -> vector<32x96xf32>
    %273 = vector.shape_cast %233 : vector<96xf32> to vector<1x96xf32>
    %274 = vector.broadcast %273 : vector<1x96xf32> to vector<32x96xf32>
    %275 = arith.addf %272, %274 : vector<32x96xf32>
    %276 = vector.extract_strided_slice %275 {offsets = [0, 0], sizes = [32, 32], strides = [1, 1]} : vector<32x96xf32> to vector<32x32xf32>
    %277 = vector.extract_strided_slice %275 {offsets = [0, 32], sizes = [32, 32], strides = [1, 1]} : vector<32x96xf32> to vector<32x32xf32>
    %278 = vector.extract_strided_slice %275 {offsets = [0, 64], sizes = [32, 32], strides = [1, 1]} : vector<32x96xf32> to vector<32x32xf32>
    %cst_104 = arith.constant 0.353553385 : f32
    %279 = vector.broadcast %cst_104 : f32 to vector<32x32xf32>
    %280 = arith.mulf %276, %279 : vector<32x32xf32>
    %281 = vector.broadcast %7 : vector<1x32xf32> to vector<32x32xf32>
    %282 = arith.mulf %280, %281 : vector<32x32xf32>
    %cst_105 = arith.constant dense<0.000000e+00> : vector<32x32xf32>
    %283 = tpu.matmul %282, %277, %cst_105 {dimension_numbers = #tpu.dot_dimension_numbers<[1], [1], [0], [0], [0, 0, 1, 0], [], []>} : vector<32x32xf32>, vector<32x32xf32>, vector<32x32xf32> -> vector<32x32xf32>
    %cst_106 = arith.constant dense<0xFF800000> : vector<32xf32>
    %284 = vector.multi_reduction <maximumf>, %283, %cst_106 [1] : vector<32x32xf32> to vector<32xf32>
    %285 = vector.shape_cast %284 : vector<32xf32> to vector<32x1xf32>
    %286 = vector.broadcast %285 : vector<32x1xf32> to vector<32x32xf32>
    %287 = arith.subf %283, %286 : vector<32x32xf32>
    %288 = math.exp %287 : vector<32x32xf32>
    %cst_107 = arith.constant dense<0.000000e+00> : vector<32xf32>
    %289 = vector.multi_reduction <add>, %288, %cst_107 [1] : vector<32x32xf32> to vector<32xf32>
    %290 = vector.shape_cast %289 : vector<32xf32> to vector<32x1xf32>
    %291 = vector.broadcast %290 : vector<32x1xf32> to vector<32x32xf32>
    %292 = arith.divf %288, %291 : vector<32x32xf32>
    %293 = vector.broadcast %7 : vector<1x32xf32> to vector<32x32xf32>
    %294 = arith.mulf %278, %293 : vector<32x32xf32>
    %cst_108 = arith.constant dense<0.000000e+00> : vector<32x32xf32>
    %295 = tpu.matmul %292, %294, %cst_108 {dimension_numbers = #tpu.dot_dimension_numbers<[1], [0], [0], [1], [0, 0, 1, 1], [], []>} : vector<32x32xf32>, vector<32x32xf32>, vector<32x32xf32> -> vector<32x32xf32>
    %296 = vector.broadcast %14 : vector<1x32xf32> to vector<32x32xf32>
    %297 = arith.mulf %280, %296 : vector<32x32xf32>
    %cst_109 = arith.constant dense<0.000000e+00> : vector<32x32xf32>
    %298 = tpu.matmul %297, %277, %cst_109 {dimension_numbers = #tpu.dot_dimension_numbers<[1], [1], [0], [0], [0, 0, 1, 0], [], []>} : vector<32x32xf32>, vector<32x32xf32>, vector<32x32xf32> -> vector<32x32xf32>
    %cst_110 = arith.constant dense<0xFF800000> : vector<32xf32>
    %299 = vector.multi_reduction <maximumf>, %298, %cst_110 [1] : vector<32x32xf32> to vector<32xf32>
    %300 = vector.shape_cast %299 : vector<32xf32> to vector<32x1xf32>
    %301 = vector.broadcast %300 : vector<32x1xf32> to vector<32x32xf32>
    %302 = arith.subf %298, %301 : vector<32x32xf32>
    %303 = math.exp %302 : vector<32x32xf32>
    %cst_111 = arith.constant dense<0.000000e+00> : vector<32xf32>
    %304 = vector.multi_reduction <add>, %303, %cst_111 [1] : vector<32x32xf32> to vector<32xf32>
    %305 = vector.shape_cast %304 : vector<32xf32> to vector<32x1xf32>
    %306 = vector.broadcast %305 : vector<32x1xf32> to vector<32x32xf32>
    %307 = arith.divf %303, %306 : vector<32x32xf32>
    %308 = vector.broadcast %14 : vector<1x32xf32> to vector<32x32xf32>
    %309 = arith.mulf %278, %308 : vector<32x32xf32>
    %cst_112 = arith.constant dense<0.000000e+00> : vector<32x32xf32>
    %310 = tpu.matmul %307, %309, %cst_112 {dimension_numbers = #tpu.dot_dimension_numbers<[1], [0], [0], [1], [0, 0, 1, 1], [], []>} : vector<32x32xf32>, vector<32x32xf32>, vector<32x32xf32> -> vector<32x32xf32>
    %311 = arith.addf %295, %310 : vector<32x32xf32>
    %312 = vector.broadcast %21 : vector<1x32xf32> to vector<32x32xf32>
    %313 = arith.mulf %280, %312 : vector<32x32xf32>
    %cst_113 = arith.constant dense<0.000000e+00> : vector<32x32xf32>
    %314 = tpu.matmul %313, %277, %cst_113 {dimension_numbers = #tpu.dot_dimension_numbers<[1], [1], [0], [0], [0, 0, 1, 0], [], []>} : vector<32x32xf32>, vector<32x32xf32>, vector<32x32xf32> -> vector<32x32xf32>
    %cst_114 = arith.constant dense<0xFF800000> : vector<32xf32>
    %315 = vector.multi_reduction <maximumf>, %314, %cst_114 [1] : vector<32x32xf32> to vector<32xf32>
    %316 = vector.shape_cast %315 : vector<32xf32> to vector<32x1xf32>
    %317 = vector.broadcast %316 : vector<32x1xf32> to vector<32x32xf32>
    %318 = arith.subf %314, %317 : vector<32x32xf32>
    %319 = math.exp %318 : vector<32x32xf32>
    %cst_115 = arith.constant dense<0.000000e+00> : vector<32xf32>
    %320 = vector.multi_reduction <add>, %319, %cst_115 [1] : vector<32x32xf32> to vector<32xf32>
    %321 = vector.shape_cast %320 : vector<32xf32> to vector<32x1xf32>
    %322 = vector.broadcast %321 : vector<32x1xf32> to vector<32x32xf32>
    %323 = arith.divf %319, %322 : vector<32x32xf32>
    %324 = vector.broadcast %21 : vector<1x32xf32> to vector<32x32xf32>
    %325 = arith.mulf %278, %324 : vector<32x32xf32>
    %cst_116 = arith.constant dense<0.000000e+00> : vector<32x32xf32>
    %326 = tpu.matmul %323, %325, %cst_116 {dimension_numbers = #tpu.dot_dimension_numbers<[1], [0], [0], [1], [0, 0, 1, 1], [], []>} : vector<32x32xf32>, vector<32x32xf32>, vector<32x32xf32> -> vector<32x32xf32>
    %327 = arith.addf %311, %326 : vector<32x32xf32>
    %328 = vector.broadcast %28 : vector<1x32xf32> to vector<32x32xf32>
    %329 = arith.mulf %280, %328 : vector<32x32xf32>
    %cst_117 = arith.constant dense<0.000000e+00> : vector<32x32xf32>
    %330 = tpu.matmul %329, %277, %cst_117 {dimension_numbers = #tpu.dot_dimension_numbers<[1], [1], [0], [0], [0, 0, 1, 0], [], []>} : vector<32x32xf32>, vector<32x32xf32>, vector<32x32xf32> -> vector<32x32xf32>
    %cst_118 = arith.constant dense<0xFF800000> : vector<32xf32>
    %331 = vector.multi_reduction <maximumf>, %330, %cst_118 [1] : vector<32x32xf32> to vector<32xf32>
    %332 = vector.shape_cast %331 : vector<32xf32> to vector<32x1xf32>
    %333 = vector.broadcast %332 : vector<32x1xf32> to vector<32x32xf32>
    %334 = arith.subf %330, %333 : vector<32x32xf32>
    %335 = math.exp %334 : vector<32x32xf32>
    %cst_119 = arith.constant dense<0.000000e+00> : vector<32xf32>
    %336 = vector.multi_reduction <add>, %335, %cst_119 [1] : vector<32x32xf32> to vector<32xf32>
    %337 = vector.shape_cast %336 : vector<32xf32> to vector<32x1xf32>
    %338 = vector.broadcast %337 : vector<32x1xf32> to vector<32x32xf32>
    %339 = arith.divf %335, %338 : vector<32x32xf32>
    %340 = vector.broadcast %28 : vector<1x32xf32> to vector<32x32xf32>
    %341 = arith.mulf %278, %340 : vector<32x32xf32>
    %cst_120 = arith.constant dense<0.000000e+00> : vector<32x32xf32>
    %342 = tpu.matmul %339, %341, %cst_120 {dimension_numbers = #tpu.dot_dimension_numbers<[1], [0], [0], [1], [0, 0, 1, 1], [], []>} : vector<32x32xf32>, vector<32x32xf32>, vector<32x32xf32> -> vector<32x32xf32>
    %343 = arith.addf %327, %342 : vector<32x32xf32>
    %cst_121 = arith.constant dense<0.000000e+00> : vector<32x32xf32>
    %344 = tpu.matmul %343, %243, %cst_121 {dimension_numbers = #tpu.dot_dimension_numbers<[1], [0], [0], [1], [0, 0, 1, 1], [], []>} : vector<32x32xf32>, vector<32x32xf32>, vector<32x32xf32> -> vector<32x32xf32>
    %345 = vector.shape_cast %235 : vector<32xf32> to vector<1x32xf32>
    %346 = vector.broadcast %345 : vector<1x32xf32> to vector<32x32xf32>
    %347 = arith.addf %344, %346 : vector<32x32xf32>
    %348 = arith.addf %223, %347 : vector<32x32xf32>
    %cst_122 = arith.constant dense<0.000000e+00> : vector<32xf32>
    %349 = vector.multi_reduction <add>, %348, %cst_122 [1] : vector<32x32xf32> to vector<32xf32>
    %350 = vector.shape_cast %349 : vector<32xf32> to vector<32x1xf32>
    %cst_123 = arith.constant 3.200000e+01 : f32
    %351 = vector.broadcast %cst_123 : f32 to vector<32x1xf32>
    %352 = arith.divf %350, %351 : vector<32x1xf32>
    %353 = vector.broadcast %352 : vector<32x1xf32> to vector<32x32xf32>
    %354 = arith.subf %348, %353 : vector<32x32xf32>
    %355 = arith.mulf %354, %354 : vector<32x32xf32>
    %cst_124 = arith.constant dense<0.000000e+00> : vector<32xf32>
    %356 = vector.multi_reduction <add>, %355, %cst_124 [1] : vector<32x32xf32> to vector<32xf32>
    %357 = vector.shape_cast %356 : vector<32xf32> to vector<32x1xf32>
    %cst_125 = arith.constant 3.200000e+01 : f32
    %358 = vector.broadcast %cst_125 : f32 to vector<32x1xf32>
    %359 = arith.divf %357, %358 : vector<32x1xf32>
    %360 = vector.broadcast %352 : vector<32x1xf32> to vector<32x32xf32>
    %361 = arith.subf %348, %360 : vector<32x32xf32>
    %cst_126 = arith.constant 9.99999974E-6 : f32
    %362 = vector.broadcast %cst_126 : f32 to vector<32x1xf32>
    %363 = arith.addf %359, %362 : vector<32x1xf32>
    %364 = math.rsqrt %363 : vector<32x1xf32>
    %365 = vector.broadcast %364 : vector<32x1xf32> to vector<32x32xf32>
    %366 = arith.mulf %361, %365 : vector<32x32xf32>
    %367 = vector.shape_cast %229 : vector<32xf32> to vector<1x32xf32>
    %368 = vector.broadcast %367 : vector<1x32xf32> to vector<32x32xf32>
    %369 = arith.mulf %366, %368 : vector<32x32xf32>
    %370 = vector.shape_cast %231 : vector<32xf32> to vector<1x32xf32>
    %371 = vector.broadcast %370 : vector<1x32xf32> to vector<32x32xf32>
    %372 = arith.addf %369, %371 : vector<32x32xf32>
    %cst_127 = arith.constant dense<0.000000e+00> : vector<32x128xf32>
    %373 = tpu.matmul %372, %245, %cst_127 {dimension_numbers = #tpu.dot_dimension_numbers<[1], [0], [0], [1], [0, 0, 1, 1], [], []>} : vector<32x32xf32>, vector<32x128xf32>, vector<32x128xf32> -> vector<32x128xf32>
    %374 = vector.shape_cast %237 : vector<128xf32> to vector<1x128xf32>
    %375 = vector.broadcast %374 : vector<1x128xf32> to vector<32x128xf32>
    %376 = arith.addf %373, %375 : vector<32x128xf32>
    %cst_128 = arith.constant 5.000000e-01 : f32
    %377 = vector.broadcast %cst_128 : f32 to vector<32x128xf32>
    %378 = arith.mulf %377, %376 : vector<32x128xf32>
    %cst_129 = arith.constant 4.471500e-02 : f32
    %379 = vector.broadcast %cst_129 : f32 to vector<32x128xf32>
    %380 = arith.mulf %379, %376 : vector<32x128xf32>
    %381 = arith.mulf %380, %376 : vector<32x128xf32>
    %382 = arith.mulf %381, %376 : vector<32x128xf32>
    %383 = arith.addf %376, %382 : vector<32x128xf32>
    %cst_130 = arith.constant 0.797884583 : f32
    %384 = vector.broadcast %cst_130 : f32 to vector<32x128xf32>
    %385 = arith.mulf %384, %383 : vector<32x128xf32>
    %386 = math.tanh %385 : vector<32x128xf32>
    %cst_131 = arith.constant 1.000000e+00 : f32
    %387 = vector.broadcast %cst_131 : f32 to vector<32x128xf32>
    %388 = arith.addf %387, %386 : vector<32x128xf32>
    %389 = arith.mulf %378, %388 : vector<32x128xf32>
    %cst_132 = arith.constant dense<0.000000e+00> : vector<32x32xf32>
    %390 = tpu.matmul %389, %247, %cst_132 {dimension_numbers = #tpu.dot_dimension_numbers<[1], [0], [0], [1], [0, 0, 1, 1], [], []>} : vector<32x128xf32>, vector<128x32xf32>, vector<32x32xf32> -> vector<32x32xf32>
    %391 = vector.shape_cast %239 : vector<32xf32> to vector<1x32xf32>
    %392 = vector.broadcast %391 : vector<1x32xf32> to vector<32x32xf32>
    %393 = arith.addf %390, %392 : vector<32x32xf32>
    %394 = arith.addf %348, %393 : vector<32x32xf32>
    %395 = tpu.iota {dimensions = array<i32: 0>} : vector<12x12xi32>
    %396 = tpu.iota {dimensions = array<i32: 1>} : vector<12x12xi32>
    %397 = arith.cmpi sge, %395, %396 : vector<12x12xi32>
    %cst_133 = arith.constant 0.000000e+00 : f32
    %cst_134 = arith.constant -1.000000e+30 : f32
    %398 = vector.broadcast %cst_133 : f32 to vector<12x12xf32>
    %399 = vector.broadcast %cst_134 : f32 to vector<12x12xf32>
    %400 = arith.select %397, %398, %399 : vector<12x12xi1>, vector<12x12xf32>
    %c0_135 = arith.constant 0 : index
    %c0_136 = arith.constant 0 : index
    %401 = vector.load %arg10[%c0_135, %c0_136] : memref<2x608xf32, #tpu.memory_space<vmem>>, vector<1x32xf32>
    %402 = vector.shape_cast %401 : vector<1x32xf32> to vector<32xf32>
    %c0_137 = arith.constant 0 : index
    %c32_138 = arith.constant 32 : index
    %403 = vector.load %arg10[%c0_137, %c32_138] : memref<2x608xf32, #tpu.memory_space<vmem>>, vector<1x32xf32>
    %404 = vector.shape_cast %403 : vector<1x32xf32> to vector<32xf32>
    %c0_139 = arith.constant 0 : index
    %c64_140 = arith.constant 64 : index
    %405 = vector.load %arg10[%c0_139, %c64_140] : memref<2x608xf32, #tpu.memory_space<vmem>>, vector<1x32xf32>
    %406 = vector.shape_cast %405 : vector<1x32xf32> to vector<32xf32>
    %c0_141 = arith.constant 0 : index
    %c96_142 = arith.constant 96 : index
    %407 = vector.load %arg10[%c0_141, %c96_142] : memref<2x608xf32, #tpu.memory_space<vmem>>, vector<1x32xf32>
    %408 = vector.shape_cast %407 : vector<1x32xf32> to vector<32xf32>
    %c0_143 = arith.constant 0 : index
    %c128_144 = arith.constant 128 : index
    %409 = vector.load %arg10[%c0_143, %c128_144] : memref<2x608xf32, #tpu.memory_space<vmem>>, vector<1x32xf32>
    %410 = vector.shape_cast %409 : vector<1x32xf32> to vector<32xf32>
    %c0_145 = arith.constant 0 : index
    %c160 = arith.constant 160 : index
    %411 = vector.load %arg10[%c0_145, %c160] : memref<2x608xf32, #tpu.memory_space<vmem>>, vector<1x32xf32>
    %412 = vector.shape_cast %411 : vector<1x32xf32> to vector<32xf32>
    %c0_146 = arith.constant 0 : index
    %c192 = arith.constant 192 : index
    %413 = vector.load %arg10[%c0_146, %c192] : memref<2x608xf32, #tpu.memory_space<vmem>>, vector<1x96xf32>
    %414 = vector.shape_cast %413 : vector<1x96xf32> to vector<96xf32>
    %c0_147 = arith.constant 0 : index
    %c288 = arith.constant 288 : index
    %415 = vector.load %arg10[%c0_147, %c288] : memref<2x608xf32, #tpu.memory_space<vmem>>, vector<1x32xf32>
    %416 = vector.shape_cast %415 : vector<1x32xf32> to vector<32xf32>
    %c0_148 = arith.constant 0 : index
    %c320 = arith.constant 320 : index
    %417 = vector.load %arg10[%c0_148, %c320] : memref<2x608xf32, #tpu.memory_space<vmem>>, vector<1x32xf32>
    %418 = vector.shape_cast %417 : vector<1x32xf32> to vector<32xf32>
    %c0_149 = arith.constant 0 : index
    %c352 = arith.constant 352 : index
    %419 = vector.load %arg10[%c0_149, %c352] : memref<2x608xf32, #tpu.memory_space<vmem>>, vector<1x64xf32>
    %420 = vector.shape_cast %419 : vector<1x64xf32> to vector<64xf32>
    %c0_150 = arith.constant 0 : index
    %c416 = arith.constant 416 : index
    %421 = vector.load %arg10[%c0_150, %c416] : memref<2x608xf32, #tpu.memory_space<vmem>>, vector<1x32xf32>
    %422 = vector.shape_cast %421 : vector<1x32xf32> to vector<32xf32>
    %c0_151 = arith.constant 0 : index
    %c448 = arith.constant 448 : index
    %423 = vector.load %arg10[%c0_151, %c448] : memref<2x608xf32, #tpu.memory_space<vmem>>, vector<1x128xf32>
    %424 = vector.shape_cast %423 : vector<1x128xf32> to vector<128xf32>
    %c0_152 = arith.constant 0 : index
    %c576 = arith.constant 576 : index
    %425 = vector.load %arg10[%c0_152, %c576] : memref<2x608xf32, #tpu.memory_space<vmem>>, vector<1x32xf32>
    %426 = vector.shape_cast %425 : vector<1x32xf32> to vector<32xf32>
    %c0_153 = arith.constant 0 : index
    %c0_154 = arith.constant 0 : index
    %c0_155 = arith.constant 0 : index
    %427 = vector.load %arg8[%c0_153, %c0_154, %c0_155] : memref<2x32x384xf32, #tpu.memory_space<vmem>>, vector<1x32x96xf32>
    %428 = vector.shape_cast %427 : vector<1x32x96xf32> to vector<32x96xf32>
    %c0_156 = arith.constant 0 : index
    %c0_157 = arith.constant 0 : index
    %c96_158 = arith.constant 96 : index
    %429 = vector.load %arg8[%c0_156, %c0_157, %c96_158] : memref<2x32x384xf32, #tpu.memory_space<vmem>>, vector<1x32x32xf32>
    %430 = vector.shape_cast %429 : vector<1x32x32xf32> to vector<32x32xf32>
    %c0_159 = arith.constant 0 : index
    %c0_160 = arith.constant 0 : index
    %c128_161 = arith.constant 128 : index
    %431 = vector.load %arg8[%c0_159, %c0_160, %c128_161] : memref<2x32x384xf32, #tpu.memory_space<vmem>>, vector<1x32x32xf32>
    %432 = vector.shape_cast %431 : vector<1x32x32xf32> to vector<32x32xf32>
    %c0_162 = arith.constant 0 : index
    %c0_163 = arith.constant 0 : index
    %c160_164 = arith.constant 160 : index
    %433 = vector.load %arg8[%c0_162, %c0_163, %c160_164] : memref<2x32x384xf32, #tpu.memory_space<vmem>>, vector<1x32x64xf32>
    %434 = vector.shape_cast %433 : vector<1x32x64xf32> to vector<32x64xf32>
    %c0_165 = arith.constant 0 : index
    %c0_166 = arith.constant 0 : index
    %c224_167 = arith.constant 224 : index
    %435 = vector.load %arg8[%c0_165, %c0_166, %c224_167] : memref<2x32x384xf32, #tpu.memory_space<vmem>>, vector<1x32x32xf32>
    %436 = vector.shape_cast %435 : vector<1x32x32xf32> to vector<32x32xf32>
    %c0_168 = arith.constant 0 : index
    %c0_169 = arith.constant 0 : index
    %c256_170 = arith.constant 256 : index
    %437 = vector.load %arg8[%c0_168, %c0_169, %c256_170] : memref<2x32x384xf32, #tpu.memory_space<vmem>>, vector<1x32x128xf32>
    %438 = vector.shape_cast %437 : vector<1x32x128xf32> to vector<32x128xf32>
    %c0_171 = arith.constant 0 : index
    %c0_172 = arith.constant 0 : index
    %c0_173 = arith.constant 0 : index
    %439 = vector.load %arg9[%c0_171, %c0_172, %c0_173] : memref<2x128x32xf32, #tpu.memory_space<vmem>>, vector<1x128x32xf32>
    %440 = vector.shape_cast %439 : vector<1x128x32xf32> to vector<128x32xf32>
    %cst_174 = arith.constant dense<0.000000e+00> : vector<12xf32>
    %441 = vector.multi_reduction <add>, %52, %cst_174 [1] : vector<12x32xf32> to vector<12xf32>
    %442 = vector.shape_cast %441 : vector<12xf32> to vector<12x1xf32>
    %cst_175 = arith.constant 3.200000e+01 : f32
    %443 = vector.broadcast %cst_175 : f32 to vector<12x1xf32>
    %444 = arith.divf %442, %443 : vector<12x1xf32>
    %445 = vector.broadcast %444 : vector<12x1xf32> to vector<12x32xf32>
    %446 = arith.subf %52, %445 : vector<12x32xf32>
    %447 = arith.mulf %446, %446 : vector<12x32xf32>
    %cst_176 = arith.constant dense<0.000000e+00> : vector<12xf32>
    %448 = vector.multi_reduction <add>, %447, %cst_176 [1] : vector<12x32xf32> to vector<12xf32>
    %449 = vector.shape_cast %448 : vector<12xf32> to vector<12x1xf32>
    %cst_177 = arith.constant 3.200000e+01 : f32
    %450 = vector.broadcast %cst_177 : f32 to vector<12x1xf32>
    %451 = arith.divf %449, %450 : vector<12x1xf32>
    %452 = vector.broadcast %444 : vector<12x1xf32> to vector<12x32xf32>
    %453 = arith.subf %52, %452 : vector<12x32xf32>
    %cst_178 = arith.constant 9.99999974E-6 : f32
    %454 = vector.broadcast %cst_178 : f32 to vector<12x1xf32>
    %455 = arith.addf %451, %454 : vector<12x1xf32>
    %456 = math.rsqrt %455 : vector<12x1xf32>
    %457 = vector.broadcast %456 : vector<12x1xf32> to vector<12x32xf32>
    %458 = arith.mulf %453, %457 : vector<12x32xf32>
    %459 = vector.shape_cast %402 : vector<32xf32> to vector<1x32xf32>
    %460 = vector.broadcast %459 : vector<1x32xf32> to vector<12x32xf32>
    %461 = arith.mulf %458, %460 : vector<12x32xf32>
    %462 = vector.shape_cast %404 : vector<32xf32> to vector<1x32xf32>
    %463 = vector.broadcast %462 : vector<1x32xf32> to vector<12x32xf32>
    %464 = arith.addf %461, %463 : vector<12x32xf32>
    %cst_179 = arith.constant dense<0.000000e+00> : vector<12x96xf32>
    %465 = tpu.matmul %464, %428, %cst_179 {dimension_numbers = #tpu.dot_dimension_numbers<[1], [0], [0], [1], [0, 0, 1, 1], [], []>} : vector<12x32xf32>, vector<32x96xf32>, vector<12x96xf32> -> vector<12x96xf32>
    %466 = vector.shape_cast %414 : vector<96xf32> to vector<1x96xf32>
    %467 = vector.broadcast %466 : vector<1x96xf32> to vector<12x96xf32>
    %468 = arith.addf %465, %467 : vector<12x96xf32>
    %469 = vector.extract_strided_slice %468 {offsets = [0, 0], sizes = [12, 32], strides = [1, 1]} : vector<12x96xf32> to vector<12x32xf32>
    %470 = vector.extract_strided_slice %468 {offsets = [0, 32], sizes = [12, 32], strides = [1, 1]} : vector<12x96xf32> to vector<12x32xf32>
    %471 = vector.extract_strided_slice %468 {offsets = [0, 64], sizes = [12, 32], strides = [1, 1]} : vector<12x96xf32> to vector<12x32xf32>
    %cst_180 = arith.constant 0.353553385 : f32
    %472 = vector.broadcast %cst_180 : f32 to vector<12x32xf32>
    %473 = arith.mulf %469, %472 : vector<12x32xf32>
    %474 = vector.broadcast %7 : vector<1x32xf32> to vector<12x32xf32>
    %475 = arith.mulf %473, %474 : vector<12x32xf32>
    %cst_181 = arith.constant dense<0.000000e+00> : vector<12x12xf32>
    %476 = tpu.matmul %475, %470, %cst_181 {dimension_numbers = #tpu.dot_dimension_numbers<[1], [1], [0], [0], [0, 0, 1, 0], [], []>} : vector<12x32xf32>, vector<12x32xf32>, vector<12x12xf32> -> vector<12x12xf32>
    %477 = arith.addf %476, %400 : vector<12x12xf32>
    %cst_182 = arith.constant dense<0xFF800000> : vector<12xf32>
    %478 = vector.multi_reduction <maximumf>, %477, %cst_182 [1] : vector<12x12xf32> to vector<12xf32>
    %479 = vector.shape_cast %478 : vector<12xf32> to vector<12x1xf32>
    %480 = vector.broadcast %479 : vector<12x1xf32> to vector<12x12xf32>
    %481 = arith.subf %477, %480 : vector<12x12xf32>
    %482 = math.exp %481 : vector<12x12xf32>
    %cst_183 = arith.constant dense<0.000000e+00> : vector<12xf32>
    %483 = vector.multi_reduction <add>, %482, %cst_183 [1] : vector<12x12xf32> to vector<12xf32>
    %484 = vector.shape_cast %483 : vector<12xf32> to vector<12x1xf32>
    %485 = vector.broadcast %484 : vector<12x1xf32> to vector<12x12xf32>
    %486 = arith.divf %482, %485 : vector<12x12xf32>
    %487 = vector.broadcast %7 : vector<1x32xf32> to vector<12x32xf32>
    %488 = arith.mulf %471, %487 : vector<12x32xf32>
    %cst_184 = arith.constant dense<0.000000e+00> : vector<12x32xf32>
    %489 = tpu.matmul %486, %488, %cst_184 {dimension_numbers = #tpu.dot_dimension_numbers<[1], [0], [0], [1], [0, 0, 1, 1], [], []>} : vector<12x12xf32>, vector<12x32xf32>, vector<12x32xf32> -> vector<12x32xf32>
    %490 = vector.broadcast %14 : vector<1x32xf32> to vector<12x32xf32>
    %491 = arith.mulf %473, %490 : vector<12x32xf32>
    %cst_185 = arith.constant dense<0.000000e+00> : vector<12x12xf32>
    %492 = tpu.matmul %491, %470, %cst_185 {dimension_numbers = #tpu.dot_dimension_numbers<[1], [1], [0], [0], [0, 0, 1, 0], [], []>} : vector<12x32xf32>, vector<12x32xf32>, vector<12x12xf32> -> vector<12x12xf32>
    %493 = arith.addf %492, %400 : vector<12x12xf32>
    %cst_186 = arith.constant dense<0xFF800000> : vector<12xf32>
    %494 = vector.multi_reduction <maximumf>, %493, %cst_186 [1] : vector<12x12xf32> to vector<12xf32>
    %495 = vector.shape_cast %494 : vector<12xf32> to vector<12x1xf32>
    %496 = vector.broadcast %495 : vector<12x1xf32> to vector<12x12xf32>
    %497 = arith.subf %493, %496 : vector<12x12xf32>
    %498 = math.exp %497 : vector<12x12xf32>
    %cst_187 = arith.constant dense<0.000000e+00> : vector<12xf32>
    %499 = vector.multi_reduction <add>, %498, %cst_187 [1] : vector<12x12xf32> to vector<12xf32>
    %500 = vector.shape_cast %499 : vector<12xf32> to vector<12x1xf32>
    %501 = vector.broadcast %500 : vector<12x1xf32> to vector<12x12xf32>
    %502 = arith.divf %498, %501 : vector<12x12xf32>
    %503 = vector.broadcast %14 : vector<1x32xf32> to vector<12x32xf32>
    %504 = arith.mulf %471, %503 : vector<12x32xf32>
    %cst_188 = arith.constant dense<0.000000e+00> : vector<12x32xf32>
    %505 = tpu.matmul %502, %504, %cst_188 {dimension_numbers = #tpu.dot_dimension_numbers<[1], [0], [0], [1], [0, 0, 1, 1], [], []>} : vector<12x12xf32>, vector<12x32xf32>, vector<12x32xf32> -> vector<12x32xf32>
    %506 = arith.addf %489, %505 : vector<12x32xf32>
    %507 = vector.broadcast %21 : vector<1x32xf32> to vector<12x32xf32>
    %508 = arith.mulf %473, %507 : vector<12x32xf32>
    %cst_189 = arith.constant dense<0.000000e+00> : vector<12x12xf32>
    %509 = tpu.matmul %508, %470, %cst_189 {dimension_numbers = #tpu.dot_dimension_numbers<[1], [1], [0], [0], [0, 0, 1, 0], [], []>} : vector<12x32xf32>, vector<12x32xf32>, vector<12x12xf32> -> vector<12x12xf32>
    %510 = arith.addf %509, %400 : vector<12x12xf32>
    %cst_190 = arith.constant dense<0xFF800000> : vector<12xf32>
    %511 = vector.multi_reduction <maximumf>, %510, %cst_190 [1] : vector<12x12xf32> to vector<12xf32>
    %512 = vector.shape_cast %511 : vector<12xf32> to vector<12x1xf32>
    %513 = vector.broadcast %512 : vector<12x1xf32> to vector<12x12xf32>
    %514 = arith.subf %510, %513 : vector<12x12xf32>
    %515 = math.exp %514 : vector<12x12xf32>
    %cst_191 = arith.constant dense<0.000000e+00> : vector<12xf32>
    %516 = vector.multi_reduction <add>, %515, %cst_191 [1] : vector<12x12xf32> to vector<12xf32>
    %517 = vector.shape_cast %516 : vector<12xf32> to vector<12x1xf32>
    %518 = vector.broadcast %517 : vector<12x1xf32> to vector<12x12xf32>
    %519 = arith.divf %515, %518 : vector<12x12xf32>
    %520 = vector.broadcast %21 : vector<1x32xf32> to vector<12x32xf32>
    %521 = arith.mulf %471, %520 : vector<12x32xf32>
    %cst_192 = arith.constant dense<0.000000e+00> : vector<12x32xf32>
    %522 = tpu.matmul %519, %521, %cst_192 {dimension_numbers = #tpu.dot_dimension_numbers<[1], [0], [0], [1], [0, 0, 1, 1], [], []>} : vector<12x12xf32>, vector<12x32xf32>, vector<12x32xf32> -> vector<12x32xf32>
    %523 = arith.addf %506, %522 : vector<12x32xf32>
    %524 = vector.broadcast %28 : vector<1x32xf32> to vector<12x32xf32>
    %525 = arith.mulf %473, %524 : vector<12x32xf32>
    %cst_193 = arith.constant dense<0.000000e+00> : vector<12x12xf32>
    %526 = tpu.matmul %525, %470, %cst_193 {dimension_numbers = #tpu.dot_dimension_numbers<[1], [1], [0], [0], [0, 0, 1, 0], [], []>} : vector<12x32xf32>, vector<12x32xf32>, vector<12x12xf32> -> vector<12x12xf32>
    %527 = arith.addf %526, %400 : vector<12x12xf32>
    %cst_194 = arith.constant dense<0xFF800000> : vector<12xf32>
    %528 = vector.multi_reduction <maximumf>, %527, %cst_194 [1] : vector<12x12xf32> to vector<12xf32>
    %529 = vector.shape_cast %528 : vector<12xf32> to vector<12x1xf32>
    %530 = vector.broadcast %529 : vector<12x1xf32> to vector<12x12xf32>
    %531 = arith.subf %527, %530 : vector<12x12xf32>
    %532 = math.exp %531 : vector<12x12xf32>
    %cst_195 = arith.constant dense<0.000000e+00> : vector<12xf32>
    %533 = vector.multi_reduction <add>, %532, %cst_195 [1] : vector<12x12xf32> to vector<12xf32>
    %534 = vector.shape_cast %533 : vector<12xf32> to vector<12x1xf32>
    %535 = vector.broadcast %534 : vector<12x1xf32> to vector<12x12xf32>
    %536 = arith.divf %532, %535 : vector<12x12xf32>
    %537 = vector.broadcast %28 : vector<1x32xf32> to vector<12x32xf32>
    %538 = arith.mulf %471, %537 : vector<12x32xf32>
    %cst_196 = arith.constant dense<0.000000e+00> : vector<12x32xf32>
    %539 = tpu.matmul %536, %538, %cst_196 {dimension_numbers = #tpu.dot_dimension_numbers<[1], [0], [0], [1], [0, 0, 1, 1], [], []>} : vector<12x12xf32>, vector<12x32xf32>, vector<12x32xf32> -> vector<12x32xf32>
    %540 = arith.addf %523, %539 : vector<12x32xf32>
    %cst_197 = arith.constant dense<0.000000e+00> : vector<12x32xf32>
    %541 = tpu.matmul %540, %430, %cst_197 {dimension_numbers = #tpu.dot_dimension_numbers<[1], [0], [0], [1], [0, 0, 1, 1], [], []>} : vector<12x32xf32>, vector<32x32xf32>, vector<12x32xf32> -> vector<12x32xf32>
    %542 = vector.shape_cast %416 : vector<32xf32> to vector<1x32xf32>
    %543 = vector.broadcast %542 : vector<1x32xf32> to vector<12x32xf32>
    %544 = arith.addf %541, %543 : vector<12x32xf32>
    %545 = arith.addf %52, %544 : vector<12x32xf32>
    %cst_198 = arith.constant dense<0.000000e+00> : vector<12xf32>
    %546 = vector.multi_reduction <add>, %545, %cst_198 [1] : vector<12x32xf32> to vector<12xf32>
    %547 = vector.shape_cast %546 : vector<12xf32> to vector<12x1xf32>
    %cst_199 = arith.constant 3.200000e+01 : f32
    %548 = vector.broadcast %cst_199 : f32 to vector<12x1xf32>
    %549 = arith.divf %547, %548 : vector<12x1xf32>
    %550 = vector.broadcast %549 : vector<12x1xf32> to vector<12x32xf32>
    %551 = arith.subf %545, %550 : vector<12x32xf32>
    %552 = arith.mulf %551, %551 : vector<12x32xf32>
    %cst_200 = arith.constant dense<0.000000e+00> : vector<12xf32>
    %553 = vector.multi_reduction <add>, %552, %cst_200 [1] : vector<12x32xf32> to vector<12xf32>
    %554 = vector.shape_cast %553 : vector<12xf32> to vector<12x1xf32>
    %cst_201 = arith.constant 3.200000e+01 : f32
    %555 = vector.broadcast %cst_201 : f32 to vector<12x1xf32>
    %556 = arith.divf %554, %555 : vector<12x1xf32>
    %557 = vector.broadcast %549 : vector<12x1xf32> to vector<12x32xf32>
    %558 = arith.subf %545, %557 : vector<12x32xf32>
    %cst_202 = arith.constant 9.99999974E-6 : f32
    %559 = vector.broadcast %cst_202 : f32 to vector<12x1xf32>
    %560 = arith.addf %556, %559 : vector<12x1xf32>
    %561 = math.rsqrt %560 : vector<12x1xf32>
    %562 = vector.broadcast %561 : vector<12x1xf32> to vector<12x32xf32>
    %563 = arith.mulf %558, %562 : vector<12x32xf32>
    %564 = vector.shape_cast %406 : vector<32xf32> to vector<1x32xf32>
    %565 = vector.broadcast %564 : vector<1x32xf32> to vector<12x32xf32>
    %566 = arith.mulf %563, %565 : vector<12x32xf32>
    %567 = vector.shape_cast %408 : vector<32xf32> to vector<1x32xf32>
    %568 = vector.broadcast %567 : vector<1x32xf32> to vector<12x32xf32>
    %569 = arith.addf %566, %568 : vector<12x32xf32>
    %cst_203 = arith.constant dense<0.000000e+00> : vector<12x32xf32>
    %570 = tpu.matmul %569, %432, %cst_203 {dimension_numbers = #tpu.dot_dimension_numbers<[1], [0], [0], [1], [0, 0, 1, 1], [], []>} : vector<12x32xf32>, vector<32x32xf32>, vector<12x32xf32> -> vector<12x32xf32>
    %571 = vector.shape_cast %418 : vector<32xf32> to vector<1x32xf32>
    %572 = vector.broadcast %571 : vector<1x32xf32> to vector<12x32xf32>
    %573 = arith.addf %570, %572 : vector<12x32xf32>
    %cst_204 = arith.constant dense<0.000000e+00> : vector<32x64xf32>
    %574 = tpu.matmul %394, %434, %cst_204 {dimension_numbers = #tpu.dot_dimension_numbers<[1], [0], [0], [1], [0, 0, 1, 1], [], []>} : vector<32x32xf32>, vector<32x64xf32>, vector<32x64xf32> -> vector<32x64xf32>
    %575 = vector.shape_cast %420 : vector<64xf32> to vector<1x64xf32>
    %576 = vector.broadcast %575 : vector<1x64xf32> to vector<32x64xf32>
    %577 = arith.addf %574, %576 : vector<32x64xf32>
    %578 = vector.extract_strided_slice %577 {offsets = [0, 0], sizes = [32, 32], strides = [1, 1]} : vector<32x64xf32> to vector<32x32xf32>
    %579 = vector.extract_strided_slice %577 {offsets = [0, 32], sizes = [32, 32], strides = [1, 1]} : vector<32x64xf32> to vector<32x32xf32>
    %cst_205 = arith.constant 0.353553385 : f32
    %580 = vector.broadcast %cst_205 : f32 to vector<12x32xf32>
    %581 = arith.mulf %573, %580 : vector<12x32xf32>
    %582 = vector.broadcast %7 : vector<1x32xf32> to vector<12x32xf32>
    %583 = arith.mulf %581, %582 : vector<12x32xf32>
    %cst_206 = arith.constant dense<0.000000e+00> : vector<12x32xf32>
    %584 = tpu.matmul %583, %578, %cst_206 {dimension_numbers = #tpu.dot_dimension_numbers<[1], [1], [0], [0], [0, 0, 1, 0], [], []>} : vector<12x32xf32>, vector<32x32xf32>, vector<12x32xf32> -> vector<12x32xf32>
    %cst_207 = arith.constant dense<0xFF800000> : vector<12xf32>
    %585 = vector.multi_reduction <maximumf>, %584, %cst_207 [1] : vector<12x32xf32> to vector<12xf32>
    %586 = vector.shape_cast %585 : vector<12xf32> to vector<12x1xf32>
    %587 = vector.broadcast %586 : vector<12x1xf32> to vector<12x32xf32>
    %588 = arith.subf %584, %587 : vector<12x32xf32>
    %589 = math.exp %588 : vector<12x32xf32>
    %cst_208 = arith.constant dense<0.000000e+00> : vector<12xf32>
    %590 = vector.multi_reduction <add>, %589, %cst_208 [1] : vector<12x32xf32> to vector<12xf32>
    %591 = vector.shape_cast %590 : vector<12xf32> to vector<12x1xf32>
    %592 = vector.broadcast %591 : vector<12x1xf32> to vector<12x32xf32>
    %593 = arith.divf %589, %592 : vector<12x32xf32>
    %594 = vector.broadcast %7 : vector<1x32xf32> to vector<32x32xf32>
    %595 = arith.mulf %579, %594 : vector<32x32xf32>
    %cst_209 = arith.constant dense<0.000000e+00> : vector<12x32xf32>
    %596 = tpu.matmul %593, %595, %cst_209 {dimension_numbers = #tpu.dot_dimension_numbers<[1], [0], [0], [1], [0, 0, 1, 1], [], []>} : vector<12x32xf32>, vector<32x32xf32>, vector<12x32xf32> -> vector<12x32xf32>
    %597 = vector.broadcast %14 : vector<1x32xf32> to vector<12x32xf32>
    %598 = arith.mulf %581, %597 : vector<12x32xf32>
    %cst_210 = arith.constant dense<0.000000e+00> : vector<12x32xf32>
    %599 = tpu.matmul %598, %578, %cst_210 {dimension_numbers = #tpu.dot_dimension_numbers<[1], [1], [0], [0], [0, 0, 1, 0], [], []>} : vector<12x32xf32>, vector<32x32xf32>, vector<12x32xf32> -> vector<12x32xf32>
    %cst_211 = arith.constant dense<0xFF800000> : vector<12xf32>
    %600 = vector.multi_reduction <maximumf>, %599, %cst_211 [1] : vector<12x32xf32> to vector<12xf32>
    %601 = vector.shape_cast %600 : vector<12xf32> to vector<12x1xf32>
    %602 = vector.broadcast %601 : vector<12x1xf32> to vector<12x32xf32>
    %603 = arith.subf %599, %602 : vector<12x32xf32>
    %604 = math.exp %603 : vector<12x32xf32>
    %cst_212 = arith.constant dense<0.000000e+00> : vector<12xf32>
    %605 = vector.multi_reduction <add>, %604, %cst_212 [1] : vector<12x32xf32> to vector<12xf32>
    %606 = vector.shape_cast %605 : vector<12xf32> to vector<12x1xf32>
    %607 = vector.broadcast %606 : vector<12x1xf32> to vector<12x32xf32>
    %608 = arith.divf %604, %607 : vector<12x32xf32>
    %609 = vector.broadcast %14 : vector<1x32xf32> to vector<32x32xf32>
    %610 = arith.mulf %579, %609 : vector<32x32xf32>
    %cst_213 = arith.constant dense<0.000000e+00> : vector<12x32xf32>
    %611 = tpu.matmul %608, %610, %cst_213 {dimension_numbers = #tpu.dot_dimension_numbers<[1], [0], [0], [1], [0, 0, 1, 1], [], []>} : vector<12x32xf32>, vector<32x32xf32>, vector<12x32xf32> -> vector<12x32xf32>
    %612 = arith.addf %596, %611 : vector<12x32xf32>
    %613 = vector.broadcast %21 : vector<1x32xf32> to vector<12x32xf32>
    %614 = arith.mulf %581, %613 : vector<12x32xf32>
    %cst_214 = arith.constant dense<0.000000e+00> : vector<12x32xf32>
    %615 = tpu.matmul %614, %578, %cst_214 {dimension_numbers = #tpu.dot_dimension_numbers<[1], [1], [0], [0], [0, 0, 1, 0], [], []>} : vector<12x32xf32>, vector<32x32xf32>, vector<12x32xf32> -> vector<12x32xf32>
    %cst_215 = arith.constant dense<0xFF800000> : vector<12xf32>
    %616 = vector.multi_reduction <maximumf>, %615, %cst_215 [1] : vector<12x32xf32> to vector<12xf32>
    %617 = vector.shape_cast %616 : vector<12xf32> to vector<12x1xf32>
    %618 = vector.broadcast %617 : vector<12x1xf32> to vector<12x32xf32>
    %619 = arith.subf %615, %618 : vector<12x32xf32>
    %620 = math.exp %619 : vector<12x32xf32>
    %cst_216 = arith.constant dense<0.000000e+00> : vector<12xf32>
    %621 = vector.multi_reduction <add>, %620, %cst_216 [1] : vector<12x32xf32> to vector<12xf32>
    %622 = vector.shape_cast %621 : vector<12xf32> to vector<12x1xf32>
    %623 = vector.broadcast %622 : vector<12x1xf32> to vector<12x32xf32>
    %624 = arith.divf %620, %623 : vector<12x32xf32>
    %625 = vector.broadcast %21 : vector<1x32xf32> to vector<32x32xf32>
    %626 = arith.mulf %579, %625 : vector<32x32xf32>
    %cst_217 = arith.constant dense<0.000000e+00> : vector<12x32xf32>
    %627 = tpu.matmul %624, %626, %cst_217 {dimension_numbers = #tpu.dot_dimension_numbers<[1], [0], [0], [1], [0, 0, 1, 1], [], []>} : vector<12x32xf32>, vector<32x32xf32>, vector<12x32xf32> -> vector<12x32xf32>
    %628 = arith.addf %612, %627 : vector<12x32xf32>
    %629 = vector.broadcast %28 : vector<1x32xf32> to vector<12x32xf32>
    %630 = arith.mulf %581, %629 : vector<12x32xf32>
    %cst_218 = arith.constant dense<0.000000e+00> : vector<12x32xf32>
    %631 = tpu.matmul %630, %578, %cst_218 {dimension_numbers = #tpu.dot_dimension_numbers<[1], [1], [0], [0], [0, 0, 1, 0], [], []>} : vector<12x32xf32>, vector<32x32xf32>, vector<12x32xf32> -> vector<12x32xf32>
    %cst_219 = arith.constant dense<0xFF800000> : vector<12xf32>
    %632 = vector.multi_reduction <maximumf>, %631, %cst_219 [1] : vector<12x32xf32> to vector<12xf32>
    %633 = vector.shape_cast %632 : vector<12xf32> to vector<12x1xf32>
    %634 = vector.broadcast %633 : vector<12x1xf32> to vector<12x32xf32>
    %635 = arith.subf %631, %634 : vector<12x32xf32>
    %636 = math.exp %635 : vector<12x32xf32>
    %cst_220 = arith.constant dense<0.000000e+00> : vector<12xf32>
    %637 = vector.multi_reduction <add>, %636, %cst_220 [1] : vector<12x32xf32> to vector<12xf32>
    %638 = vector.shape_cast %637 : vector<12xf32> to vector<12x1xf32>
    %639 = vector.broadcast %638 : vector<12x1xf32> to vector<12x32xf32>
    %640 = arith.divf %636, %639 : vector<12x32xf32>
    %641 = vector.broadcast %28 : vector<1x32xf32> to vector<32x32xf32>
    %642 = arith.mulf %579, %641 : vector<32x32xf32>
    %cst_221 = arith.constant dense<0.000000e+00> : vector<12x32xf32>
    %643 = tpu.matmul %640, %642, %cst_221 {dimension_numbers = #tpu.dot_dimension_numbers<[1], [0], [0], [1], [0, 0, 1, 1], [], []>} : vector<12x32xf32>, vector<32x32xf32>, vector<12x32xf32> -> vector<12x32xf32>
    %644 = arith.addf %628, %643 : vector<12x32xf32>
    %cst_222 = arith.constant dense<0.000000e+00> : vector<12x32xf32>
    %645 = tpu.matmul %644, %436, %cst_222 {dimension_numbers = #tpu.dot_dimension_numbers<[1], [0], [0], [1], [0, 0, 1, 1], [], []>} : vector<12x32xf32>, vector<32x32xf32>, vector<12x32xf32> -> vector<12x32xf32>
    %646 = vector.shape_cast %422 : vector<32xf32> to vector<1x32xf32>
    %647 = vector.broadcast %646 : vector<1x32xf32> to vector<12x32xf32>
    %648 = arith.addf %645, %647 : vector<12x32xf32>
    %649 = arith.addf %545, %648 : vector<12x32xf32>
    %cst_223 = arith.constant dense<0.000000e+00> : vector<12xf32>
    %650 = vector.multi_reduction <add>, %649, %cst_223 [1] : vector<12x32xf32> to vector<12xf32>
    %651 = vector.shape_cast %650 : vector<12xf32> to vector<12x1xf32>
    %cst_224 = arith.constant 3.200000e+01 : f32
    %652 = vector.broadcast %cst_224 : f32 to vector<12x1xf32>
    %653 = arith.divf %651, %652 : vector<12x1xf32>
    %654 = vector.broadcast %653 : vector<12x1xf32> to vector<12x32xf32>
    %655 = arith.subf %649, %654 : vector<12x32xf32>
    %656 = arith.mulf %655, %655 : vector<12x32xf32>
    %cst_225 = arith.constant dense<0.000000e+00> : vector<12xf32>
    %657 = vector.multi_reduction <add>, %656, %cst_225 [1] : vector<12x32xf32> to vector<12xf32>
    %658 = vector.shape_cast %657 : vector<12xf32> to vector<12x1xf32>
    %cst_226 = arith.constant 3.200000e+01 : f32
    %659 = vector.broadcast %cst_226 : f32 to vector<12x1xf32>
    %660 = arith.divf %658, %659 : vector<12x1xf32>
    %661 = vector.broadcast %653 : vector<12x1xf32> to vector<12x32xf32>
    %662 = arith.subf %649, %661 : vector<12x32xf32>
    %cst_227 = arith.constant 9.99999974E-6 : f32
    %663 = vector.broadcast %cst_227 : f32 to vector<12x1xf32>
    %664 = arith.addf %660, %663 : vector<12x1xf32>
    %665 = math.rsqrt %664 : vector<12x1xf32>
    %666 = vector.broadcast %665 : vector<12x1xf32> to vector<12x32xf32>
    %667 = arith.mulf %662, %666 : vector<12x32xf32>
    %668 = vector.shape_cast %410 : vector<32xf32> to vector<1x32xf32>
    %669 = vector.broadcast %668 : vector<1x32xf32> to vector<12x32xf32>
    %670 = arith.mulf %667, %669 : vector<12x32xf32>
    %671 = vector.shape_cast %412 : vector<32xf32> to vector<1x32xf32>
    %672 = vector.broadcast %671 : vector<1x32xf32> to vector<12x32xf32>
    %673 = arith.addf %670, %672 : vector<12x32xf32>
    %cst_228 = arith.constant dense<0.000000e+00> : vector<12x128xf32>
    %674 = tpu.matmul %673, %438, %cst_228 {dimension_numbers = #tpu.dot_dimension_numbers<[1], [0], [0], [1], [0, 0, 1, 1], [], []>} : vector<12x32xf32>, vector<32x128xf32>, vector<12x128xf32> -> vector<12x128xf32>
    %675 = vector.shape_cast %424 : vector<128xf32> to vector<1x128xf32>
    %676 = vector.broadcast %675 : vector<1x128xf32> to vector<12x128xf32>
    %677 = arith.addf %674, %676 : vector<12x128xf32>
    %cst_229 = arith.constant 5.000000e-01 : f32
    %678 = vector.broadcast %cst_229 : f32 to vector<12x128xf32>
    %679 = arith.mulf %678, %677 : vector<12x128xf32>
    %cst_230 = arith.constant 4.471500e-02 : f32
    %680 = vector.broadcast %cst_230 : f32 to vector<12x128xf32>
    %681 = arith.mulf %680, %677 : vector<12x128xf32>
    %682 = arith.mulf %681, %677 : vector<12x128xf32>
    %683 = arith.mulf %682, %677 : vector<12x128xf32>
    %684 = arith.addf %677, %683 : vector<12x128xf32>
    %cst_231 = arith.constant 0.797884583 : f32
    %685 = vector.broadcast %cst_231 : f32 to vector<12x128xf32>
    %686 = arith.mulf %685, %684 : vector<12x128xf32>
    %687 = math.tanh %686 : vector<12x128xf32>
    %cst_232 = arith.constant 1.000000e+00 : f32
    %688 = vector.broadcast %cst_232 : f32 to vector<12x128xf32>
    %689 = arith.addf %688, %687 : vector<12x128xf32>
    %690 = arith.mulf %679, %689 : vector<12x128xf32>
    %cst_233 = arith.constant dense<0.000000e+00> : vector<12x32xf32>
    %691 = tpu.matmul %690, %440, %cst_233 {dimension_numbers = #tpu.dot_dimension_numbers<[1], [0], [0], [1], [0, 0, 1, 1], [], []>} : vector<12x128xf32>, vector<128x32xf32>, vector<12x32xf32> -> vector<12x32xf32>
    %692 = vector.shape_cast %426 : vector<32xf32> to vector<1x32xf32>
    %693 = vector.broadcast %692 : vector<1x32xf32> to vector<12x32xf32>
    %694 = arith.addf %691, %693 : vector<12x32xf32>
    %695 = arith.addf %649, %694 : vector<12x32xf32>
    %c1_234 = arith.constant 1 : index
    %c0_235 = arith.constant 0 : index
    %696 = vector.load %arg10[%c1_234, %c0_235] : memref<2x608xf32, #tpu.memory_space<vmem>>, vector<1x32xf32>
    %697 = vector.shape_cast %696 : vector<1x32xf32> to vector<32xf32>
    %c1_236 = arith.constant 1 : index
    %c32_237 = arith.constant 32 : index
    %698 = vector.load %arg10[%c1_236, %c32_237] : memref<2x608xf32, #tpu.memory_space<vmem>>, vector<1x32xf32>
    %699 = vector.shape_cast %698 : vector<1x32xf32> to vector<32xf32>
    %c1_238 = arith.constant 1 : index
    %c64_239 = arith.constant 64 : index
    %700 = vector.load %arg10[%c1_238, %c64_239] : memref<2x608xf32, #tpu.memory_space<vmem>>, vector<1x32xf32>
    %701 = vector.shape_cast %700 : vector<1x32xf32> to vector<32xf32>
    %c1_240 = arith.constant 1 : index
    %c96_241 = arith.constant 96 : index
    %702 = vector.load %arg10[%c1_240, %c96_241] : memref<2x608xf32, #tpu.memory_space<vmem>>, vector<1x32xf32>
    %703 = vector.shape_cast %702 : vector<1x32xf32> to vector<32xf32>
    %c1_242 = arith.constant 1 : index
    %c128_243 = arith.constant 128 : index
    %704 = vector.load %arg10[%c1_242, %c128_243] : memref<2x608xf32, #tpu.memory_space<vmem>>, vector<1x32xf32>
    %705 = vector.shape_cast %704 : vector<1x32xf32> to vector<32xf32>
    %c1_244 = arith.constant 1 : index
    %c160_245 = arith.constant 160 : index
    %706 = vector.load %arg10[%c1_244, %c160_245] : memref<2x608xf32, #tpu.memory_space<vmem>>, vector<1x32xf32>
    %707 = vector.shape_cast %706 : vector<1x32xf32> to vector<32xf32>
    %c1_246 = arith.constant 1 : index
    %c192_247 = arith.constant 192 : index
    %708 = vector.load %arg10[%c1_246, %c192_247] : memref<2x608xf32, #tpu.memory_space<vmem>>, vector<1x96xf32>
    %709 = vector.shape_cast %708 : vector<1x96xf32> to vector<96xf32>
    %c1_248 = arith.constant 1 : index
    %c288_249 = arith.constant 288 : index
    %710 = vector.load %arg10[%c1_248, %c288_249] : memref<2x608xf32, #tpu.memory_space<vmem>>, vector<1x32xf32>
    %711 = vector.shape_cast %710 : vector<1x32xf32> to vector<32xf32>
    %c1_250 = arith.constant 1 : index
    %c320_251 = arith.constant 320 : index
    %712 = vector.load %arg10[%c1_250, %c320_251] : memref<2x608xf32, #tpu.memory_space<vmem>>, vector<1x32xf32>
    %713 = vector.shape_cast %712 : vector<1x32xf32> to vector<32xf32>
    %c1_252 = arith.constant 1 : index
    %c352_253 = arith.constant 352 : index
    %714 = vector.load %arg10[%c1_252, %c352_253] : memref<2x608xf32, #tpu.memory_space<vmem>>, vector<1x64xf32>
    %715 = vector.shape_cast %714 : vector<1x64xf32> to vector<64xf32>
    %c1_254 = arith.constant 1 : index
    %c416_255 = arith.constant 416 : index
    %716 = vector.load %arg10[%c1_254, %c416_255] : memref<2x608xf32, #tpu.memory_space<vmem>>, vector<1x32xf32>
    %717 = vector.shape_cast %716 : vector<1x32xf32> to vector<32xf32>
    %c1_256 = arith.constant 1 : index
    %c448_257 = arith.constant 448 : index
    %718 = vector.load %arg10[%c1_256, %c448_257] : memref<2x608xf32, #tpu.memory_space<vmem>>, vector<1x128xf32>
    %719 = vector.shape_cast %718 : vector<1x128xf32> to vector<128xf32>
    %c1_258 = arith.constant 1 : index
    %c576_259 = arith.constant 576 : index
    %720 = vector.load %arg10[%c1_258, %c576_259] : memref<2x608xf32, #tpu.memory_space<vmem>>, vector<1x32xf32>
    %721 = vector.shape_cast %720 : vector<1x32xf32> to vector<32xf32>
    %c1_260 = arith.constant 1 : index
    %c0_261 = arith.constant 0 : index
    %c0_262 = arith.constant 0 : index
    %722 = vector.load %arg8[%c1_260, %c0_261, %c0_262] : memref<2x32x384xf32, #tpu.memory_space<vmem>>, vector<1x32x96xf32>
    %723 = vector.shape_cast %722 : vector<1x32x96xf32> to vector<32x96xf32>
    %c1_263 = arith.constant 1 : index
    %c0_264 = arith.constant 0 : index
    %c96_265 = arith.constant 96 : index
    %724 = vector.load %arg8[%c1_263, %c0_264, %c96_265] : memref<2x32x384xf32, #tpu.memory_space<vmem>>, vector<1x32x32xf32>
    %725 = vector.shape_cast %724 : vector<1x32x32xf32> to vector<32x32xf32>
    %c1_266 = arith.constant 1 : index
    %c0_267 = arith.constant 0 : index
    %c128_268 = arith.constant 128 : index
    %726 = vector.load %arg8[%c1_266, %c0_267, %c128_268] : memref<2x32x384xf32, #tpu.memory_space<vmem>>, vector<1x32x32xf32>
    %727 = vector.shape_cast %726 : vector<1x32x32xf32> to vector<32x32xf32>
    %c1_269 = arith.constant 1 : index
    %c0_270 = arith.constant 0 : index
    %c160_271 = arith.constant 160 : index
    %728 = vector.load %arg8[%c1_269, %c0_270, %c160_271] : memref<2x32x384xf32, #tpu.memory_space<vmem>>, vector<1x32x64xf32>
    %729 = vector.shape_cast %728 : vector<1x32x64xf32> to vector<32x64xf32>
    %c1_272 = arith.constant 1 : index
    %c0_273 = arith.constant 0 : index
    %c224_274 = arith.constant 224 : index
    %730 = vector.load %arg8[%c1_272, %c0_273, %c224_274] : memref<2x32x384xf32, #tpu.memory_space<vmem>>, vector<1x32x32xf32>
    %731 = vector.shape_cast %730 : vector<1x32x32xf32> to vector<32x32xf32>
    %c1_275 = arith.constant 1 : index
    %c0_276 = arith.constant 0 : index
    %c256_277 = arith.constant 256 : index
    %732 = vector.load %arg8[%c1_275, %c0_276, %c256_277] : memref<2x32x384xf32, #tpu.memory_space<vmem>>, vector<1x32x128xf32>
    %733 = vector.shape_cast %732 : vector<1x32x128xf32> to vector<32x128xf32>
    %c1_278 = arith.constant 1 : index
    %c0_279 = arith.constant 0 : index
    %c0_280 = arith.constant 0 : index
    %734 = vector.load %arg9[%c1_278, %c0_279, %c0_280] : memref<2x128x32xf32, #tpu.memory_space<vmem>>, vector<1x128x32xf32>
    %735 = vector.shape_cast %734 : vector<1x128x32xf32> to vector<128x32xf32>
    %cst_281 = arith.constant dense<0.000000e+00> : vector<12xf32>
    %736 = vector.multi_reduction <add>, %695, %cst_281 [1] : vector<12x32xf32> to vector<12xf32>
    %737 = vector.shape_cast %736 : vector<12xf32> to vector<12x1xf32>
    %cst_282 = arith.constant 3.200000e+01 : f32
    %738 = vector.broadcast %cst_282 : f32 to vector<12x1xf32>
    %739 = arith.divf %737, %738 : vector<12x1xf32>
    %740 = vector.broadcast %739 : vector<12x1xf32> to vector<12x32xf32>
    %741 = arith.subf %695, %740 : vector<12x32xf32>
    %742 = arith.mulf %741, %741 : vector<12x32xf32>
    %cst_283 = arith.constant dense<0.000000e+00> : vector<12xf32>
    %743 = vector.multi_reduction <add>, %742, %cst_283 [1] : vector<12x32xf32> to vector<12xf32>
    %744 = vector.shape_cast %743 : vector<12xf32> to vector<12x1xf32>
    %cst_284 = arith.constant 3.200000e+01 : f32
    %745 = vector.broadcast %cst_284 : f32 to vector<12x1xf32>
    %746 = arith.divf %744, %745 : vector<12x1xf32>
    %747 = vector.broadcast %739 : vector<12x1xf32> to vector<12x32xf32>
    %748 = arith.subf %695, %747 : vector<12x32xf32>
    %cst_285 = arith.constant 9.99999974E-6 : f32
    %749 = vector.broadcast %cst_285 : f32 to vector<12x1xf32>
    %750 = arith.addf %746, %749 : vector<12x1xf32>
    %751 = math.rsqrt %750 : vector<12x1xf32>
    %752 = vector.broadcast %751 : vector<12x1xf32> to vector<12x32xf32>
    %753 = arith.mulf %748, %752 : vector<12x32xf32>
    %754 = vector.shape_cast %697 : vector<32xf32> to vector<1x32xf32>
    %755 = vector.broadcast %754 : vector<1x32xf32> to vector<12x32xf32>
    %756 = arith.mulf %753, %755 : vector<12x32xf32>
    %757 = vector.shape_cast %699 : vector<32xf32> to vector<1x32xf32>
    %758 = vector.broadcast %757 : vector<1x32xf32> to vector<12x32xf32>
    %759 = arith.addf %756, %758 : vector<12x32xf32>
    %cst_286 = arith.constant dense<0.000000e+00> : vector<12x96xf32>
    %760 = tpu.matmul %759, %723, %cst_286 {dimension_numbers = #tpu.dot_dimension_numbers<[1], [0], [0], [1], [0, 0, 1, 1], [], []>} : vector<12x32xf32>, vector<32x96xf32>, vector<12x96xf32> -> vector<12x96xf32>
    %761 = vector.shape_cast %709 : vector<96xf32> to vector<1x96xf32>
    %762 = vector.broadcast %761 : vector<1x96xf32> to vector<12x96xf32>
    %763 = arith.addf %760, %762 : vector<12x96xf32>
    %764 = vector.extract_strided_slice %763 {offsets = [0, 0], sizes = [12, 32], strides = [1, 1]} : vector<12x96xf32> to vector<12x32xf32>
    %765 = vector.extract_strided_slice %763 {offsets = [0, 32], sizes = [12, 32], strides = [1, 1]} : vector<12x96xf32> to vector<12x32xf32>
    %766 = vector.extract_strided_slice %763 {offsets = [0, 64], sizes = [12, 32], strides = [1, 1]} : vector<12x96xf32> to vector<12x32xf32>
    %cst_287 = arith.constant 0.353553385 : f32
    %767 = vector.broadcast %cst_287 : f32 to vector<12x32xf32>
    %768 = arith.mulf %764, %767 : vector<12x32xf32>
    %769 = vector.broadcast %7 : vector<1x32xf32> to vector<12x32xf32>
    %770 = arith.mulf %768, %769 : vector<12x32xf32>
    %cst_288 = arith.constant dense<0.000000e+00> : vector<12x12xf32>
    %771 = tpu.matmul %770, %765, %cst_288 {dimension_numbers = #tpu.dot_dimension_numbers<[1], [1], [0], [0], [0, 0, 1, 0], [], []>} : vector<12x32xf32>, vector<12x32xf32>, vector<12x12xf32> -> vector<12x12xf32>
    %772 = arith.addf %771, %400 : vector<12x12xf32>
    %cst_289 = arith.constant dense<0xFF800000> : vector<12xf32>
    %773 = vector.multi_reduction <maximumf>, %772, %cst_289 [1] : vector<12x12xf32> to vector<12xf32>
    %774 = vector.shape_cast %773 : vector<12xf32> to vector<12x1xf32>
    %775 = vector.broadcast %774 : vector<12x1xf32> to vector<12x12xf32>
    %776 = arith.subf %772, %775 : vector<12x12xf32>
    %777 = math.exp %776 : vector<12x12xf32>
    %cst_290 = arith.constant dense<0.000000e+00> : vector<12xf32>
    %778 = vector.multi_reduction <add>, %777, %cst_290 [1] : vector<12x12xf32> to vector<12xf32>
    %779 = vector.shape_cast %778 : vector<12xf32> to vector<12x1xf32>
    %780 = vector.broadcast %779 : vector<12x1xf32> to vector<12x12xf32>
    %781 = arith.divf %777, %780 : vector<12x12xf32>
    %782 = vector.broadcast %7 : vector<1x32xf32> to vector<12x32xf32>
    %783 = arith.mulf %766, %782 : vector<12x32xf32>
    %cst_291 = arith.constant dense<0.000000e+00> : vector<12x32xf32>
    %784 = tpu.matmul %781, %783, %cst_291 {dimension_numbers = #tpu.dot_dimension_numbers<[1], [0], [0], [1], [0, 0, 1, 1], [], []>} : vector<12x12xf32>, vector<12x32xf32>, vector<12x32xf32> -> vector<12x32xf32>
    %785 = vector.broadcast %14 : vector<1x32xf32> to vector<12x32xf32>
    %786 = arith.mulf %768, %785 : vector<12x32xf32>
    %cst_292 = arith.constant dense<0.000000e+00> : vector<12x12xf32>
    %787 = tpu.matmul %786, %765, %cst_292 {dimension_numbers = #tpu.dot_dimension_numbers<[1], [1], [0], [0], [0, 0, 1, 0], [], []>} : vector<12x32xf32>, vector<12x32xf32>, vector<12x12xf32> -> vector<12x12xf32>
    %788 = arith.addf %787, %400 : vector<12x12xf32>
    %cst_293 = arith.constant dense<0xFF800000> : vector<12xf32>
    %789 = vector.multi_reduction <maximumf>, %788, %cst_293 [1] : vector<12x12xf32> to vector<12xf32>
    %790 = vector.shape_cast %789 : vector<12xf32> to vector<12x1xf32>
    %791 = vector.broadcast %790 : vector<12x1xf32> to vector<12x12xf32>
    %792 = arith.subf %788, %791 : vector<12x12xf32>
    %793 = math.exp %792 : vector<12x12xf32>
    %cst_294 = arith.constant dense<0.000000e+00> : vector<12xf32>
    %794 = vector.multi_reduction <add>, %793, %cst_294 [1] : vector<12x12xf32> to vector<12xf32>
    %795 = vector.shape_cast %794 : vector<12xf32> to vector<12x1xf32>
    %796 = vector.broadcast %795 : vector<12x1xf32> to vector<12x12xf32>
    %797 = arith.divf %793, %796 : vector<12x12xf32>
    %798 = vector.broadcast %14 : vector<1x32xf32> to vector<12x32xf32>
    %799 = arith.mulf %766, %798 : vector<12x32xf32>
    %cst_295 = arith.constant dense<0.000000e+00> : vector<12x32xf32>
    %800 = tpu.matmul %797, %799, %cst_295 {dimension_numbers = #tpu.dot_dimension_numbers<[1], [0], [0], [1], [0, 0, 1, 1], [], []>} : vector<12x12xf32>, vector<12x32xf32>, vector<12x32xf32> -> vector<12x32xf32>
    %801 = arith.addf %784, %800 : vector<12x32xf32>
    %802 = vector.broadcast %21 : vector<1x32xf32> to vector<12x32xf32>
    %803 = arith.mulf %768, %802 : vector<12x32xf32>
    %cst_296 = arith.constant dense<0.000000e+00> : vector<12x12xf32>
    %804 = tpu.matmul %803, %765, %cst_296 {dimension_numbers = #tpu.dot_dimension_numbers<[1], [1], [0], [0], [0, 0, 1, 0], [], []>} : vector<12x32xf32>, vector<12x32xf32>, vector<12x12xf32> -> vector<12x12xf32>
    %805 = arith.addf %804, %400 : vector<12x12xf32>
    %cst_297 = arith.constant dense<0xFF800000> : vector<12xf32>
    %806 = vector.multi_reduction <maximumf>, %805, %cst_297 [1] : vector<12x12xf32> to vector<12xf32>
    %807 = vector.shape_cast %806 : vector<12xf32> to vector<12x1xf32>
    %808 = vector.broadcast %807 : vector<12x1xf32> to vector<12x12xf32>
    %809 = arith.subf %805, %808 : vector<12x12xf32>
    %810 = math.exp %809 : vector<12x12xf32>
    %cst_298 = arith.constant dense<0.000000e+00> : vector<12xf32>
    %811 = vector.multi_reduction <add>, %810, %cst_298 [1] : vector<12x12xf32> to vector<12xf32>
    %812 = vector.shape_cast %811 : vector<12xf32> to vector<12x1xf32>
    %813 = vector.broadcast %812 : vector<12x1xf32> to vector<12x12xf32>
    %814 = arith.divf %810, %813 : vector<12x12xf32>
    %815 = vector.broadcast %21 : vector<1x32xf32> to vector<12x32xf32>
    %816 = arith.mulf %766, %815 : vector<12x32xf32>
    %cst_299 = arith.constant dense<0.000000e+00> : vector<12x32xf32>
    %817 = tpu.matmul %814, %816, %cst_299 {dimension_numbers = #tpu.dot_dimension_numbers<[1], [0], [0], [1], [0, 0, 1, 1], [], []>} : vector<12x12xf32>, vector<12x32xf32>, vector<12x32xf32> -> vector<12x32xf32>
    %818 = arith.addf %801, %817 : vector<12x32xf32>
    %819 = vector.broadcast %28 : vector<1x32xf32> to vector<12x32xf32>
    %820 = arith.mulf %768, %819 : vector<12x32xf32>
    %cst_300 = arith.constant dense<0.000000e+00> : vector<12x12xf32>
    %821 = tpu.matmul %820, %765, %cst_300 {dimension_numbers = #tpu.dot_dimension_numbers<[1], [1], [0], [0], [0, 0, 1, 0], [], []>} : vector<12x32xf32>, vector<12x32xf32>, vector<12x12xf32> -> vector<12x12xf32>
    %822 = arith.addf %821, %400 : vector<12x12xf32>
    %cst_301 = arith.constant dense<0xFF800000> : vector<12xf32>
    %823 = vector.multi_reduction <maximumf>, %822, %cst_301 [1] : vector<12x12xf32> to vector<12xf32>
    %824 = vector.shape_cast %823 : vector<12xf32> to vector<12x1xf32>
    %825 = vector.broadcast %824 : vector<12x1xf32> to vector<12x12xf32>
    %826 = arith.subf %822, %825 : vector<12x12xf32>
    %827 = math.exp %826 : vector<12x12xf32>
    %cst_302 = arith.constant dense<0.000000e+00> : vector<12xf32>
    %828 = vector.multi_reduction <add>, %827, %cst_302 [1] : vector<12x12xf32> to vector<12xf32>
    %829 = vector.shape_cast %828 : vector<12xf32> to vector<12x1xf32>
    %830 = vector.broadcast %829 : vector<12x1xf32> to vector<12x12xf32>
    %831 = arith.divf %827, %830 : vector<12x12xf32>
    %832 = vector.broadcast %28 : vector<1x32xf32> to vector<12x32xf32>
    %833 = arith.mulf %766, %832 : vector<12x32xf32>
    %cst_303 = arith.constant dense<0.000000e+00> : vector<12x32xf32>
    %834 = tpu.matmul %831, %833, %cst_303 {dimension_numbers = #tpu.dot_dimension_numbers<[1], [0], [0], [1], [0, 0, 1, 1], [], []>} : vector<12x12xf32>, vector<12x32xf32>, vector<12x32xf32> -> vector<12x32xf32>
    %835 = arith.addf %818, %834 : vector<12x32xf32>
    %cst_304 = arith.constant dense<0.000000e+00> : vector<12x32xf32>
    %836 = tpu.matmul %835, %725, %cst_304 {dimension_numbers = #tpu.dot_dimension_numbers<[1], [0], [0], [1], [0, 0, 1, 1], [], []>} : vector<12x32xf32>, vector<32x32xf32>, vector<12x32xf32> -> vector<12x32xf32>
    %837 = vector.shape_cast %711 : vector<32xf32> to vector<1x32xf32>
    %838 = vector.broadcast %837 : vector<1x32xf32> to vector<12x32xf32>
    %839 = arith.addf %836, %838 : vector<12x32xf32>
    %840 = arith.addf %695, %839 : vector<12x32xf32>
    %cst_305 = arith.constant dense<0.000000e+00> : vector<12xf32>
    %841 = vector.multi_reduction <add>, %840, %cst_305 [1] : vector<12x32xf32> to vector<12xf32>
    %842 = vector.shape_cast %841 : vector<12xf32> to vector<12x1xf32>
    %cst_306 = arith.constant 3.200000e+01 : f32
    %843 = vector.broadcast %cst_306 : f32 to vector<12x1xf32>
    %844 = arith.divf %842, %843 : vector<12x1xf32>
    %845 = vector.broadcast %844 : vector<12x1xf32> to vector<12x32xf32>
    %846 = arith.subf %840, %845 : vector<12x32xf32>
    %847 = arith.mulf %846, %846 : vector<12x32xf32>
    %cst_307 = arith.constant dense<0.000000e+00> : vector<12xf32>
    %848 = vector.multi_reduction <add>, %847, %cst_307 [1] : vector<12x32xf32> to vector<12xf32>
    %849 = vector.shape_cast %848 : vector<12xf32> to vector<12x1xf32>
    %cst_308 = arith.constant 3.200000e+01 : f32
    %850 = vector.broadcast %cst_308 : f32 to vector<12x1xf32>
    %851 = arith.divf %849, %850 : vector<12x1xf32>
    %852 = vector.broadcast %844 : vector<12x1xf32> to vector<12x32xf32>
    %853 = arith.subf %840, %852 : vector<12x32xf32>
    %cst_309 = arith.constant 9.99999974E-6 : f32
    %854 = vector.broadcast %cst_309 : f32 to vector<12x1xf32>
    %855 = arith.addf %851, %854 : vector<12x1xf32>
    %856 = math.rsqrt %855 : vector<12x1xf32>
    %857 = vector.broadcast %856 : vector<12x1xf32> to vector<12x32xf32>
    %858 = arith.mulf %853, %857 : vector<12x32xf32>
    %859 = vector.shape_cast %701 : vector<32xf32> to vector<1x32xf32>
    %860 = vector.broadcast %859 : vector<1x32xf32> to vector<12x32xf32>
    %861 = arith.mulf %858, %860 : vector<12x32xf32>
    %862 = vector.shape_cast %703 : vector<32xf32> to vector<1x32xf32>
    %863 = vector.broadcast %862 : vector<1x32xf32> to vector<12x32xf32>
    %864 = arith.addf %861, %863 : vector<12x32xf32>
    %cst_310 = arith.constant dense<0.000000e+00> : vector<12x32xf32>
    %865 = tpu.matmul %864, %727, %cst_310 {dimension_numbers = #tpu.dot_dimension_numbers<[1], [0], [0], [1], [0, 0, 1, 1], [], []>} : vector<12x32xf32>, vector<32x32xf32>, vector<12x32xf32> -> vector<12x32xf32>
    %866 = vector.shape_cast %713 : vector<32xf32> to vector<1x32xf32>
    %867 = vector.broadcast %866 : vector<1x32xf32> to vector<12x32xf32>
    %868 = arith.addf %865, %867 : vector<12x32xf32>
    %cst_311 = arith.constant dense<0.000000e+00> : vector<32x64xf32>
    %869 = tpu.matmul %394, %729, %cst_311 {dimension_numbers = #tpu.dot_dimension_numbers<[1], [0], [0], [1], [0, 0, 1, 1], [], []>} : vector<32x32xf32>, vector<32x64xf32>, vector<32x64xf32> -> vector<32x64xf32>
    %870 = vector.shape_cast %715 : vector<64xf32> to vector<1x64xf32>
    %871 = vector.broadcast %870 : vector<1x64xf32> to vector<32x64xf32>
    %872 = arith.addf %869, %871 : vector<32x64xf32>
    %873 = vector.extract_strided_slice %872 {offsets = [0, 0], sizes = [32, 32], strides = [1, 1]} : vector<32x64xf32> to vector<32x32xf32>
    %874 = vector.extract_strided_slice %872 {offsets = [0, 32], sizes = [32, 32], strides = [1, 1]} : vector<32x64xf32> to vector<32x32xf32>
    %cst_312 = arith.constant 0.353553385 : f32
    %875 = vector.broadcast %cst_312 : f32 to vector<12x32xf32>
    %876 = arith.mulf %868, %875 : vector<12x32xf32>
    %877 = vector.broadcast %7 : vector<1x32xf32> to vector<12x32xf32>
    %878 = arith.mulf %876, %877 : vector<12x32xf32>
    %cst_313 = arith.constant dense<0.000000e+00> : vector<12x32xf32>
    %879 = tpu.matmul %878, %873, %cst_313 {dimension_numbers = #tpu.dot_dimension_numbers<[1], [1], [0], [0], [0, 0, 1, 0], [], []>} : vector<12x32xf32>, vector<32x32xf32>, vector<12x32xf32> -> vector<12x32xf32>
    %cst_314 = arith.constant dense<0xFF800000> : vector<12xf32>
    %880 = vector.multi_reduction <maximumf>, %879, %cst_314 [1] : vector<12x32xf32> to vector<12xf32>
    %881 = vector.shape_cast %880 : vector<12xf32> to vector<12x1xf32>
    %882 = vector.broadcast %881 : vector<12x1xf32> to vector<12x32xf32>
    %883 = arith.subf %879, %882 : vector<12x32xf32>
    %884 = math.exp %883 : vector<12x32xf32>
    %cst_315 = arith.constant dense<0.000000e+00> : vector<12xf32>
    %885 = vector.multi_reduction <add>, %884, %cst_315 [1] : vector<12x32xf32> to vector<12xf32>
    %886 = vector.shape_cast %885 : vector<12xf32> to vector<12x1xf32>
    %887 = vector.broadcast %886 : vector<12x1xf32> to vector<12x32xf32>
    %888 = arith.divf %884, %887 : vector<12x32xf32>
    %889 = vector.broadcast %7 : vector<1x32xf32> to vector<32x32xf32>
    %890 = arith.mulf %874, %889 : vector<32x32xf32>
    %cst_316 = arith.constant dense<0.000000e+00> : vector<12x32xf32>
    %891 = tpu.matmul %888, %890, %cst_316 {dimension_numbers = #tpu.dot_dimension_numbers<[1], [0], [0], [1], [0, 0, 1, 1], [], []>} : vector<12x32xf32>, vector<32x32xf32>, vector<12x32xf32> -> vector<12x32xf32>
    %892 = vector.broadcast %14 : vector<1x32xf32> to vector<12x32xf32>
    %893 = arith.mulf %876, %892 : vector<12x32xf32>
    %cst_317 = arith.constant dense<0.000000e+00> : vector<12x32xf32>
    %894 = tpu.matmul %893, %873, %cst_317 {dimension_numbers = #tpu.dot_dimension_numbers<[1], [1], [0], [0], [0, 0, 1, 0], [], []>} : vector<12x32xf32>, vector<32x32xf32>, vector<12x32xf32> -> vector<12x32xf32>
    %cst_318 = arith.constant dense<0xFF800000> : vector<12xf32>
    %895 = vector.multi_reduction <maximumf>, %894, %cst_318 [1] : vector<12x32xf32> to vector<12xf32>
    %896 = vector.shape_cast %895 : vector<12xf32> to vector<12x1xf32>
    %897 = vector.broadcast %896 : vector<12x1xf32> to vector<12x32xf32>
    %898 = arith.subf %894, %897 : vector<12x32xf32>
    %899 = math.exp %898 : vector<12x32xf32>
    %cst_319 = arith.constant dense<0.000000e+00> : vector<12xf32>
    %900 = vector.multi_reduction <add>, %899, %cst_319 [1] : vector<12x32xf32> to vector<12xf32>
    %901 = vector.shape_cast %900 : vector<12xf32> to vector<12x1xf32>
    %902 = vector.broadcast %901 : vector<12x1xf32> to vector<12x32xf32>
    %903 = arith.divf %899, %902 : vector<12x32xf32>
    %904 = vector.broadcast %14 : vector<1x32xf32> to vector<32x32xf32>
    %905 = arith.mulf %874, %904 : vector<32x32xf32>
    %cst_320 = arith.constant dense<0.000000e+00> : vector<12x32xf32>
    %906 = tpu.matmul %903, %905, %cst_320 {dimension_numbers = #tpu.dot_dimension_numbers<[1], [0], [0], [1], [0, 0, 1, 1], [], []>} : vector<12x32xf32>, vector<32x32xf32>, vector<12x32xf32> -> vector<12x32xf32>
    %907 = arith.addf %891, %906 : vector<12x32xf32>
    %908 = vector.broadcast %21 : vector<1x32xf32> to vector<12x32xf32>
    %909 = arith.mulf %876, %908 : vector<12x32xf32>
    %cst_321 = arith.constant dense<0.000000e+00> : vector<12x32xf32>
    %910 = tpu.matmul %909, %873, %cst_321 {dimension_numbers = #tpu.dot_dimension_numbers<[1], [1], [0], [0], [0, 0, 1, 0], [], []>} : vector<12x32xf32>, vector<32x32xf32>, vector<12x32xf32> -> vector<12x32xf32>
    %cst_322 = arith.constant dense<0xFF800000> : vector<12xf32>
    %911 = vector.multi_reduction <maximumf>, %910, %cst_322 [1] : vector<12x32xf32> to vector<12xf32>
    %912 = vector.shape_cast %911 : vector<12xf32> to vector<12x1xf32>
    %913 = vector.broadcast %912 : vector<12x1xf32> to vector<12x32xf32>
    %914 = arith.subf %910, %913 : vector<12x32xf32>
    %915 = math.exp %914 : vector<12x32xf32>
    %cst_323 = arith.constant dense<0.000000e+00> : vector<12xf32>
    %916 = vector.multi_reduction <add>, %915, %cst_323 [1] : vector<12x32xf32> to vector<12xf32>
    %917 = vector.shape_cast %916 : vector<12xf32> to vector<12x1xf32>
    %918 = vector.broadcast %917 : vector<12x1xf32> to vector<12x32xf32>
    %919 = arith.divf %915, %918 : vector<12x32xf32>
    %920 = vector.broadcast %21 : vector<1x32xf32> to vector<32x32xf32>
    %921 = arith.mulf %874, %920 : vector<32x32xf32>
    %cst_324 = arith.constant dense<0.000000e+00> : vector<12x32xf32>
    %922 = tpu.matmul %919, %921, %cst_324 {dimension_numbers = #tpu.dot_dimension_numbers<[1], [0], [0], [1], [0, 0, 1, 1], [], []>} : vector<12x32xf32>, vector<32x32xf32>, vector<12x32xf32> -> vector<12x32xf32>
    %923 = arith.addf %907, %922 : vector<12x32xf32>
    %924 = vector.broadcast %28 : vector<1x32xf32> to vector<12x32xf32>
    %925 = arith.mulf %876, %924 : vector<12x32xf32>
    %cst_325 = arith.constant dense<0.000000e+00> : vector<12x32xf32>
    %926 = tpu.matmul %925, %873, %cst_325 {dimension_numbers = #tpu.dot_dimension_numbers<[1], [1], [0], [0], [0, 0, 1, 0], [], []>} : vector<12x32xf32>, vector<32x32xf32>, vector<12x32xf32> -> vector<12x32xf32>
    %cst_326 = arith.constant dense<0xFF800000> : vector<12xf32>
    %927 = vector.multi_reduction <maximumf>, %926, %cst_326 [1] : vector<12x32xf32> to vector<12xf32>
    %928 = vector.shape_cast %927 : vector<12xf32> to vector<12x1xf32>
    %929 = vector.broadcast %928 : vector<12x1xf32> to vector<12x32xf32>
    %930 = arith.subf %926, %929 : vector<12x32xf32>
    %931 = math.exp %930 : vector<12x32xf32>
    %cst_327 = arith.constant dense<0.000000e+00> : vector<12xf32>
    %932 = vector.multi_reduction <add>, %931, %cst_327 [1] : vector<12x32xf32> to vector<12xf32>
    %933 = vector.shape_cast %932 : vector<12xf32> to vector<12x1xf32>
    %934 = vector.broadcast %933 : vector<12x1xf32> to vector<12x32xf32>
    %935 = arith.divf %931, %934 : vector<12x32xf32>
    %936 = vector.broadcast %28 : vector<1x32xf32> to vector<32x32xf32>
    %937 = arith.mulf %874, %936 : vector<32x32xf32>
    %cst_328 = arith.constant dense<0.000000e+00> : vector<12x32xf32>
    %938 = tpu.matmul %935, %937, %cst_328 {dimension_numbers = #tpu.dot_dimension_numbers<[1], [0], [0], [1], [0, 0, 1, 1], [], []>} : vector<12x32xf32>, vector<32x32xf32>, vector<12x32xf32> -> vector<12x32xf32>
    %939 = arith.addf %923, %938 : vector<12x32xf32>
    %cst_329 = arith.constant dense<0.000000e+00> : vector<12x32xf32>
    %940 = tpu.matmul %939, %731, %cst_329 {dimension_numbers = #tpu.dot_dimension_numbers<[1], [0], [0], [1], [0, 0, 1, 1], [], []>} : vector<12x32xf32>, vector<32x32xf32>, vector<12x32xf32> -> vector<12x32xf32>
    %941 = vector.shape_cast %717 : vector<32xf32> to vector<1x32xf32>
    %942 = vector.broadcast %941 : vector<1x32xf32> to vector<12x32xf32>
    %943 = arith.addf %940, %942 : vector<12x32xf32>
    %944 = arith.addf %840, %943 : vector<12x32xf32>
    %cst_330 = arith.constant dense<0.000000e+00> : vector<12xf32>
    %945 = vector.multi_reduction <add>, %944, %cst_330 [1] : vector<12x32xf32> to vector<12xf32>
    %946 = vector.shape_cast %945 : vector<12xf32> to vector<12x1xf32>
    %cst_331 = arith.constant 3.200000e+01 : f32
    %947 = vector.broadcast %cst_331 : f32 to vector<12x1xf32>
    %948 = arith.divf %946, %947 : vector<12x1xf32>
    %949 = vector.broadcast %948 : vector<12x1xf32> to vector<12x32xf32>
    %950 = arith.subf %944, %949 : vector<12x32xf32>
    %951 = arith.mulf %950, %950 : vector<12x32xf32>
    %cst_332 = arith.constant dense<0.000000e+00> : vector<12xf32>
    %952 = vector.multi_reduction <add>, %951, %cst_332 [1] : vector<12x32xf32> to vector<12xf32>
    %953 = vector.shape_cast %952 : vector<12xf32> to vector<12x1xf32>
    %cst_333 = arith.constant 3.200000e+01 : f32
    %954 = vector.broadcast %cst_333 : f32 to vector<12x1xf32>
    %955 = arith.divf %953, %954 : vector<12x1xf32>
    %956 = vector.broadcast %948 : vector<12x1xf32> to vector<12x32xf32>
    %957 = arith.subf %944, %956 : vector<12x32xf32>
    %cst_334 = arith.constant 9.99999974E-6 : f32
    %958 = vector.broadcast %cst_334 : f32 to vector<12x1xf32>
    %959 = arith.addf %955, %958 : vector<12x1xf32>
    %960 = math.rsqrt %959 : vector<12x1xf32>
    %961 = vector.broadcast %960 : vector<12x1xf32> to vector<12x32xf32>
    %962 = arith.mulf %957, %961 : vector<12x32xf32>
    %963 = vector.shape_cast %705 : vector<32xf32> to vector<1x32xf32>
    %964 = vector.broadcast %963 : vector<1x32xf32> to vector<12x32xf32>
    %965 = arith.mulf %962, %964 : vector<12x32xf32>
    %966 = vector.shape_cast %707 : vector<32xf32> to vector<1x32xf32>
    %967 = vector.broadcast %966 : vector<1x32xf32> to vector<12x32xf32>
    %968 = arith.addf %965, %967 : vector<12x32xf32>
    %cst_335 = arith.constant dense<0.000000e+00> : vector<12x128xf32>
    %969 = tpu.matmul %968, %733, %cst_335 {dimension_numbers = #tpu.dot_dimension_numbers<[1], [0], [0], [1], [0, 0, 1, 1], [], []>} : vector<12x32xf32>, vector<32x128xf32>, vector<12x128xf32> -> vector<12x128xf32>
    %970 = vector.shape_cast %719 : vector<128xf32> to vector<1x128xf32>
    %971 = vector.broadcast %970 : vector<1x128xf32> to vector<12x128xf32>
    %972 = arith.addf %969, %971 : vector<12x128xf32>
    %cst_336 = arith.constant 5.000000e-01 : f32
    %973 = vector.broadcast %cst_336 : f32 to vector<12x128xf32>
    %974 = arith.mulf %973, %972 : vector<12x128xf32>
    %cst_337 = arith.constant 4.471500e-02 : f32
    %975 = vector.broadcast %cst_337 : f32 to vector<12x128xf32>
    %976 = arith.mulf %975, %972 : vector<12x128xf32>
    %977 = arith.mulf %976, %972 : vector<12x128xf32>
    %978 = arith.mulf %977, %972 : vector<12x128xf32>
    %979 = arith.addf %972, %978 : vector<12x128xf32>
    %cst_338 = arith.constant 0.797884583 : f32
    %980 = vector.broadcast %cst_338 : f32 to vector<12x128xf32>
    %981 = arith.mulf %980, %979 : vector<12x128xf32>
    %982 = math.tanh %981 : vector<12x128xf32>
    %cst_339 = arith.constant 1.000000e+00 : f32
    %983 = vector.broadcast %cst_339 : f32 to vector<12x128xf32>
    %984 = arith.addf %983, %982 : vector<12x128xf32>
    %985 = arith.mulf %974, %984 : vector<12x128xf32>
    %cst_340 = arith.constant dense<0.000000e+00> : vector<12x32xf32>
    %986 = tpu.matmul %985, %735, %cst_340 {dimension_numbers = #tpu.dot_dimension_numbers<[1], [0], [0], [1], [0, 0, 1, 1], [], []>} : vector<12x128xf32>, vector<128x32xf32>, vector<12x32xf32> -> vector<12x32xf32>
    %987 = vector.shape_cast %721 : vector<32xf32> to vector<1x32xf32>
    %988 = vector.broadcast %987 : vector<1x32xf32> to vector<12x32xf32>
    %989 = arith.addf %986, %988 : vector<12x32xf32>
    %990 = arith.addf %944, %989 : vector<12x32xf32>
    %c0_341 = arith.constant 0 : index
    %c0_342 = arith.constant 0 : index
    %991 = vector.load %arg11[%c0_341, %c0_342] : memref<35x16xf32, #tpu.memory_space<vmem>>, vector<32x16xf32>
    %c32_343 = arith.constant 32 : index
    %c0_344 = arith.constant 0 : index
    %992 = vector.load %arg11[%c32_343, %c0_344] : memref<35x16xf32, #tpu.memory_space<vmem>>, vector<1x16xf32>
    %993 = vector.shape_cast %992 : vector<1x16xf32> to vector<16xf32>
    %c33_345 = arith.constant 33 : index
    %c0_346 = arith.constant 0 : index
    %994 = vector.load %arg11[%c33_345, %c0_346] : memref<35x16xf32, #tpu.memory_space<vmem>>, vector<1x16xf32>
    %c34 = arith.constant 34 : index
    %c0_347 = arith.constant 0 : index
    %995 = vector.load %arg11[%c34, %c0_347] : memref<35x16xf32, #tpu.memory_space<vmem>>, vector<1x1xf32>
    %cst_348 = arith.constant dense<0.000000e+00> : vector<12x16xf32>
    %996 = tpu.matmul %990, %991, %cst_348 {dimension_numbers = #tpu.dot_dimension_numbers<[1], [0], [0], [1], [0, 0, 1, 1], [], []>} : vector<12x32xf32>, vector<32x16xf32>, vector<12x16xf32> -> vector<12x16xf32>
    %997 = vector.shape_cast %993 : vector<16xf32> to vector<1x16xf32>
    %998 = vector.broadcast %997 : vector<1x16xf32> to vector<12x16xf32>
    %999 = arith.addf %996, %998 : vector<12x16xf32>
    %cst_349 = arith.constant 5.000000e-01 : f32
    %1000 = vector.broadcast %cst_349 : f32 to vector<12x16xf32>
    %1001 = arith.mulf %1000, %999 : vector<12x16xf32>
    %cst_350 = arith.constant 4.471500e-02 : f32
    %1002 = vector.broadcast %cst_350 : f32 to vector<12x16xf32>
    %1003 = arith.mulf %1002, %999 : vector<12x16xf32>
    %1004 = arith.mulf %1003, %999 : vector<12x16xf32>
    %1005 = arith.mulf %1004, %999 : vector<12x16xf32>
    %1006 = arith.addf %999, %1005 : vector<12x16xf32>
    %cst_351 = arith.constant 0.797884583 : f32
    %1007 = vector.broadcast %cst_351 : f32 to vector<12x16xf32>
    %1008 = arith.mulf %1007, %1006 : vector<12x16xf32>
    %1009 = math.tanh %1008 : vector<12x16xf32>
    %cst_352 = arith.constant 1.000000e+00 : f32
    %1010 = vector.broadcast %cst_352 : f32 to vector<12x16xf32>
    %1011 = arith.addf %1010, %1009 : vector<12x16xf32>
    %1012 = arith.mulf %1001, %1011 : vector<12x16xf32>
    %cst_353 = arith.constant dense<0.000000e+00> : vector<1x12xf32>
    %1013 = tpu.matmul %994, %1012, %cst_353 {dimension_numbers = #tpu.dot_dimension_numbers<[1], [1], [0], [0], [0, 0, 1, 0], [], []>} : vector<1x16xf32>, vector<12x16xf32>, vector<1x12xf32> -> vector<1x12xf32>
    %1014 = vector.broadcast %995 : vector<1x1xf32> to vector<1x12xf32>
    %1015 = arith.addf %1013, %1014 : vector<1x12xf32>
    %1016 = vector.shape_cast %1015 : vector<1x12xf32> to vector<1x1x12xf32>
    %c0_354 = arith.constant 0 : index
    %c0_355 = arith.constant 0 : index
    %c0_356 = arith.constant 0 : index
    %1017 = vector.load %arg12[%c0_354, %c0_355, %c0_356] : memref<1x1x12xf32, #tpu.memory_space<vmem>>, vector<1x1x12xf32>
    tpu.vector_store %arg12[%c0_354, %c0_355, %c0_356], %1016 {strides = array<i32>} : memref<1x1x12xf32, #tpu.memory_space<vmem>>, vector<1x1x12xf32>,
    return
  }
  func.func @transform_0(%arg0: i32) -> (i32, i32, i32) {
    %c0_i32 = arith.constant 0 : i32
    %c0_i32_0 = arith.constant 0 : i32
    %c0_i32_1 = arith.constant 0 : i32
    return %arg0, %c0_i32, %c0_i32_0 : i32, i32, i32
  }
  func.func @transform_1(%arg0: i32) -> (i32, i32, i32) {
    %c0_i32 = arith.constant 0 : i32
    %c0_i32_0 = arith.constant 0 : i32
    %c0_i32_1 = arith.constant 0 : i32
    return %arg0, %c0_i32, %c0_i32_0 : i32, i32, i32
  }
  func.func @transform_2(%arg0: i32) -> (i32, i32, i32) {
    %c0_i32 = arith.constant 0 : i32
    %c0_i32_0 = arith.constant 0 : i32
    %c0_i32_1 = arith.constant 0 : i32
    return %arg0, %c0_i32, %c0_i32_0 : i32, i32, i32
  }
  func.func @transform_3(%arg0: i32) -> (i32, i32) {
    %c0_i32 = arith.constant 0 : i32
    %c0_i32_0 = arith.constant 0 : i32
    %c0_i32_1 = arith.constant 0 : i32
    return %c0_i32, %c0_i32_0 : i32, i32
  }
  func.func @transform_4(%arg0: i32) -> (i32, i32, i32) {
    %c0_i32 = arith.constant 0 : i32
    %c0_i32_0 = arith.constant 0 : i32
    %c0_i32_1 = arith.constant 0 : i32
    %c0_i32_2 = arith.constant 0 : i32
    return %c0_i32, %c0_i32_0, %c0_i32_1 : i32, i32, i32
  }
  func.func @transform_5(%arg0: i32) -> (i32, i32, i32) {
    %c0_i32 = arith.constant 0 : i32
    %c0_i32_0 = arith.constant 0 : i32
    %c0_i32_1 = arith.constant 0 : i32
    %c0_i32_2 = arith.constant 0 : i32
    return %c0_i32, %c0_i32_0, %c0_i32_1 : i32, i32, i32
  }
  func.func @transform_6(%arg0: i32) -> (i32, i32) {
    %c0_i32 = arith.constant 0 : i32
    %c0_i32_0 = arith.constant 0 : i32
    %c0_i32_1 = arith.constant 0 : i32
    return %c0_i32, %c0_i32_0 : i32, i32
  }
  func.func @transform_7(%arg0: i32) -> (i32, i32, i32) {
    %c0_i32 = arith.constant 0 : i32
    %c0_i32_0 = arith.constant 0 : i32
    %c0_i32_1 = arith.constant 0 : i32
    %c0_i32_2 = arith.constant 0 : i32
    return %c0_i32, %c0_i32_0, %c0_i32_1 : i32, i32, i32
  }
  func.func @transform_8(%arg0: i32) -> (i32, i32, i32) {
    %c0_i32 = arith.constant 0 : i32
    %c0_i32_0 = arith.constant 0 : i32
    %c0_i32_1 = arith.constant 0 : i32
    %c0_i32_2 = arith.constant 0 : i32
    return %c0_i32, %c0_i32_0, %c0_i32_1 : i32, i32, i32
  }
  func.func @transform_9(%arg0: i32) -> (i32, i32) {
    %c0_i32 = arith.constant 0 : i32
    %c0_i32_0 = arith.constant 0 : i32
    %c0_i32_1 = arith.constant 0 : i32
    return %c0_i32, %c0_i32_0 : i32, i32
  }
  func.func @transform_10(%arg0: i32) -> (i32, i32) {
    %c0_i32 = arith.constant 0 : i32
    %c0_i32_0 = arith.constant 0 : i32
    %c0_i32_1 = arith.constant 0 : i32
    return %c0_i32, %c0_i32_0 : i32, i32
  }
  func.func @transform_11(%arg0: i32) -> (i32, i32, i32) {
    %c0_i32 = arith.constant 0 : i32
    %c0_i32_0 = arith.constant 0 : i32
    %c0_i32_1 = arith.constant 0 : i32
    return %arg0, %c0_i32, %c0_i32_0 : i32, i32, i32
  }
}

</mosaic_0001>

<bundles_post_ra>
// kernel: _lambda_.1
= control target key start
LH: loop header
LB: loop body
LE: loop exit
PB: predicated region body
PF: predicated region fallthrough
CT: control target
= control target key end

     0   :  { %s12568_s17 = smov 0   ;;  %s14938_s0 = inlined_call_operand.vmem [shape: f32[2,32,1], index: 0, kind: input, shape index: {}]   ;;  %s14939_s1 = inlined_call_operand.vmem [shape: f32[2,12,1], index: 1, kind: input, shape index: {}]   ;;  %s14940_s2 = inlined_call_operand.vmem [shape: f32[2,1,32], index: 2, kind: input, shape index: {}]   ;;  %s14941_s3 = inlined_call_operand.vmem [shape: f32[45,32], index: 3, kind: input, shape index: {}]   ;;  %s14942_s4 = inlined_call_operand.vmem [shape: f32[2,32,256], index: 4, kind: input, shape index: {}]   ;;  %s14943_s5 = inlined_call_operand.vmem [shape: f32[2,128,32], index: 5, kind: input, shape index: {}]   ;;  %s14944_s6 = inlined_call_operand.vmem [shape: f32[2,416], index: 6, kind: input, shape index: {}]   ;;  %s14945_s7 = inlined_call_operand.vmem [shape: f32[2,32,384], index: 7, kind: input, shape index: {}]   ;;  %s14946_s8 = inlined_call_operand.vmem [shape: f32[2,128,32], index: 8, kind: input, shape index: {}]   ;;  %s14947_s9 = inlined_call_operand.vmem [shape: f32[2,608], index: 9, kind: input, shape index: {}]   ;;  %s14948_s10 = inlined_call_operand.vmem [shape: f32[35,16], index: 10, kind: input, shape index: {}]   ;;  %s14949_s11 = inlined_call_operand.vmem [shape: f32[2,1,12], index: 11, kind: output, shape index: {}]  }
   0x1 LB: > { %s9292_s18 = sadd.s32 4294967295, %s12497_s17   ;;  %p9296_p0 = scmp.ge.s32.totalorder %s12497_s17, 1  ;;  %s12497_s17 = sphi %s12568_s17, %s21_s17  }
   0x2   : > { %p355_p1 = scmp.lt.s32.totalorder %s12497_s17, 3 }
   0x4   : > { %p356_p2 = pnand %p9296_p0, %p355_p1 }
   0x5   : > { %p401_p3 = scmp.lt.s32.totalorder (!%p356_p2), %s9292_s18, 1  ;;  %v12499_v0 = vmov (!%p356_p2), 0   ;;  %v9305_v5 = vld [vmem:[%s14941_s3] ss:$0 sm:$0xff] (!%p356_p2)  ;;  %v440_v6 = vld [vmem:[%s14941_s3 + $0x1] sm:$0xff] (!%p356_p2)  ;;  %v442_v8 = vld [vmem:[%s14941_s3 + $0x11] sm:$0xff] (!%p356_p2) }
   0x6   : > { %359 = sbr.rel (%p356_p2) target bundleno = 14351 (0x380f), region = 64  ;;  %11815 = vset.pattern.permute.xlu0 (!%p356_p2), %v12499_v0  ;;  %11816 = vset.pattern.permute.xlu1 (!%p356_p2), %v12499_v0  ;;  %v441_v15 = vld [vmem:[%s14941_s3 + $0x9] sm:$0xff] (!%p356_p2)  ;;  %v443_v17 = vld [vmem:[%s14941_s3 + $0x19] sm:$0xff] (!%p356_p2)  ;;  %vm539_vm0 = vcmask (!%p356_p2), 261120   ;;  %s12500_s21 = smov (!%p356_p2), 96   ;;  %vm3965_vm12 = vcmask (!%p356_p2), 257024  }
   0x7   : > { %v9307_v51 = vld [vmem:[%s14944_s6] ss:$0 sm:$0xff] (!%p356_p2)  ;;  %v12640_v53 = vld [vmem:[%s14942_s4 + $0x10] sm:$0xff] (!%p356_p2)  ;;  %s12502_s14 = smov (!%p356_p2), 64   ;;  %vm12730_vm11 = vmpackc.low (!%p356_p2), %vm539_vm0, %vm539_vm0  ;;  %s12503_s15 = smov (!%p356_p2), 32   ;;  %vm4026_vm13 = vcmask (!%p356_p2), 523264  }
   0x8   : > { %v12635_v52 = vld [vmem:[%s14942_s4] sm:$0xff] (!%p356_p2)  ;;  %v12654_v57 = vld [vmem:[%s14942_s4 + $0x30] sm:$0xff] (!%p356_p2) }
   0x9   : > { %v12645_v54 = vld [vmem:[%s14942_s4 + $0x20] sm:$0xff] (!%p356_p2)  ;;  %v11877_v55 = vpack.i.bf16 (!%p356_p2), %v12640_v53, %v12635_v52  ;;  %v11050_v56 = vpack.c.bf16 (!%p356_p2), %v12640_v53, %v12635_v52 }
   0xa   : > { %v11054_v58 = vpack.c.bf16 (!%p356_p2), %v12654_v57, %v12645_v54 }
   0xb   : > { %11051 = vmatprep.subr.bf16.mxu1 (!%p356_p2), %v11050_v56 }
   0xc   : > { %11053 = vmatpush3.bf16.msra.mxu1 (!%p356_p2), %v11050_v56 }
   0xd   : > { %s14972_s18 = smov (!%p401_p3, %s9292_s18), 1  ;;  %11055 = vmatprep.subr.bf16.mxu1 %v11054_v58 }
   0xe   : > { %s9653_s19 = sshll.u32 %s14972_s18, 5  ;;  %s12589_s27 = scalar_lea.vmem %s14940_s2, %s14972_s18 }
   0xf   : > { %s405_s22 = scalar_lea.vmem %s14938_s0, %s9653_s19  ;;  %v9306_v12 = vld [vmem:[%s12589_s27] ss:$0 sm:$0xff]  ;;  %s9654_s25 = sshll.u32 %s14972_s18, 4 }
  0x10   : > { %v447_v1 = vld [vmem:[%s405_s22] sm:$0xff]  ;;  %v449_v2 = vld [vmem:[%s405_s22 + $0x10] sm:$0xff]  ;;  %v448_v3 = vld [vmem:[%s405_s22 + $0x8] sm:$0xff]  ;;  %11057 = vmatpush3.bf16.msra.mxu1 %v11054_v58  ;;  %s410_s29 = scalar_lea.vmem %s14939_s1, %s9654_s25 }
  0x11   : > { %453 = vperm.xlu0 %11815, %v447_v1   ;;  %463 = vperm.xlu1 %11816, %v449_v2   ;;  %v450_v4 = vld [vmem:[%s405_s22 + $0x18] sm:$0xff]  ;;  %s416_s22 = scalar_lea.vmem %s14949_s11, %s14972_s18 }
  0x15   : > { %458 = vperm.xlu0 %11815, %v448_v3   ;;  %468 = vperm.xlu1 %11816, %v450_v4  }
  0x90   : > { %v454_v7 = vpop.permute.xlu0 %453  ;;  %v464_v9 = vpop.permute.xlu1 %463 }
  0x91   : > { %v475_v10 = vmul.f32 %v9305_v5, %v454_v7  ;;  %v477_v11 = vmul.f32 %v9305_v5, %v464_v9 }
  0x93   : > { %v479_v13 = vadd.f32 %v475_v10, %v440_v6  ;;  %v481_v14 = vadd.f32 %v477_v11, %v442_v8 }
  0x94   : > { %v459_v16 = vpop.permute.xlu0 %458  ;;  %v469_v18 = vpop.permute.xlu1 %468 }
  0x95   : > { %v476_v19 = vmul.f32 %v9305_v5, %v459_v16  ;;  %v478_v20 = vmul.f32 %v9305_v5, %v469_v18  ;;  %v12604_v21 = vadd.f32 %v9306_v12, %v479_v13  ;;  %v12606_v22 = vadd.f32 %v9306_v12, %v481_v14 }
  0x97   : > { %v480_v23 = vadd.f32 %v476_v19, %v441_v15  ;;  %v482_v24 = vadd.f32 %v478_v20, %v443_v17  ;;  %v540_v25 = vsel %vm539_vm0, %v12604_v21, 0.0  ;;  %v546_v26 = vsel %vm539_vm0, %v12606_v22, 0.0 }
  0x98   : > { %541 = vadd.xlane.f32.xlu0 %v540_v25 }
  0x99   : > { %v12612_v27 = vadd.f32 %v9306_v12, %v480_v23  ;;  %v12614_v28 = vadd.f32 %v9306_v12, %v482_v24 }
  0x9b   : > { %v543_v29 = vsel %vm539_vm0, %v12612_v27, 0.0  ;;  %v549_v30 = vsel %vm539_vm0, %v12614_v28, 0.0 }
  0x9c   : > { %547 = vadd.xlane.f32.xlu0 %v546_v26  ;;  %544 = vadd.xlane.f32.xlu1 %v543_v29  ;;  %v14951_v26 = vlaneseq }
  0x9e   : > { %v12663_v29 = vand.u32 127, %v14951_v26 }
  0xa0   : > { %550 = vadd.xlane.f32.xlu0 %v549_v30  ;;  %vm424_vm1 = vcmp.ge.s32.totalorder %v12663_v29, 8  ;;  %vm425_vm2 = vcmp.lt.s32.totalorder %v12663_v29, 16  ;;  %v12670_v30 = vld [vmem:[%s14944_s6 + $0x2] ss:$0 sm:$0xff]  ;;  %vm420_vm3 = vcmp.lt.s32.totalorder %v12663_v29, 8  ;;  %vm429_vm5 = vcmp.ge.s32.totalorder %v12663_v29, 16 }
  0xa1   : > { %vm426_vm4 = vmand %vm424_vm1, %vm425_vm2  ;;  %vm430_vm6 = vcmp.lt.s32.totalorder %v12663_v29, 24  ;;  %vm434_vm7 = vcmp.ge.s32.totalorder %v12663_v29, 24  ;;  %vm435_vm8 = vcmp.lt.s32.totalorder %v12663_v29, 32  ;;  %vm4209_vm1 = vcmask 93184  }
  0xa2   : > { %vm431_vm9 = vmand %vm429_vm5, %vm430_vm6  ;;  %vm4205_vm2 = vcmask 97280   ;;  %vm12507_vm6 = vmmov 0  }
  0xa3   : > { %vm436_vm10 = vmand %vm434_vm7, %vm435_vm8  ;;  %vm9222_vm8 = vcmask 90112  }
 0x125   : > { %v542_v31 = vpop.xlane.xlu0 %541 }
 0x126   : > { %v553_v32 = vmul.f32 0.03125, %v542_v31 }
 0x128   : > { %v557_v33 = vsub.f32 %v12604_v21, %v553_v32 }
 0x129   : > { %v545_v34 = vpop.xlane.xlu1 %544  ;;  %v548_v35 = vpop.xlane.xlu0 %547 }
 0x12a   : > { %v554_v36 = vmul.f32 0.03125, %v545_v34  ;;  %v555_v37 = vmul.f32 0.03125, %v548_v35  ;;  %v561_v38 = vmul.f32 %v557_v33, %v557_v33  ;;  %v14950_v35 = vmov 0.0  }
 0x12c   : > { %v558_v39 = vsub.f32 %v12612_v27, %v554_v36  ;;  %v559_v40 = vsub.f32 %v12606_v22, %v555_v37  ;;  %v565_v41 = vsel %vm539_vm0, %v561_v38, 0.0  ;;  %v12682_v36 = vsel %vm420_vm3, 1.0, %v14950_v35 }
 0x12d   : > { %566 = vadd.xlane.f32.xlu1 %v565_v41  ;;  %v551_v42 = vpop.xlane.xlu0 %550  ;;  %v12685_v37 = vsel %vm426_vm4, 1.0, %v14950_v35  ;;  %vm4351_vm3 = vcmask 1043456   ;;  %vm12505_vm4 = vmmov 1  }
 0x12e   : > { %v556_v43 = vmul.f32 0.03125, %v551_v42  ;;  %v562_v44 = vmul.f32 %v558_v39, %v558_v39  ;;  %v563_v45 = vmul.f32 %v559_v40, %v559_v40  ;;  %vm13891_vm5 = vmpackc.low %vm4351_vm3, %vm12505_vm4 }
 0x130   : > { %v560_v46 = vsub.f32 %v12614_v28, %v556_v43  ;;  %v568_v47 = vsel %vm539_vm0, %v562_v44, 0.0  ;;  %v571_v48 = vsel %vm539_vm0, %v563_v45, 0.0 }
 0x131   : > { %569 = vadd.xlane.f32.xlu0 %v568_v47  ;;  %572 = vadd.xlane.f32.xlu1 %v571_v48  ;;  %v12714_v48 = vsel %vm431_vm9, 1.0, %v14950_v35 }
 0x132   : > { %v564_v49 = vmul.f32 %v560_v46, %v560_v46 }
 0x134   : > { %v574_v50 = vsel %vm539_vm0, %v564_v49, 0.0  ;;  %v12717_v49 = vsel %vm436_vm10, 1.0, %v14950_v35 }
 0x135   : > { %575 = vadd.xlane.f32.xlu0 %v574_v50  ;;  %v12724_v50 = vpack.i.bf16 %v12717_v49, %v12714_v48 }
 0x142   : > { %602 = vrot.lane.b32.xlu1 %v9307_v51, %s12500_s21 }
 0x1ba   : > { %v567_v59 = vpop.xlane.xlu1 %566 }
 0x1bb   : > { %v577_v60 = vmul.f32 0.03125, %v567_v59 }
 0x1bd   : > { %v581_v61 = vadd.f32 1e-05, %v577_v60 }
 0x1be   : > { %v573_v62 = vpop.xlane.xlu1 %572  ;;  %v570_v63 = vpop.xlane.xlu0 %569 }
 0x1bf   : > { %12147 = vrsqrt.f32 %v581_v61  ;;  %v579_v0 = vmul.f32 0.03125, %v573_v62  ;;  %v578_v1 = vmul.f32 0.03125, %v570_v63 }
 0x1c1   : > { %v583_v2 = vadd.f32 1e-05, %v579_v0  ;;  %v582_v3 = vadd.f32 1e-05, %v578_v1 }
 0x1c2   : > { %v576_v4 = vpop.xlane.xlu0 %575  ;;  %v603_v9 = vpop.permute.xlu1 %602 }
 0x1c3   : > { %12149 = vrsqrt.f32 %v583_v2  ;;  %v580_v5 = vmul.f32 0.03125, %v576_v4 }
 0x1c4   : > { %12151 = vrsqrt.f32 %v582_v3 }
 0x1c5   : > { %v584_v6 = vadd.f32 1e-05, %v580_v5 }
 0x1c7   : > { %12153 = vrsqrt.f32 %v584_v6 }
 0x1c9   : > { %v12148_v7 = vpop.eup %12147 }
 0x1ca   : > { %v589_v8 = vmul.f32 %v12148_v7, %v557_v33 }
 0x1cc   : > { %v597_v10 = vmul.f32 %v9307_v51, %v589_v8 }
 0x1cd   : > { %v12150_v11 = vpop.eup %12149 }
 0x1ce   : > { %v12152_v12 = vpop.eup %12151  ;;  %v605_v13 = vadd.f32 %v603_v9, %v597_v10  ;;  %v591_v14 = vmul.f32 %v12150_v11, %v559_v40 }
 0x1cf   : > { %v590_v15 = vmul.f32 %v12152_v12, %v558_v39 }
 0x1d0   : > { %10160 = vmatprep.mubr.msk.f32.mxu1 %vm539_vm0, %v605_v13  ;;  %v599_v16 = vmul.f32 %v9307_v51, %v591_v14 }
 0x1d1   : > { %v12154_v17 = vpop.eup %12153  ;;  %v598_v18 = vmul.f32 %v9307_v51, %v590_v15 }
 0x1d2   : > { %v607_v19 = vadd.f32 %v603_v9, %v599_v16  ;;  %v592_v20 = vmul.f32 %v12154_v17, %v560_v46  ;;  %v12707_v46 = vpack.i.bf16 %v12682_v36, %v12685_v37 }
 0x1d3   : > { %v606_v23 = vadd.f32 %v603_v9, %v598_v18 }
 0x1d4   : > { %v600_v24 = vmul.f32 %v9307_v51, %v592_v20 }
 0x1d5   : > { %10161 = vmatmul.mubr.msk.f32.vlgmr.msra.gmra.mrb[0].mxu1 %vm539_vm0, %v606_v23 }
 0x1d6   : > { %10163 = vmatprep.mubr.msk.f32.mxu1 %vm539_vm0, %v607_v19  ;;  %v608_v25 = vadd.f32 %v603_v9, %v600_v24 }
 0x1d9   : > { %10164 = vmatmul.mubr.msk.f32.gmra.mrb[2].mxu1 %vm539_vm0, %v608_v25 }
 0x2a8   : > { %v10162_v31 = vpop.f32.mrb[0].mxu1 }
 0x2a9   : > { %v12674_v32 = vadd.f32 %v10162_v31, %v12670_v30  ;;  %v691_v33 = vpop.f32.mrb[1].mxu1 }
 0x2aa   : > { %v12677_v34 = vadd.f32 %v12670_v30, %v691_v33 }
 0x2ab   : > { %v711_v13 = vmul.f32 0.35355338, %v12674_v32 }
 0x2ac   : > { %v10165_v38 = vpop.f32.mrb[2].mxu1  ;;  %v11817_v39 = vpack.i.bf16 %v12674_v32, %v12677_v34  ;;  %v12692_v40 = vmul.f32 0.35355338, %v12677_v34 }
 0x2ad   : > { %v12695_v41 = vadd.f32 %v10165_v38, %v12670_v30  ;;  %v701_v42 = vpop.f32.mrb[3].mxu1  ;;  %v715_v15 = vmul.f32 %v12682_v36, %v711_v13  ;;  %v888_v16 = vmul.f32 %v12685_v37, %v711_v13  ;;  %v1267_v25 = vmul.f32 %v12714_v48, %v711_v13 }
 0x2ae   : > { %v12698_v43 = vadd.f32 %v12670_v30, %v701_v42  ;;  %11818 = vrot.lane.b32.xlu0 %v11817_v39, %s12500_s21  ;;  %v714_v44 = vmul.f32 %v12682_v36, %v12692_v40  ;;  %v887_v45 = vmul.f32 %v12685_v37, %v12692_v40  ;;  %v1266_v24 = vmul.f32 %v12714_v48, %v12692_v40 }
 0x2af   : > { %v713_v17 = vmul.f32 0.35355338, %v12695_v41  ;;  %v1536_v38 = vmul.f32 %v12717_v49, %v12692_v40  ;;  %v1537_v39 = vmul.f32 %v12717_v49, %v711_v13 }
 0x2b0   : > { %10174 = vmatprep.mubr.msk.f32.mxu1 %vm539_vm0, %v714_v44  ;;  %10188 = vmatprep.mubr.msk.f32.mxu0 %vm539_vm0, %v887_v45  ;;  %v11822_v47 = vpack.i.bf16 %v12695_v41, %v12698_v43  ;;  %v712_v14 = vmul.f32 0.35355338, %v12698_v43 }
 0x2b1   : > { %v717_v20 = vmul.f32 %v12682_v36, %v713_v17  ;;  %v890_v23 = vmul.f32 %v12685_v37, %v713_v17  ;;  %v1269_v33 = vmul.f32 %v12714_v48, %v713_v17  ;;  %v1539_v44 = vmul.f32 %v12717_v49, %v713_v17 }
 0x2b2   : > { %11828 = vrot.lane.b32.xlu0 %v12707_v46, %s12502_s14  ;;  %11823 = vrot.lane.b32.xlu1 %v11822_v47, %s12500_s21  ;;  %v716_v18 = vmul.f32 %v12682_v36, %v712_v14  ;;  %v889_v19 = vmul.f32 %v12685_v37, %v712_v14  ;;  %v1268_v31 = vmul.f32 %v12714_v48, %v712_v14 }
 0x2b3   : > { %v1538_v42 = vmul.f32 %v12717_v49, %v712_v14 }
 0x2b6   : > { %11833 = vrot.lane.b32.xlu1 %v12724_v50, %s12502_s14 }
 0x320   : > { %v11819_v51 = vpop.permute.xlu0 %11818 }
 0x321   : > { %v11821_v56 = vunpack.i.h.bf16 %v11819_v51  ;;  %v11820_v58 = vunpack.i.l.bf16 %v11819_v51 }
 0x323   : > { %v11058_v60 = vpack.c.bf16 %v11821_v56, %v11820_v58 }
 0x324   : > { %v11824_v61 = vpop.permute.xlu1 %11823  ;;  %v11829_v62 = vpop.permute.xlu0 %11828 }
 0x325   : > { %v11826_v63 = vunpack.i.h.bf16 %v11824_v61  ;;  %v11825_v0 = vunpack.i.l.bf16 %v11824_v61  ;;  %v12734_v1 = vunpack.i.l.bf16 %v11829_v62  ;;  %11060 = vmatprep.subr.msk.bf16.mxu1 %vm12730_vm11, %v11058_v60  ;;  %11072 = vmatprep.subr.msk.bf16.mxu0 %vm12730_vm11, %v11058_v60  ;;  %v12740_v2 = vunpack.i.h.bf16 %v11829_v62 }
 0x326   : > { %11063 = vmatpush3.bf16.xpose.msk.msra.mxu1 %vm12730_vm11, %v11058_v60  ;;  %11075 = vmatpush3.bf16.xpose.msk.msra.mxu0 %vm12730_vm11, %v11058_v60 }
 0x327   : > { %v11064_v3 = vpack.c.bf16 %v11826_v63, %v11825_v0  ;;  %v1038_v4 = vmul.f32 %v12734_v1, %v12698_v43  ;;  %v1039_v5 = vmul.f32 %v12734_v1, %v12695_v41  ;;  %v1036_v6 = vmul.f32 %v12734_v1, %v12677_v34 }
 0x328   : > { %v1037_v7 = vmul.f32 %v12734_v1, %v12674_v32  ;;  %v883_v10 = vmul.f32 %v12740_v2, %v12677_v34  ;;  %v884_v11 = vmul.f32 %v12740_v2, %v12674_v32  ;;  %v12818_v40 = vpop.permute.xlu1 %11833 }
 0x329   : > { %11066 = vmatprep.subr.msk.bf16.mxu1 %vm12730_vm11, %v11064_v3  ;;  %11078 = vmatprep.subr.msk.bf16.mxu0 %vm12730_vm11, %v11064_v3  ;;  %v11847_v8 = vpack.i.bf16 %v1039_v5, %v1038_v4 }
 0x32a   : > { %v11837_v9 = vpack.i.bf16 %v1037_v7, %v1036_v6  ;;  %v11842_v12 = vpack.i.bf16 %v884_v11, %v883_v10 }
 0x32b   : > { %11848 = vrot.lane.b32.xlu1 %v11847_v8, %s12502_s14 }
 0x32c   : > { %11838 = vrot.lane.b32.xlu0 %v11837_v9, %s12502_s14 }
 0x32e   : > { %11069 = vmatpush3.bf16.xpose.msk.msra.mxu1 %vm12730_vm11, %v11064_v3  ;;  %11081 = vmatpush3.bf16.xpose.msk.msra.mxu0 %vm12730_vm11, %v11064_v3 }
 0x32f   : > { %11100 = vmatprep.subr.msk.bf16.mxu0 %vm12730_vm11, %v11058_v60 }
 0x330   : > { %11843 = vrot.lane.b32.xlu0 %v11842_v12, %s12502_s14 }
 0x335   : > { %10175 = vmatmul.mubr.msk.f32.vlgmr.msra.gmra.mrb[4].mxu1 %vm539_vm0, %v715_v15  ;;  %10189 = vmatmul.mubr.msk.f32.vlgmr.msra.gmra.mrb[0].mxu0 %vm539_vm0, %v888_v16 }
 0x336   : > { %10177 = vmatprep.mubr.msk.f32.mxu1 %vm539_vm0, %v716_v18  ;;  %10191 = vmatprep.mubr.msk.f32.mxu0 %vm539_vm0, %v889_v19 }
 0x337   : > { %11103 = vmatpush3.bf16.xpose.msk.msra.mxu0 %vm12730_vm11, %v11058_v60 }
 0x338   : > { %11106 = vmatprep.subr.msk.bf16.mxu0 %vm12730_vm11, %v11064_v3 }
 0x339   : > { %10178 = vmatmul.mubr.msk.f32.gmra.mrb[6].mxu1 %vm539_vm0, %v717_v20  ;;  %10192 = vmatmul.mubr.msk.f32.gmra.mrb[2].mxu0 %vm539_vm0, %v890_v23 }
 0x33a   : > { %10230 = vmatprep.mubr.msk.f32.mxu0 %vm539_vm0, %v1266_v24 }
 0x33f   : > { %11109 = vmatpush3.bf16.xpose.msk.msra.mxu0 %vm12730_vm11, %v11064_v3 }
 0x340   : > { %11120 = vmatprep.subr.msk.bf16.mxu0 %vm12730_vm11, %v11058_v60 }
 0x346   : > { %10231 = vmatmul.mubr.msk.f32.vlgmr.msra.gmra.mrb[4].mxu0 %vm539_vm0, %v1267_v25 }
 0x347   : > { %10233 = vmatprep.mubr.msk.f32.mxu0 %vm539_vm0, %v1268_v31  ;;  %11123 = vmatpush3.bf16.xpose.msk.msra.mxu0 %vm12730_vm11, %v11058_v60 }
 0x348   : > { %11126 = vmatprep.subr.msk.bf16.mxu0 %vm12730_vm11, %v11064_v3 }
 0x34a   : > { %10234 = vmatmul.mubr.msk.f32.gmra.mrb[6].mxu0 %vm539_vm0, %v1269_v33 }
 0x34b   : > { %10258 = vmatprep.mubr.msk.f32.mxu0 %vm539_vm0, %v1536_v38 }
 0x34f   : > { %11129 = vmatpush3.bf16.xpose.msk.msra.mxu0 %vm12730_vm11, %v11064_v3 }
 0x356   : > { %10259 = vmatmul.mubr.msk.f32.vlgmr.msra.gmra.mrb[8].mxu0 %vm539_vm0, %v1537_v39 }
 0x357   : > { %10261 = vmatprep.mubr.msk.f32.mxu0 %vm539_vm0, %v1538_v42 }
 0x35a   : > { %10262 = vmatmul.mubr.msk.f32.gmra.mrb[10].mxu0 %vm539_vm0, %v1539_v44 }
 0x39d   : > { %v11849_v45 = vpop.permute.xlu1 %11848 }
 0x39e   : > { %v11839_v47 = vpop.permute.xlu0 %11838  ;;  %v11851_v51 = vunpack.i.h.bf16 %v11849_v45  ;;  %v11850_v56 = vunpack.i.l.bf16 %v11849_v45 }
 0x39f   : > { %v11841_v58 = vunpack.i.h.bf16 %v11839_v47  ;;  %v11840_v60 = vunpack.i.l.bf16 %v11839_v47 }
 0x3a0   : > { %v11086_v3 = vpack.c.bf16 %v11851_v51, %v11850_v56 }
 0x3a1   : > { %v11082_v61 = vpack.c.bf16 %v11841_v58, %v11840_v60 }
 0x3a2   : > { %v11844_v62 = vpop.permute.xlu0 %11843 }
 0x3a3   : > { %v11846_v63 = vunpack.i.h.bf16 %v11844_v62  ;;  %v11845_v0 = vunpack.i.l.bf16 %v11844_v62  ;;  %11083 = vmatprep.subr.bf16.mxu1 %v11082_v61  ;;  %v885_v62 = vmul.f32 %v12740_v2, %v12698_v43 }
 0x3a4   : > { %11085 = vmatpush3.bf16.msra.mxu1 %v11082_v61  ;;  %v12880_v61 = vunpack.i.l.bf16 %v12818_v40 }
 0x3a5   : > { %11087 = vmatprep.subr.bf16.mxu1 %v11086_v3  ;;  %v12820_v4 = vpack.c.bf16 %v11846_v63, %v11845_v0  ;;  %v886_v63 = vmul.f32 %v12740_v2, %v12695_v41 }
 0x3a6   : > { %v1415_v0 = vmul.f32 %v12880_v61, %v12677_v34 }
 0x3a8   : > { %11089 = vmatpush3.bf16.msra.mxu1 %v11086_v3  ;;  %v1416_v3 = vmul.f32 %v12880_v61, %v12674_v32 }
 0x3a9   : > { %11091 = vmatprep.subr.bf16.mxu1 %v12820_v4 }
 0x408   : > { %v10176_v5 = vpop.f32.mrb[4].mxu1  ;;  %v10190_v6 = vpop.f32.mrb[0].mxu0 }
 0x409   : > { %v12823_v7 = vpop.f32.mrb[5].mxu1  ;;  %v12825_v8 = vpop.f32.mrb[1].mxu0  ;;  %v991_v9 = vsel %vm539_vm0, %v10190_v6, -inf  ;;  %v838_v10 = vsel %vm539_vm0, %v10176_v5, -inf }
 0x40a   : > { %992 = vmax.xlane.f32.xlu0 %v991_v9  ;;  %839 = vmax.xlane.f32.xlu1 %v838_v10  ;;  %v988_v15 = vsel %vm539_vm0, %v12825_v8, -inf  ;;  %v835_v16 = vsel %vm539_vm0, %v12823_v7, -inf  ;;  %v11852_v9 = vpack.i.bf16 %v886_v63, %v885_v62  ;;  %v11857_v10 = vpack.i.bf16 %v1416_v3, %v1415_v0 }
 0x40c   : > { %v12829_v11 = vpop.f32.mrb[6].mxu1  ;;  %v12831_v12 = vpop.f32.mrb[2].mxu0 }
 0x40d   : > { %v12833_v13 = vpop.f32.mrb[7].mxu1  ;;  %v12835_v14 = vpop.f32.mrb[3].mxu0  ;;  %v997_v17 = vsel %vm539_vm0, %v12831_v12, -inf  ;;  %v844_v19 = vsel %vm539_vm0, %v12829_v11, -inf }
 0x40e   : > { %989 = vmax.xlane.f32.xlu1 %v988_v15  ;;  %836 = vmax.xlane.f32.xlu0 %v835_v16  ;;  %v994_v18 = vsel %vm539_vm0, %v12835_v14, -inf  ;;  %v841_v20 = vsel %vm539_vm0, %v12833_v13, -inf }
 0x412   : > { %998 = vmax.xlane.f32.xlu1 %v997_v17  ;;  %995 = vmax.xlane.f32.xlu0 %v994_v18 }
 0x416   : > { %845 = vmax.xlane.f32.xlu1 %v844_v19  ;;  %842 = vmax.xlane.f32.xlu0 %v841_v20 }
 0x419   : > { %v12849_v23 = vpop.f32.mrb[4].mxu0 }
 0x41a   : > { %v12851_v24 = vpop.f32.mrb[5].mxu0  ;;  %v1370_v25 = vsel %vm539_vm0, %v12849_v23, -inf }
 0x41b   : > { %1371 = vmax.xlane.f32.xlu1 %v1370_v25  ;;  %v1367_v31 = vsel %vm539_vm0, %v12851_v24, -inf }
 0x41c   : > { %1368 = vmax.xlane.f32.xlu0 %v1367_v31 }
 0x41d   : > { %v12857_v33 = vpop.f32.mrb[6].mxu0 }
 0x41e   : > { %v12859_v38 = vpop.f32.mrb[7].mxu0  ;;  %v1376_v39 = vsel %vm539_vm0, %v12857_v33, -inf }
 0x41f   : > { %1377 = vmax.xlane.f32.xlu1 %v1376_v39  ;;  %v1373_v42 = vsel %vm539_vm0, %v12859_v38, -inf }
 0x420   : > { %1374 = vmax.xlane.f32.xlu0 %v1373_v42 }
 0x429   : > { %v12865_v44 = vpop.f32.mrb[8].mxu0 }
 0x42a   : > { %v12867_v45 = vpop.f32.mrb[9].mxu0  ;;  %v1640_v47 = vsel %vm539_vm0, %v12865_v44, -inf }
 0x42b   : > { %1641 = vmax.xlane.f32.xlu1 %v1640_v47  ;;  %v1637_v51 = vsel %vm539_vm0, %v12867_v45, -inf }
 0x42c   : > { %1638 = vmax.xlane.f32.xlu0 %v1637_v51 }
 0x42d   : > { %v12873_v56 = vpop.f32.mrb[10].mxu0 }
 0x42e   : > { %v12875_v58 = vpop.f32.mrb[11].mxu0  ;;  %v1646_v60 = vsel %vm539_vm0, %v12873_v56, -inf }
 0x42f   : > { %1647 = vmax.xlane.f32.xlu1 %v1646_v60  ;;  %v1643_v15 = vsel %vm539_vm0, %v12875_v58, -inf }
 0x440   : > { %11853 = vrot.lane.b32.xlu1 %v11852_v9, %s12502_s14 }
 0x442   : > { %11858 = vrot.lane.b32.xlu0 %v11857_v10, %s12502_s14 }
 0x461   : > { %1644 = vmax.xlane.f32.xlu0 %v1643_v15 }
 0x497   : > { %v993_v16 = vpop.xlane.xlu0 %992  ;;  %v840_v17 = vpop.xlane.xlu1 %839 }
 0x498   : > { %v1001_v18 = vsub.f32 %v10190_v6, %v993_v16  ;;  %v848_v19 = vsub.f32 %v10176_v5, %v840_v17 }
 0x49a   : > { %v1006_v20 = vmul.f32 1.442695, %v1001_v18  ;;  %v853_v25 = vmul.f32 1.442695, %v848_v19 }
 0x49b   : > { %v990_v31 = vpop.xlane.xlu1 %989  ;;  %v837_v39 = vpop.xlane.xlu0 %836 }
 0x49c   : > { %12155 = vpow2.f32 %v1006_v20  ;;  %v1000_v42 = vsub.f32 %v12825_v8, %v990_v31  ;;  %v847_v47 = vsub.f32 %v12823_v7, %v837_v39 }
 0x49d   : > { %12157 = vpow2.f32 %v853_v25 }
 0x49e   : > { %v1004_v51 = vmul.f32 1.442695, %v1000_v42  ;;  %v851_v60 = vmul.f32 1.442695, %v847_v47 }
 0x49f   : > { %v999_v62 = vpop.xlane.xlu1 %998  ;;  %v996_v63 = vpop.xlane.xlu0 %995 }
 0x4a0   : > { %12159 = vpow2.f32 %v1004_v51  ;;  %v1003_v0 = vsub.f32 %v12831_v12, %v999_v62  ;;  %v1002_v6 = vsub.f32 %v12835_v14, %v996_v63 }
 0x4a1   : > { %12161 = vpow2.f32 %v851_v60 }
 0x4a2   : > { %v1010_v5 = vmul.f32 1.442695, %v1003_v0  ;;  %v1008_v3 = vmul.f32 1.442695, %v1002_v6 }
 0x4a3   : > { %v846_v9 = vpop.xlane.xlu1 %845  ;;  %v843_v10 = vpop.xlane.xlu0 %842 }
 0x4a4   : > { %12163 = vpow2.f32 %v1010_v5  ;;  %v850_v8 = vsub.f32 %v12829_v11, %v846_v9  ;;  %v849_v7 = vsub.f32 %v12833_v13, %v843_v10 }
 0x4a5   : > { %12165 = vpow2.f32 %v1008_v3 }
 0x4a6   : > { %v12900_v15 = vpop.eup %12155  ;;  %v857_v16 = vmul.f32 1.442695, %v850_v8  ;;  %v855_v17 = vmul.f32 1.442695, %v849_v7 }
 0x4a7   : > { %v12902_v18 = vpop.eup %12157  ;;  %v1015_v12 = vsel %vm539_vm0, %v12900_v15, 0.0 }
 0x4a8   : > { %12167 = vpow2.f32 %v857_v16  ;;  %v1372_v14 = vpop.xlane.xlu1 %1371  ;;  %v862_v19 = vsel %vm539_vm0, %v12902_v18, 0.0  ;;  %1016 = vadd.xlane.f32.xlu0 %v1015_v12 }
 0x4a9   : > { %12169 = vpow2.f32 %v855_v17  ;;  %v1380_v11 = vsub.f32 %v12849_v23, %v1372_v14  ;;  %863 = vadd.xlane.f32.xlu1 %v862_v19  ;;  %v1369_v13 = vpop.xlane.xlu0 %1368 }
 0x4aa   : > { %v12909_v20 = vpop.eup %12159  ;;  %v1379_v25 = vsub.f32 %v12851_v24, %v1369_v13 }
 0x4ab   : > { %v12912_v31 = vpop.eup %12161  ;;  %v1385_v39 = vmul.f32 1.442695, %v1380_v11  ;;  %v1012_v42 = vsel %vm539_vm0, %v12909_v20, 0.0 }
 0x4ac   : > { %v1383_v47 = vmul.f32 1.442695, %v1379_v25  ;;  %v1378_v51 = vpop.xlane.xlu1 %1377  ;;  %v859_v60 = vsel %vm539_vm0, %v12912_v31, 0.0 }
 0x4ad   : > { %12171 = vpow2.f32 %v1385_v39  ;;  %v1382_v23 = vsub.f32 %v12857_v33, %v1378_v51  ;;  %1013 = vadd.xlane.f32.xlu1 %v1012_v42  ;;  %860 = vadd.xlane.f32.xlu0 %v859_v60  ;;  %v1375_v62 = vpop.xlane.xlu0 %1374 }
 0x4ae   : > { %v12919_v63 = vpop.eup %12163  ;;  %12173 = vpow2.f32 %v1383_v47  ;;  %v1381_v24 = vsub.f32 %v12859_v38, %v1375_v62 }
 0x4af   : > { %v12922_v0 = vpop.eup %12165  ;;  %v1389_v6 = vmul.f32 1.442695, %v1382_v23  ;;  %v1021_v5 = vsel %vm539_vm0, %v12919_v63, 0.0 }
 0x4b0   : > { %v1387_v3 = vmul.f32 1.442695, %v1381_v24  ;;  %v1018_v9 = vsel %vm539_vm0, %v12922_v0, 0.0 }
 0x4b1   : > { %12175 = vpow2.f32 %v1389_v6  ;;  %1022 = vadd.xlane.f32.xlu1 %v1021_v5  ;;  %1019 = vadd.xlane.f32.xlu0 %v1018_v9  ;;  %v12968_v9 = vunpack.i.h.bf16 %v12818_v40 }
 0x4b2   : > { %v12928_v33 = vpop.eup %12167  ;;  %12177 = vpow2.f32 %v1387_v3 }
 0x4b3   : > { %v12930_v10 = vpop.eup %12169  ;;  %v868_v38 = vsel %vm539_vm0, %v12928_v33, 0.0 }
 0x4b4   : > { %v865_v8 = vsel %vm539_vm0, %v12930_v10, 0.0 }
 0x4b5   : > { %869 = vadd.xlane.f32.xlu1 %v868_v38  ;;  %866 = vadd.xlane.f32.xlu0 %v865_v8  ;;  %v1417_v38 = vmul.f32 %v12880_v61, %v12698_v43  ;;  %v1418_v8 = vmul.f32 %v12880_v61, %v12695_v41 }
 0x4b7   : > { %v12936_v7 = vpop.eup %12171 }
 0x4b8   : > { %v12938_v16 = vpop.eup %12173  ;;  %v1642_v17 = vpop.xlane.xlu1 %1641  ;;  %v1394_v12 = vsel %vm539_vm0, %v12936_v7, 0.0 }
 0x4b9   : > { %v1650_v14 = vsub.f32 %v12865_v44, %v1642_v17  ;;  %1395 = vadd.xlane.f32.xlu1 %v1394_v12  ;;  %v1639_v19 = vpop.xlane.xlu0 %1638  ;;  %v1391_v11 = vsel %vm539_vm0, %v12938_v16, 0.0  ;;  %v1685_v17 = vmul.f32 %v12968_v9, %v12677_v34  ;;  %v1686_v12 = vmul.f32 %v12968_v9, %v12674_v32 }
 0x4ba   : > { %v1649_v13 = vsub.f32 %v12867_v45, %v1639_v19  ;;  %1392 = vadd.xlane.f32.xlu0 %v1391_v11  ;;  %v1687_v32 = vmul.f32 %v12968_v9, %v12698_v43 }
 0x4bb   : > { %v12946_v25 = vpop.eup %12175  ;;  %v1655_v39 = vmul.f32 1.442695, %v1650_v14  ;;  %v11862_v14 = vpack.i.bf16 %v1418_v8, %v1417_v38  ;;  %v11867_v19 = vpack.i.bf16 %v1686_v12, %v1685_v17 }
 0x4bc   : > { %v1653_v42 = vmul.f32 1.442695, %v1649_v13  ;;  %v1648_v47 = vpop.xlane.xlu1 %1647  ;;  %v1400_v51 = vsel %vm539_vm0, %v12946_v25, 0.0  ;;  %v12950_v60 = vpop.eup %12177 }
 0x4bd   : > { %12179 = vpow2.f32 %v1655_v39  ;;  %v1652_v44 = vsub.f32 %v12873_v56, %v1648_v47  ;;  %1401 = vadd.xlane.f32.xlu1 %v1400_v51  ;;  %v1397_v45 = vsel %vm539_vm0, %v12950_v60, 0.0  ;;  %v11859_v40 = vpop.permute.xlu0 %11858  ;;  %v1688_v47 = vmul.f32 %v12968_v9, %v12695_v41 }
 0x4be   : > { %12181 = vpow2.f32 %v1653_v42 }
 0x4bf   : > { %v1659_v23 = vmul.f32 1.442695, %v1652_v44  ;;  %v11872_v51 = vpack.i.bf16 %v1688_v47, %v1687_v32 }
 0x4c0   : > { %v11854_v43 = vpop.permute.xlu1 %11853 }
 0x4c1   : > { %12183 = vpow2.f32 %v1659_v23  ;;  %1398 = vadd.xlane.f32.xlu1 %v1397_v45 }
 0x4c7   : > { %v12955_v62 = vpop.eup %12179 }
 0x4c8   : > { %v12957_v24 = vpop.eup %12181  ;;  %v1664_v6 = vsel %vm539_vm0, %v12955_v62, 0.0 }
 0x4c9   : > { %1665 = vadd.xlane.f32.xlu1 %v1664_v6  ;;  %v1661_v5 = vsel %vm539_vm0, %v12957_v24, 0.0 }
 0x4ca   : > { %1662 = vadd.xlane.f32.xlu0 %v1661_v5  ;;  %v11856_v5 = vunpack.i.h.bf16 %v11854_v43 }
 0x4cb   : > { %v12963_v56 = vpop.eup %12183 }
 0x4cc   : > { %v1670_v3 = vsel %vm539_vm0, %v12963_v56, 0.0 }
 0x4cd   : > { %1671 = vadd.xlane.f32.xlu1 %v1670_v3 }
 0x4de   : > { %11863 = vrot.lane.b32.xlu1 %v11862_v14, %s12502_s14 }
 0x4e0   : > { %11868 = vrot.lane.b32.xlu0 %v11867_v19, %s12502_s14 }
 0x4e2   : > { %11878 = vrot.lane.b32.xlu1 %v11877_v55, %s12503_s15 }
 0x4e6   : > { %1823 = vrot.lane.b32.xlu1 %v12670_v30, %s12503_s15  ;;  %v11855_v30 = vunpack.i.l.bf16 %v11854_v43 }
 0x4e8   : > { %v11094_v19 = vpack.c.bf16 %v11856_v5, %v11855_v30 }
 0x4ee   : > { %v1645_v11 = vpop.xlane.xlu0 %1644 }
 0x4ef   : > { %v1651_v13 = vsub.f32 %v12875_v58, %v1645_v11  ;;  %v11882_v58 = vpack.i.bf16 %v12654_v57, %v12645_v54 }
 0x4f1   : > { %v1657_v39 = vmul.f32 1.442695, %v1651_v13  ;;  %v11861_v13 = vunpack.i.h.bf16 %v11859_v40 }
 0x4f3   : > { %12185 = vpow2.f32 %v1657_v39  ;;  %v11860_v39 = vunpack.i.l.bf16 %v11859_v40 }
 0x4fd   : > { %v12981_v42 = vpop.eup %12185 }
 0x4fe   : > { %v1667_v34 = vsel %vm539_vm0, %v12981_v42, 0.0 }
 0x4ff   : > { %1668 = vadd.xlane.f32.xlu0 %v1667_v34 }
 0x515   : > { %11873 = vrot.lane.b32.xlu0 %v11872_v51, %s12502_s14 }
 0x519   : > { %11883 = vrot.lane.b32.xlu0 %v11882_v58, %s12503_s15  ;;  %v11110_v58 = vpack.c.bf16 %v11861_v13, %v11860_v39 }
 0x535   : > { %v1017_v44 = vpop.xlane.xlu0 %1016 }
 0x536   : > { %v864_v41 = vpop.xlane.xlu1 %863  ;;  %12187 = vrcp.f32 %v1017_v44 }
 0x53a   : > { %v1014_v23 = vpop.xlane.xlu1 %1013  ;;  %v861_v45 = vpop.xlane.xlu0 %860 }
 0x53b   : > { %12189 = vrcp.f32 %v1014_v23 }
 0x53c   : > { %12191 = vrcp.f32 %v861_v45 }
 0x53e   : > { %v1023_v54 = vpop.xlane.xlu1 %1022  ;;  %v1020_v57 = vpop.xlane.xlu0 %1019 }
 0x53f   : > { %12193 = vrcp.f32 %v1023_v54 }
 0x540   : > { %12195 = vrcp.f32 %v1020_v57  ;;  %v12188_v53 = vpop.eup %12187 }
 0x541   : > { %12197 = vrcp.f32 %v864_v41  ;;  %v1027_v8 = vmul.f32 %v12188_v53, %v12900_v15 }
 0x542   : > { %v870_v6 = vpop.xlane.xlu1 %869  ;;  %v867_v52 = vpop.xlane.xlu0 %866 }
 0x543   : > { %12199 = vrcp.f32 %v867_v52 }
 0x544   : > { %12201 = vrcp.f32 %v870_v6 }
 0x545   : > { %v12190_v55 = vpop.eup %12189 }
 0x546   : > { %v1396_v3 = vpop.xlane.xlu1 %1395  ;;  %v1025_v38 = vmul.f32 %v12190_v55, %v12909_v20  ;;  %v12192_v12 = vpop.eup %12191 }
 0x547   : > { %v1393_v17 = vpop.xlane.xlu0 %1392  ;;  %v872_v47 = vmul.f32 %v12192_v12, %v12912_v31 }
 0x548   : > { %12203 = vrcp.f32 %v1393_v17  ;;  %10202 = vmatprep.mubr.msk.f32.mxu1 %vm539_vm0, %v1025_v38 }
 0x549   : > { %v12194_v14 = vpop.eup %12193  ;;  %10203 = vmatmul.mubr.msk.f32.vlgmr.msra.gmra.mrb[8].mxu1 %vm539_vm0, %v1027_v8  ;;  %12205 = vrcp.f32 %v1396_v3 }
 0x54a   : > { %v12196_v11 = vpop.eup %12195  ;;  %11093 = vmatpush3.bf16.msra.mxu1 %v12820_v4  ;;  %v1031_v34 = vmul.f32 %v12194_v14, %v12919_v63  ;;  %v1402_v20 = vpop.xlane.xlu1 %1401 }
 0x54b   : > { %11095 = vmatprep.subr.bf16.mxu1 %v11094_v19  ;;  %v1029_v15 = vmul.f32 %v12196_v11, %v12922_v0  ;;  %v12198_v32 = vpop.eup %12197 }
 0x54c   : > { %v874_v4 = vmul.f32 %v12198_v32, %v12902_v18 }
 0x54d   : > { %10205 = vmatprep.mubr.msk.f32.mxu1 %vm539_vm0, %v1029_v15  ;;  %v12200_v51 = vpop.eup %12199 }
 0x54e   : > { %10206 = vmatmul.mubr.msk.f32.gmra.mrb[10].mxu1 %vm539_vm0, %v1031_v34  ;;  %v12202_v63 = vpop.eup %12201  ;;  %v876_v40 = vmul.f32 %v12200_v51, %v12930_v10  ;;  %v1399_v43 = vpop.xlane.xlu1 %1398 }
 0x54f   : > { %11097 = vmatpush3.bf16.msra.mxu1 %v11094_v19  ;;  %10216 = vmatprep.mubr.msk.f32.mxu1 %vm539_vm0, %v872_v47  ;;  %v878_v44 = vmul.f32 %v12202_v63, %v12928_v33  ;;  %12207 = vrcp.f32 %v1399_v43 }
 0x550   : > { %11111 = vmatprep.subr.bf16.mxu1 %v11110_v58  ;;  %12209 = vrcp.f32 %v1402_v20 }
 0x552   : > { %v12204_v0 = vpop.eup %12203  ;;  %10217 = vmatmul.mubr.msk.f32.vlgmr.msra.gmra.mrb[8].mxu1 %vm539_vm0, %v874_v4 }
 0x553   : > { %11113 = vmatpush3.bf16.msra.mxu1 %v11110_v58  ;;  %10219 = vmatprep.mubr.msk.f32.mxu1 %vm539_vm0, %v876_v40  ;;  %v1404_v31 = vmul.f32 %v12204_v0, %v12938_v16  ;;  %v12206_v53 = vpop.eup %12205 }
 0x554   : > { %v1406_v5 = vmul.f32 %v12206_v53, %v12936_v7 }
 0x556   : > { %10220 = vmatmul.mubr.msk.f32.gmra.mrb[10].mxu1 %vm539_vm0, %v878_v44  ;;  %v1666_v41 = vpop.xlane.xlu1 %1665 }
 0x557   : > { %10244 = vmatprep.mubr.msk.f32.mxu1 %vm539_vm0, %v1404_v31  ;;  %v1663_v18 = vpop.xlane.xlu0 %1662 }
 0x558   : > { %12211 = vrcp.f32 %v1663_v18 }
 0x559   : > { %v12208_v33 = vpop.eup %12207  ;;  %12213 = vrcp.f32 %v1666_v41 }
 0x55a   : > { %v1672_v10 = vpop.xlane.xlu1 %1671  ;;  %v12210_v30 = vpop.eup %12209  ;;  %v1408_v3 = vmul.f32 %v12208_v33, %v12950_v60 }
 0x55b   : > { %v11869_v23 = vpop.permute.xlu0 %11868  ;;  %v1410_v8 = vmul.f32 %v12210_v30, %v12946_v25 }
 0x55c   : > { %v11871_v54 = vunpack.i.h.bf16 %v11869_v23  ;;  %v11870_v57 = vunpack.i.l.bf16 %v11869_v23 }
 0x55e   : > { %v11864_v45 = vpop.permute.xlu1 %11863  ;;  %v11130_v55 = vpack.c.bf16 %v11871_v54, %v11870_v57 }
 0x55f   : > { %v11866_v6 = vunpack.i.h.bf16 %v11864_v45  ;;  %v11865_v52 = vunpack.i.l.bf16 %v11864_v45 }
 0x561   : > { %v11114_v16 = vpack.c.bf16 %v11866_v6, %v11865_v52 }
 0x562   : > { %v12212_v38 = vpop.eup %12211  ;;  %v11879_v60 = vpop.permute.xlu1 %11878 }
 0x563   : > { %11115 = vmatprep.subr.bf16.mxu1 %v11114_v16  ;;  %v1674_v17 = vmul.f32 %v12212_v38, %v12957_v24  ;;  %v11881_v11 = vunpack.i.h.bf16 %v11879_v60  ;;  %v11880_v13 = vunpack.i.l.bf16 %v11879_v60  ;;  %v12214_v15 = vpop.eup %12213 }
 0x564   : > { %11117 = vmatpush3.bf16.msra.mxu1 %v11114_v16  ;;  %v1676_v47 = vmul.f32 %v12214_v15, %v12955_v62 }
 0x565   : > { %11131 = vmatprep.subr.bf16.mxu1 %v11130_v55  ;;  %v11138_v34 = vpack.c.bf16 %v11881_v11, %v11880_v13 }
 0x567   : > { %10245 = vmatmul.mubr.msk.f32.vlgmr.msra.gmra.mrb[8].mxu1 %vm539_vm0, %v1406_v5 }
 0x568   : > { %10247 = vmatprep.mubr.msk.f32.mxu1 %vm539_vm0, %v1408_v3  ;;  %11133 = vmatpush3.bf16.msra.mxu1 %v11130_v55 }
 0x56b   : > { %10248 = vmatmul.mubr.msk.f32.gmra.mrb[10].mxu1 %vm539_vm0, %v1410_v8 }
 0x56c   : > { %10272 = vmatprep.mubr.msk.f32.mxu1 %vm539_vm0, %v1674_v17 }
 0x58c   : > { %v1669_v7 = vpop.xlane.xlu0 %1668 }
 0x58d   : > { %12215 = vrcp.f32 %v1669_v7 }
 0x58e   : > { %12217 = vrcp.f32 %v1672_v10 }
 0x590   : > { %v11874_v12 = vpop.permute.xlu0 %11873 }
 0x591   : > { %v11876_v14 = vunpack.i.h.bf16 %v11874_v12  ;;  %v11875_v19 = vunpack.i.l.bf16 %v11874_v12 }
 0x593   : > { %v11134_v39 = vpack.c.bf16 %v11876_v14, %v11875_v19 }
 0x594   : > { %v11884_v25 = vpop.permute.xlu0 %11883 }
 0x595   : > { %11135 = vmatprep.subr.bf16.mxu1 %v11134_v39  ;;  %v11886_v24 = vunpack.i.h.bf16 %v11884_v25  ;;  %v11885_v20 = vunpack.i.l.bf16 %v11884_v25  ;;  %v12487_v25 = vld [vmem:[%s14944_s6] ss:$0 sm:$0xff] }
 0x596   : > { %11137 = vmatpush3.bf16.msra.mxu1 %v11134_v39 }
 0x597   : > { %v12216_v32 = vpop.eup %12215  ;;  %11139 = vmatprep.subr.bf16.mxu1 %v11138_v34  ;;  %v11142_v51 = vpack.c.bf16 %v11886_v24, %v11885_v20  ;;  %v519_v24 = vld [vmem:[%s14942_s4 + $0x8] sm:$0xff]  ;;  %v520_v20 = vld [vmem:[%s14942_s4 + $0x18] sm:$0xff] }
 0x598   : > { %v12218_v58 = vpop.eup %12217  ;;  %v1678_v4 = vmul.f32 %v12216_v32, %v12981_v42  ;;  %v1824_v42 = vpop.permute.xlu1 %1823  ;;  %v11146_v32 = vpack.c.bf16 %v520_v20, %v519_v24  ;;  %v530_v24 = vld [vmem:[%s14943_s5 + $0x38] sm:$0xff] }
 0x599   : > { %10273 = vmatmul.mubr.msk.f32.vlgmr.msra.gmra.mrb[8].mxu1 %vm539_vm0, %v1676_v47  ;;  %v1680_v63 = vmul.f32 %v12218_v58, %v12963_v56  ;;  %v521_v47 = vld [vmem:[%s14942_s4 + $0x28] sm:$0xff] }
 0x59a   : > { %10275 = vmatprep.mubr.msk.f32.mxu1 %vm539_vm0, %v1678_v4  ;;  %11141 = vmatpush3.bf16.msra.mxu1 %v11138_v34  ;;  %v523_v4 = vld [vmem:[%s14943_s5] sm:$0xff] }
 0x59b   : > { %11143 = vmatprep.subr.bf16.mxu1 %v11142_v51  ;;  %11147 = vmatprep.subr.bf16.mxu0 %v11146_v32 }
 0x59c   : > { %11149 = vmatpush3.bf16.msra.mxu0 %v11146_v32  ;;  %v531_v32 = vld [vmem:[%s14943_s5 + $0x40] sm:$0xff] }
 0x59d   : > { %10276 = vmatmul.mubr.msk.f32.gmra.mrb[10].mxu1 %vm539_vm0, %v1680_v63  ;;  %v524_v63 = vld [vmem:[%s14943_s5 + $0x8] sm:$0xff] }
 0x59e   : > { %11145 = vmatpush3.bf16.msra.mxu1 %v11142_v51  ;;  %v522_v51 = vld [vmem:[%s14942_s4 + $0x38] sm:$0xff] }
 0x59f   : > { %v11150_v58 = vpack.c.bf16 %v522_v51, %v521_v47  ;;  %v532_v47 = vld [vmem:[%s14943_s5 + $0x48] sm:$0xff]  ;;  %v533_v51 = vld [vmem:[%s14943_s5 + $0x50] sm:$0xff] }
 0x5a1   : > { %11151 = vmatprep.subr.bf16.mxu0 %v11150_v58 }
 0x5a2   : > { %11153 = vmatpush3.bf16.msra.mxu0 %v11150_v58  ;;  %v11170_v58 = vpack.c.bf16 %v532_v47, %v531_v32 }
 0x66c   : > { %v10274_v40 = vpop.f32.mrb[8].mxu1 }
 0x66d   : > { %v1783_v0 = vpop.f32.mrb[9].mxu1 }
 0x66e   : > { %10286 = vmatprep.mubr.msk.f32.mxu1 %vm539_vm0, %v1783_v0 }
 0x66f   : > { %10287 = vmatmul.mubr.msk.f32.vlgmr.msra.gmra.mrb[12].mxu1 %vm539_vm0, %v10274_v40  ;;  %v11154_v40 = vpack.c.bf16 %v524_v63, %v523_v4  ;;  %v534_v4 = vld [vmem:[%s14943_s5 + $0x58] sm:$0xff] }
 0x670   : > { %v10277_v62 = vpop.f32.mrb[10].mxu1  ;;  %v11174_v63 = vpack.c.bf16 %v534_v4, %v533_v51 }
 0x671   : > { %v1793_v43 = vpop.f32.mrb[11].mxu1  ;;  %11155 = vmatprep.subr.bf16.mxu1 %v11154_v40 }
 0x672   : > { %10289 = vmatprep.mubr.msk.f32.mxu1 %vm539_vm0, %v1793_v43  ;;  %11157 = vmatpush3.bf16.msra.mxu1 %v11154_v40  ;;  %v535_v40 = vld [vmem:[%s14943_s5 + $0x60] sm:$0xff] }
 0x673   : > { %10290 = vmatmul.mubr.msk.f32.gmra.mrb[14].mxu1 %vm539_vm0, %v10277_v62 }
 0x742   : > { %v10288_v31 = vpop.f32.mrb[12].mxu1 }
 0x743   : > { %v1910_v44 = vadd.f32 %v10288_v31, %v1824_v42  ;;  %v1904_v56 = vpop.f32.mrb[13].mxu1 }
 0x744   : > { %v1905_v41 = vadd.f32 %v1904_v56, %v1824_v42 }
 0x745   : > { %v13037_v18 = vadd.f32 %v1910_v44, %v12612_v27 }
 0x746   : > { %v13040_v10 = vadd.f32 %v1905_v41, %v12604_v21  ;;  %v10291_v23 = vpop.f32.mrb[14].mxu1 }
 0x747   : > { %v1914_v45 = vpop.f32.mrb[15].mxu1  ;;  %v1930_v54 = vsel %vm539_vm0, %v13037_v18, 0.0  ;;  %v1920_v57 = vadd.f32 %v10291_v23, %v1824_v42 }
 0x748   : > { %v1915_v6 = vadd.f32 %v1914_v45, %v1824_v42  ;;  %1931 = vadd.xlane.f32.xlu1 %v1930_v54  ;;  %v1927_v52 = vsel %vm539_vm0, %v13040_v10, 0.0 }
 0x749   : > { %1928 = vadd.xlane.f32.xlu0 %v1927_v52  ;;  %v13050_v27 = vadd.f32 %v1920_v57, %v12614_v28 }
 0x74a   : > { %v13047_v16 = vadd.f32 %v1915_v6, %v12606_v22 }
 0x74b   : > { %v1936_v53 = vsel %vm539_vm0, %v13050_v27, 0.0 }
 0x74c   : > { %v1933_v21 = vsel %vm539_vm0, %v13047_v16, 0.0 }
 0x74d   : > { %1934 = vadd.xlane.f32.xlu0 %v1933_v21 }
 0x751   : > { %1937 = vadd.xlane.f32.xlu0 %v1936_v53 }
 0x7d5   : > { %v1932_v33 = vpop.xlane.xlu1 %1931 }
 0x7d6   : > { %v1940_v55 = vmul.f32 0.03125, %v1932_v33  ;;  %v1929_v5 = vpop.xlane.xlu0 %1928 }
 0x7d7   : > { %v1939_v30 = vmul.f32 0.03125, %v1929_v5 }
 0x7d8   : > { %v1944_v3 = vsub.f32 %v13037_v18, %v1940_v55 }
 0x7d9   : > { %v1943_v22 = vsub.f32 %v13040_v10, %v1939_v30 }
 0x7da   : > { %v1935_v38 = vpop.xlane.xlu0 %1934  ;;  %v1948_v8 = vmul.f32 %v1944_v3, %v1944_v3 }
 0x7db   : > { %v1941_v28 = vmul.f32 0.03125, %v1935_v38  ;;  %v1947_v17 = vmul.f32 %v1943_v22, %v1943_v22 }
 0x7dc   : > { %v1954_v7 = vsel %vm539_vm0, %v1948_v8, 0.0 }
 0x7dd   : > { %v1945_v12 = vsub.f32 %v13047_v16, %v1941_v28  ;;  %1955 = vadd.xlane.f32.xlu0 %v1954_v7  ;;  %v1951_v60 = vsel %vm539_vm0, %v1947_v17, 0.0 }
 0x7de   : > { %1952 = vadd.xlane.f32.xlu1 %v1951_v60  ;;  %v1938_v14 = vpop.xlane.xlu0 %1937 }
 0x7df   : > { %v1942_v19 = vmul.f32 0.03125, %v1938_v14  ;;  %v1949_v11 = vmul.f32 %v1945_v12, %v1945_v12 }
 0x7e1   : > { %v1946_v13 = vsub.f32 %v13050_v27, %v1942_v19  ;;  %v1957_v39 = vsel %vm539_vm0, %v1949_v11, 0.0 }
 0x7e2   : > { %1958 = vadd.xlane.f32.xlu1 %v1957_v39 }
 0x7e3   : > { %v1950_v34 = vmul.f32 %v1946_v13, %v1946_v13 }
 0x7e5   : > { %v1960_v15 = vsel %vm539_vm0, %v1950_v34, 0.0  ;;  %v528_v34 = vld [vmem:[%s14943_s5 + $0x28] sm:$0xff] }
 0x7e6   : > { %1961 = vadd.xlane.f32.xlu0 %v1960_v15 }
 0x7f3   : > { %1979 = vrot.lane.b32.xlu1 %v12487_v25, %s12502_s14 }
 0x7fc   : > { %1986 = vrot.lane.b32.xlu0 %v12487_v25, %s12503_s15  ;;  %v529_v25 = vld [vmem:[%s14943_s5 + $0x30] sm:$0xff] }
 0x7fd   : > { %v11166_v20 = vpack.c.bf16 %v530_v24, %v529_v25 }
 0x86a   : > { %v1956_v0 = vpop.xlane.xlu0 %1955 }
 0x86b   : > { %v1964_v62 = vmul.f32 0.03125, %v1956_v0  ;;  %v1953_v43 = vpop.xlane.xlu1 %1952  ;;  %v536_v0 = vld [vmem:[%s14943_s5 + $0x68] sm:$0xff] }
 0x86c   : > { %v1963_v42 = vmul.f32 0.03125, %v1953_v43  ;;  %v537_v43 = vld [vmem:[%s14943_s5 + $0x70] sm:$0xff] }
 0x86d   : > { %v1968_v31 = vadd.f32 1e-05, %v1964_v62  ;;  %v11178_v62 = vpack.c.bf16 %v536_v0, %v535_v40 }
 0x86e   : > { %v1967_v44 = vadd.f32 1e-05, %v1963_v42  ;;  %v538_v42 = vld [vmem:[%s14943_s5 + $0x78] sm:$0xff] }
 0x86f   : > { %12219 = vrsqrt.f32 %v1968_v31  ;;  %v1959_v56 = vpop.xlane.xlu1 %1958  ;;  %v11182_v31 = vpack.c.bf16 %v538_v42, %v537_v43 }
 0x870   : > { %12221 = vrsqrt.f32 %v1967_v44  ;;  %v1965_v41 = vmul.f32 0.03125, %v1959_v56  ;;  %v9365_v44 = vld [vmem:[%s14944_s6 + $0x4] ss:$0 sm:$0xff] }
 0x872   : > { %v1969_v23 = vadd.f32 1e-05, %v1965_v41 }
 0x873   : > { %v1962_v45 = vpop.xlane.xlu0 %1961  ;;  %v1980_v52 = vpop.permute.xlu1 %1979 }
 0x874   : > { %12223 = vrsqrt.f32 %v1969_v23  ;;  %v1966_v54 = vmul.f32 0.03125, %v1962_v45 }
 0x876   : > { %v1970_v57 = vadd.f32 1e-05, %v1966_v54 }
 0x877   : > { %v1987_v5 = vpop.permute.xlu0 %1986 }
 0x878   : > { %12225 = vrsqrt.f32 %v1970_v57 }
 0x879   : > { %v12220_v6 = vpop.eup %12219 }
 0x87a   : > { %v12222_v21 = vpop.eup %12221  ;;  %v1976_v53 = vmul.f32 %v12220_v6, %v1944_v3 }
 0x87b   : > { %v1975_v33 = vmul.f32 %v12222_v21, %v1943_v22  ;;  %v525_v22 = vld [vmem:[%s14943_s5 + $0x10] sm:$0xff] }
 0x87c   : > { %v1983_v55 = vmul.f32 %v1980_v52, %v1976_v53 }
 0x87d   : > { %v1982_v30 = vmul.f32 %v1980_v52, %v1975_v33 }
 0x87e   : > { %v12224_v38 = vpop.eup %12223  ;;  %v1990_v17 = vadd.f32 %v1987_v5, %v1983_v55 }
 0x87f   : > { %v1977_v8 = vmul.f32 %v12224_v38, %v1945_v12  ;;  %v1989_v28 = vadd.f32 %v1987_v5, %v1982_v30  ;;  %v526_v12 = vld [vmem:[%s14943_s5 + $0x18] sm:$0xff] }
 0x880   : > { %v11158_v39 = vpack.c.bf16 %v526_v12, %v525_v22 }
 0x881   : > { %v1984_v7 = vmul.f32 %v1980_v52, %v1977_v8  ;;  %10300 = vmatprep.mubr.msk.f32.mxu0 %vm539_vm0, %v1989_v28 }
 0x882   : > { %v12226_v60 = vpop.eup %12225  ;;  %10301 = vmatmul.mubr.msk.f32.vlgmr.msra.gmra.mrb[12].mxu0 %vm539_vm0, %v1990_v17  ;;  %11159 = vmatprep.subr.bf16.mxu1 %v11158_v39 }
 0x883   : > { %v1978_v14 = vmul.f32 %v12226_v60, %v1946_v13  ;;  %v1991_v19 = vadd.f32 %v1987_v5, %v1984_v7  ;;  %11161 = vmatpush3.bf16.msra.mxu1 %v11158_v39  ;;  %v527_v13 = vld [vmem:[%s14943_s5 + $0x20] sm:$0xff] }
 0x884   : > { %v11162_v15 = vpack.c.bf16 %v528_v34, %v527_v13 }
 0x885   : > { %v1985_v11 = vmul.f32 %v1980_v52, %v1978_v14  ;;  %10303 = vmatprep.mubr.msk.f32.mxu0 %vm539_vm0, %v1991_v19 }
 0x886   : > { %11163 = vmatprep.subr.bf16.mxu1 %v11162_v15 }
 0x887   : > { %v1992_v3 = vadd.f32 %v1987_v5, %v1985_v11  ;;  %11165 = vmatpush3.bf16.msra.mxu1 %v11162_v15 }
 0x888   : > { %11167 = vmatprep.subr.bf16.mxu1 %v11166_v20 }
 0x889   : > { %10304 = vmatmul.mubr.msk.f32.gmra.mrb[14].mxu0 %vm539_vm0, %v1992_v3 }
 0x88b   : > { %11169 = vmatpush3.bf16.msra.mxu1 %v11166_v20 }
 0x88c   : > { %11171 = vmatprep.subr.bf16.mxu1 %v11170_v58 }
 0x88f   : > { %11173 = vmatpush3.bf16.msra.mxu1 %v11170_v58 }
 0x890   : > { %11175 = vmatprep.subr.bf16.mxu1 %v11174_v63 }
 0x893   : > { %11177 = vmatpush3.bf16.msra.mxu1 %v11174_v63 }
 0x894   : > { %11179 = vmatprep.subr.bf16.mxu1 %v11178_v62 }
 0x897   : > { %11181 = vmatpush3.bf16.msra.mxu1 %v11178_v62 }
 0x898   : > { %11183 = vmatprep.subr.bf16.mxu1 %v11182_v31 }
 0x89b   : > { %11185 = vmatpush3.bf16.msra.mxu1 %v11182_v31  ;;  %v9370_v31 = vld [vmem:[%s14944_s6 + $0x6] ss:$0 sm:$0xff] }
 0x955   : > { %v10302_v56 = vpop.f32.mrb[12].mxu0 }
 0x956   : > { %v2081_v41 = vadd.f32 %v10302_v56, %v9365_v44  ;;  %v2075_v23 = vpop.f32.mrb[13].mxu0 }
 0x957   : > { %v2076_v45 = vadd.f32 %v9365_v44, %v2075_v23 }
 0x958   : > { %v2099_v54 = vmul.f32 0.044715, %v2081_v41  ;;  %v2095_v32 = vmul.f32 0.5, %v2081_v41 }
 0x959   : > { %v2098_v57 = vmul.f32 0.044715, %v2076_v45  ;;  %v2094_v24 = vmul.f32 0.5, %v2076_v45 }
 0x95a   : > { %v2103_v6 = vmul.f32 %v2099_v54, %v2081_v41 }
 0x95b   : > { %v2102_v52 = vmul.f32 %v2098_v57, %v2076_v45 }
 0x95c   : > { %v2107_v21 = vmul.f32 %v2103_v6, %v2081_v41  ;;  %v10305_v53 = vpop.f32.mrb[14].mxu0 }
 0x95d   : > { %v2091_v33 = vadd.f32 %v10305_v53, %v9365_v44  ;;  %v2085_v55 = vpop.f32.mrb[15].mxu0  ;;  %v2106_v5 = vmul.f32 %v2102_v52, %v2076_v45 }
 0x95e   : > { %v2111_v30 = vadd.f32 %v2107_v21, %v2081_v41  ;;  %v2086_v38 = vadd.f32 %v9365_v44, %v2085_v55 }
 0x95f   : > { %v2101_v8 = vmul.f32 0.044715, %v2091_v33  ;;  %v2110_v28 = vadd.f32 %v2106_v5, %v2076_v45  ;;  %v2097_v62 = vmul.f32 0.5, %v2091_v33 }
 0x960   : > { %v2115_v17 = vmul.f32 0.7978846, %v2111_v30  ;;  %v2100_v7 = vmul.f32 0.044715, %v2086_v38  ;;  %v2096_v40 = vmul.f32 0.5, %v2086_v38 }
 0x961   : > { %v2105_v60 = vmul.f32 %v2101_v8, %v2091_v33  ;;  %v2114_v14 = vmul.f32 0.7978846, %v2110_v28 }
 0x962   : > { %12227 = vtanh.f32 %v2115_v17  ;;  %v2104_v19 = vmul.f32 %v2100_v7, %v2086_v38 }
 0x963   : > { %12229 = vtanh.f32 %v2114_v14  ;;  %v2109_v11 = vmul.f32 %v2105_v60, %v2091_v33 }
 0x964   : > { %v2108_v3 = vmul.f32 %v2104_v19, %v2086_v38 }
 0x965   : > { %v2113_v22 = vadd.f32 %v2109_v11, %v2091_v33 }
 0x966   : > { %v2112_v12 = vadd.f32 %v2108_v3, %v2086_v38 }
 0x967   : > { %v2117_v39 = vmul.f32 0.7978846, %v2113_v22 }
 0x968   : > { %v2116_v13 = vmul.f32 0.7978846, %v2112_v12 }
 0x969   : > { %12231 = vtanh.f32 %v2117_v39 }
 0x96a   : > { %12233 = vtanh.f32 %v2116_v13 }
 0x96c   : > { %v12228_v34 = vpop.eup %12227 }
 0x96d   : > { %v12230_v15 = vpop.eup %12229  ;;  %v2123_v25 = vadd.f32 1.0, %v12228_v34 }
 0x96e   : > { %v2122_v20 = vadd.f32 1.0, %v12230_v15 }
 0x96f   : > { %v2127_v51 = vmul.f32 %v2123_v25, %v2095_v32  ;;  %v13179_v32 = vld [vmem:[%s14942_s4 + $0x50] sm:$0xff] }
 0x970   : > { %v2126_v47 = vmul.f32 %v2122_v20, %v2094_v24  ;;  %v9395_v24 = vld [vmem:[%s14944_s6 + $0x1] ss:$0 sm:$0xff] }
 0x971   : > { %v13174_v20 = vld [vmem:[%s14942_s4 + $0x40] sm:$0xff] }
 0x972   : > { %10338 = vmatprep.mubr.f32.mxu1 %v2126_v47 }
 0x973   : > { %v12232_v58 = vpop.eup %12231  ;;  %10339 = vmatmul.mubr.f32.vlgmr.msra.gmra.mrb[16].mxu1 %v2127_v51  ;;  %v11186_v51 = vpack.c.bf16 %v13179_v32, %v13174_v20 }
 0x974   : > { %v12234_v4 = vpop.eup %12233  ;;  %v2125_v63 = vadd.f32 1.0, %v12232_v58  ;;  %v13188_v58 = vld [vmem:[%s14942_s4 + $0x60] sm:$0xff] }
 0x975   : > { %v2124_v0 = vadd.f32 1.0, %v12234_v4  ;;  %11187 = vmatprep.subr.bf16.mxu0 %v11186_v51  ;;  %v13193_v4 = vld [vmem:[%s14942_s4 + $0x70] sm:$0xff] }
 0x976   : > { %v2129_v42 = vmul.f32 %v2125_v63, %v2097_v62  ;;  %11189 = vmatpush3.bf16.msra.mxu0 %v11186_v51 }
 0x977   : > { %v2128_v43 = vmul.f32 %v2124_v0, %v2096_v40  ;;  %v11190_v40 = vpack.c.bf16 %v13193_v4, %v13188_v58 }
 0x979   : > { %10341 = vmatprep.mubr.f32.mxu1 %v2128_v43  ;;  %11191 = vmatprep.subr.bf16.mxu0 %v11190_v40 }
 0x97a   : > { %10342 = vmatmul.mubr.f32.gmra.mrb[18].mxu1 %v2129_v42  ;;  %11193 = vmatpush3.bf16.msra.mxu0 %v11190_v40 }
 0xa46   : > { %v10340_v44 = vpop.f32.mrb[16].mxu1 }
 0xa47   : > { %v2206_v56 = vadd.f32 %v10340_v44, %v9370_v31  ;;  %v2200_v41 = vpop.f32.mrb[17].mxu1 }
 0xa48   : > { %v2201_v23 = vadd.f32 %v9370_v31, %v2200_v41 }
 0xa49   : > { %v13140_v45 = vadd.f32 %v2206_v56, %v13037_v18 }
 0xa4a   : > { %v13143_v54 = vadd.f32 %v2201_v23, %v13040_v10 }
 0xa4b   : > { %v2256_v57 = vsel %vm539_vm0, %v13140_v45, 0.0 }
 0xa4c   : > { %2257 = vadd.xlane.f32.xlu0 %v2256_v57  ;;  %v2253_v6 = vsel %vm539_vm0, %v13143_v54, 0.0 }
 0xa4d   : > { %v10343_v52 = vpop.f32.mrb[18].mxu1  ;;  %2254 = vadd.xlane.f32.xlu1 %v2253_v6 }
 0xa4e   : > { %v2216_v21 = vadd.f32 %v10343_v52, %v9370_v31  ;;  %v2210_v53 = vpop.f32.mrb[19].mxu1 }
 0xa4f   : > { %v2211_v33 = vadd.f32 %v9370_v31, %v2210_v53 }
 0xa50   : > { %v13150_v55 = vadd.f32 %v2216_v21, %v13050_v27 }
 0xa51   : > { %v13153_v18 = vadd.f32 %v2211_v33, %v13047_v16 }
 0xa52   : > { %v2262_v10 = vsel %vm539_vm0, %v13150_v55, 0.0 }
 0xa53   : > { %2263 = vadd.xlane.f32.xlu0 %v2262_v10  ;;  %v2259_v5 = vsel %vm539_vm0, %v13153_v18, 0.0 }
 0xa54   : > { %2260 = vadd.xlane.f32.xlu1 %v2259_v5 }
 0xad9   : > { %v2258_v30 = vpop.xlane.xlu0 %2257 }
 0xada   : > { %v2266_v38 = vmul.f32 0.03125, %v2258_v30  ;;  %v2255_v8 = vpop.xlane.xlu1 %2254 }
 0xadb   : > { %v2265_v28 = vmul.f32 0.03125, %v2255_v8 }
 0xadc   : > { %v2270_v17 = vsub.f32 %v13140_v45, %v2266_v38 }
 0xadd   : > { %v2269_v27 = vsub.f32 %v13143_v54, %v2265_v28 }
 0xade   : > { %v2274_v7 = vmul.f32 %v2270_v17, %v2270_v17 }
 0xadf   : > { %v2273_v60 = vmul.f32 %v2269_v27, %v2269_v27 }
 0xae0   : > { %v2264_v16 = vpop.xlane.xlu0 %2263  ;;  %v2280_v14 = vsel %vm539_vm0, %v2274_v7, 0.0 }
 0xae1   : > { %v2268_v19 = vmul.f32 0.03125, %v2264_v16  ;;  %2281 = vadd.xlane.f32.xlu0 %v2280_v14  ;;  %v2261_v11 = vpop.xlane.xlu1 %2260  ;;  %v2277_v3 = vsel %vm539_vm0, %v2273_v60, 0.0 }
 0xae2   : > { %v2267_v22 = vmul.f32 0.03125, %v2261_v11  ;;  %2278 = vadd.xlane.f32.xlu1 %v2277_v3 }
 0xae3   : > { %v2272_v12 = vsub.f32 %v13150_v55, %v2268_v19 }
 0xae4   : > { %v2271_v39 = vsub.f32 %v13153_v18, %v2267_v22 }
 0xae5   : > { %v2276_v13 = vmul.f32 %v2272_v12, %v2272_v12 }
 0xae6   : > { %v2275_v34 = vmul.f32 %v2271_v39, %v2271_v39 }
 0xae7   : > { %v2286_v15 = vsel %vm539_vm0, %v2276_v13, 0.0 }
 0xae8   : > { %2287 = vadd.xlane.f32.xlu0 %v2286_v15  ;;  %v2283_v25 = vsel %vm539_vm0, %v2275_v34, 0.0 }
 0xae9   : > { %2284 = vadd.xlane.f32.xlu1 %v2283_v25 }
 0xafa   : > { %2314 = vrot.lane.b32.xlu1 %v9395_v24, %s12500_s21 }
 0xb6e   : > { %v2282_v0 = vpop.xlane.xlu0 %2281 }
 0xb6f   : > { %v2290_v62 = vmul.f32 0.03125, %v2282_v0  ;;  %v2279_v43 = vpop.xlane.xlu1 %2278 }
 0xb70   : > { %v2289_v42 = vmul.f32 0.03125, %v2279_v43 }
 0xb71   : > { %v2294_v31 = vadd.f32 1e-05, %v2290_v62 }
 0xb72   : > { %v2293_v44 = vadd.f32 1e-05, %v2289_v42 }
 0xb73   : > { %12235 = vrsqrt.f32 %v2294_v31 }
 0xb74   : > { %12237 = vrsqrt.f32 %v2293_v44 }
 0xb75   : > { %v2288_v56 = vpop.xlane.xlu0 %2287 }
 0xb76   : > { %v2292_v41 = vmul.f32 0.03125, %v2288_v56  ;;  %v2285_v23 = vpop.xlane.xlu1 %2284 }
 0xb77   : > { %v2291_v57 = vmul.f32 0.03125, %v2285_v23 }
 0xb78   : > { %v2296_v6 = vadd.f32 1e-05, %v2292_v41 }
 0xb79   : > { %v2295_v52 = vadd.f32 1e-05, %v2291_v57 }
 0xb7a   : > { %12239 = vrsqrt.f32 %v2296_v6  ;;  %v2315_v30 = vpop.permute.xlu1 %2314 }
 0xb7b   : > { %12241 = vrsqrt.f32 %v2295_v52 }
 0xb7d   : > { %v12236_v21 = vpop.eup %12235 }
 0xb7e   : > { %v12238_v53 = vpop.eup %12237  ;;  %v2302_v33 = vmul.f32 %v12236_v21, %v2270_v17  ;;  %v13206_v17 = vld [vmem:[%s14944_s6 + $0x3] ss:$0 sm:$0xff] }
 0xb7f   : > { %v2301_v10 = vmul.f32 %v12238_v53, %v2269_v27 }
 0xb80   : > { %v2310_v5 = vmul.f32 %v9395_v24, %v2302_v33 }
 0xb81   : > { %v2309_v38 = vmul.f32 %v9395_v24, %v2301_v10 }
 0xb82   : > { %v2318_v7 = vadd.f32 %v2315_v30, %v2310_v5 }
 0xb83   : > { %v2317_v8 = vadd.f32 %v2315_v30, %v2309_v38 }
 0xb84   : > { %v12240_v28 = vpop.eup %12239 }
 0xb85   : > { %v12242_v60 = vpop.eup %12241  ;;  %10352 = vmatprep.mubr.msk.f32.mxu0 %vm539_vm0, %v2317_v8  ;;  %v2304_v16 = vmul.f32 %v12240_v28, %v2272_v12 }
 0xb86   : > { %10353 = vmatmul.mubr.msk.f32.vlgmr.msra.gmra.mrb[16].mxu0 %vm539_vm0, %v2318_v7  ;;  %v2303_v14 = vmul.f32 %v12242_v60, %v2271_v39 }
 0xb87   : > { %v2312_v19 = vmul.f32 %v9395_v24, %v2304_v16 }
 0xb88   : > { %v2311_v11 = vmul.f32 %v9395_v24, %v2303_v14 }
 0xb89   : > { %v2320_v22 = vadd.f32 %v2315_v30, %v2312_v19 }
 0xb8a   : > { %v2319_v3 = vadd.f32 %v2315_v30, %v2311_v11 }
 0xb8c   : > { %10355 = vmatprep.mubr.msk.f32.mxu0 %vm539_vm0, %v2319_v3 }
 0xb8d   : > { %10356 = vmatmul.mubr.msk.f32.gmra.mrb[18].mxu0 %vm539_vm0, %v2320_v22 }
 0xc59   : > { %v10354_v27 = vpop.f32.mrb[16].mxu0 }
 0xc5a   : > { %v2409_v13 = vadd.f32 %v10354_v27, %v13206_v17  ;;  %v2403_v12 = vpop.f32.mrb[17].mxu0 }
 0xc5b   : > { %v2404_v34 = vadd.f32 %v13206_v17, %v2403_v12 }
 0xc5c   : > { %v13211_v39 = vmul.f32 %v12734_v1, %v2409_v13  ;;  %v13214_v15 = vmul.f32 %v12740_v2, %v2409_v13  ;;  %v13217_v25 = vmul.f32 %v12880_v61, %v2409_v13  ;;  %v13261_v30 = vmul.f32 %v12968_v9, %v2409_v13 }
 0xc5d   : > { %v11887_v24 = vpack.i.bf16 %v2409_v13, %v2404_v34  ;;  %v13219_v51 = vmul.f32 0.35355338, %v2404_v34  ;;  %v13222_v40 = vmul.f32 %v12734_v1, %v2404_v34  ;;  %v13225_v0 = vmul.f32 %v12740_v2, %v2404_v34 }
 0xc5e   : > { %v13228_v62 = vmul.f32 %v12880_v61, %v2404_v34  ;;  %v13252_v53 = vmul.f32 %v12968_v9, %v2404_v34 }
 0xc5f   : > { %11888 = vrot.lane.b32.xlu0 %v11887_v24, %s12500_s21  ;;  %v2426_v43 = vmul.f32 %v12682_v36, %v13219_v51  ;;  %v11897_v42 = vpack.i.bf16 %v13211_v39, %v13222_v40  ;;  %v11907_v44 = vpack.i.bf16 %v13214_v15, %v13225_v0 }
 0xc60   : > { %v10357_v31 = vpop.f32.mrb[18].mxu0 }
 0xc61   : > { %v2419_v41 = vadd.f32 %v10357_v31, %v13206_v17  ;;  %v2413_v23 = vpop.f32.mrb[19].mxu0  ;;  %10366 = vmatprep.mubr.msk.f32.mxu0 %vm539_vm0, %v2426_v43  ;;  %v13299_v31 = vmul.f32 0.35355338, %v2409_v13 }
 0xc62   : > { %v2414_v57 = vadd.f32 %v13206_v17, %v2413_v23 }
 0xc63   : > { %v13243_v6 = vmul.f32 %v12734_v1, %v2419_v41  ;;  %v13246_v52 = vmul.f32 %v12740_v2, %v2419_v41  ;;  %v13249_v21 = vmul.f32 %v12880_v61, %v2419_v41  ;;  %v13277_v16 = vmul.f32 %v12968_v9, %v2419_v41 }
 0xc64   : > { %v11892_v33 = vpack.i.bf16 %v2419_v41, %v2414_v57  ;;  %v13255_v10 = vmul.f32 %v12734_v1, %v2414_v57  ;;  %v13258_v5 = vmul.f32 %v12740_v2, %v2414_v57  ;;  %v13264_v38 = vmul.f32 %v12880_v61, %v2414_v57 }
 0xc65   : > { %v13274_v60 = vmul.f32 %v12968_v9, %v2414_v57  ;;  %v13304_v23 = vmul.f32 0.35355338, %v2414_v57  ;;  %v2596_v57 = vmul.f32 %v12685_v37, %v13299_v31 }
 0xc66   : > { %11893 = vrot.lane.b32.xlu1 %v11892_v33, %s12500_s21  ;;  %v11902_v8 = vpack.i.bf16 %v13243_v6, %v13255_v10  ;;  %v11912_v28 = vpack.i.bf16 %v13246_v52, %v13258_v5  ;;  %v2427_v33 = vmul.f32 %v12682_v36, %v13299_v31 }
 0xcd1   : > { %v11889_v11 = vpop.permute.xlu0 %11888 }
 0xcd2   : > { %v11891_v3 = vunpack.i.h.bf16 %v11889_v11  ;;  %v11890_v22 = vunpack.i.l.bf16 %v11889_v11  ;;  %v13308_v11 = vmul.f32 0.35355338, %v2419_v41  ;;  %v2595_v41 = vmul.f32 %v12685_v37, %v13219_v51 }
 0xcd4   : > { %v13283_v27 = vpack.c.bf16 %v11891_v3, %v11890_v22  ;;  %v2428_v3 = vmul.f32 %v12682_v36, %v13304_v23  ;;  %v2429_v13 = vmul.f32 %v12682_v36, %v13308_v11  ;;  %v2597_v22 = vmul.f32 %v12685_v37, %v13304_v23 }
 0xcd6   : > { %11196 = vmatprep.subr.msk.bf16.mxu0 %vm12730_vm11, %v13283_v27 }
 0xcd7   : > { %11199 = vmatpush3.bf16.xpose.msk.msra.mxu0 %vm12730_vm11, %v13283_v27 }
 0xcd8   : > { %v11894_v12 = vpop.permute.xlu1 %11893 }
 0xcd9   : > { %v11896_v34 = vunpack.i.h.bf16 %v11894_v12  ;;  %v11895_v24 = vunpack.i.l.bf16 %v11894_v12  ;;  %v2598_v12 = vmul.f32 %v12685_v37, %v13308_v11 }
 0xcdb   : > { %v13291_v43 = vpack.c.bf16 %v11896_v34, %v11895_v24  ;;  %v2970_v34 = vmul.f32 %v12714_v48, %v13219_v51  ;;  %v2971_v24 = vmul.f32 %v12714_v48, %v13299_v31 }
 0xcdd   : > { %11202 = vmatprep.subr.msk.bf16.mxu0 %vm12730_vm11, %v13291_v43 }
 0xcdf   : > { %11205 = vmatpush3.bf16.xpose.msk.msra.mxu0 %vm12730_vm11, %v13291_v43 }
 0xce0   : > { %11208 = vmatprep.subr.msk.bf16.mxu0 %vm12730_vm11, %v13283_v27 }
 0xce6   : > { %10367 = vmatmul.mubr.msk.f32.vlgmr.msra.gmra.mrb[20].mxu0 %vm539_vm0, %v2427_v33  ;;  %v2972_v33 = vmul.f32 %v12714_v48, %v13304_v23 }
 0xce7   : > { %10369 = vmatprep.mubr.msk.f32.mxu0 %vm539_vm0, %v2428_v3  ;;  %11211 = vmatpush3.bf16.xpose.msk.msra.mxu0 %vm12730_vm11, %v13283_v27  ;;  %v2973_v3 = vmul.f32 %v12714_v48, %v13308_v11 }
 0xce8   : > { %11214 = vmatprep.subr.msk.bf16.mxu0 %vm12730_vm11, %v13291_v43 }
 0xcea   : > { %10370 = vmatmul.mubr.msk.f32.gmra.mrb[22].mxu0 %vm539_vm0, %v2429_v13 }
 0xceb   : > { %10380 = vmatprep.mubr.msk.f32.mxu0 %vm539_vm0, %v2595_v41 }
 0xcef   : > { %11217 = vmatpush3.bf16.xpose.msk.msra.mxu0 %vm12730_vm11, %v13291_v43 }
 0xcf0   : > { %11236 = vmatprep.subr.msk.bf16.mxu0 %vm12730_vm11, %v13283_v27 }
 0xcf6   : > { %10381 = vmatmul.mubr.msk.f32.vlgmr.msra.gmra.mrb[24].mxu0 %vm539_vm0, %v2596_v57 }
 0xcf7   : > { %10383 = vmatprep.mubr.msk.f32.mxu0 %vm539_vm0, %v2597_v22  ;;  %11239 = vmatpush3.bf16.xpose.msk.msra.mxu0 %vm12730_vm11, %v13283_v27 }
 0xcf8   : > { %11242 = vmatprep.subr.msk.bf16.mxu0 %vm12730_vm11, %v13291_v43 }
 0xcfa   : > { %10384 = vmatmul.mubr.msk.f32.gmra.mrb[26].mxu0 %vm539_vm0, %v2598_v12 }
 0xcfb   : > { %10422 = vmatprep.mubr.msk.f32.mxu0 %vm539_vm0, %v2970_v34 }
 0xcff   : > { %11245 = vmatpush3.bf16.xpose.msk.msra.mxu0 %vm12730_vm11, %v13291_v43 }
 0xd06   : > { %10423 = vmatmul.mubr.msk.f32.vlgmr.msra.gmra.mrb[28].mxu0 %vm539_vm0, %v2971_v24 }
 0xd07   : > { %10425 = vmatprep.mubr.msk.f32.mxu0 %vm539_vm0, %v2972_v33 }
 0xd0a   : > { %10426 = vmatmul.mubr.msk.f32.gmra.mrb[30].mxu0 %vm539_vm0, %v2973_v3 }
 0xdb9   : > { %v10368_v13 = vpop.f32.mrb[20].mxu0 }
 0xdba   : > { %v2528_v41 = vpop.f32.mrb[21].mxu0  ;;  %v2550_v57 = vsel %vm539_vm0, %v10368_v13, -inf }
 0xdbb   : > { %2551 = vmax.xlane.f32.xlu1 %v2550_v57  ;;  %v2547_v22 = vsel %vm539_vm0, %v2528_v41, -inf }
 0xdbc   : > { %2548 = vmax.xlane.f32.xlu0 %v2547_v22 }
 0xdbd   : > { %v10371_v12 = vpop.f32.mrb[22].mxu0 }
 0xdbe   : > { %v2538_v34 = vpop.f32.mrb[23].mxu0  ;;  %v2556_v35 = vsel %vm539_vm0, %v10371_v12, -inf }
 0xdbf   : > { %2557 = vmax.xlane.f32.xlu1 %v2556_v35  ;;  %v2553_v24 = vsel %vm539_vm0, %v2538_v34, -inf }
 0xdc0   : > { %2554 = vmax.xlane.f32.xlu0 %v2553_v24 }
 0xdc9   : > { %v10382_v33 = vpop.f32.mrb[24].mxu0 }
 0xdca   : > { %v2677_v26 = vpop.f32.mrb[25].mxu0  ;;  %v2699_v3 = vsel %vm539_vm0, %v10382_v33, -inf }
 0xdcb   : > { %2700 = vmax.xlane.f32.xlu0 %v2699_v3  ;;  %v2696_v63 = vsel %vm539_vm0, %v2677_v26, -inf }
 0xdcc   : > { %2697 = vmax.xlane.f32.xlu1 %v2696_v63 }
 0xdcd   : > { %v10385_v57 = vpop.f32.mrb[26].mxu0 }
 0xdce   : > { %v2687_v47 = vpop.f32.mrb[27].mxu0  ;;  %v2705_v22 = vsel %vm539_vm0, %v10385_v57, -inf }
 0xdcf   : > { %v2702_v14 = vsel %vm539_vm0, %v2687_v47, -inf }
 0xdd0   : > { %2706 = vmax.xlane.f32.xlu1 %v2705_v22  ;;  %2703 = vmax.xlane.f32.xlu0 %v2702_v14 }
 0xdd9   : > { %v13370_v35 = vpop.f32.mrb[28].mxu0 }
 0xdda   : > { %v13372_v19 = vpop.f32.mrb[29].mxu0  ;;  %v3074_v63 = vsel %vm539_vm0, %v13370_v35, -inf }
 0xddb   : > { %v3071_v14 = vsel %vm539_vm0, %v13372_v19, -inf }
 0xddd   : > { %v13374_v24 = vpop.f32.mrb[30].mxu0 }
 0xdde   : > { %v13376_v7 = vpop.f32.mrb[31].mxu0  ;;  %v3080_v3 = vsel %vm539_vm0, %v13374_v24, -inf }
 0xddf   : > { %v3077_v39 = vsel %vm539_vm0, %v13376_v7, -inf }
 0xde1   : > { %11898 = vrot.lane.b32.xlu1 %v11897_v42, %s12502_s14 }
 0xde6   : > { %11903 = vrot.lane.b32.xlu0 %v11902_v8, %s12502_s14 }
 0xe05   : > { %3075 = vmax.xlane.f32.xlu1 %v3074_v63  ;;  %3072 = vmax.xlane.f32.xlu0 %v3071_v14 }
 0xe09   : > { %3081 = vmax.xlane.f32.xlu1 %v3080_v3  ;;  %3078 = vmax.xlane.f32.xlu0 %v3077_v39 }
 0xe1a   : > { %11908 = vrot.lane.b32.xlu1 %v11907_v44, %s12502_s14 }
 0xe1f   : > { %11913 = vrot.lane.b32.xlu0 %v11912_v28, %s12502_s14 }
 0xe48   : > { %v2552_v40 = vpop.xlane.xlu1 %2551 }
 0xe49   : > { %v2560_v42 = vsub.f32 %v10368_v13, %v2552_v40  ;;  %v2549_v6 = vpop.xlane.xlu0 %2548 }
 0xe4a   : > { %v2559_v10 = vsub.f32 %v2528_v41, %v2549_v6 }
 0xe4b   : > { %v2565_v8 = vmul.f32 1.442695, %v2560_v42 }
 0xe4c   : > { %v2563_v22 = vmul.f32 1.442695, %v2559_v10  ;;  %v2558_v63 = vpop.xlane.xlu1 %2557 }
 0xe4d   : > { %12243 = vpow2.f32 %v2565_v8  ;;  %v2562_v14 = vsub.f32 %v10371_v12, %v2558_v63  ;;  %v2555_v3 = vpop.xlane.xlu0 %2554 }
 0xe4e   : > { %12245 = vpow2.f32 %v2563_v22  ;;  %v2561_v39 = vsub.f32 %v2538_v34, %v2555_v3 }
 0xe4f   : > { %v2569_v56 = vmul.f32 1.442695, %v2562_v14 }
 0xe50   : > { %v2567_v15 = vmul.f32 1.442695, %v2561_v39 }
 0xe51   : > { %12247 = vpow2.f32 %v2569_v56 }
 0xe52   : > { %12249 = vpow2.f32 %v2567_v15 }
 0xe57   : > { %v13402_v0 = vpop.eup %12243 }
 0xe58   : > { %v13404_v44 = vpop.eup %12245  ;;  %v2701_v52 = vpop.xlane.xlu0 %2700  ;;  %v2574_v5 = vsel %vm539_vm0, %v13402_v0, 0.0 }
 0xe59   : > { %v2709_v28 = vsub.f32 %v10382_v33, %v2701_v52  ;;  %v2698_v13 = vpop.xlane.xlu1 %2697  ;;  %2575 = vadd.xlane.f32.xlu1 %v2574_v5  ;;  %v2571_v41 = vsel %vm539_vm0, %v13404_v44, 0.0 }
 0xe5a   : > { %v2708_v12 = vsub.f32 %v2677_v26, %v2698_v13  ;;  %2572 = vadd.xlane.f32.xlu0 %v2571_v41 }
 0xe5b   : > { %v13410_v34 = vpop.eup %12247  ;;  %v2714_v56 = vmul.f32 1.442695, %v2709_v28 }
 0xe5c   : > { %v2712_v40 = vmul.f32 1.442695, %v2708_v12  ;;  %v2580_v42 = vsel %vm539_vm0, %v13410_v34, 0.0  ;;  %v13414_v8 = vpop.eup %12249 }
 0xe5d   : > { %12251 = vpow2.f32 %v2714_v56  ;;  %v2707_v6 = vpop.xlane.xlu1 %2706  ;;  %v2704_v10 = vpop.xlane.xlu0 %2703  ;;  %v2577_v39 = vsel %vm539_vm0, %v13414_v8, 0.0 }
 0xe5e   : > { %12253 = vpow2.f32 %v2712_v40  ;;  %v2711_v33 = vsub.f32 %v10385_v57, %v2707_v6  ;;  %v2710_v22 = vsub.f32 %v2687_v47, %v2704_v10  ;;  %2581 = vadd.xlane.f32.xlu0 %v2580_v42 }
 0xe60   : > { %v2718_v63 = vmul.f32 1.442695, %v2711_v33  ;;  %v2716_v14 = vmul.f32 1.442695, %v2710_v22 }
 0xe61   : > { %v11899_v26 = vpop.permute.xlu1 %11898  ;;  %v11904_v3 = vpop.permute.xlu0 %11903 }
 0xe62   : > { %12255 = vpow2.f32 %v2718_v63  ;;  %v11901_v15 = vunpack.i.h.bf16 %v11899_v26  ;;  %v11900_v52 = vunpack.i.l.bf16 %v11899_v26  ;;  %v11906_v5 = vunpack.i.h.bf16 %v11904_v3  ;;  %2578 = vadd.xlane.f32.xlu0 %v2577_v39 }
 0xe63   : > { %12257 = vpow2.f32 %v2716_v14  ;;  %v11905_v28 = vunpack.i.l.bf16 %v11904_v3 }
 0xe64   : > { %v11218_v13 = vpack.c.bf16 %v11901_v15, %v11900_v52 }
 0xe65   : > { %v11222_v41 = vpack.c.bf16 %v11906_v5, %v11905_v28 }
 0xe66   : > { %11219 = vmatprep.subr.bf16.mxu1 %v11218_v13 }
 0xe67   : > { %v13418_v57 = vpop.eup %12251  ;;  %11221 = vmatpush3.bf16.msra.mxu1 %v11218_v13 }
 0xe68   : > { %v13420_v47 = vpop.eup %12253  ;;  %11223 = vmatprep.subr.bf16.mxu1 %v11222_v41  ;;  %v2723_v12 = vsel %vm539_vm0, %v13418_v57, 0.0 }
 0xe69   : > { %2724 = vadd.xlane.f32.xlu1 %v2723_v12  ;;  %v2720_v56 = vsel %vm539_vm0, %v13420_v47, 0.0 }
 0xe6a   : > { %2721 = vadd.xlane.f32.xlu0 %v2720_v56 }
 0xe6b   : > { %11225 = vmatpush3.bf16.msra.mxu1 %v11222_v41 }
 0xe6c   : > { %v13426_v40 = vpop.eup %12255 }
 0xe6d   : > { %v13428_v42 = vpop.eup %12257  ;;  %v2729_v6 = vsel %vm539_vm0, %v13426_v40, 0.0 }
 0xe6e   : > { %2730 = vadd.xlane.f32.xlu1 %v2729_v6  ;;  %v2726_v10 = vsel %vm539_vm0, %v13428_v42, 0.0 }
 0xe6f   : > { %2727 = vadd.xlane.f32.xlu0 %v2726_v10 }
 0xe92   : > { %v3076_v33 = vpop.xlane.xlu1 %3075  ;;  %v3073_v22 = vpop.xlane.xlu0 %3072 }
 0xe93   : > { %v3084_v63 = vsub.f32 %v13370_v35, %v3076_v33  ;;  %v3083_v14 = vsub.f32 %v13372_v19, %v3073_v22 }
 0xe95   : > { %v3089_v26 = vmul.f32 1.442695, %v3084_v63  ;;  %v3087_v3 = vmul.f32 1.442695, %v3083_v14  ;;  %v14954_v14 = vpack.i.bf16 %v13217_v25, %v13228_v62 }
 0xe96   : > { %v3082_v39 = vpop.xlane.xlu1 %3081  ;;  %v3079_v15 = vpop.xlane.xlu0 %3078 }
 0xe97   : > { %12259 = vpow2.f32 %v3089_v26  ;;  %v3086_v52 = vsub.f32 %v13374_v24, %v3082_v39  ;;  %v3085_v5 = vsub.f32 %v13376_v7, %v3079_v15  ;;  %v14955_v26 = vpack.i.bf16 %v13249_v21, %v13264_v38 }
 0xe98   : > { %12261 = vpow2.f32 %v3087_v3 }
 0xe99   : > { %v3093_v28 = vmul.f32 1.442695, %v3086_v52  ;;  %v3091_v13 = vmul.f32 1.442695, %v3085_v5 }
 0xe9a   : > { %v11909_v41 = vpop.permute.xlu1 %11908  ;;  %v11914_v3 = vpop.permute.xlu0 %11913 }
 0xe9b   : > { %12263 = vpow2.f32 %v3093_v28  ;;  %v11911_v12 = vunpack.i.h.bf16 %v11909_v41  ;;  %v11910_v56 = vunpack.i.l.bf16 %v11909_v41  ;;  %v11916_v21 = vunpack.i.h.bf16 %v11914_v3 }
 0xe9c   : > { %12265 = vpow2.f32 %v3091_v13  ;;  %v11915_v38 = vunpack.i.l.bf16 %v11914_v3 }
 0xe9d   : > { %v11226_v35 = vpack.c.bf16 %v11911_v12, %v11910_v56 }
 0xe9f   : > { %11227 = vmatprep.subr.bf16.mxu1 %v11226_v35 }
 0xea1   : > { %v13438_v19 = vpop.eup %12259 }
 0xea2   : > { %v13440_v6 = vpop.eup %12261  ;;  %v3098_v10 = vsel %vm539_vm0, %v13438_v19, 0.0 }
 0xea3   : > { %3099 = vadd.xlane.f32.xlu0 %v3098_v10  ;;  %v3095_v7 = vsel %vm539_vm0, %v13440_v6, 0.0 }
 0xea4   : > { %3096 = vadd.xlane.f32.xlu1 %v3095_v7 }
 0xea5   : > { %v13446_v24 = vpop.eup %12263 }
 0xea6   : > { %v13448_v33 = vpop.eup %12265  ;;  %v3104_v22 = vsel %vm539_vm0, %v13446_v24, 0.0 }
 0xea7   : > { %3105 = vadd.xlane.f32.xlu0 %v3104_v22  ;;  %v3101_v63 = vsel %vm539_vm0, %v13448_v33, 0.0 }
 0xea8   : > { %3102 = vadd.xlane.f32.xlu1 %v3101_v63  ;;  %v11230_v63 = vpack.c.bf16 %v11916_v21, %v11915_v38 }
 0xeb9   : > { %11918 = vrot.lane.b32.xlu1 %v14954_v14, %s12502_s14 }
 0xebd   : > { %11923 = vrot.lane.b32.xlu0 %v14955_v26, %s12502_s14 }
 0xee6   : > { %v2576_v52 = vpop.xlane.xlu1 %2575 }
 0xee7   : > { %v2573_v39 = vpop.xlane.xlu0 %2572 }
 0xeeb   : > { %v2582_v15 = vpop.xlane.xlu0 %2581 }
 0xeef   : > { %v2579_v5 = vpop.xlane.xlu0 %2578 }
 0xef6   : > { %v2725_v28 = vpop.xlane.xlu1 %2724 }
 0xef7   : > { %12267 = vrcp.f32 %v2725_v28  ;;  %v2722_v13 = vpop.xlane.xlu0 %2721 }
 0xef8   : > { %12269 = vrcp.f32 %v2722_v13 }
 0xef9   : > { %12271 = vrcp.f32 %v2573_v39 }
 0xefb   : > { %v2731_v41 = vpop.xlane.xlu1 %2730 }
 0xefc   : > { %12273 = vrcp.f32 %v2731_v41  ;;  %v2728_v12 = vpop.xlane.xlu0 %2727 }
 0xefd   : > { %12275 = vrcp.f32 %v2728_v12 }
 0xefe   : > { %12277 = vrcp.f32 %v2576_v52 }
 0xeff   : > { %12279 = vrcp.f32 %v2579_v5 }
 0xf00   : > { %12281 = vrcp.f32 %v2582_v15 }
 0xf01   : > { %v12268_v25 = vpop.eup %12267 }
 0xf02   : > { %v12270_v62 = vpop.eup %12269  ;;  %v2735_v10 = vmul.f32 %v12268_v25, %v13418_v57 }
 0xf03   : > { %v2733_v56 = vmul.f32 %v12270_v62, %v13420_v47  ;;  %v12272_v7 = vpop.eup %12271 }
 0xf04   : > { %v2584_v47 = vmul.f32 %v12272_v7, %v13404_v44 }
 0xf05   : > { %10394 = vmatprep.mubr.msk.f32.mxu1 %vm539_vm0, %v2733_v56 }
 0xf06   : > { %v12274_v22 = vpop.eup %12273  ;;  %10395 = vmatmul.mubr.msk.f32.vlgmr.msra.gmra.mrb[20].mxu1 %vm539_vm0, %v2735_v10 }
 0xf07   : > { %v12276_v14 = vpop.eup %12275  ;;  %11229 = vmatpush3.bf16.msra.mxu1 %v11226_v35  ;;  %v2739_v26 = vmul.f32 %v12274_v22, %v13426_v40 }
 0xf08   : > { %11231 = vmatprep.subr.bf16.mxu1 %v11230_v63  ;;  %v2737_v39 = vmul.f32 %v12276_v14, %v13428_v42  ;;  %v12278_v3 = vpop.eup %12277  ;;  %v3236_v14 = vmul.f32 %v12717_v49, %v13219_v51  ;;  %v3238_v51 = vmul.f32 %v12717_v49, %v13304_v23 }
 0xf09   : > { %v12280_v57 = vpop.eup %12279  ;;  %v2586_v15 = vmul.f32 %v12278_v3, %v13402_v0 }
 0xf0a   : > { %10397 = vmatprep.mubr.msk.f32.mxu1 %vm539_vm0, %v2737_v39  ;;  %v12282_v52 = vpop.eup %12281  ;;  %v2588_v35 = vmul.f32 %v12280_v57, %v13414_v8 }
 0xf0b   : > { %10398 = vmatmul.mubr.msk.f32.gmra.mrb[22].mxu1 %vm539_vm0, %v2739_v26  ;;  %v2590_v40 = vmul.f32 %v12282_v52, %v13410_v34 }
 0xf0c   : > { %11233 = vmatpush3.bf16.msra.mxu1 %v11230_v63  ;;  %10408 = vmatprep.mubr.msk.f32.mxu1 %vm539_vm0, %v2584_v47 }
 0xf0f   : > { %10409 = vmatmul.mubr.msk.f32.vlgmr.msra.gmra.mrb[20].mxu1 %vm539_vm0, %v2586_v15 }
 0xf10   : > { %10411 = vmatprep.mubr.msk.f32.mxu1 %vm539_vm0, %v2588_v35 }
 0xf13   : > { %10412 = vmatmul.mubr.msk.f32.gmra.mrb[22].mxu1 %vm539_vm0, %v2590_v40 }
 0xf30   : > { %v3100_v44 = vpop.xlane.xlu0 %3099 }
 0xf31   : > { %v3097_v42 = vpop.xlane.xlu1 %3096 }
 0xf32   : > { %12283 = vrcp.f32 %v3097_v42 }
 0xf33   : > { %12285 = vrcp.f32 %v3100_v44 }
 0xf34   : > { %v3106_v5 = vpop.xlane.xlu0 %3105 }
 0xf35   : > { %v3103_v28 = vpop.xlane.xlu1 %3102 }
 0xf36   : > { %12287 = vrcp.f32 %v3103_v28 }
 0xf37   : > { %12289 = vrcp.f32 %v3106_v5 }
 0xf38   : > { %v11924_v13 = vpop.permute.xlu0 %11923 }
 0xf39   : > { %v11919_v0 = vpop.permute.xlu1 %11918  ;;  %v11926_v8 = vunpack.i.h.bf16 %v11924_v13  ;;  %v11925_v25 = vunpack.i.l.bf16 %v11924_v13 }
 0xf3a   : > { %v11921_v41 = vunpack.i.h.bf16 %v11919_v0  ;;  %v11920_v12 = vunpack.i.l.bf16 %v11919_v0 }
 0xf3b   : > { %v11250_v38 = vpack.c.bf16 %v11926_v8, %v11925_v25 }
 0xf3c   : > { %v12284_v62 = vpop.eup %12283  ;;  %v11246_v21 = vpack.c.bf16 %v11921_v41, %v11920_v12 }
 0xf3d   : > { %v3108_v34 = vmul.f32 %v12284_v62, %v13440_v6  ;;  %v12286_v56 = vpop.eup %12285 }
 0xf3e   : > { %11247 = vmatprep.subr.bf16.mxu1 %v11246_v21  ;;  %v3110_v7 = vmul.f32 %v12286_v56, %v13438_v19  ;;  %v3237_v19 = vmul.f32 %v12717_v49, %v13299_v31  ;;  %v14957_v56 = vpack.i.bf16 %v13261_v30, %v13252_v53 }
 0xf3f   : > { %11249 = vmatpush3.bf16.msra.mxu1 %v11246_v21  ;;  %10436 = vmatprep.mubr.msk.f32.mxu1 %vm539_vm0, %v3108_v34 }
 0xf40   : > { %11251 = vmatprep.subr.bf16.mxu1 %v11250_v38  ;;  %v12288_v10 = vpop.eup %12287 }
 0xf41   : > { %v12290_v22 = vpop.eup %12289  ;;  %v3112_v63 = vmul.f32 %v12288_v10, %v13448_v33  ;;  %v14958_v10 = vpack.i.bf16 %v13179_v32, %v13174_v20 }
 0xf42   : > { %v3114_v6 = vmul.f32 %v12290_v22, %v13446_v24 }
 0xf43   : > { %11253 = vmatpush3.bf16.msra.mxu1 %v11250_v38  ;;  %v14956_v38 = vpack.i.bf16 %v13277_v16, %v13274_v60  ;;  %v493_v60 = vld [vmem:[%s410_s29] sm:$0xff]  ;;  %v494_v16 = vld [vmem:[%s410_s29 + $0x8] sm:$0xf] }
 0xf44   : > { %11256 = vmatprep.subr.msk.bf16.mxu1 %vm12730_vm11, %v13283_v27 }
 0xf46   : > { %10437 = vmatmul.mubr.msk.f32.vlgmr.msra.gmra.mrb[20].mxu1 %vm539_vm0, %v3110_v7  ;;  %v14959_v7 = vpack.i.bf16 %v13193_v4, %v13188_v58 }
 0xf47   : > { %10439 = vmatprep.mubr.msk.f32.mxu1 %vm539_vm0, %v3112_v63 }
 0xf4a   : > { %10440 = vmatmul.mubr.msk.f32.gmra.mrb[22].mxu1 %vm539_vm0, %v3114_v6 }
 0xf4b   : > { %10450 = vmatprep.mubr.msk.f32.mxu1 %vm539_vm0, %v3236_v14 }
 0xf4c   : > { %11259 = vmatpush3.bf16.xpose.msk.msra.mxu1 %vm12730_vm11, %v13283_v27  ;;  %v3239_v27 = vmul.f32 %v12717_v49, %v13308_v11 }
 0xf4d   : > { %11262 = vmatprep.subr.msk.bf16.mxu1 %vm12730_vm11, %v13291_v43 }
 0xf54   : > { %11265 = vmatpush3.bf16.xpose.msk.msra.mxu1 %vm12730_vm11, %v13291_v43 }
 0xf5b   : > { %10451 = vmatmul.mubr.msk.f32.vlgmr.msra.gmra.mrb[24].mxu1 %vm539_vm0, %v3237_v19 }
 0xf5c   : > { %10453 = vmatprep.mubr.msk.f32.mxu1 %vm539_vm0, %v3238_v51 }
 0xf5f   : > { %10454 = vmatmul.mubr.msk.f32.gmra.mrb[26].mxu1 %vm539_vm0, %v3239_v27 }
0x102e   : > { %v10452_v24 = vpop.f32.mrb[24].mxu1 }
0x102f   : > { %v3318_v33 = vpop.f32.mrb[25].mxu1  ;;  %v3340_v26 = vsel %vm539_vm0, %v10452_v24, -inf }
0x1030   : > { %3341 = vmax.xlane.f32.xlu0 %v3340_v26  ;;  %v3337_v43 = vsel %vm539_vm0, %v3318_v33, -inf }
0x1031   : > { %3338 = vmax.xlane.f32.xlu1 %v3337_v43 }
0x1032   : > { %v10455_v31 = vpop.f32.mrb[26].mxu1 }
0x1033   : > { %v3328_v39 = vpop.f32.mrb[27].mxu1  ;;  %v3346_v3 = vsel %vm539_vm0, %v10455_v31, -inf }
0x1034   : > { %v3343_v23 = vsel %vm539_vm0, %v3328_v39, -inf }
0x1035   : > { %3344 = vmax.xlane.f32.xlu1 %v3343_v23  ;;  %v445_v23 = vld [vmem:[%s14941_s3 + $0x29] sm:$0xf] }
0x1039   : > { %3347 = vmax.xlane.f32.xlu1 %v3346_v3 }
0x10bd   : > { %v3342_v47 = vpop.xlane.xlu0 %3341 }
0x10be   : > { %v3350_v11 = vsub.f32 %v10452_v24, %v3342_v47  ;;  %v3339_v57 = vpop.xlane.xlu1 %3338  ;;  %v444_v47 = vld [vmem:[%s14941_s3 + $0x21] sm:$0xff] }
0x10bf   : > { %v3349_v15 = vsub.f32 %v3318_v33, %v3339_v57 }
0x10c0   : > { %v3355_v52 = vmul.f32 1.442695, %v3350_v11 }
0x10c1   : > { %v3353_v35 = vmul.f32 1.442695, %v3349_v15  ;;  %v12488_v15 = vld [vmem:[%s14941_s3] ss:$0 sm:$0xff] }
0x10c2   : > { %12291 = vpow2.f32 %v3355_v52  ;;  %v3345_v40 = vpop.xlane.xlu1 %3344 }
0x10c3   : > { %12293 = vpow2.f32 %v3353_v35  ;;  %v3351_v44 = vsub.f32 %v3328_v39, %v3345_v40 }
0x10c5   : > { %v3357_v42 = vmul.f32 1.442695, %v3351_v44 }
0x10c6   : > { %v3348_v5 = vpop.xlane.xlu1 %3347 }
0x10c7   : > { %12295 = vpow2.f32 %v3357_v42  ;;  %v3352_v28 = vsub.f32 %v10455_v31, %v3348_v5  ;;  %v12489_v5 = vld [vmem:[%s12589_s27] ss:$0 sm:$0xff] }
0x10c9   : > { %v3359_v13 = vmul.f32 1.442695, %v3352_v28 }
0x10cb   : > { %12297 = vpow2.f32 %v3359_v13 }
0x10cc   : > { %v12292_v0 = vpop.eup %12291 }
0x10cd   : > { %v12294_v41 = vpop.eup %12293  ;;  %v3364_v12 = vsel %vm539_vm0, %v12292_v0, 0.0 }
0x10ce   : > { %3365 = vadd.xlane.f32.xlu1 %v3364_v12  ;;  %v3361_v8 = vsel %vm539_vm0, %v12294_v41, 0.0 }
0x10cf   : > { %3362 = vadd.xlane.f32.xlu0 %v3361_v8 }
0x10d1   : > { %v12296_v25 = vpop.eup %12295 }
0x10d2   : > { %v3367_v62 = vsel %vm539_vm0, %v12296_v25, 0.0 }
0x10d3   : > { %3368 = vadd.xlane.f32.xlu0 %v3367_v62 }
0x10d5   : > { %v12298_v21 = vpop.eup %12297 }
0x10d6   : > { %v3370_v34 = vsel %vm539_vm0, %v12298_v21, 0.0 }
0x10d7   : > { %3371 = vadd.xlane.f32.xlu1 %v3370_v34 }
0x10e8   : > { %11933 = vrot.lane.b32.xlu1 %v14956_v38, %s12502_s14 }
0x10e9   : > { %11928 = vrot.lane.b32.xlu0 %v14957_v56, %s12502_s14 }
0x10ec   : > { %11938 = vrot.lane.b32.xlu1 %v14958_v10, %s12503_s15 }
0x10ed   : > { %11943 = vrot.lane.b32.xlu0 %v14959_v7, %s12503_s15 }
0x10f0   : > { %497 = vperm.xlu1 %11816, %v493_v60  }
0x10f1   : > { %502 = vperm.xlu0 %11815, %v494_v16  }
0x10f4   : > { %3519 = vrot.lane.b32.xlu1 %v13206_v17, %s12503_s15 }
0x115b   : > { %v3366_v30 = vpop.xlane.xlu1 %3365 }
0x115c   : > { %v3363_v53 = vpop.xlane.xlu0 %3362 }
0x115d   : > { %12299 = vrcp.f32 %v3363_v53 }
0x115e   : > { %12301 = vrcp.f32 %v3366_v30 }
0x1160   : > { %v3369_v22 = vpop.xlane.xlu0 %3368 }
0x1161   : > { %12303 = vrcp.f32 %v3369_v22 }
0x1164   : > { %v11929_v20 = vpop.permute.xlu0 %11928  ;;  %v3372_v32 = vpop.xlane.xlu1 %3371 }
0x1165   : > { %v11931_v63 = vunpack.i.h.bf16 %v11929_v20  ;;  %v11930_v6 = vunpack.i.l.bf16 %v11929_v20  ;;  %12305 = vrcp.f32 %v3372_v32 }
0x1167   : > { %v12300_v58 = vpop.eup %12299  ;;  %v11266_v4 = vpack.c.bf16 %v11931_v63, %v11930_v6 }
0x1168   : > { %v11934_v14 = vpop.permute.xlu1 %11933  ;;  %v3374_v19 = vmul.f32 %v12300_v58, %v12294_v41  ;;  %v11944_v17 = vpop.permute.xlu0 %11943 }
0x1169   : > { %v11936_v51 = vunpack.i.h.bf16 %v11934_v14  ;;  %v11935_v27 = vunpack.i.l.bf16 %v11934_v14  ;;  %11267 = vmatprep.subr.bf16.mxu1 %v11266_v4  ;;  %v12302_v33 = vpop.eup %12301  ;;  %v11946_v12 = vunpack.i.h.bf16 %v11944_v17  ;;  %v11945_v8 = vunpack.i.l.bf16 %v11944_v17 }
0x116a   : > { %11269 = vmatpush3.bf16.msra.mxu1 %v11266_v4  ;;  %10464 = vmatprep.mubr.msk.f32.mxu1 %vm539_vm0, %v3374_v19  ;;  %v3376_v31 = vmul.f32 %v12302_v33, %v12292_v0 }
0x116b   : > { %v11270_v24 = vpack.c.bf16 %v11936_v51, %v11935_v27  ;;  %v12304_v43 = vpop.eup %12303  ;;  %v11278_v34 = vpack.c.bf16 %v11946_v12, %v11945_v8  ;;  %v3928_v12 = vld [vmem:[%s14947_s9 + $0x2] sm:$0x5] }
0x116c   : > { %v11939_v26 = vpop.permute.xlu1 %11938  ;;  %v3378_v57 = vmul.f32 %v12304_v43, %v12296_v25 }
0x116d   : > { %11271 = vmatprep.subr.bf16.mxu1 %v11270_v24  ;;  %v11941_v25 = vunpack.i.h.bf16 %v11939_v26  ;;  %v11940_v62 = vunpack.i.l.bf16 %v11939_v26 }
0x116e   : > { %11273 = vmatpush3.bf16.msra.mxu1 %v11270_v24 }
0x116f   : > { %v12306_v39 = vpop.eup %12305 }
0x1170   : > { %v503_v3 = vpop.permute.xlu0 %502  ;;  %v498_v11 = vpop.permute.xlu1 %497  ;;  %v3380_v42 = vmul.f32 %v12306_v39, %v12298_v21  ;;  %v11274_v21 = vpack.c.bf16 %v11941_v25, %v11940_v62 }
0x1171   : > { %v506_v52 = vmul.f32 %v12488_v15, %v503_v3  ;;  %v505_v35 = vmul.f32 %v12488_v15, %v498_v11  ;;  %10465 = vmatmul.mubr.msk.f32.vlgmr.msra.gmra.mrb[20].mxu1 %vm539_vm0, %v3376_v31  ;;  %v13601_v3 = vld [vmem:[%s14947_s9] ss:$0 sm:$0xff] }
0x1172   : > { %10467 = vmatprep.mubr.msk.f32.mxu1 %vm539_vm0, %v3378_v57  ;;  %11275 = vmatprep.subr.bf16.mxu0 %v11274_v21  ;;  %v13615_v11 = vld [vmem:[%s14945_s7] sm:$0xff]  ;;  %v13620_v57 = vld [vmem:[%s14945_s7 + $0x18] sm:$0xff] }
0x1173   : > { %v508_v40 = vadd.f32 %v506_v52, %v445_v23  ;;  %v507_v44 = vadd.f32 %v505_v35, %v444_v47  ;;  %11277 = vmatpush3.bf16.msra.mxu0 %v11274_v21  ;;  %v13608_v47 = vld [vmem:[%s14944_s6 + $0x1] ss:$0 sm:$0xff]  ;;  %v11322_v52 = vpack.c.bf16 %v13620_v57, %v13615_v11  ;;  %v13629_v35 = vld [vmem:[%s14945_s7 + $0x30] sm:$0xff] }
0x1174   : > { %11279 = vmatprep.subr.bf16.mxu0 %v11278_v34  ;;  %v3520_v60 = vpop.permute.xlu1 %3519 }
0x1175   : > { %v13553_v28 = vadd.f32 %v12489_v5, %v508_v40  ;;  %v13555_v13 = vadd.f32 %v12489_v5, %v507_v44  ;;  %10468 = vmatmul.mubr.msk.f32.gmra.mrb[22].mxu1 %vm539_vm0, %v3380_v42  ;;  %11323 = vmatprep.subr.bf16.mxu1 %v11322_v52  ;;  %v13634_v40 = vld [vmem:[%s14945_s7 + $0x48] sm:$0xff]  ;;  %v14960_v5 = vlaneseq }
0x1176   : > { %11325 = vmatpush3.bf16.msra.mxu1 %v11322_v52  ;;  %v11326_v42 = vpack.c.bf16 %v13634_v40, %v13629_v35 }
0x1177   : > { %v3966_v0 = vsel %vm3965_vm12, %v13553_v28, 0.0  ;;  %v3962_v41 = vsel %vm539_vm0, %v13555_v13, 0.0  ;;  %11281 = vmatpush3.bf16.msra.mxu0 %v11278_v34 }
0x1178   : > { %3967 = vadd.xlane.f32.xlu1 %v3966_v0  ;;  %3963 = vadd.xlane.f32.xlu0 %v3962_v41  ;;  %v13641_v0 = vshrl.u32 %v14960_v5, 7 }
0x1179   : > { %11327 = vmatprep.subr.bf16.mxu1 %v11326_v42 }
0x117a   : > { %11329 = vmatpush3.bf16.msra.mxu1 %v11326_v42  ;;  %v13644_v41 = vsub.s32 0, %v13641_v0  ;;  %v13650_v8 = vsub.s32 2, %v13641_v0  ;;  %vm3922_vm15 = vcmp.ge.s32.totalorder %v13641_v0, %v12663_v29 }
0x117c   : > { %v4005_v25 = vrot.slane %v3928_v12, %v13644_v41  ;;  %v4009_v62 = vrot.slane %v3928_v12, %v13650_v8 }
0x117e   : > { %v4015_v21 = vrot.slane %v4005_v25, %v13644_v41  ;;  %v4019_v34 = vrot.slane %v4009_v62, %v13644_v41 }
0x1205   : > { %v3964_v16 = vpop.xlane.xlu0 %3963  ;;  %v3968_v20 = vpop.xlane.xlu1 %3967 }
0x1206   : > { %v3969_v30 = vmul.f32 0.03125, %v3964_v16  ;;  %v3970_v14 = vmul.f32 0.03125, %v3968_v20 }
0x1208   : > { %v13570_v4 = vsub.f32 %v13555_v13, %v3969_v30 }
0x120a   : > { %v3973_v31 = vmul.f32 %v13570_v4, %v13570_v4 }
0x120c   : > { %v3975_v39 = vsel %vm539_vm0, %v3973_v31, 0.0 }
0x1244   : > { %v10466_v38 = vpop.f32.mrb[20].mxu1 }
0x1245   : > { %v3479_v56 = vpop.f32.mrb[21].mxu1 }
0x1246   : > { %10478 = vmatprep.mubr.msk.f32.mxu0 %vm539_vm0, %v3479_v56 }
0x1247   : > { %10479 = vmatmul.mubr.msk.f32.vlgmr.msra.gmra.mrb[32].mxu0 %vm539_vm0, %v10466_v38 }
0x1248   : > { %v10469_v10 = vpop.f32.mrb[22].mxu1 }
0x1249   : > { %v3489_v7 = vpop.f32.mrb[23].mxu1 }
0x124a   : > { %10481 = vmatprep.mubr.msk.f32.mxu0 %vm539_vm0, %v3489_v7 }
0x124b   : > { %10482 = vmatmul.mubr.msk.f32.gmra.mrb[34].mxu0 %vm539_vm0, %v10469_v10 }
0x131a   : > { %v10480_v53 = vpop.f32.mrb[32].mxu0 }
0x131b   : > { %v3600_v22 = vpop.f32.mrb[33].mxu0  ;;  %v3606_v32 = vadd.f32 %v10480_v53, %v3520_v60 }
0x131c   : > { %v3601_v63 = vadd.f32 %v3600_v22, %v3520_v60 }
0x131d   : > { %v13573_v51 = vadd.f32 %v3606_v32, %v13140_v45 }
0x131e   : > { %v13567_v6 = vadd.f32 %v3601_v63, %v13143_v54  ;;  %v10483_v58 = vpop.f32.mrb[34].mxu0  ;;  %v13581_v54 = vsub.f32 %v13553_v28, %v3970_v14 }
0x131f   : > { %v3610_v19 = vpop.f32.mrb[35].mxu0  ;;  %v3616_v27 = vadd.f32 %v10483_v58, %v3520_v60  ;;  %v3626_v43 = vsel %vm539_vm0, %v13573_v51, 0.0 }
0x1320   : > { %v3611_v17 = vadd.f32 %v3610_v19, %v3520_v60  ;;  %v3623_v24 = vsel %vm539_vm0, %v13567_v6, 0.0 }
0x1321   : > { %3624 = vadd.xlane.f32.xlu0 %v3623_v24  ;;  %v13584_v26 = vadd.f32 %v3616_v27, %v13150_v55  ;;  %v3974_v55 = vmul.f32 %v13581_v54, %v13581_v54 }
0x1322   : > { %v13578_v33 = vadd.f32 %v3611_v17, %v13153_v18 }
0x1323   : > { %v3632_v18 = vsel %vm539_vm0, %v13584_v26, 0.0  ;;  %v3978_v23 = vsel %vm3965_vm12, %v3974_v55, 0.0 }
0x1324   : > { %v3629_v45 = vsel %vm539_vm0, %v13578_v33, 0.0 }
0x1325   : > { %3627 = vadd.xlane.f32.xlu0 %v3626_v43  ;;  %3630 = vadd.xlane.f32.xlu1 %v3629_v45 }
0x1329   : > { %3633 = vadd.xlane.f32.xlu0 %v3632_v18  ;;  %3976 = vadd.xlane.f32.xlu1 %v3975_v39 }
0x132d   : > { %3979 = vadd.xlane.f32.xlu0 %v3978_v23 }
0x133a   : > { %3996 = vrot.lane.b32.xlu1 %v13601_v3, %s12500_s21 }
0x133e   : > { %3675 = vrot.lane.b32.xlu1 %v13608_v47, %s12502_s14 }
0x1342   : > { %4022 = vrot.lane.b32.xlu1 %v4015_v21, %s12502_s14 }
0x1346   : > { %4024 = vrot.lane.b32.xlu1 %v4019_v34, %s12502_s14 }
0x13ae   : > { %v3625_v38 = vpop.xlane.xlu0 %3624 }
0x13af   : > { %v3635_v56 = vmul.f32 0.03125, %v3625_v38 }
0x13b1   : > { %v13659_v16 = vsub.f32 %v13567_v6, %v3635_v56 }
0x13b2   : > { %v3628_v10 = vpop.xlane.xlu0 %3627  ;;  %v3631_v7 = vpop.xlane.xlu1 %3630 }
0x13b3   : > { %v3636_v60 = vmul.f32 0.03125, %v3628_v10  ;;  %v3637_v58 = vmul.f32 0.03125, %v3631_v7  ;;  %v3643_v17 = vmul.f32 %v13659_v16, %v13659_v16  ;;  %v9376_v10 = vld [vmem:[%s14942_s4 + $0x58] sm:$0xff]  ;;  %v9377_v7 = vld [vmem:[%s14942_s4 + $0x68] sm:$0xff] }
0x13b5   : > { %v13662_v53 = vsub.f32 %v13573_v51, %v3636_v60  ;;  %v13673_v45 = vsub.f32 %v13578_v33, %v3637_v58  ;;  %v3647_v18 = vsel %vm539_vm0, %v3643_v17, 0.0  ;;  %v9378_v60 = vld [vmem:[%s14942_s4 + $0x78] sm:$0xff] }
0x13b6   : > { %v3634_v30 = vpop.xlane.xlu0 %3633  ;;  %v3977_v22 = vpop.xlane.xlu1 %3976 }
0x13b7   : > { %v3638_v20 = vmul.f32 0.03125, %v3634_v30  ;;  %v3981_v32 = vmul.f32 0.03125, %v3977_v22  ;;  %v3644_v63 = vmul.f32 %v13662_v53, %v13662_v53  ;;  %v3645_v23 = vmul.f32 %v13673_v45, %v13673_v45  ;;  %v9379_v30 = vld [vmem:[%s14943_s5 + $0x80] sm:$0xff]  ;;  %v9380_v22 = vld [vmem:[%s14943_s5 + $0x88] sm:$0xff] }
0x13b9   : > { %v13667_v14 = vsub.f32 %v13584_v26, %v3638_v20  ;;  %v3983_v19 = vadd.f32 1e-05, %v3981_v32  ;;  %v3650_v27 = vsel %vm539_vm0, %v3644_v63, 0.0  ;;  %v3653_v42 = vsel %vm539_vm0, %v3645_v23, 0.0 }
0x13ba   : > { %3651 = vadd.xlane.f32.xlu0 %v3650_v27  ;;  %v3980_v24 = vpop.xlane.xlu0 %3979  ;;  %v3997_v12 = vpop.permute.xlu1 %3996  ;;  %v11290_v20 = vpack.c.bf16 %v9380_v22, %v9379_v30 }
0x13bb   : > { %12307 = vrsqrt.f32 %v3983_v19  ;;  %v3982_v43 = vmul.f32 0.03125, %v3980_v24  ;;  %v3646_v39 = vmul.f32 %v13667_v14, %v13667_v14 }
0x13bd   : > { %v3984_v31 = vadd.f32 1e-05, %v3982_v43  ;;  %v3656_v55 = vsel %vm539_vm0, %v3646_v39, 0.0 }
0x13be   : > { %3648 = vadd.xlane.f32.xlu0 %v3647_v18 }
0x13bf   : > { %12309 = vrsqrt.f32 %v3984_v31 }
0x13c2   : > { %3657 = vadd.xlane.f32.xlu0 %v3656_v55 }
0x13c5   : > { %v12308_v52 = vpop.eup %12307 }
0x13c6   : > { %3654 = vadd.xlane.f32.xlu0 %v3653_v42  ;;  %v3987_v5 = vmul.f32 %v12308_v52, %v13570_v4  ;;  %v9375_v4 = vld [vmem:[%s14942_s4 + $0x48] sm:$0xff]  ;;  %v3676_v42 = vpop.permute.xlu1 %3675 }
0x13c8   : > { %v3993_v25 = vmul.f32 %v13601_v3, %v3987_v5 }
0x13c9   : > { %v12310_v62 = vpop.eup %12309 }
0x13ca   : > { %v3988_v21 = vmul.f32 %v12310_v62, %v13581_v54  ;;  %v3999_v34 = vadd.f32 %v3997_v12, %v3993_v25  ;;  %v11282_v54 = vpack.c.bf16 %v9376_v10, %v9375_v4 }
0x13cc   : > { %v3994_v38 = vmul.f32 %v13601_v3, %v3988_v21  ;;  %10544 = vmatprep.mubr.msk.f32.mxu1 %vm539_vm0, %v3999_v34  ;;  %11283 = vmatprep.subr.bf16.mxu0 %v11282_v54  ;;  %v9381_v34 = vld [vmem:[%s14943_s5 + $0x90] sm:$0xff] }
0x13cd   : > { %11285 = vmatpush3.bf16.msra.mxu0 %v11282_v54 }
0x13ce   : > { %v4000_v56 = vadd.f32 %v3997_v12, %v3994_v38  ;;  %v9382_v38 = vld [vmem:[%s14943_s5 + $0x98] sm:$0xff] }
0x13cf   : > { %v11294_v54 = vpack.c.bf16 %v9382_v38, %v9381_v34 }
0x13d0   : > { %10545 = vmatmul.mubr.msk.f32.vlgmr.msra.gmra.mrb[28].mxu1 %vm539_vm0, %v4000_v56 }
0x13dc   : > { %3682 = vrot.lane.b32.xlu0 %v13608_v47, %s12503_s15  ;;  %v11286_v47 = vpack.c.bf16 %v9378_v60, %v9377_v7  ;;  %v9384_v7 = vld [vmem:[%s14943_s5 + $0xa8] sm:$0xff] }
0x13de   : > { %11287 = vmatprep.subr.bf16.mxu0 %v11286_v47 }
0x13df   : > { %11289 = vmatpush3.bf16.msra.mxu0 %v11286_v47 }
0x13e0   : > { %11291 = vmatprep.subr.bf16.mxu0 %v11290_v20 }
0x1447   : > { %v3652_v32 = vpop.xlane.xlu0 %3651 }
0x1448   : > { %v3660_v63 = vmul.f32 0.03125, %v3652_v32  ;;  %v9385_v32 = vld [vmem:[%s14943_s5 + $0xb0] sm:$0xff] }
0x144a   : > { %v3664_v58 = vadd.f32 1e-05, %v3660_v63  ;;  %v9386_v63 = vld [vmem:[%s14943_s5 + $0xb8] sm:$0xff] }
0x144b   : > { %v3649_v19 = vpop.xlane.xlu0 %3648 }
0x144c   : > { %12311 = vrsqrt.f32 %v3664_v58  ;;  %v3659_v27 = vmul.f32 0.03125, %v3649_v19 }
0x144e   : > { %v3663_v17 = vadd.f32 1e-05, %v3659_v27  ;;  %v11302_v27 = vpack.c.bf16 %v9386_v63, %v9385_v32 }
0x144f   : > { %v3658_v24 = vpop.xlane.xlu0 %3657 }
0x1450   : > { %12313 = vrsqrt.f32 %v3663_v17  ;;  %v3662_v43 = vmul.f32 0.03125, %v3658_v24  ;;  %v9389_v24 = vld [vmem:[%s14943_s5 + $0xd0] sm:$0xff] }
0x1452   : > { %v3666_v31 = vadd.f32 1e-05, %v3662_v43  ;;  %v9390_v43 = vld [vmem:[%s14943_s5 + $0xd8] sm:$0xff] }
0x1453   : > { %v3655_v18 = vpop.xlane.xlu0 %3654 }
0x1454   : > { %12315 = vrsqrt.f32 %v3666_v31  ;;  %v3661_v39 = vmul.f32 0.03125, %v3655_v18  ;;  %v11310_v31 = vpack.c.bf16 %v9390_v43, %v9389_v24  ;;  %v9391_v18 = vld [vmem:[%s14943_s5 + $0xe0] sm:$0xff] }
0x1456   : > { %v12312_v55 = vpop.eup %12311  ;;  %v3665_v23 = vadd.f32 1e-05, %v3661_v39  ;;  %v9392_v39 = vld [vmem:[%s14943_s5 + $0xe8] sm:$0xff] }
0x1457   : > { %v3672_v52 = vmul.f32 %v12312_v55, %v13662_v53  ;;  %v3683_v21 = vpop.permute.xlu0 %3682  ;;  %v11314_v55 = vpack.c.bf16 %v9392_v39, %v9391_v18  ;;  %v9453_v18 = vld [vmem:[%s14944_s6 + $0x5] ss:$0 sm:$0xff] }
0x1458   : > { %12317 = vrsqrt.f32 %v3665_v23  ;;  %v4023_v23 = vpop.permute.xlu1 %4022 }
0x1459   : > { %v3679_v25 = vmul.f32 %v3676_v42, %v3672_v52  ;;  %v9393_v52 = vld [vmem:[%s14943_s5 + $0xf0] sm:$0xff] }
0x145a   : > { %v12314_v5 = vpop.eup %12313 }
0x145b   : > { %v3671_v12 = vmul.f32 %v12314_v5, %v13659_v16  ;;  %v3686_v53 = vadd.f32 %v3683_v21, %v3679_v25  ;;  %v9383_v16 = vld [vmem:[%s14943_s5 + $0xa0] sm:$0xff] }
0x145d   : > { %v3678_v62 = vmul.f32 %v3676_v42, %v3671_v12  ;;  %v4025_v12 = vpop.permute.xlu1 %4024 }
0x145e   : > { %v12316_v56 = vpop.eup %12315  ;;  %v4027_v25 = vsel %vm4026_vm13, %v4023_v23, %v4025_v12 }
0x145f   : > { %v3685_v4 = vadd.f32 %v3683_v21, %v3678_v62  ;;  %v3674_v10 = vmul.f32 %v12316_v56, %v13667_v14  ;;  %v11298_v14 = vpack.c.bf16 %v9384_v7, %v9383_v16 }
0x1461   : > { %10492 = vmatprep.mubr.msk.f32.mxu0 %vm539_vm0, %v3685_v4  ;;  %v3681_v30 = vmul.f32 %v3676_v42, %v3674_v10 }
0x1462   : > { %v12318_v60 = vpop.eup %12317  ;;  %10493 = vmatmul.mubr.msk.f32.vlgmr.msra.gmra.mrb[36].mxu0 %vm539_vm0, %v3686_v53 }
0x1463   : > { %v3673_v47 = vmul.f32 %v12318_v60, %v13673_v45  ;;  %11293 = vmatpush3.bf16.msra.mxu0 %v11290_v20  ;;  %v3688_v19 = vadd.f32 %v3683_v21, %v3681_v30  ;;  %v9387_v45 = vld [vmem:[%s14943_s5 + $0xc0] sm:$0xff]  ;;  %v9388_v20 = vld [vmem:[%s14943_s5 + $0xc8] sm:$0xff] }
0x1464   : > { %11295 = vmatprep.subr.bf16.mxu0 %v11294_v54  ;;  %v11306_v17 = vpack.c.bf16 %v9388_v20, %v9387_v45 }
0x1465   : > { %v3680_v22 = vmul.f32 %v3676_v42, %v3673_v47  ;;  %v9394_v42 = vld [vmem:[%s14943_s5 + $0xf8] sm:$0xff] }
0x1466   : > { %v11318_v5 = vpack.c.bf16 %v9394_v42, %v9393_v52 }
0x1467   : > { %v3687_v58 = vadd.f32 %v3683_v21, %v3680_v22  ;;  %11297 = vmatpush3.bf16.msra.mxu0 %v11294_v54 }
0x1468   : > { %11299 = vmatprep.subr.bf16.mxu0 %v11298_v14 }
0x1469   : > { %10495 = vmatprep.mubr.msk.f32.mxu0 %vm539_vm0, %v3687_v58 }
0x146a   : > { %10496 = vmatmul.mubr.msk.f32.gmra.mrb[38].mxu0 %vm539_vm0, %v3688_v19 }
0x146b   : > { %11301 = vmatpush3.bf16.msra.mxu0 %v11298_v14 }
0x146c   : > { %11303 = vmatprep.subr.bf16.mxu0 %v11302_v27 }
0x146f   : > { %11305 = vmatpush3.bf16.msra.mxu0 %v11302_v27 }
0x1470   : > { %11307 = vmatprep.subr.bf16.mxu0 %v11306_v17 }
0x1473   : > { %11309 = vmatpush3.bf16.msra.mxu0 %v11306_v17 }
0x1474   : > { %11311 = vmatprep.subr.bf16.mxu0 %v11310_v31 }
0x1477   : > { %11313 = vmatpush3.bf16.msra.mxu0 %v11310_v31 }
0x1478   : > { %11315 = vmatprep.subr.bf16.mxu0 %v11314_v55 }
0x147b   : > { %11317 = vmatpush3.bf16.msra.mxu0 %v11314_v55 }
0x147c   : > { %11319 = vmatprep.subr.bf16.mxu0 %v11318_v5 }
0x147f   : > { %11321 = vmatpush3.bf16.msra.mxu0 %v11318_v5 }
0x14a3   : > { %v10546_v62 = vpop.f32.mrb[28].mxu1 }
0x14a4   : > { %v4107_v21 = vadd.f32 %v10546_v62, %v4027_v25  ;;  %v4101_v34 = vpop.f32.mrb[29].mxu1 }
0x14a5   : > { %v4102_v38 = vadd.f32 %v4101_v34, %v4027_v25 }
0x14a6   : > { %v13760_v56 = vmul.f32 %v12734_v1, %v4107_v21  ;;  %v13763_v4 = vmul.f32 %v12740_v2, %v4107_v21  ;;  %v13766_v10 = vmul.f32 %v12880_v61, %v4107_v21  ;;  %v13793_v63 = vmul.f32 %v12968_v9, %v4107_v21 }
0x14a7   : > { %v11947_v53 = vpack.i.bf16 %v4107_v21, %v4102_v38  ;;  %v13768_v54 = vmul.f32 0.35355338, %v4102_v38  ;;  %v13771_v16 = vmul.f32 %v12734_v1, %v4102_v38  ;;  %v13774_v7 = vmul.f32 %v12740_v2, %v4102_v38 }
0x14a8   : > { %v13777_v60 = vmul.f32 %v12880_v61, %v4102_v38  ;;  %v13790_v32 = vmul.f32 %v12968_v9, %v4102_v38  ;;  %v13808_v17 = vmul.f32 0.35355338, %v4107_v21 }
0x14a9   : > { %11948 = vrot.lane.b32.xlu1 %v11947_v53, %s12500_s21  ;;  %v4112_v47 = vmul.f32 %v12682_v36, %v13768_v54  ;;  %v11952_v30 = vpack.i.bf16 %v13760_v56, %v13771_v16  ;;  %v4231_v43 = vmul.f32 %v12685_v37, %v13768_v54  ;;  %v14961_v56 = vpack.i.bf16 %v13763_v4, %v13774_v7 }
0x14aa   : > { %v4113_v24 = vmul.f32 %v12682_v36, %v13808_v17  ;;  %v4232_v31 = vmul.f32 %v12685_v37, %v13808_v17  ;;  %v14962_v16 = vpack.i.bf16 %v13766_v10, %v13777_v60 }
0x14ab   : > { %10551 = vmatprep.mubr.msk.f32.mxu1 %vm539_vm0, %v4112_v47 }
0x151b   : > { %v11949_v19 = vpop.permute.xlu1 %11948 }
0x151c   : > { %v11951_v27 = vunpack.i.h.bf16 %v11949_v19  ;;  %v11950_v45 = vunpack.i.l.bf16 %v11949_v19 }
0x151e   : > { %v13797_v20 = vpack.c.bf16 %v11951_v27, %v11950_v45 }
0x1520   : > { %11332 = vmatprep.subr.msk.bf16.mxu1 %vm12730_vm11, %v13797_v20  ;;  %11356 = vmatprep.subr.msk.bf16.mxu0 %vm12730_vm11, %v13797_v20 }
0x1521   : > { %11335 = vmatpush3.bf16.xpose.msk.msra.mxu1 %vm12730_vm11, %v13797_v20 }
0x1522   : > { %11338 = vmatprep.subr.msk.bf16.mxu1 %vm12730_vm11, %v13797_v20 }
0x1528   : > { %10552 = vmatmul.mubr.msk.f32.vlgmr.msra.gmra.mrb[30].mxu1 %vm539_vm0, %v4113_v24 }
0x1529   : > { %11341 = vmatpush3.bf16.xpose.msk.msra.mxu1 %vm12730_vm11, %v13797_v20  ;;  %10558 = vmatprep.mubr.msk.f32.mxu1 %vm539_vm0, %v4231_v43 }
0x1530   : > { %10559 = vmatmul.mubr.msk.f32.vlgmr.msra.gmra.mrb[32].mxu1 %vm539_vm0, %v4232_v31 }
0x1535   : > { %v10494_v39 = vpop.f32.mrb[36].mxu0 }
0x1536   : > { %v3777_v55 = vadd.f32 %v10494_v39, %v9453_v18  ;;  %v3771_v23 = vpop.f32.mrb[37].mxu0 }
0x1537   : > { %v3772_v52 = vadd.f32 %v9453_v18, %v3771_v23 }
0x1538   : > { %v3795_v42 = vmul.f32 0.044715, %v3777_v55 }
0x1539   : > { %v3794_v5 = vmul.f32 0.044715, %v3772_v52 }
0x153a   : > { %v3799_v12 = vmul.f32 %v3795_v42, %v3777_v55 }
0x153b   : > { %v3798_v25 = vmul.f32 %v3794_v5, %v3772_v52 }
0x153c   : > { %v3803_v62 = vmul.f32 %v3799_v12, %v3777_v55 }
0x153d   : > { %v10497_v21 = vpop.f32.mrb[38].mxu0  ;;  %v3802_v34 = vmul.f32 %v3798_v25, %v3772_v52 }
0x153e   : > { %v3807_v38 = vadd.f32 %v3803_v62, %v3777_v55  ;;  %v3787_v53 = vadd.f32 %v10497_v21, %v9453_v18  ;;  %v3781_v47 = vpop.f32.mrb[39].mxu0  ;;  %v3790_v21 = vmul.f32 0.5, %v3772_v52 }
0x153f   : > { %v3782_v19 = vadd.f32 %v9453_v18, %v3781_v47  ;;  %v3806_v27 = vadd.f32 %v3802_v34, %v3772_v52  ;;  %v4520_v52 = vmul.f32 %v12714_v48, %v13808_v17 }
0x1540   : > { %v3811_v45 = vmul.f32 0.7978846, %v3807_v38  ;;  %v3797_v24 = vmul.f32 0.044715, %v3787_v53  ;;  %v3791_v38 = vmul.f32 0.5, %v3777_v55  ;;  %v4519_v55 = vmul.f32 %v12714_v48, %v13768_v54 }
0x1541   : > { %v3796_v43 = vmul.f32 0.044715, %v3782_v19  ;;  %v3810_v31 = vmul.f32 0.7978846, %v3806_v27 }
0x1542   : > { %12319 = vtanh.f32 %v3811_v45  ;;  %v3801_v39 = vmul.f32 %v3797_v24, %v3787_v53  ;;  %v3792_v24 = vmul.f32 0.5, %v3782_v19 }
0x1543   : > { %v3800_v58 = vmul.f32 %v3796_v43, %v3782_v19  ;;  %12321 = vtanh.f32 %v3810_v31 }
0x1544   : > { %v3805_v23 = vmul.f32 %v3801_v39, %v3787_v53 }
0x1545   : > { %v3804_v44 = vmul.f32 %v3800_v58, %v3782_v19 }
0x1546   : > { %v3809_v42 = vadd.f32 %v3805_v23, %v3787_v53 }
0x1547   : > { %v3808_v5 = vadd.f32 %v3804_v44, %v3782_v19 }
0x1548   : > { %v3813_v12 = vmul.f32 0.7978846, %v3809_v42  ;;  %v3921_v42 = vadd.s32 8, %v13641_v0 }
0x1549   : > { %v3812_v15 = vmul.f32 0.7978846, %v3808_v5 }
0x154a   : > { %12323 = vtanh.f32 %v3813_v12  ;;  %vm3923_vm14 = vcmp.ge.s32.totalorder %v3921_v42, %v12663_v29 }
0x154b   : > { %12325 = vtanh.f32 %v3812_v15  ;;  %v3793_v15 = vmul.f32 0.5, %v3787_v53  ;;  %v12504_v53 = vmov -1e+30  }
0x154c   : > { %v12320_v25 = vpop.eup %12319  ;;  %v13841_v5 = vsel %vm3923_vm14, 0.0, %v12504_v53 }
0x154d   : > { %v12322_v62 = vpop.eup %12321  ;;  %v3819_v18 = vadd.f32 1.0, %v12320_v25  ;;  %v13843_v25 = vsel %vm3922_vm15, 0.0, %v12504_v53 }
0x154e   : > { %v3818_v34 = vadd.f32 1.0, %v12322_v62 }
0x154f   : > { %v3823_v27 = vmul.f32 %v3819_v18, %v3791_v38 }
0x1550   : > { %v3822_v47 = vmul.f32 %v3818_v34, %v3790_v21 }
0x1552   : > { %10530 = vmatprep.mubr.f32.mxu0 %v3822_v47 }
0x1553   : > { %10531 = vmatmul.mubr.f32.vlgmr.msra.gmra.mrb[40].mxu0 %v3823_v27 }
0x1554   : > { %v12324_v45 = vpop.eup %12323  ;;  %11359 = vmatpush3.bf16.xpose.msk.msra.mxu0 %vm12730_vm11, %v13797_v20 }
0x1555   : > { %v12326_v44 = vpop.eup %12325  ;;  %v3821_v58 = vadd.f32 1.0, %v12324_v45  ;;  %v13856_v45 = vld [vmem:[%s14944_s6 + $0x7] ss:$0 sm:$0xff] }
0x1556   : > { %v3820_v43 = vadd.f32 1.0, %v12326_v44 }
0x1557   : > { %v3825_v39 = vmul.f32 %v3821_v58, %v3793_v15 }
0x1558   : > { %v3824_v31 = vmul.f32 %v3820_v43, %v3792_v24 }
0x155a   : > { %10533 = vmatprep.mubr.f32.mxu0 %v3824_v31 }
0x155b   : > { %10534 = vmatmul.mubr.f32.gmra.mrb[42].mxu0 %v3825_v39 }
0x155c   : > { %10579 = vmatprep.mubr.msk.f32.mxu0 %vm539_vm0, %v4519_v55 }
0x155f   : > { %10580 = vmatmul.mubr.msk.f32.vlgmr.msra.gmra.mrb[44].mxu0 %vm539_vm0, %v4520_v52 }
0x15fb   : > { %v10553_v23 = vpop.f32.mrb[30].mxu1 }
0x15fc   : > { %v4196_v19 = vpop.f32.mrb[31].mxu1  ;;  %v4202_v34 = vadd.f32 %v10553_v23, %v13841_v5 }
0x15fd   : > { %v4197_v47 = vadd.f32 %v4196_v19, %v13843_v25 }
0x15fe   : > { %v4210_v0 = vsel %vm4209_vm1, %v4202_v34, -inf }
0x15ff   : > { %v4206_v27 = vsel %vm4205_vm2, %v4197_v47, -inf }
0x1603   : > { %v10560_v12 = vpop.f32.mrb[32].mxu1 }
0x1604   : > { %v4311_v62 = vadd.f32 %v10560_v12, %v13841_v5  ;;  %v4305_v18 = vpop.f32.mrb[33].mxu1 }
0x1605   : > { %v4306_v21 = vadd.f32 %v4305_v18, %v13843_v25 }
0x1606   : > { %v4317_v38 = vsel %vm4209_vm1, %v4311_v62, -inf }
0x1607   : > { %4318 = vmax.xlane.f32.xlu0 %v4317_v38  ;;  %v4314_v29 = vsel %vm4205_vm2, %v4306_v21, -inf }
0x1608   : > { %4315 = vmax.xlane.f32.xlu1 %v4314_v29 }
0x160b   : > { %4211 = vmax.xlane.f32.xlu0 %v4210_v0 }
0x160c   : > { %4207 = vmax.xlane.f32.xlu1 %v4206_v27 }
0x1626   : > { %v10532_v44 = vpop.f32.mrb[40].mxu0 }
0x1627   : > { %v13859_v58 = vadd.f32 %v10532_v44, %v13856_v45  ;;  %v13861_v24 = vpop.f32.mrb[41].mxu0 }
0x162e   : > { %v10535_v43 = vpop.f32.mrb[42].mxu0 }
0x162f   : > { %v13864_v15 = vadd.f32 %v10535_v43, %v13856_v45  ;;  %v3906_v31 = vpop.f32.mrb[43].mxu0 }
0x1630   : > { %v13867_v39 = vadd.f32 %v13856_v45, %v3906_v31 }
0x1632   : > { %v10581_v55 = vpop.f32.mrb[44].mxu0 }
0x1633   : > { %v4599_v52 = vadd.f32 %v10581_v55, %v13841_v5  ;;  %v4593_v23 = vpop.f32.mrb[45].mxu0 }
0x1634   : > { %v4594_v42 = vadd.f32 %v4593_v23, %v13843_v25 }
0x1635   : > { %v4605_v19 = vsel %vm4209_vm1, %v4599_v52, -inf }
0x1636   : > { %4606 = vmax.xlane.f32.xlu0 %v4605_v19  ;;  %v4602_v53 = vsel %vm4205_vm2, %v4594_v42, -inf }
0x1637   : > { %4603 = vmax.xlane.f32.xlu1 %v4602_v53 }
0x1694   : > { %v4319_v12 = vpop.xlane.xlu0 %4318 }
0x1695   : > { %v4321_v18 = vsub.f32 %v4311_v62, %v4319_v12  ;;  %v4316_v38 = vpop.xlane.xlu1 %4315 }
0x1696   : > { %v4320_v29 = vsub.f32 %v4306_v21, %v4316_v38 }
0x1697   : > { %v4324_v0 = vmul.f32 1.442695, %v4321_v18 }
0x1698   : > { %v4322_v27 = vmul.f32 1.442695, %v4320_v29  ;;  %v4212_v44 = vpop.xlane.xlu0 %4211 }
0x1699   : > { %12327 = vpow2.f32 %v4324_v0  ;;  %v4214_v43 = vsub.f32 %v4202_v34, %v4212_v44  ;;  %v4208_v31 = vpop.xlane.xlu1 %4207 }
0x169a   : > { %12329 = vpow2.f32 %v4322_v27  ;;  %v4213_v55 = vsub.f32 %v4197_v47, %v4208_v31 }
0x169b   : > { %v4217_v22 = vmul.f32 1.442695, %v4214_v43 }
0x169c   : > { %v4215_v23 = vmul.f32 1.442695, %v4213_v55 }
0x169d   : > { %12331 = vpow2.f32 %v4217_v22 }
0x169e   : > { %12333 = vpow2.f32 %v4215_v23 }
0x16a3   : > { %v12328_v19 = vpop.eup %12327 }
0x16a4   : > { %v12330_v14 = vpop.eup %12329  ;;  %v4329_v53 = vsel %vm4209_vm1, %v12328_v19, 0.0 }
0x16a5   : > { %4330 = vadd.xlane.f32.xlu0 %v4329_v53  ;;  %v4326_v62 = vsel %vm4205_vm2, %v12330_v14, 0.0 }
0x16a6   : > { %4327 = vadd.xlane.f32.xlu1 %v4326_v62 }
0x16a7   : > { %v12332_v21 = vpop.eup %12331 }
0x16a8   : > { %v12334_v12 = vpop.eup %12333  ;;  %v4222_v18 = vsel %vm4209_vm1, %v12332_v21, 0.0 }
0x16a9   : > { %4223 = vadd.xlane.f32.xlu0 %v4222_v18  ;;  %v4219_v34 = vsel %vm4205_vm2, %v12334_v12, 0.0 }
0x16aa   : > { %4220 = vadd.xlane.f32.xlu1 %v4219_v34 }
0x16bb   : > { %11953 = vrot.lane.b32.xlu1 %v11952_v30, %s12502_s14 }
0x16c3   : > { %v4607_v22 = vpop.xlane.xlu0 %4606 }
0x16c4   : > { %v4609_v47 = vsub.f32 %v4599_v52, %v4607_v22  ;;  %v4604_v29 = vpop.xlane.xlu1 %4603 }
0x16c5   : > { %v4608_v0 = vsub.f32 %v4594_v42, %v4604_v29 }
0x16c6   : > { %v4612_v38 = vmul.f32 1.442695, %v4609_v47 }
0x16c7   : > { %v4610_v27 = vmul.f32 1.442695, %v4608_v0 }
0x16c8   : > { %12335 = vpow2.f32 %v4612_v38 }
0x16c9   : > { %12337 = vpow2.f32 %v4610_v27 }
0x16d2   : > { %v12336_v44 = vpop.eup %12335 }
0x16d3   : > { %v4617_v43 = vsel %vm4209_vm1, %v12336_v44, 0.0  ;;  %v12338_v31 = vpop.eup %12337 }
0x16d4   : > { %4618 = vadd.xlane.f32.xlu0 %v4617_v43  ;;  %v4614_v55 = vsel %vm4205_vm2, %v12338_v31, 0.0 }
0x16df   : > { %4615 = vadd.xlane.f32.xlu1 %v4614_v55 }
0x16ea   : > { %11958 = vrot.lane.b32.xlu0 %v14961_v56, %s12502_s14 }
0x16f0   : > { %11963 = vrot.lane.b32.xlu1 %v14962_v16, %s12502_s14 }
0x1732   : > { %v4331_v30 = vpop.xlane.xlu0 %4330 }
0x1733   : > { %v4328_v52 = vpop.xlane.xlu1 %4327 }
0x1734   : > { %12339 = vrcp.f32 %v4328_v52 }
0x1735   : > { %12341 = vrcp.f32 %v4331_v30 }
0x1736   : > { %v4224_v38 = vpop.xlane.xlu0 %4223 }
0x1737   : > { %v4221_v42 = vpop.xlane.xlu1 %4220 }
0x1738   : > { %12343 = vrcp.f32 %v4221_v42 }
0x1739   : > { %12345 = vrcp.f32 %v4224_v38 }
0x173b   : > { %v11954_v23 = vpop.permute.xlu1 %11953 }
0x173c   : > { %v11956_v53 = vunpack.i.h.bf16 %v11954_v23  ;;  %v11955_v62 = vunpack.i.l.bf16 %v11954_v23 }
0x173e   : > { %v12340_v4 = vpop.eup %12339  ;;  %v11342_v7 = vpack.c.bf16 %v11956_v53, %v11955_v62  ;;  %v4718_v62 = vmul.f32 %v12717_v49, %v13768_v54 }
0x173f   : > { %v12342_v34 = vpop.eup %12341  ;;  %v4333_v10 = vmul.f32 %v12340_v4, %v12330_v14  ;;  %v4719_v4 = vmul.f32 %v12717_v49, %v13808_v17 }
0x1740   : > { %11344 = vmatprep.subr.msk.bf16.mxu1 %vm13891_vm5, %v11342_v7  ;;  %v4335_v22 = vmul.f32 %v12342_v34, %v12328_v19 }
0x1741   : > { %11347 = vmatpush3.bf16.msk.msra.mxu1 %vm13891_vm5, %v11342_v7  ;;  %10565 = vmatprep.mubr.msk.f32.mxu1 %vm4205_vm2, %v4333_v10 }
0x1742   : > { %v12344_v60 = vpop.eup %12343 }
0x1743   : > { %v4226_v47 = vmul.f32 %v12344_v60, %v12334_v12  ;;  %v12346_v55 = vpop.eup %12345 }
0x1744   : > { %10566 = vmatmul.mubr.msk.f32.vlgmr.msra.gmra.mrb[34].mxu1 %vm4205_vm2, %v4335_v22  ;;  %v4228_v12 = vmul.f32 %v12346_v55, %v12332_v21  ;;  %v14966_v55 = vpack.i.bf16 %v13634_v40, %v13629_v35 }
0x1745   : > { %10572 = vmatprep.mubr.msk.f32.mxu1 %vm4205_vm2, %v4226_v47 }
0x1761   : > { %v4619_v29 = vpop.xlane.xlu0 %4618 }
0x1762   : > { %12347 = vrcp.f32 %v4619_v29 }
0x1765   : > { %v11959_v0 = vpop.permute.xlu0 %11958 }
0x1766   : > { %v11961_v14 = vunpack.i.h.bf16 %v11959_v0  ;;  %v11960_v27 = vunpack.i.l.bf16 %v11959_v0 }
0x1768   : > { %v11348_v43 = vpack.c.bf16 %v11961_v14, %v11960_v27 }
0x176a   : > { %11350 = vmatprep.subr.msk.bf16.mxu1 %vm13891_vm5, %v11348_v43 }
0x176b   : > { %11353 = vmatpush3.bf16.msk.msra.mxu1 %vm13891_vm5, %v11348_v43  ;;  %v14965_v43 = vpack.i.bf16 %v13620_v57, %v13615_v11 }
0x176c   : > { %v4616_v19 = vpop.xlane.xlu1 %4615  ;;  %v12348_v42 = vpop.eup %12347 }
0x176d   : > { %12349 = vrcp.f32 %v4616_v19  ;;  %v4623_v53 = vmul.f32 %v12348_v42, %v12336_v44  ;;  %v14967_v19 = vpack.i.bf16 %v13793_v63, %v13790_v32  ;;  %v3897_v63 = vadd.f32 %v13856_v45, %v13861_v24  ;;  %v9490_v45 = vld [vmem:[%s14947_s9 + $0x4] ss:$0 sm:$0xff] }
0x176e   : > { %10573 = vmatmul.mubr.msk.f32.vlgmr.msra.gmra.mrb[34].mxu1 %vm4205_vm2, %v4228_v12 }
0x1770   : > { %v11964_v56 = vpop.permute.xlu1 %11963 }
0x1771   : > { %v11966_v16 = vunpack.i.h.bf16 %v11964_v56  ;;  %v11965_v30 = vunpack.i.l.bf16 %v11964_v56 }
0x1773   : > { %v11360_v52 = vpack.c.bf16 %v11966_v16, %v11965_v30 }
0x1775   : > { %11362 = vmatprep.subr.msk.bf16.mxu1 %vm13891_vm5, %v11360_v52 }
0x1776   : > { %11365 = vmatpush3.bf16.msk.msra.mxu1 %vm13891_vm5, %v11360_v52 }
0x1777   : > { %v12350_v23 = vpop.eup %12349  ;;  %11368 = vmatprep.subr.msk.bf16.mxu1 %vm12730_vm11, %v13797_v20 }
0x1778   : > { %v4621_v21 = vmul.f32 %v12350_v23, %v12338_v31 }
0x177a   : > { %10586 = vmatprep.mubr.msk.f32.mxu1 %vm4205_vm2, %v4621_v21 }
0x177b   : > { %10587 = vmatmul.mubr.msk.f32.vlgmr.msra.gmra.mrb[34].mxu1 %vm4205_vm2, %v4623_v53 }
0x177c   : > { %10593 = vmatprep.mubr.msk.f32.mxu1 %vm539_vm0, %v4718_v62 }
0x177f   : > { %11371 = vmatpush3.bf16.xpose.msk.msra.mxu1 %vm12730_vm11, %v13797_v20 }
0x1786   : > { %10594 = vmatmul.mubr.msk.f32.vlgmr.msra.gmra.mrb[36].mxu1 %vm539_vm0, %v4719_v4 }
0x1859   : > { %v10595_v31 = vpop.f32.mrb[36].mxu1 }
0x185a   : > { %v4798_v44 = vadd.f32 %v10595_v31, %v13841_v5  ;;  %v4792_v7 = vpop.f32.mrb[37].mxu1 }
0x185b   : > { %v4793_v34 = vadd.f32 %v4792_v7, %v13843_v25  ;;  %v13950_v7 = vadd.f32 %v3897_v63, %v13567_v6 }
0x185c   : > { %v4804_v54 = vsel %vm4209_vm1, %v4798_v44, -inf }
0x185d   : > { %4805 = vmax.xlane.f32.xlu0 %v4804_v54  ;;  %v4801_v10 = vsel %vm4205_vm2, %v4793_v34, -inf }
0x185e   : > { %4802 = vmax.xlane.f32.xlu1 %v4801_v10 }
0x18ea   : > { %v4806_v60 = vpop.xlane.xlu0 %4805 }
0x18eb   : > { %v4808_v22 = vsub.f32 %v4798_v44, %v4806_v60  ;;  %v4803_v20 = vpop.xlane.xlu1 %4802 }
0x18ec   : > { %v4807_v47 = vsub.f32 %v4793_v34, %v4803_v20 }
0x18ed   : > { %v4811_v38 = vmul.f32 1.442695, %v4808_v22 }
0x18ee   : > { %v4809_v17 = vmul.f32 1.442695, %v4807_v47 }
0x18ef   : > { %12351 = vpow2.f32 %v4811_v38 }
0x18f0   : > { %12353 = vpow2.f32 %v4809_v17 }
0x18f9   : > { %v12352_v29 = vpop.eup %12351 }
0x18fa   : > { %v12354_v0 = vpop.eup %12353  ;;  %v4816_v14 = vsel %vm4209_vm1, %v12352_v29, 0.0 }
0x18fb   : > { %4817 = vadd.xlane.f32.xlu1 %v4816_v14  ;;  %v4813_v27 = vsel %vm4205_vm2, %v12354_v0, 0.0 }
0x18fc   : > { %4814 = vadd.xlane.f32.xlu0 %v4813_v27 }
0x190c   : > { %11973 = vrot.lane.b32.xlu1 %v14965_v43, %s12503_s15 }
0x1910   : > { %11978 = vrot.lane.b32.xlu1 %v14966_v55, %s12503_s15 }
0x1912   : > { %11968 = vrot.lane.b32.xlu0 %v14967_v19, %s12502_s14 }
0x1916   : > { %4938 = vrot.lane.b32.xlu0 %v9490_v45, %s12500_s21 }
0x1988   : > { %v4818_v12 = vpop.xlane.xlu1 %4817 }
0x1989   : > { %12355 = vrcp.f32 %v4818_v12  ;;  %v4815_v56 = vpop.xlane.xlu0 %4814 }
0x198a   : > { %12357 = vrcp.f32 %v4815_v56  ;;  %v3940_v56 = vld [vmem:[%s14945_s7 + $0x38] sm:$0xff] }
0x198c   : > { %v11974_v16 = vpop.permute.xlu1 %11973 }
0x198d   : > { %v11969_v30 = vpop.permute.xlu0 %11968  ;;  %v11976_v52 = vunpack.i.h.bf16 %v11974_v16  ;;  %v11975_v42 = vunpack.i.l.bf16 %v11974_v16  ;;  %v3941_v16 = vld [vmem:[%s14945_s7 + $0x50] sm:$0xff] }
0x198e   : > { %v11971_v11 = vunpack.i.h.bf16 %v11969_v30  ;;  %v11970_v57 = vunpack.i.l.bf16 %v11969_v30  ;;  %v13982_v30 = vpack.i.bf16 %v3941_v16, %v3940_v56 }
0x198f   : > { %v11378_v23 = vpack.c.bf16 %v11976_v52, %v11975_v42  ;;  %v3938_v52 = vld [vmem:[%s14945_s7 + $0x8] sm:$0xff]  ;;  %v3939_v42 = vld [vmem:[%s14945_s7 + $0x20] sm:$0xff] }
0x1990   : > { %v11372_v21 = vpack.c.bf16 %v11971_v11, %v11970_v57  ;;  %v11979_v53 = vpop.permute.xlu1 %11978  ;;  %v13992_v11 = vpack.i.bf16 %v3939_v42, %v3938_v52  ;;  %v11386_v57 = vpack.c.bf16 %v3939_v42, %v3938_v52 }
0x1991   : > { %v11981_v35 = vunpack.i.h.bf16 %v11979_v53  ;;  %v11980_v40 = vunpack.i.l.bf16 %v11979_v53  ;;  %11379 = vmatprep.subr.bf16.mxu0 %v11378_v23  ;;  %v4939_v6 = vpop.permute.xlu0 %4938 }
0x1992   : > { %11374 = vmatprep.subr.msk.bf16.mxu1 %vm13891_vm5, %v11372_v21  ;;  %11381 = vmatpush3.bf16.msra.mxu0 %v11378_v23  ;;  %v11390_v23 = vpack.c.bf16 %v3941_v16, %v3940_v56  ;;  %v14024_v56 = vadd.f32 %v13864_v15, %v13584_v26 }
0x1993   : > { %v12356_v32 = vpop.eup %12355  ;;  %11377 = vmatpush3.bf16.msk.msra.mxu1 %vm13891_vm5, %v11372_v21  ;;  %v11382_v62 = vpack.c.bf16 %v11981_v35, %v11980_v40  ;;  %v3930_v21 = vld [vmem:[%s14947_s9 + $0x4] sm:$0x5] }
0x1994   : > { %v12358_v4 = vpop.eup %12357  ;;  %v4822_v44 = vmul.f32 %v12356_v32, %v12352_v29  ;;  %v5148_v53 = vrot.slane %v3930_v21, %v13644_v41  ;;  %v5152_v35 = vrot.slane %v3930_v21, %v13650_v8 }
0x1995   : > { %v4820_v31 = vmul.f32 %v12358_v4, %v12354_v0  ;;  %11383 = vmatprep.subr.bf16.mxu0 %v11382_v62 }
0x1996   : > { %11385 = vmatpush3.bf16.msra.mxu0 %v11382_v62  ;;  %v5158_v40 = vrot.slane %v5148_v53, %v13644_v41  ;;  %v5162_v32 = vrot.slane %v5152_v35, %v13644_v41 }
0x1997   : > { %10600 = vmatprep.mubr.msk.f32.mxu1 %vm4205_vm2, %v4820_v31  ;;  %11387 = vmatprep.subr.bf16.mxu0 %v11386_v57 }
0x1998   : > { %10601 = vmatmul.mubr.msk.f32.vlgmr.msra.gmra.mrb[34].mxu1 %vm4205_vm2, %v4822_v44 }
0x1999   : > { %10633 = vmatprep.mubr.msk.f32.mxu1 %vm539_vm0, %v13950_v7 }
0x1a6b   : > { %v10602_v24 = vpop.f32.mrb[34].mxu1 }
0x1a6c   : > { %v4906_v34 = vpop.f32.mrb[35].mxu1 }
0x1a6d   : > { %10611 = vmatprep.mubr.msk.f32.mxu0 %vm539_vm0, %v4906_v34 }
0x1a6e   : > { %10612 = vmatmul.mubr.msk.f32.vlgmr.msra.gmra.mrb[46].mxu0 %vm539_vm0, %v10602_v24 }
0x1a6f   : > { %11389 = vmatpush3.bf16.msra.mxu0 %v11386_v57 }
0x1a70   : > { %11391 = vmatprep.subr.bf16.mxu0 %v11390_v23 }
0x1a73   : > { %11393 = vmatpush3.bf16.msra.mxu0 %v11390_v23 }
0x1b41   : > { %v10613_v54 = vpop.f32.mrb[46].mxu0 }
0x1b42   : > { %v5019_v10 = vadd.f32 %v10613_v54, %v4939_v6  ;;  %v5013_v60 = vpop.f32.mrb[47].mxu0 }
0x1b43   : > { %v5014_v22 = vadd.f32 %v5013_v60, %v4939_v6 }
0x1b44   : > { %v13963_v20 = vadd.f32 %v5019_v10, %v13553_v28 }
0x1b45   : > { %v13966_v47 = vadd.f32 %v5014_v22, %v13555_v13 }
0x1b46   : > { %v5027_v38 = vsel %vm3965_vm12, %v13963_v20, 0.0 }
0x1b47   : > { %5028 = vadd.xlane.f32.xlu0 %v5027_v38  ;;  %v5024_v17 = vsel %vm539_vm0, %v13966_v47, 0.0 }
0x1b48   : > { %5025 = vadd.xlane.f32.xlu1 %v5024_v17 }
0x1bd4   : > { %v5029_v29 = vpop.xlane.xlu0 %5028 }
0x1bd5   : > { %v5031_v0 = vmul.f32 0.03125, %v5029_v29  ;;  %v5026_v14 = vpop.xlane.xlu1 %5025 }
0x1bd6   : > { %v5030_v27 = vmul.f32 0.03125, %v5026_v14 }
0x1bd7   : > { %v5033_v43 = vsub.f32 %v13963_v20, %v5031_v0  ;;  %v14012_v0 = vadd.f32 %v13859_v58, %v13573_v51 }
0x1bd8   : > { %v5032_v28 = vsub.f32 %v13966_v47, %v5030_v27  ;;  %v14016_v27 = vadd.f32 %v13867_v39, %v13578_v33 }
0x1bd9   : > { %v5035_v55 = vmul.f32 %v5033_v43, %v5033_v43 }
0x1bda   : > { %v5034_v19 = vmul.f32 %v5032_v28, %v5032_v28 }
0x1bdb   : > { %v5039_v13 = vsel %vm3965_vm12, %v5035_v55, 0.0 }
0x1bdc   : > { %5040 = vadd.xlane.f32.xlu1 %v5039_v13  ;;  %v5036_v12 = vsel %vm539_vm0, %v5034_v19, 0.0 }
0x1bdd   : > { %5037 = vadd.xlane.f32.xlu0 %v5036_v12 }
0x1bed   : > { %11988 = vrot.lane.b32.xlu1 %v13982_v30, %s12500_s21 }
0x1bf1   : > { %5050 = vrot.lane.b32.xlu1 %v13601_v3, %s12502_s14 }
0x1bf3   : > { %11983 = vrot.lane.b32.xlu0 %v13992_v11, %s12500_s21 }
0x1bf5   : > { %5181 = vrot.lane.b32.xlu1 %v5158_v40, %s12503_s15 }
0x1bf7   : > { %5055 = vrot.lane.b32.xlu0 %v13601_v3, %s12503_s15 }
0x1bf9   : > { %5060 = vrot.lane.b32.xlu1 %v9490_v45, %s12502_s14 }
0x1bfb   : > { %5183 = vrot.lane.b32.xlu0 %v5162_v32, %s12503_s15 }
0x1c69   : > { %v5041_v3 = vpop.xlane.xlu1 %5040 }
0x1c6a   : > { %v5043_v63 = vmul.f32 0.03125, %v5041_v3  ;;  %v5038_v62 = vpop.xlane.xlu0 %5037 }
0x1c6b   : > { %v5042_v4 = vmul.f32 0.03125, %v5038_v62 }
0x1c6c   : > { %v5045_v31 = vadd.f32 1e-05, %v5043_v63 }
0x1c6d   : > { %v5044_v44 = vadd.f32 1e-05, %v5042_v4  ;;  %v11989_v24 = vpop.permute.xlu1 %11988 }
0x1c6e   : > { %12359 = vrsqrt.f32 %v5045_v31  ;;  %v11984_v34 = vpop.permute.xlu0 %11983  ;;  %v11991_v6 = vunpack.i.h.bf16 %v11989_v24  ;;  %v11990_v54 = vunpack.i.l.bf16 %v11989_v24 }
0x1c6f   : > { %12361 = vrsqrt.f32 %v5044_v44  ;;  %v11986_v10 = vunpack.i.h.bf16 %v11984_v34  ;;  %v11985_v60 = vunpack.i.l.bf16 %v11984_v34 }
0x1c70   : > { %v11398_v38 = vpack.c.bf16 %v11991_v6, %v11990_v54 }
0x1c71   : > { %v11394_v22 = vpack.c.bf16 %v11986_v10, %v11985_v60  ;;  %v5051_v17 = vpop.permute.xlu1 %5050 }
0x1c72   : > { %v5056_v13 = vpop.permute.xlu0 %5055 }
0x1c73   : > { %11395 = vmatprep.subr.bf16.mxu1 %v11394_v22 }
0x1c74   : > { %11397 = vmatpush3.bf16.msra.mxu1 %v11394_v22 }
0x1c75   : > { %11399 = vmatprep.subr.bf16.mxu1 %v11398_v38  ;;  %v5182_v39 = vpop.permute.xlu1 %5181 }
0x1c76   : > { %v5184_v33 = vpop.permute.xlu0 %5183 }
0x1c78   : > { %v12360_v45 = vpop.eup %12359  ;;  %11401 = vmatpush3.bf16.msra.mxu1 %v11398_v38 }
0x1c79   : > { %v12362_v29 = vpop.eup %12361  ;;  %v5049_v14 = vmul.f32 %v12360_v45, %v5033_v43  ;;  %v5185_v43 = vsel %vm539_vm0, %v5182_v39, %v5184_v33  ;;  %v5061_v21 = vpop.permute.xlu1 %5060 }
0x1c7a   : > { %v5048_v55 = vmul.f32 %v12362_v29, %v5032_v28 }
0x1c7b   : > { %v5054_v19 = vmul.f32 %v5051_v17, %v5049_v14  ;;  %10634 = vmatmul.mubr.msk.f32.vlgmr.msra.gmra.mrb[38].mxu1 %vm539_vm0, %v14012_v0 }
0x1c7c   : > { %v5053_v12 = vmul.f32 %v5051_v17, %v5048_v55  ;;  %10636 = vmatprep.mubr.msk.f32.mxu1 %vm539_vm0, %v14016_v27 }
0x1c7d   : > { %v5059_v58 = vadd.f32 %v5056_v13, %v5054_v19 }
0x1c7e   : > { %v5058_v51 = vadd.f32 %v5056_v13, %v5053_v12 }
0x1c7f   : > { %10637 = vmatmul.mubr.msk.f32.gmra.mrb[40].mxu1 %vm539_vm0, %v14024_v56 }
0x1c80   : > { %10622 = vmatprep.mubr.msk.f32.mxu0 %vm539_vm0, %v5058_v51 }
0x1c81   : > { %10623 = vmatmul.mubr.msk.f32.vlgmr.msra.gmra.mrb[48].mxu0 %vm539_vm0, %v5059_v58 }
0x1d4e   : > { %v10635_v28 = vpop.f32.mrb[38].mxu1 }
0x1d4f   : > { %v14031_v16 = vadd.f32 %v10635_v28, %v5185_v43  ;;  %v5265_v52 = vpop.f32.mrb[39].mxu1 }
0x1d50   : > { %v14033_v42 = vadd.f32 %v5265_v52, %v5185_v43 }
0x1d52   : > { %v11402_v26 = vpack.c.bf16 %v14031_v16, %v14033_v42  ;;  %v10638_v15 = vpop.f32.mrb[40].mxu1 }
0x1d53   : > { %v14037_v57 = vadd.f32 %v10638_v15, %v5185_v43  ;;  %v5275_v23 = vpop.f32.mrb[41].mxu1 }
0x1d54   : > { %v14039_v53 = vadd.f32 %v5275_v23, %v5185_v43  ;;  %v10624_v35 = vpop.f32.mrb[48].mxu0  ;;  %11404 = vmatprep.subr.msk.bf16.mxu0 %vm12730_vm11, %v11402_v26  ;;  %11416 = vmatprep.subr.msk.bf16.mxu1 %vm12730_vm11, %v11402_v26 }
0x1d55   : > { %v5135_v40 = vpop.f32.mrb[49].mxu0  ;;  %11407 = vmatpush3.bf16.xpose.msk.msra.mxu0 %vm12730_vm11, %v11402_v26  ;;  %11419 = vmatpush3.bf16.xpose.msk.msra.mxu1 %vm12730_vm11, %v11402_v26  ;;  %v5141_v62 = vadd.f32 %v10624_v35, %v5061_v21 }
0x1d56   : > { %v11408_v32 = vpack.c.bf16 %v14037_v57, %v14039_v53  ;;  %v5136_v3 = vadd.f32 %v5135_v40, %v5061_v21 }
0x1d57   : > { %v5285_v44 = vmul.f32 0.35355338, %v5141_v62 }
0x1d58   : > { %v5284_v63 = vmul.f32 0.35355338, %v5136_v3  ;;  %11410 = vmatprep.subr.msk.bf16.mxu0 %vm12730_vm11, %v11408_v32  ;;  %11422 = vmatprep.subr.msk.bf16.mxu1 %vm12730_vm11, %v11408_v32 }
0x1d59   : > { %v5411_v24 = vmul.f32 %v12685_v37, %v5285_v44  ;;  %v5287_v34 = vmul.f32 %v12682_v36, %v5285_v44  ;;  %v5717_v54 = vmul.f32 %v12714_v48, %v5285_v44  ;;  %v5928_v60 = vmul.f32 %v12717_v49, %v5285_v44 }
0x1d5a   : > { %v5286_v4 = vmul.f32 %v12682_v36, %v5284_v63  ;;  %v5410_v31 = vmul.f32 %v12685_v37, %v5284_v63  ;;  %v5716_v6 = vmul.f32 %v12714_v48, %v5284_v63  ;;  %v5927_v10 = vmul.f32 %v12717_v49, %v5284_v63 }
0x1d5c   : > { %10647 = vmatprep.mubr.msk.f32.mxu0 %vm539_vm0, %v5286_v4  ;;  %10658 = vmatprep.mubr.msk.f32.mxu1 %vm539_vm0, %v5410_v31 }
0x1d5d   : > { %11413 = vmatpush3.bf16.xpose.msk.msra.mxu0 %vm12730_vm11, %v11408_v32  ;;  %11425 = vmatpush3.bf16.xpose.msk.msra.mxu1 %vm12730_vm11, %v11408_v32 }
0x1d5e   : > { %11444 = vmatprep.subr.msk.bf16.mxu1 %vm12730_vm11, %v11402_v26 }
0x1d64   : > { %10648 = vmatmul.mubr.msk.f32.vlgmr.msra.gmra.mrb[50].mxu0 %vm539_vm0, %v5287_v34  ;;  %10659 = vmatmul.mubr.msk.f32.vlgmr.msra.gmra.mrb[42].mxu1 %vm539_vm0, %v5411_v24 }
0x1d65   : > { %11447 = vmatpush3.bf16.xpose.msk.msra.mxu1 %vm12730_vm11, %v11402_v26  ;;  %10691 = vmatprep.mubr.msk.f32.mxu1 %vm539_vm0, %v5716_v6 }
0x1d66   : > { %11450 = vmatprep.subr.msk.bf16.mxu1 %vm12730_vm11, %v11408_v32 }
0x1d6d   : > { %11453 = vmatpush3.bf16.xpose.msk.msra.mxu1 %vm12730_vm11, %v11408_v32 }
0x1d6e   : > { %11464 = vmatprep.subr.msk.bf16.mxu1 %vm12730_vm11, %v11402_v26 }
0x1d74   : > { %10692 = vmatmul.mubr.msk.f32.vlgmr.msra.gmra.mrb[44].mxu1 %vm539_vm0, %v5717_v54 }
0x1d75   : > { %11467 = vmatpush3.bf16.xpose.msk.msra.mxu1 %vm12730_vm11, %v11402_v26  ;;  %10713 = vmatprep.mubr.msk.f32.mxu1 %vm539_vm0, %v5927_v10 }
0x1d76   : > { %11470 = vmatprep.subr.msk.bf16.mxu1 %vm12730_vm11, %v11408_v32 }
0x1d7d   : > { %11473 = vmatpush3.bf16.xpose.msk.msra.mxu1 %vm12730_vm11, %v11408_v32 }
0x1d84   : > { %10714 = vmatmul.mubr.msk.f32.vlgmr.msra.gmra.mrb[46].mxu1 %vm539_vm0, %v5928_v60 }
0x1e37   : > { %v14091_v22 = vpop.f32.mrb[50].mxu0  ;;  %v10660_v38 = vpop.f32.mrb[42].mxu1 }
0x1e38   : > { %v14093_v45 = vpop.f32.mrb[51].mxu0  ;;  %v14095_v17 = vpop.f32.mrb[43].mxu1  ;;  %v5496_v29 = vsel %vm3965_vm12, %v10660_v38, -inf  ;;  %v5384_v19 = vsel %vm3965_vm12, %v14091_v22, -inf }
0x1e39   : > { %5497 = vmax.xlane.f32.xlu1 %v5496_v29  ;;  %v5493_v14 = vsel %vm539_vm0, %v14095_v17, -inf  ;;  %v5381_v55 = vsel %vm539_vm0, %v14093_v45, -inf }
0x1e3a   : > { %5494 = vmax.xlane.f32.xlu0 %v5493_v14 }
0x1e3e   : > { %5382 = vmax.xlane.f32.xlu0 %v5381_v55 }
0x1e42   : > { %5385 = vmax.xlane.f32.xlu0 %v5384_v19 }
0x1e47   : > { %v10693_v13 = vpop.f32.mrb[44].mxu1 }
0x1e48   : > { %v14104_v12 = vpop.f32.mrb[45].mxu1  ;;  %v5802_v51 = vsel %vm3965_vm12, %v10693_v13, -inf }
0x1e49   : > { %5803 = vmax.xlane.f32.xlu0 %v5802_v51  ;;  %v5799_v58 = vsel %vm539_vm0, %v14104_v12, -inf }
0x1e4a   : > { %5800 = vmax.xlane.f32.xlu1 %v5799_v58 }
0x1e57   : > { %v10715_v33 = vpop.f32.mrb[46].mxu1 }
0x1e58   : > { %v14109_v39 = vpop.f32.mrb[47].mxu1  ;;  %v6013_v43 = vsel %vm3965_vm12, %v10715_v33, -inf }
0x1e59   : > { %6014 = vmax.xlane.f32.xlu0 %v6013_v43  ;;  %v6010_v28 = vsel %vm539_vm0, %v14109_v39, -inf }
0x1e5b   : > { %11993 = vrot.lane.b32.xlu1 %v12707_v46, %s12503_s15 }
0x1e6f   : > { %11998 = vrot.lane.b32.xlu0 %v12724_v50, %s12503_s15 }
0x1e7f   : > { %6011 = vmax.xlane.f32.xlu1 %v6010_v28 }
0x1ec6   : > { %v5498_v26 = vpop.xlane.xlu1 %5497 }
0x1ec7   : > { %v5495_v52 = vpop.xlane.xlu0 %5494  ;;  %v5500_v51 = vsub.f32 %v10660_v38, %v5498_v26 }
0x1ecb   : > { %v5383_v23 = vpop.xlane.xlu0 %5382 }
0x1ecf   : > { %v5386_v32 = vpop.xlane.xlu0 %5385 }
0x1ed6   : > { %v5804_v6 = vpop.xlane.xlu0 %5803 }
0x1ed7   : > { %v14118_v15 = vpop.xlane.xlu1 %5800 }
0x1edb   : > { %v11994_v21 = vpop.permute.xlu1 %11993 }
0x1edc   : > { %v14120_v35 = vunpack.i.h.bf16 %v11994_v21  ;;  %v14122_v40 = vunpack.i.l.bf16 %v11994_v21  ;;  %v5503_v21 = vmul.f32 1.442695, %v5500_v51 }
0x1ede   : > { %v5518_v46 = vmul.f32 %v14122_v40, %v14033_v42  ;;  %v5519_v50 = vmul.f32 %v14122_v40, %v14031_v16  ;;  %v5520_v3 = vmul.f32 %v14122_v40, %v14039_v53  ;;  %v5521_v63 = vmul.f32 %v14122_v40, %v14037_v57 }
0x1edf   : > { %v5406_v62 = vmul.f32 %v14120_v35, %v14033_v42  ;;  %v5407_v4 = vmul.f32 %v14120_v35, %v14031_v16  ;;  %v5408_v24 = vmul.f32 %v14120_v35, %v14039_v53  ;;  %v5409_v34 = vmul.f32 %v14120_v35, %v14037_v57 }
0x1ee0   : > { %v12002_v31 = vpack.i.bf16 %v5519_v50, %v5518_v46  ;;  %v12007_v44 = vpack.i.bf16 %v5521_v63, %v5520_v3  ;;  %v5388_v46 = vsub.f32 %v14091_v22, %v5386_v32  ;;  %12363 = vpow2.f32 %v5503_v21 }
0x1ee1   : > { %v12012_v54 = vpack.i.bf16 %v5407_v4, %v5406_v62  ;;  %v12017_v10 = vpack.i.bf16 %v5409_v34, %v5408_v24  ;;  %v5806_v63 = vsub.f32 %v10693_v13, %v5804_v6  ;;  %v5387_v24 = vsub.f32 %v14093_v45, %v5383_v23 }
0x1ee2   : > { %12003 = vrot.lane.b32.xlu1 %v12002_v31, %s12500_s21  ;;  %12008 = vrot.lane.b32.xlu0 %v12007_v44, %s12500_s21  ;;  %v5391_v3 = vmul.f32 1.442695, %v5388_v46  ;;  %v5499_v31 = vsub.f32 %v14095_v17, %v5495_v52  ;;  %v5805_v17 = vsub.f32 %v14104_v12, %v14118_v15 }
0x1ee3   : > { %v5809_v38 = vmul.f32 1.442695, %v5806_v63  ;;  %v5389_v34 = vmul.f32 1.442695, %v5387_v24 }
0x1ee4   : > { %12365 = vpow2.f32 %v5391_v3  ;;  %v5501_v32 = vmul.f32 1.442695, %v5499_v31  ;;  %v5807_v45 = vmul.f32 1.442695, %v5805_v17 }
0x1ee5   : > { %12367 = vpow2.f32 %v5809_v38 }
0x1ee6   : > { %12013 = vrot.lane.b32.xlu1 %v12012_v54, %s12500_s21  ;;  %12018 = vrot.lane.b32.xlu0 %v12017_v10, %s12500_s21  ;;  %v6015_v60 = vpop.xlane.xlu0 %6014 }
0x1ee7   : > { %v6017_v26 = vsub.f32 %v10715_v33, %v6015_v60 }
0x1ee9   : > { %v6020_v62 = vmul.f32 1.442695, %v6017_v26 }
0x1eea   : > { %v11999_v29 = vpop.permute.xlu0 %11998  ;;  %v14157_v4 = vpop.eup %12363 }
0x1eeb   : > { %v14144_v14 = vunpack.i.l.bf16 %v11999_v29  ;;  %12369 = vpow2.f32 %v6020_v62  ;;  %v5508_v44 = vsel %vm3965_vm12, %v14157_v4, 0.0 }
0x1eec   : > { %12371 = vpow2.f32 %v5501_v32 }
0x1eed   : > { %v5824_v55 = vmul.f32 %v14144_v14, %v14033_v42  ;;  %v5825_v19 = vmul.f32 %v14144_v14, %v14031_v16  ;;  %v5826_v43 = vmul.f32 %v14144_v14, %v14039_v53  ;;  %v5827_v28 = vmul.f32 %v14144_v14, %v14037_v57 }
0x1eee   : > { %v14162_v22 = vpop.eup %12365  ;;  %12373 = vpow2.f32 %v5389_v34 }
0x1eef   : > { %v12022_v58 = vpack.i.bf16 %v5825_v19, %v5824_v55  ;;  %v12027_v50 = vpack.i.bf16 %v5827_v28, %v5826_v43  ;;  %v5396_v13 = vsel %vm3965_vm12, %v14162_v22, 0.0  ;;  %v14167_v33 = vpop.eup %12367  ;;  %12375 = vpow2.f32 %v5807_v45 }
0x1ef0   : > { %v5814_v6 = vsel %vm3965_vm12, %v14167_v33, 0.0 }
0x1ef1   : > { %12023 = vrot.lane.b32.xlu1 %v12022_v58, %s12500_s21  ;;  %v14185_v58 = vunpack.i.h.bf16 %v11999_v29 }
0x1ef3   : > { %v6035_v28 = vmul.f32 %v14185_v58, %v14033_v42  ;;  %v6036_v21 = vmul.f32 %v14185_v58, %v14031_v16  ;;  %v6037_v29 = vmul.f32 %v14185_v58, %v14039_v53  ;;  %v6038_v3 = vmul.f32 %v14185_v58, %v14037_v57 }
0x1ef5   : > { %12028 = vrot.lane.b32.xlu1 %v12027_v50, %s12500_s21  ;;  %v14173_v54 = vpop.eup %12369  ;;  %v12032_v50 = vpack.i.bf16 %v6036_v21, %v6035_v28  ;;  %v12037_v63 = vpack.i.bf16 %v6038_v3, %v6037_v29 }
0x1ef6   : > { %v6025_v10 = vsel %vm3965_vm12, %v14173_v54, 0.0  ;;  %v12372_v55 = vpop.eup %12371 }
0x1ef7   : > { %v5505_v12 = vsel %vm539_vm0, %v12372_v55, 0.0 }
0x1ef8   : > { %v14179_v15 = vpop.eup %12373 }
0x1ef9   : > { %v5393_v19 = vsel %vm539_vm0, %v14179_v15, 0.0  ;;  %v14183_v51 = vpop.eup %12375 }
0x1f05   : > { %5509 = vadd.xlane.f32.xlu0 %v5508_v44 }
0x1f09   : > { %5397 = vadd.xlane.f32.xlu0 %v5396_v13 }
0x1f0c   : > { %v6012_v52 = vpop.xlane.xlu1 %6011 }
0x1f0d   : > { %5815 = vadd.xlane.f32.xlu0 %v5814_v6  ;;  %v6016_v23 = vsub.f32 %v14109_v39, %v6012_v52  ;;  %v5811_v39 = vsel %vm539_vm0, %v14183_v51, 0.0 }
0x1f0f   : > { %v6018_v60 = vmul.f32 1.442695, %v6016_v23 }
0x1f11   : > { %6026 = vadd.xlane.f32.xlu0 %v6025_v10  ;;  %12377 = vpow2.f32 %v6018_v60 }
0x1f19   : > { %5506 = vadd.xlane.f32.xlu1 %v5505_v12 }
0x1f1b   : > { %v14189_v43 = vpop.eup %12377 }
0x1f1c   : > { %v6022_v46 = vsel %vm539_vm0, %v14189_v43, 0.0 }
0x1f1d   : > { %5394 = vadd.xlane.f32.xlu1 %v5393_v19 }
0x1f21   : > { %5812 = vadd.xlane.f32.xlu1 %v5811_v39 }
0x1f25   : > { %6023 = vadd.xlane.f32.xlu1 %v6022_v46 }
0x1f27   : > { %12033 = vrot.lane.b32.xlu0 %v12032_v50, %s12500_s21 }
0x1f2b   : > { %12043 = vrot.lane.b32.xlu0 %v13992_v11, %s12503_s15 }
0x1f36   : > { %12038 = vrot.lane.b32.xlu1 %v12037_v63, %s12500_s21 }
0x1f3a   : > { %12048 = vrot.lane.b32.xlu1 %v13982_v30, %s12503_s15 }
0x1f54   : > { %v12004_v16 = vpop.permute.xlu1 %12003  ;;  %v12009_v42 = vpop.permute.xlu0 %12008 }
0x1f55   : > { %v12006_v38 = vunpack.i.h.bf16 %v12004_v16  ;;  %v12005_v26 = vunpack.i.l.bf16 %v12004_v16  ;;  %v12011_v62 = vunpack.i.h.bf16 %v12009_v42  ;;  %v12010_v31 = vunpack.i.l.bf16 %v12009_v42 }
0x1f57   : > { %v11426_v44 = vpack.c.bf16 %v12006_v38, %v12005_v26  ;;  %v11430_v57 = vpack.c.bf16 %v12011_v62, %v12010_v31 }
0x1f58   : > { %v12014_v53 = vpop.permute.xlu1 %12013  ;;  %v12019_v34 = vpop.permute.xlu0 %12018 }
0x1f59   : > { %v12016_v32 = vunpack.i.h.bf16 %v12014_v53  ;;  %v12015_v24 = vunpack.i.l.bf16 %v12014_v53  ;;  %11427 = vmatprep.subr.bf16.mxu0 %v11426_v44  ;;  %v12021_v19 = vunpack.i.h.bf16 %v12019_v34  ;;  %v12020_v39 = vunpack.i.l.bf16 %v12019_v34 }
0x1f5a   : > { %11429 = vmatpush3.bf16.msra.mxu0 %v11426_v44 }
0x1f5b   : > { %11431 = vmatprep.subr.bf16.mxu0 %v11430_v57  ;;  %v11434_v13 = vpack.c.bf16 %v12016_v32, %v12015_v24  ;;  %v11438_v16 = vpack.c.bf16 %v12021_v19, %v12020_v39 }
0x1f5e   : > { %11433 = vmatpush3.bf16.msra.mxu0 %v11430_v57 }
0x1f5f   : > { %11435 = vmatprep.subr.bf16.mxu0 %v11434_v13 }
0x1f63   : > { %v12024_v11 = vpop.permute.xlu1 %12023 }
0x1f64   : > { %v12026_v3 = vunpack.i.h.bf16 %v12024_v11  ;;  %v12025_v63 = vunpack.i.l.bf16 %v12024_v11 }
0x1f66   : > { %v11454_v62 = vpack.c.bf16 %v12026_v3, %v12025_v63 }
0x1f67   : > { %v12029_v30 = vpop.permute.xlu1 %12028 }
0x1f68   : > { %v12030_v26 = vunpack.i.l.bf16 %v12029_v30 }
0x1f92   : > { %v5510_v17 = vpop.xlane.xlu0 %5509 }
0x1f93   : > { %12379 = vrcp.f32 %v5510_v17 }
0x1f96   : > { %v5398_v6 = vpop.xlane.xlu0 %5397 }
0x1f9a   : > { %v5816_v23 = vpop.xlane.xlu0 %5815 }
0x1f9d   : > { %v12380_v60 = vpop.eup %12379 }
0x1f9e   : > { %v5514_v21 = vmul.f32 %v12380_v60, %v14157_v4  ;;  %v6027_v46 = vpop.xlane.xlu0 %6026 }
0x1fa2   : > { %v12034_v31 = vpop.permute.xlu0 %12033 }
0x1fa3   : > { %v12036_v32 = vunpack.i.h.bf16 %v12034_v31  ;;  %v12035_v24 = vunpack.i.l.bf16 %v12034_v31 }
0x1fa5   : > { %v11474_v34 = vpack.c.bf16 %v12036_v32, %v12035_v24 }
0x1fa6   : > { %v5507_v52 = vpop.xlane.xlu1 %5506 }
0x1fa7   : > { %12381 = vrcp.f32 %v5507_v52 }
0x1faa   : > { %v5395_v45 = vpop.xlane.xlu1 %5394 }
0x1fab   : > { %12383 = vrcp.f32 %v5395_v45 }
0x1fac   : > { %12385 = vrcp.f32 %v5398_v6 }
0x1fae   : > { %v5813_v10 = vpop.xlane.xlu1 %5812 }
0x1faf   : > { %12387 = vrcp.f32 %v5813_v10 }
0x1fb0   : > { %12389 = vrcp.f32 %v5816_v23 }
0x1fb1   : > { %v12382_v12 = vpop.eup %12381 }
0x1fb2   : > { %v5512_v28 = vmul.f32 %v12382_v12, %v12372_v55  ;;  %v6024_v50 = vpop.xlane.xlu1 %6023  ;;  %v12031_v55 = vunpack.i.h.bf16 %v12029_v30 }
0x1fb3   : > { %12391 = vrcp.f32 %v6024_v50 }
0x1fb4   : > { %10669 = vmatprep.mubr.msk.f32.mxu0 %vm539_vm0, %v5512_v28  ;;  %12393 = vrcp.f32 %v6027_v46 }
0x1fb5   : > { %v12384_v29 = vpop.eup %12383  ;;  %10670 = vmatmul.mubr.msk.f32.vlgmr.msra.gmra.mrb[52].mxu0 %vm539_vm0, %v5514_v21 }
0x1fb6   : > { %11437 = vmatpush3.bf16.msra.mxu0 %v11434_v13  ;;  %v5400_v42 = vmul.f32 %v12384_v29, %v14179_v15  ;;  %v12386_v38 = vpop.eup %12385  ;;  %v11458_v15 = vpack.c.bf16 %v12031_v55, %v12030_v26  ;;  %v12039_v57 = vpop.permute.xlu1 %12038 }
0x1fb7   : > { %11439 = vmatprep.subr.bf16.mxu0 %v11438_v16  ;;  %v5402_v44 = vmul.f32 %v12386_v38, %v14162_v22  ;;  %v12041_v30 = vunpack.i.h.bf16 %v12039_v57  ;;  %v12040_v17 = vunpack.i.l.bf16 %v12039_v57  ;;  %v12044_v22 = vpop.permute.xlu0 %12043  ;;  %v3943_v57 = vld [vmem:[%s14945_s7 + $0x28] sm:$0xff] }
0x1fb8   : > { %10680 = vmatprep.mubr.msk.f32.mxu0 %vm539_vm0, %v5400_v42  ;;  %v12046_v52 = vunpack.i.h.bf16 %v12044_v22  ;;  %v12045_v6 = vunpack.i.l.bf16 %v12044_v22  ;;  %v3932_v22 = vld [vmem:[%s14947_s9 + $0x6] sm:$0x5] }
0x1fb9   : > { %v12388_v4 = vpop.eup %12387  ;;  %v11478_v10 = vpack.c.bf16 %v12041_v30, %v12040_v17  ;;  %v3945_v30 = vld [vmem:[%s14945_s7 + $0x58] sm:$0xff] }
0x1fba   : > { %11441 = vmatpush3.bf16.msra.mxu0 %v11438_v16  ;;  %v5818_v53 = vmul.f32 %v12388_v4, %v14183_v51  ;;  %v12390_v13 = vpop.eup %12389  ;;  %v12049_v23 = vpop.permute.xlu1 %12048  ;;  %v11482_v60 = vpack.c.bf16 %v12046_v52, %v12045_v6  ;;  %v3947_v52 = vld [vmem:[%s14946_s8 + $0x8] sm:$0xff]  ;;  %v6283_v6 = vrot.slane %v3932_v22, %v13644_v41 }
0x1fbb   : > { %11455 = vmatprep.subr.bf16.mxu0 %v11454_v62  ;;  %v5820_v51 = vmul.f32 %v12390_v13, %v14167_v33  ;;  %v12051_v12 = vunpack.i.h.bf16 %v12049_v23  ;;  %v12050_v19 = vunpack.i.l.bf16 %v12049_v23  ;;  %v9534_v13 = vld [vmem:[%s14947_s9 + $0x2] ss:$0 sm:$0xff] }
0x1fbd   : > { %10681 = vmatmul.mubr.msk.f32.vlgmr.msra.gmra.mrb[52].mxu0 %vm539_vm0, %v5402_v44  ;;  %v12392_v11 = vpop.eup %12391  ;;  %v11486_v28 = vpack.c.bf16 %v12051_v12, %v12050_v19 }
0x1fbe   : > { %11457 = vmatpush3.bf16.msra.mxu0 %v11454_v62  ;;  %10702 = vmatprep.mubr.msk.f32.mxu0 %vm539_vm0, %v5818_v53  ;;  %v6029_v45 = vmul.f32 %v12392_v11, %v14189_v43  ;;  %v12394_v39 = vpop.eup %12393  ;;  %v9531_v43 = vld [vmem:[%s14947_s9 + $0x6] ss:$0 sm:$0xff] }
0x1fbf   : > { %11459 = vmatprep.subr.bf16.mxu0 %v11458_v15  ;;  %v6031_v33 = vmul.f32 %v12394_v39, %v14173_v54  ;;  %6155 = vrot.lane.b32.xlu0 %v9531_v43, %s12500_s21 }
0x1fc2   : > { %11461 = vmatpush3.bf16.msra.mxu0 %v11458_v15  ;;  %v3942_v15 = vld [vmem:[%s14945_s7 + $0x10] sm:$0xff] }
0x1fc3   : > { %11475 = vmatprep.subr.bf16.mxu0 %v11474_v34  ;;  %v11490_v11 = vpack.c.bf16 %v3943_v57, %v3942_v15  ;;  %v3955_v15 = vld [vmem:[%s14946_s8 + $0x48] sm:$0xff] }
0x1fc5   : > { %10703 = vmatmul.mubr.msk.f32.vlgmr.msra.gmra.mrb[52].mxu0 %vm539_vm0, %v5820_v51  ;;  %11491 = vmatprep.subr.bf16.mxu1 %v11490_v11  ;;  %v3946_v51 = vld [vmem:[%s14946_s8] sm:$0xff] }
0x1fc6   : > { %11477 = vmatpush3.bf16.msra.mxu0 %v11474_v34  ;;  %10724 = vmatprep.mubr.msk.f32.mxu0 %vm539_vm0, %v6029_v45  ;;  %v3944_v34 = vld [vmem:[%s14945_s7 + $0x40] sm:$0xff]  ;;  %v6287_v45 = vrot.slane %v3932_v22, %v13650_v8  ;;  %v11498_v23 = vpack.c.bf16 %v3947_v52, %v3946_v51  ;;  %v3960_v51 = vld [vmem:[%s14946_s8 + $0x70] sm:$0xff]  ;;  %v3961_v52 = vld [vmem:[%s14946_s8 + $0x78] sm:$0xff] }
0x1fc7   : > { %11479 = vmatprep.subr.bf16.mxu0 %v11478_v10  ;;  %11493 = vmatpush3.bf16.msra.mxu1 %v11490_v11  ;;  %v11494_v17 = vpack.c.bf16 %v3945_v30, %v3944_v34  ;;  %v3957_v11 = vld [vmem:[%s14946_s8 + $0x58] sm:$0xff]  ;;  %v3958_v30 = vld [vmem:[%s14946_s8 + $0x60] sm:$0xff] }
0x1fc9   : > { %11495 = vmatprep.subr.bf16.mxu1 %v11494_v17 }
0x1fca   : > { %11481 = vmatpush3.bf16.msra.mxu0 %v11478_v10  ;;  %v6293_v10 = vrot.slane %v6283_v6, %v13644_v41  ;;  %v11526_v6 = vpack.c.bf16 %v3961_v52, %v3960_v51 }
0x1fcb   : > { %11483 = vmatprep.subr.bf16.mxu0 %v11482_v60  ;;  %11497 = vmatpush3.bf16.msra.mxu1 %v11494_v17  ;;  %v3959_v17 = vld [vmem:[%s14946_s8 + $0x68] sm:$0xff] }
0x1fcc   : > { %v11522_v22 = vpack.c.bf16 %v3959_v17, %v3958_v30 }
0x1fcd   : > { %10725 = vmatmul.mubr.msk.f32.vlgmr.msra.gmra.mrb[52].mxu0 %vm539_vm0, %v6031_v33 }
0x1fce   : > { %11485 = vmatpush3.bf16.msra.mxu0 %v11482_v60  ;;  %v6297_v60 = vrot.slane %v6287_v45, %v13644_v41  ;;  %v9537_v45 = vld [vmem:[%s14947_s9 + $0x8] ss:$0 sm:$0xff] }
0x1fcf   : > { %11487 = vmatprep.subr.bf16.mxu0 %v11486_v28 }
0x1fd2   : > { %11489 = vmatpush3.bf16.msra.mxu0 %v11486_v28 }
0x1fd3   : > { %11499 = vmatprep.subr.bf16.mxu0 %v11498_v23 }
0x2031   : > { %v6156_v54 = vpop.permute.xlu0 %6155 }
0x20a0   : > { %v10726_v21 = vpop.f32.mrb[52].mxu0 }
0x20a1   : > { %v6127_v46 = vpop.f32.mrb[53].mxu0 }
0x20a2   : > { %10735 = vmatprep.mubr.msk.f32.mxu0 %vm539_vm0, %v6127_v46 }
0x20a3   : > { %10736 = vmatmul.mubr.msk.f32.vlgmr.msra.gmra.mrb[54].mxu0 %vm539_vm0, %v10726_v21 }
0x20a4   : > { %11501 = vmatpush3.bf16.msra.mxu0 %v11498_v23 }
0x2176   : > { %v10737_v50 = vpop.f32.mrb[54].mxu0 }
0x2177   : > { %v6236_v29 = vadd.f32 %v10737_v50, %v6156_v54  ;;  %v6230_v3 = vpop.f32.mrb[55].mxu0 }
0x2178   : > { %v6231_v63 = vadd.f32 %v6230_v3, %v6156_v54 }
0x2179   : > { %v14229_v16 = vadd.f32 %v6236_v29, %v13963_v20 }
0x217a   : > { %v14232_v42 = vadd.f32 %v6231_v63, %v13966_v47 }
0x217b   : > { %v6244_v38 = vsel %vm3965_vm12, %v14229_v16, 0.0 }
0x217c   : > { %6245 = vadd.xlane.f32.xlu0 %v6244_v38  ;;  %v6241_v4 = vsel %vm539_vm0, %v14232_v42, 0.0 }
0x217d   : > { %6242 = vadd.xlane.f32.xlu1 %v6241_v4 }
0x2209   : > { %v6246_v55 = vpop.xlane.xlu0 %6245 }
0x220a   : > { %v6248_v26 = vmul.f32 0.03125, %v6246_v55  ;;  %v6243_v62 = vpop.xlane.xlu1 %6242  ;;  %v3948_v55 = vld [vmem:[%s14946_s8 + $0x10] sm:$0xff] }
0x220b   : > { %v6247_v31 = vmul.f32 0.03125, %v6243_v62 }
0x220c   : > { %v6250_v44 = vsub.f32 %v14229_v16, %v6248_v26  ;;  %v3949_v26 = vld [vmem:[%s14946_s8 + $0x18] sm:$0xff] }
0x220d   : > { %v6249_v20 = vsub.f32 %v14232_v42, %v6247_v31  ;;  %v11502_v62 = vpack.c.bf16 %v3949_v26, %v3948_v55  ;;  %v3950_v31 = vld [vmem:[%s14946_s8 + $0x20] sm:$0xff] }
0x220e   : > { %v6252_v53 = vmul.f32 %v6250_v44, %v6250_v44 }
0x220f   : > { %v6251_v32 = vmul.f32 %v6249_v20, %v6249_v20  ;;  %11503 = vmatprep.subr.bf16.mxu0 %v11502_v62 }
0x2210   : > { %v6256_v47 = vsel %vm3965_vm12, %v6252_v53, 0.0  ;;  %11505 = vmatpush3.bf16.msra.mxu0 %v11502_v62 }
0x2211   : > { %6257 = vadd.xlane.f32.xlu1 %v6256_v47  ;;  %v6253_v24 = vsel %vm539_vm0, %v6251_v32, 0.0  ;;  %v3953_v32 = vld [vmem:[%s14946_s8 + $0x38] sm:$0xff] }
0x2212   : > { %6254 = vadd.xlane.f32.xlu0 %v6253_v24  ;;  %v3954_v24 = vld [vmem:[%s14946_s8 + $0x40] sm:$0xff] }
0x2213   : > { %v11514_v57 = vpack.c.bf16 %v3955_v15, %v3954_v24 }
0x2222   : > { %6300 = vrot.lane.b32.xlu1 %v6293_v10, %s12502_s14 }
0x2226   : > { %6302 = vrot.lane.b32.xlu1 %v6297_v60, %s12502_s14 }
0x2228   : > { %6274 = vrot.lane.b32.xlu0 %v9534_v13, %s12500_s21 }
0x222c   : > { %6410 = vrot.lane.b32.xlu0 %v9537_v45, %s12502_s14 }
0x229e   : > { %v6258_v12 = vpop.xlane.xlu1 %6257 }
0x229f   : > { %v6260_v19 = vmul.f32 0.03125, %v6258_v12  ;;  %v6255_v39 = vpop.xlane.xlu0 %6254 }
0x22a0   : > { %v6259_v33 = vmul.f32 0.03125, %v6255_v39 }
0x22a1   : > { %v6262_v28 = vadd.f32 1e-05, %v6260_v19 }
0x22a2   : > { %v6261_v43 = vadd.f32 1e-05, %v6259_v33  ;;  %v6301_v23 = vpop.permute.xlu1 %6300 }
0x22a3   : > { %12395 = vrsqrt.f32 %v6262_v28  ;;  %v6275_v29 = vpop.permute.xlu0 %6274 }
0x22a4   : > { %12397 = vrsqrt.f32 %v6261_v43 }
0x22a6   : > { %v6303_v10 = vpop.permute.xlu1 %6302 }
0x22a7   : > { %v6304_v60 = vsel %vm4026_vm13, %v6301_v23, %v6303_v10 }
0x22ad   : > { %v12396_v21 = vpop.eup %12395 }
0x22ae   : > { %v12398_v46 = vpop.eup %12397  ;;  %v6266_v54 = vmul.f32 %v12396_v21, %v6250_v44  ;;  %v3951_v44 = vld [vmem:[%s14946_s8 + $0x28] sm:$0xff] }
0x22af   : > { %v6265_v50 = vmul.f32 %v12398_v46, %v6249_v20  ;;  %v3952_v20 = vld [vmem:[%s14946_s8 + $0x30] sm:$0xff]  ;;  %v11506_v53 = vpack.c.bf16 %v3951_v44, %v3950_v31 }
0x22b0   : > { %v6272_v3 = vmul.f32 %v9534_v13, %v6266_v54  ;;  %v11510_v47 = vpack.c.bf16 %v3953_v32, %v3952_v20  ;;  %v6411_v32 = vpop.permute.xlu0 %6410 }
0x22b1   : > { %v6271_v63 = vmul.f32 %v9534_v13, %v6265_v50  ;;  %11507 = vmatprep.subr.bf16.mxu0 %v11506_v53  ;;  %v3956_v13 = vld [vmem:[%s14946_s8 + $0x50] sm:$0xff] }
0x22b2   : > { %v6278_v4 = vadd.f32 %v6275_v29, %v6272_v3  ;;  %11509 = vmatpush3.bf16.msra.mxu0 %v11506_v53  ;;  %v11518_v34 = vpack.c.bf16 %v3957_v11, %v3956_v13 }
0x22b3   : > { %v6277_v38 = vadd.f32 %v6275_v29, %v6271_v63  ;;  %11511 = vmatprep.subr.bf16.mxu0 %v11510_v47 }
0x22b5   : > { %10746 = vmatprep.mubr.msk.f32.mxu1 %vm539_vm0, %v6277_v38 }
0x22b6   : > { %10747 = vmatmul.mubr.msk.f32.vlgmr.msra.gmra.mrb[48].mxu1 %vm539_vm0, %v6278_v4  ;;  %11513 = vmatpush3.bf16.msra.mxu0 %v11510_v47 }
0x22b7   : > { %11515 = vmatprep.subr.bf16.mxu0 %v11514_v57 }
0x22ba   : > { %11517 = vmatpush3.bf16.msra.mxu0 %v11514_v57 }
0x22bb   : > { %11519 = vmatprep.subr.bf16.mxu0 %v11518_v34 }
0x22be   : > { %11521 = vmatpush3.bf16.msra.mxu0 %v11518_v34 }
0x22bf   : > { %11523 = vmatprep.subr.bf16.mxu0 %v11522_v22 }
0x22c2   : > { %11525 = vmatpush3.bf16.msra.mxu0 %v11522_v22 }
0x22c3   : > { %11527 = vmatprep.subr.bf16.mxu0 %v11526_v6 }
0x22c6   : > { %11529 = vmatpush3.bf16.msra.mxu0 %v11526_v6 }
0x2389   : > { %v10748_v12 = vpop.f32.mrb[48].mxu1 }
0x238a   : > { %v6384_v19 = vadd.f32 %v10748_v12, %v6304_v60  ;;  %v6378_v39 = vpop.f32.mrb[49].mxu1  ;;  %v14344_v12 = vld [vmem:[%s14945_s7 + $0x78] sm:$0xff] }
0x238b   : > { %v6379_v33 = vadd.f32 %v6378_v39, %v6304_v60  ;;  %v14339_v60 = vld [vmem:[%s14945_s7 + $0x60] sm:$0xff] }
0x238c   : > { %v6390_v28 = vmul.f32 0.044715, %v6384_v19  ;;  %v6388_v44 = vmul.f32 0.5, %v6384_v19 }
0x238d   : > { %v6389_v43 = vmul.f32 0.044715, %v6379_v33  ;;  %v6387_v62 = vmul.f32 0.5, %v6379_v33 }
0x238e   : > { %v6392_v21 = vmul.f32 %v6390_v28, %v6384_v19  ;;  %v14360_v28 = vld [vmem:[%s14945_s7 + $0x90] sm:$0xff] }
0x238f   : > { %v6391_v46 = vmul.f32 %v6389_v43, %v6379_v33  ;;  %v14365_v43 = vld [vmem:[%s14945_s7 + $0xa8] sm:$0xff] }
0x2390   : > { %v6394_v54 = vmul.f32 %v6392_v21, %v6384_v19 }
0x2391   : > { %v6393_v50 = vmul.f32 %v6391_v46, %v6379_v33  ;;  %v11534_v46 = vpack.c.bf16 %v14365_v43, %v14360_v28 }
0x2392   : > { %v6396_v29 = vadd.f32 %v6394_v54, %v6384_v19  ;;  %v14349_v19 = vld [vmem:[%s14947_s9 + $0x1] ss:$0 sm:$0xff]  ;;  %v6492_v54 = vld [vmem:[%s14947_s9 + $0x3] sm:$0x5] }
0x2393   : > { %v6395_v3 = vadd.f32 %v6393_v50, %v6379_v33  ;;  %v11530_v33 = vpack.c.bf16 %v14344_v12, %v14339_v60  ;;  %v6570_v50 = vrot.slane %v6492_v54, %v13644_v41 }
0x2394   : > { %v6398_v63 = vmul.f32 0.7978846, %v6396_v29  ;;  %v6574_v29 = vrot.slane %v6492_v54, %v13650_v8 }
0x2395   : > { %v6397_v38 = vmul.f32 0.7978846, %v6395_v3  ;;  %11531 = vmatprep.subr.bf16.mxu1 %v11530_v33  ;;  %v6580_v3 = vrot.slane %v6570_v50, %v13644_v41 }
0x2396   : > { %12399 = vtanh.f32 %v6398_v63  ;;  %11533 = vmatpush3.bf16.msra.mxu1 %v11530_v33  ;;  %v6584_v63 = vrot.slane %v6574_v29, %v13644_v41 }
0x2397   : > { %12401 = vtanh.f32 %v6397_v38  ;;  %11535 = vmatprep.subr.bf16.mxu1 %v11534_v46 }
0x239a   : > { %11537 = vmatpush3.bf16.msra.mxu1 %v11534_v46 }
0x23a0   : > { %v12400_v4 = vpop.eup %12399 }
0x23a1   : > { %v12402_v55 = vpop.eup %12401  ;;  %v6402_v26 = vadd.f32 1.0, %v12400_v4 }
0x23a2   : > { %v6401_v31 = vadd.f32 1.0, %v12402_v55 }
0x23a3   : > { %v6404_v53 = vmul.f32 %v6402_v26, %v6388_v44 }
0x23a4   : > { %v6403_v20 = vmul.f32 %v6401_v31, %v6387_v62 }
0x23a6   : > { %10781 = vmatprep.mubr.f32.mxu0 %v6403_v20 }
0x23a7   : > { %10782 = vmatmul.mubr.f32.vlgmr.msra.gmra.mrb[56].mxu0 %v6404_v53 }
0x247a   : > { %v10783_v47 = vpop.f32.mrb[56].mxu0 }
0x247b   : > { %v6485_v24 = vadd.f32 %v10783_v47, %v6411_v32  ;;  %v6479_v15 = vpop.f32.mrb[57].mxu0 }
0x247c   : > { %v6480_v57 = vadd.f32 %v6479_v15, %v6411_v32 }
0x247d   : > { %v14323_v13 = vadd.f32 %v6485_v24, %v14229_v16 }
0x247e   : > { %v14326_v11 = vadd.f32 %v6480_v57, %v14232_v42 }
0x247f   : > { %v6531_v34 = vsel %vm3965_vm12, %v14323_v13, 0.0 }
0x2480   : > { %6532 = vadd.xlane.f32.xlu0 %v6531_v34  ;;  %v6528_v30 = vsel %vm539_vm0, %v14326_v11, 0.0 }
0x2481   : > { %6529 = vadd.xlane.f32.xlu1 %v6528_v30 }
0x250d   : > { %v6533_v17 = vpop.xlane.xlu0 %6532 }
0x250e   : > { %v6535_v22 = vmul.f32 0.03125, %v6533_v17  ;;  %v6530_v51 = vpop.xlane.xlu1 %6529 }
0x250f   : > { %v6534_v52 = vmul.f32 0.03125, %v6530_v51 }
0x2510   : > { %v6537_v6 = vsub.f32 %v14323_v13, %v6535_v22 }
0x2511   : > { %v6536_v16 = vsub.f32 %v14326_v11, %v6534_v52 }
0x2512   : > { %v6539_v45 = vmul.f32 %v6537_v6, %v6537_v6 }
0x2513   : > { %v6538_v23 = vmul.f32 %v6536_v16, %v6536_v16 }
0x2514   : > { %v6543_v42 = vsel %vm3965_vm12, %v6539_v45, 0.0 }
0x2515   : > { %6544 = vadd.xlane.f32.xlu1 %v6543_v42  ;;  %v6540_v10 = vsel %vm539_vm0, %v6538_v23, 0.0 }
0x2516   : > { %6541 = vadd.xlane.f32.xlu0 %v6540_v10 }
0x2526   : > { %6587 = vrot.lane.b32.xlu1 %v6580_v3, %s12502_s14 }
0x252a   : > { %6589 = vrot.lane.b32.xlu1 %v6584_v63, %s12502_s14 }
0x252c   : > { %6561 = vrot.lane.b32.xlu0 %v14349_v19, %s12500_s21 }
0x25a2   : > { %v6545_v38 = vpop.xlane.xlu1 %6544 }
0x25a3   : > { %v6547_v4 = vmul.f32 0.03125, %v6545_v38  ;;  %v6542_v55 = vpop.xlane.xlu0 %6541 }
0x25a4   : > { %v6546_v26 = vmul.f32 0.03125, %v6542_v55 }
0x25a5   : > { %v6549_v62 = vadd.f32 1e-05, %v6547_v4 }
0x25a6   : > { %v6548_v31 = vadd.f32 1e-05, %v6546_v26  ;;  %v6588_v30 = vpop.permute.xlu1 %6587 }
0x25a7   : > { %12403 = vrsqrt.f32 %v6549_v62  ;;  %v6562_v47 = vpop.permute.xlu0 %6561 }
0x25a8   : > { %12405 = vrsqrt.f32 %v6548_v31 }
0x25aa   : > { %v6590_v17 = vpop.permute.xlu1 %6589 }
0x25ab   : > { %v6591_v22 = vsel %vm4026_vm13, %v6588_v30, %v6590_v17 }
0x25b1   : > { %v12404_v44 = vpop.eup %12403 }
0x25b2   : > { %v12406_v20 = vpop.eup %12405  ;;  %v6553_v53 = vmul.f32 %v12404_v44, %v6537_v6 }
0x25b3   : > { %v6552_v32 = vmul.f32 %v12406_v20, %v6536_v16 }
0x25b4   : > { %v6559_v24 = vmul.f32 %v14349_v19, %v6553_v53 }
0x25b5   : > { %v6558_v15 = vmul.f32 %v14349_v19, %v6552_v32 }
0x25b6   : > { %v6565_v34 = vadd.f32 %v6562_v47, %v6559_v24 }
0x25b7   : > { %v6564_v57 = vadd.f32 %v6562_v47, %v6558_v15 }
0x25b9   : > { %10792 = vmatprep.mubr.msk.f32.mxu1 %vm539_vm0, %v6564_v57 }
0x25ba   : > { %10793 = vmatmul.mubr.msk.f32.vlgmr.msra.gmra.mrb[50].mxu1 %vm539_vm0, %v6565_v34 }
0x268d   : > { %v10794_v51 = vpop.f32.mrb[50].mxu1 }
0x268e   : > { %v6671_v52 = vadd.f32 %v10794_v51, %v6591_v22  ;;  %v6665_v45 = vpop.f32.mrb[51].mxu1 }
0x268f   : > { %v6666_v6 = vadd.f32 %v6665_v45, %v6591_v22 }
0x2690   : > { %v14386_v16 = vmul.f32 %v12740_v2, %v6671_v52  ;;  %v14389_v23 = vmul.f32 %v12880_v61, %v6671_v52  ;;  %v14392_v42 = vmul.f32 %v12734_v1, %v6671_v52  ;;  %v14422_v38 = vmul.f32 %v12968_v9, %v6671_v52 }
0x2691   : > { %v12052_v10 = vpack.i.bf16 %v6671_v52, %v6666_v6  ;;  %v14394_v33 = vmul.f32 0.35355338, %v6666_v6  ;;  %v14397_v46 = vmul.f32 %v12740_v2, %v6666_v6  ;;  %v14400_v54 = vmul.f32 %v12880_v61, %v6666_v6 }
0x2692   : > { %v14403_v50 = vmul.f32 %v12734_v1, %v6666_v6  ;;  %v14419_v1 = vmul.f32 %v12968_v9, %v6666_v6  ;;  %v14440_v9 = vmul.f32 0.35355338, %v6671_v52 }
0x2693   : > { %12053 = vrot.lane.b32.xlu0 %v12052_v10, %s12500_s21  ;;  %v6676_v29 = vmul.f32 %v12682_v36, %v14394_v33  ;;  %v7080_v3 = vmul.f32 %v12714_v48, %v14394_v33  ;;  %v12062_v63 = vpack.i.bf16 %v14386_v16, %v14397_v46  ;;  %v12067_v2 = vpack.i.bf16 %v14389_v23, %v14400_v54 }
0x2694   : > { %v12057_v61 = vpack.i.bf16 %v14392_v42, %v14403_v50  ;;  %v12072_v4 = vpack.i.bf16 %v14422_v38, %v14419_v1  ;;  %v6677_v44 = vmul.f32 %v12682_v36, %v14440_v9  ;;  %v7081_v20 = vmul.f32 %v12714_v48, %v14440_v9 }
0x2695   : > { %10799 = vmatprep.mubr.msk.f32.mxu1 %vm539_vm0, %v6676_v29  ;;  %10827 = vmatprep.mubr.msk.f32.mxu0 %vm539_vm0, %v7080_v3  ;;  %v6793_v53 = vmul.f32 %v12685_v37, %v14394_v33  ;;  %v6794_v32 = vmul.f32 %v12685_v37, %v14440_v9 }
0x2705   : > { %v12054_v55 = vpop.permute.xlu0 %12053 }
0x2706   : > { %v12056_v26 = vunpack.i.h.bf16 %v12054_v55  ;;  %v12055_v62 = vunpack.i.l.bf16 %v12054_v55 }
0x2708   : > { %v14426_v31 = vpack.c.bf16 %v12056_v26, %v12055_v62 }
0x270a   : > { %11540 = vmatprep.subr.msk.bf16.mxu1 %vm12730_vm11, %v14426_v31  ;;  %11564 = vmatprep.subr.msk.bf16.mxu0 %vm12730_vm11, %v14426_v31 }
0x270b   : > { %11543 = vmatpush3.bf16.xpose.msk.msra.mxu1 %vm12730_vm11, %v14426_v31  ;;  %11567 = vmatpush3.bf16.xpose.msk.msra.mxu0 %vm12730_vm11, %v14426_v31 }
0x270c   : > { %11546 = vmatprep.subr.msk.bf16.mxu1 %vm12730_vm11, %v14426_v31 }
0x2712   : > { %10800 = vmatmul.mubr.msk.f32.vlgmr.msra.gmra.mrb[52].mxu1 %vm539_vm0, %v6677_v44  ;;  %10828 = vmatmul.mubr.msk.f32.vlgmr.msra.gmra.mrb[58].mxu0 %vm539_vm0, %v7081_v20 }
0x2713   : > { %11549 = vmatpush3.bf16.xpose.msk.msra.mxu1 %vm12730_vm11, %v14426_v31  ;;  %10806 = vmatprep.mubr.msk.f32.mxu1 %vm539_vm0, %v6793_v53 }
0x271a   : > { %10807 = vmatmul.mubr.msk.f32.vlgmr.msra.gmra.mrb[54].mxu1 %vm539_vm0, %v6794_v32 }
0x27e5   : > { %v10801_v47 = vpop.f32.mrb[52].mxu1  ;;  %v10829_v24 = vpop.f32.mrb[58].mxu0 }
0x27e6   : > { %v6760_v15 = vpop.f32.mrb[53].mxu1  ;;  %v7154_v57 = vpop.f32.mrb[59].mxu0  ;;  %v6766_v45 = vadd.f32 %v10801_v47, %v13841_v5  ;;  %v7160_v3 = vadd.f32 %v10829_v24, %v13841_v5 }
0x27e7   : > { %v6761_v51 = vadd.f32 %v6760_v15, %v13843_v25  ;;  %v7155_v10 = vadd.f32 %v7154_v57, %v13843_v25 }
0x27e8   : > { %v6772_v55 = vsel %vm4209_vm1, %v6766_v45, -inf  ;;  %v7166_v62 = vsel %vm4209_vm1, %v7160_v3, -inf }
0x27e9   : > { %v6769_v29 = vsel %vm4205_vm2, %v6761_v51, -inf  ;;  %v7163_v26 = vsel %vm4205_vm2, %v7155_v10, -inf }
0x27ed   : > { %v10808_v34 = vpop.f32.mrb[54].mxu1 }
0x27ee   : > { %v6873_v30 = vadd.f32 %v10808_v34, %v13841_v5  ;;  %v6867_v17 = vpop.f32.mrb[55].mxu1 }
0x27ef   : > { %v6868_v22 = vadd.f32 %v6867_v17, %v13843_v25 }
0x27f0   : > { %v6879_v52 = vsel %vm4209_vm1, %v6873_v30, -inf }
0x27f1   : > { %6880 = vmax.xlane.f32.xlu0 %v6879_v52  ;;  %v6876_v6 = vsel %vm4205_vm2, %v6868_v22, -inf }
0x27f2   : > { %6877 = vmax.xlane.f32.xlu1 %v6876_v6 }
0x27f5   : > { %6770 = vmax.xlane.f32.xlu0 %v6769_v29 }
0x27f6   : > { %6773 = vmax.xlane.f32.xlu1 %v6772_v55 }
0x27f9   : > { %7164 = vmax.xlane.f32.xlu0 %v7163_v26 }
0x27fa   : > { %7167 = vmax.xlane.f32.xlu1 %v7166_v62 }
0x287e   : > { %v6881_v44 = vpop.xlane.xlu0 %6880 }
0x287f   : > { %v6878_v20 = vpop.xlane.xlu1 %6877  ;;  %v6883_v17 = vsub.f32 %v6873_v30, %v6881_v44 }
0x2880   : > { %v6882_v57 = vsub.f32 %v6868_v22, %v6878_v20 }
0x2881   : > { %v6886_v21 = vmul.f32 1.442695, %v6883_v17 }
0x2882   : > { %v6771_v53 = vpop.xlane.xlu0 %6770  ;;  %v6884_v26 = vmul.f32 1.442695, %v6882_v57 }
0x2883   : > { %v6775_v32 = vsub.f32 %v6761_v51, %v6771_v53  ;;  %v6774_v47 = vpop.xlane.xlu1 %6773 }
0x2884   : > { %v6776_v15 = vsub.f32 %v6766_v45, %v6774_v47 }
0x2885   : > { %v6777_v34 = vmul.f32 1.442695, %v6775_v32 }
0x2886   : > { %v6779_v24 = vmul.f32 1.442695, %v6776_v15  ;;  %v7165_v52 = vpop.xlane.xlu0 %7164 }
0x2887   : > { %12407 = vpow2.f32 %v6777_v34  ;;  %v7169_v6 = vsub.f32 %v7155_v10, %v7165_v52  ;;  %v7168_v29 = vpop.xlane.xlu1 %7167 }
0x2888   : > { %12409 = vpow2.f32 %v6779_v24  ;;  %v7170_v55 = vsub.f32 %v7160_v3, %v7168_v29 }
0x2889   : > { %v7171_v39 = vmul.f32 1.442695, %v7169_v6 }
0x288a   : > { %v7173_v62 = vmul.f32 1.442695, %v7170_v55 }
0x288b   : > { %12411 = vpow2.f32 %v7171_v39 }
0x288c   : > { %12413 = vpow2.f32 %v7173_v62 }
0x288d   : > { %12415 = vpow2.f32 %v6884_v26 }
0x288e   : > { %12417 = vpow2.f32 %v6886_v21 }
0x2891   : > { %v12408_v51 = vpop.eup %12407 }
0x2892   : > { %v12410_v45 = vpop.eup %12409  ;;  %v6781_v22 = vsel %vm4205_vm2, %v12408_v51, 0.0 }
0x2893   : > { %6782 = vadd.xlane.f32.xlu0 %v6781_v22  ;;  %v6784_v30 = vsel %vm4209_vm1, %v12410_v45, 0.0 }
0x2894   : > { %6785 = vadd.xlane.f32.xlu1 %v6784_v30 }
0x2895   : > { %v12412_v10 = vpop.eup %12411 }
0x2896   : > { %v12414_v44 = vpop.eup %12413  ;;  %v7175_v3 = vsel %vm4205_vm2, %v12412_v10, 0.0 }
0x2897   : > { %v12416_v20 = vpop.eup %12415  ;;  %7176 = vadd.xlane.f32.xlu0 %v7175_v3  ;;  %v7178_v53 = vsel %vm4209_vm1, %v12414_v44, 0.0 }
0x2898   : > { %v12418_v39 = vpop.eup %12417  ;;  %7179 = vadd.xlane.f32.xlu1 %v7178_v53  ;;  %v6888_v21 = vsel %vm4205_vm2, %v12416_v20, 0.0 }
0x2899   : > { %v6891_v32 = vsel %vm4209_vm1, %v12418_v39, 0.0 }
0x289b   : > { %6889 = vadd.xlane.f32.xlu0 %v6888_v21 }
0x289c   : > { %6892 = vadd.xlane.f32.xlu1 %v6891_v32 }
0x28ad   : > { %12063 = vrot.lane.b32.xlu1 %v12062_v63, %s12502_s14 }
0x28b1   : > { %12068 = vrot.lane.b32.xlu1 %v12067_v2, %s12502_s14  ;;  %12058 = vrot.lane.b32.xlu0 %v12057_v61, %s12502_s14 }
0x2920   : > { %v6783_v47 = vpop.xlane.xlu0 %6782 }
0x2921   : > { %v6786_v15 = vpop.xlane.xlu1 %6785  ;;  %12419 = vrcp.f32 %v6783_v47  ;;  %v7279_v47 = vmul.f32 %v12717_v49, %v14394_v33 }
0x2924   : > { %v7177_v57 = vpop.xlane.xlu0 %7176 }
0x2925   : > { %v7180_v34 = vpop.xlane.xlu1 %7179 }
0x2928   : > { %v6890_v17 = vpop.xlane.xlu0 %6889 }
0x2929   : > { %12421 = vrcp.f32 %v6890_v17  ;;  %v6893_v24 = vpop.xlane.xlu1 %6892 }
0x292a   : > { %12423 = vrcp.f32 %v6893_v24 }
0x292b   : > { %12425 = vrcp.f32 %v6786_v15  ;;  %v12420_v50 = vpop.eup %12419 }
0x292c   : > { %v12059_v16 = vpop.permute.xlu0 %12058  ;;  %12427 = vrcp.f32 %v7177_v57  ;;  %v6788_v30 = vmul.f32 %v12420_v50, %v12408_v51 }
0x292d   : > { %v12061_v46 = vunpack.i.h.bf16 %v12059_v16  ;;  %v12060_v63 = vunpack.i.l.bf16 %v12059_v16  ;;  %v12064_v52 = vpop.permute.xlu1 %12063  ;;  %12429 = vrcp.f32 %v7180_v34 }
0x292e   : > { %v12066_v23 = vunpack.i.h.bf16 %v12064_v52  ;;  %v12065_v54 = vunpack.i.l.bf16 %v12064_v52 }
0x292f   : > { %v11550_v2 = vpack.c.bf16 %v12061_v46, %v12060_v63 }
0x2930   : > { %v11556_v6 = vpack.c.bf16 %v12066_v23, %v12065_v54 }
0x2931   : > { %v12069_v42 = vpop.permute.xlu1 %12068  ;;  %11552 = vmatprep.subr.msk.bf16.mxu1 %vm13891_vm5, %v11550_v2 }
0x2932   : > { %11555 = vmatpush3.bf16.msk.msra.mxu1 %vm13891_vm5, %v11550_v2  ;;  %v12071_v29 = vunpack.i.h.bf16 %v12069_v42  ;;  %v12070_v55 = vunpack.i.l.bf16 %v12069_v42 }
0x2933   : > { %v12422_v61 = vpop.eup %12421  ;;  %11558 = vmatprep.subr.msk.bf16.mxu1 %vm13891_vm5, %v11556_v6 }
0x2934   : > { %v12424_v26 = vpop.eup %12423  ;;  %v6895_v62 = vmul.f32 %v12422_v61, %v12416_v20  ;;  %v11568_v3 = vpack.c.bf16 %v12071_v29, %v12070_v55 }
0x2935   : > { %v6897_v22 = vmul.f32 %v12424_v26, %v12418_v39  ;;  %v12426_v53 = vpop.eup %12425 }
0x2936   : > { %10813 = vmatprep.mubr.msk.f32.mxu1 %vm4205_vm2, %v6895_v62  ;;  %v12428_v21 = vpop.eup %12427  ;;  %v6790_v32 = vmul.f32 %v12426_v53, %v12410_v45  ;;  %v7280_v45 = vmul.f32 %v12717_v49, %v14440_v9 }
0x2937   : > { %10814 = vmatmul.mubr.msk.f32.vlgmr.msra.gmra.mrb[56].mxu1 %vm4205_vm2, %v6897_v22  ;;  %v7182_v20 = vmul.f32 %v12428_v21, %v12412_v10  ;;  %v12430_v51 = vpop.eup %12429 }
0x2938   : > { %11561 = vmatpush3.bf16.msk.msra.mxu1 %vm13891_vm5, %v11556_v6  ;;  %10820 = vmatprep.mubr.msk.f32.mxu1 %vm4205_vm2, %v6788_v30  ;;  %v7184_v39 = vmul.f32 %v12430_v51, %v12414_v44  ;;  %v9597_v30 = vld [vmem:[%s14947_s9 + $0x5] ss:$0 sm:$0xff] }
0x2939   : > { %11570 = vmatprep.subr.msk.bf16.mxu1 %vm13891_vm5, %v11568_v3 }
0x293f   : > { %10821 = vmatmul.mubr.msk.f32.vlgmr.msra.gmra.mrb[56].mxu1 %vm4205_vm2, %v6790_v32 }
0x2940   : > { %11573 = vmatpush3.bf16.msk.msra.mxu1 %vm13891_vm5, %v11568_v3  ;;  %10834 = vmatprep.mubr.msk.f32.mxu1 %vm4205_vm2, %v7182_v20 }
0x2941   : > { %11576 = vmatprep.subr.msk.bf16.mxu1 %vm12730_vm11, %v14426_v31 }
0x2947   : > { %10835 = vmatmul.mubr.msk.f32.vlgmr.msra.gmra.mrb[56].mxu1 %vm4205_vm2, %v7184_v39 }
0x2948   : > { %10841 = vmatprep.mubr.msk.f32.mxu1 %vm539_vm0, %v7279_v47 }
0x2949   : > { %11579 = vmatpush3.bf16.xpose.msk.msra.mxu1 %vm12730_vm11, %v14426_v31  ;;  %v14968_v31 = vpack.i.bf16 %v14365_v43, %v14360_v28 }
0x2950   : > { %10842 = vmatmul.mubr.msk.f32.vlgmr.msra.gmra.mrb[58].mxu1 %vm539_vm0, %v7280_v45 }
0x2a23   : > { %v10843_v10 = vpop.f32.mrb[58].mxu1 }
0x2a24   : > { %v7359_v15 = vadd.f32 %v10843_v10, %v13841_v5  ;;  %v7353_v44 = vpop.f32.mrb[59].mxu1 }
0x2a25   : > { %v7354_v57 = vadd.f32 %v7353_v44, %v13843_v25 }
0x2a26   : > { %v7365_v33 = vsel %vm4209_vm1, %v7359_v15, -inf }
0x2a27   : > { %7366 = vmax.xlane.f32.xlu1 %v7365_v33  ;;  %v7362_v34 = vsel %vm4205_vm2, %v7354_v57, -inf }
0x2a28   : > { %7363 = vmax.xlane.f32.xlu0 %v7362_v34 }
0x2a38   : > { %12073 = vrot.lane.b32.xlu1 %v12072_v4, %s12502_s14  ;;  %v14969_v4 = vpack.i.bf16 %v14344_v12, %v14339_v60 }
0x2a3c   : > { %12083 = vrot.lane.b32.xlu1 %v14968_v31, %s12503_s15 }
0x2a40   : > { %7499 = vrot.lane.b32.xlu1 %v9597_v30, %s12500_s21 }
0x2ab4   : > { %v7367_v5 = vpop.xlane.xlu1 %7366 }
0x2ab5   : > { %v7369_v9 = vsub.f32 %v7359_v15, %v7367_v5  ;;  %v7364_v17 = vpop.xlane.xlu0 %7363  ;;  %v9542_v15 = vld [vmem:[%s14945_s7 + $0x68] sm:$0xff] }
0x2ab6   : > { %v7368_v25 = vsub.f32 %v7354_v57, %v7364_v17 }
0x2ab7   : > { %v7372_v24 = vmul.f32 1.442695, %v7369_v9 }
0x2ab8   : > { %v7370_v16 = vmul.f32 1.442695, %v7368_v25  ;;  %v12074_v46 = vpop.permute.xlu1 %12073 }
0x2ab9   : > { %v12076_v63 = vunpack.i.h.bf16 %v12074_v46  ;;  %v12075_v52 = vunpack.i.l.bf16 %v12074_v46  ;;  %v9545_v46 = vld [vmem:[%s14945_s7 + $0xb0] sm:$0xff] }
0x2aba   : > { %12431 = vpow2.f32 %v7370_v16 }
0x2abb   : > { %v11580_v23 = vpack.c.bf16 %v12076_v63, %v12075_v52  ;;  %12433 = vpow2.f32 %v7372_v24 }
0x2abc   : > { %v12084_v6 = vpop.permute.xlu1 %12083 }
0x2abd   : > { %11582 = vmatprep.subr.msk.bf16.mxu1 %vm13891_vm5, %v11580_v23  ;;  %v12086_v18 = vunpack.i.h.bf16 %v12084_v6  ;;  %v12085_v42 = vunpack.i.l.bf16 %v12084_v6 }
0x2abe   : > { %11585 = vmatpush3.bf16.msk.msra.mxu1 %vm13891_vm5, %v11580_v23 }
0x2abf   : > { %v11590_v62 = vpack.c.bf16 %v12086_v18, %v12085_v42 }
0x2ac0   : > { %v7500_v21 = vpop.permute.xlu1 %7499 }
0x2ac4   : > { %v12432_v28 = vpop.eup %12431 }
0x2ac5   : > { %v7374_v43 = vsel %vm4205_vm2, %v12432_v28, 0.0  ;;  %v12434_v1 = vpop.eup %12433 }
0x2ac6   : > { %7375 = vadd.xlane.f32.xlu0 %v7374_v43  ;;  %v7377_v38 = vsel %vm4209_vm1, %v12434_v1, 0.0 }
0x2aca   : > { %7378 = vadd.xlane.f32.xlu0 %v7377_v38  ;;  %v6494_v38 = vld [vmem:[%s14947_s9 + $0x5] sm:$0x5] }
0x2ae0   : > { %12078 = vrot.lane.b32.xlu0 %v14969_v4, %s12503_s15  ;;  %v7713_v4 = vrot.slane %v6494_v38, %v13650_v8 }
0x2b53   : > { %v7376_v54 = vpop.xlane.xlu0 %7375 }
0x2b54   : > { %12435 = vrcp.f32 %v7376_v54  ;;  %v7709_v54 = vrot.slane %v6494_v38, %v13644_v41 }
0x2b56   : > { %v7719_v6 = vrot.slane %v7709_v54, %v13644_v41 }
0x2b57   : > { %v7379_v2 = vpop.xlane.xlu0 %7378 }
0x2b58   : > { %12437 = vrcp.f32 %v7379_v2  ;;  %v7723_v2 = vrot.slane %v7713_v4, %v13644_v41 }
0x2b5b   : > { %v12079_v50 = vpop.permute.xlu0 %12078 }
0x2b5c   : > { %v12081_v61 = vunpack.i.h.bf16 %v12079_v50  ;;  %v12080_v29 = vunpack.i.l.bf16 %v12079_v50 }
0x2b5e   : > { %v12436_v55 = vpop.eup %12435  ;;  %v11586_v26 = vpack.c.bf16 %v12081_v61, %v12080_v29 }
0x2b5f   : > { %v7381_v22 = vmul.f32 %v12436_v55, %v12432_v28 }
0x2b60   : > { %11587 = vmatprep.subr.bf16.mxu0 %v11586_v26 }
0x2b61   : > { %10848 = vmatprep.mubr.msk.f32.mxu1 %vm4205_vm2, %v7381_v22  ;;  %11589 = vmatpush3.bf16.msra.mxu0 %v11586_v26 }
0x2b62   : > { %v12438_v60 = vpop.eup %12437  ;;  %11591 = vmatprep.subr.bf16.mxu0 %v11590_v62 }
0x2b63   : > { %v7383_v12 = vmul.f32 %v12438_v60, %v12434_v1 }
0x2b65   : > { %10849 = vmatmul.mubr.msk.f32.vlgmr.msra.gmra.mrb[56].mxu1 %vm4205_vm2, %v7383_v12  ;;  %11593 = vmatpush3.bf16.msra.mxu0 %v11590_v62 }
0x2b66   : > { %10881 = vmatprep.mubr.msk.f32.mxu1 %vm539_vm0, %v13950_v7 }
0x2c38   : > { %v10850_v3 = vpop.f32.mrb[56].mxu1 }
0x2c39   : > { %v7467_v53 = vpop.f32.mrb[57].mxu1 }
0x2c3a   : > { %10859 = vmatprep.mubr.msk.f32.mxu0 %vm539_vm0, %v7467_v53 }
0x2c3b   : > { %10860 = vmatmul.mubr.msk.f32.vlgmr.msra.gmra.mrb[60].mxu0 %vm539_vm0, %v10850_v3 }
0x2d0e   : > { %v10861_v32 = vpop.f32.mrb[60].mxu0 }
0x2d0f   : > { %v7580_v20 = vadd.f32 %v10861_v32, %v7500_v21  ;;  %v7574_v51 = vpop.f32.mrb[61].mxu0 }
0x2d10   : > { %v7575_v39 = vadd.f32 %v7574_v51, %v7500_v21 }
0x2d11   : > { %v14553_v47 = vadd.f32 %v7580_v20, %v14323_v13  ;;  %v9543_v13 = vld [vmem:[%s14945_s7 + $0x80] sm:$0xff] }
0x2d12   : > { %v14556_v7 = vadd.f32 %v7575_v39, %v14326_v11  ;;  %v14568_v44 = vpack.i.bf16 %v9543_v13, %v9542_v15  ;;  %v11594_v43 = vpack.c.bf16 %v9543_v13, %v9542_v15 }
0x2d13   : > { %v7588_v45 = vsel %vm3965_vm12, %v14553_v47, 0.0 }
0x2d14   : > { %7589 = vadd.xlane.f32.xlu1 %v7588_v45  ;;  %v7585_v10 = vsel %vm539_vm0, %v14556_v7, 0.0  ;;  %11595 = vmatprep.subr.bf16.mxu0 %v11594_v43 }
0x2d15   : > { %7586 = vadd.xlane.f32.xlu0 %v7585_v10  ;;  %11597 = vmatpush3.bf16.msra.mxu0 %v11594_v43 }
0x2d25   : > { %12088 = vrot.lane.b32.xlu1 %v14568_v44, %s12500_s21 }
0x2d29   : > { %7611 = vrot.lane.b32.xlu1 %v14349_v19, %s12502_s14 }
0x2d2d   : > { %7616 = vrot.lane.b32.xlu1 %v14349_v19, %s12503_s15  ;;  %v9544_v19 = vld [vmem:[%s14945_s7 + $0x98] sm:$0xff] }
0x2d2e   : > { %v14586_v28 = vpack.i.bf16 %v9545_v46, %v9544_v19  ;;  %v11598_v1 = vpack.c.bf16 %v9545_v46, %v9544_v19 }
0x2d30   : > { %11599 = vmatprep.subr.bf16.mxu0 %v11598_v1 }
0x2d31   : > { %11601 = vmatpush3.bf16.msra.mxu0 %v11598_v1  ;;  %7744 = vrot.lane.b32.xlu1 %v7723_v2, %s12503_s15 }
0x2da1   : > { %v7590_v11 = vpop.xlane.xlu1 %7589 }
0x2da2   : > { %v7592_v57 = vmul.f32 0.03125, %v7590_v11  ;;  %v7587_v33 = vpop.xlane.xlu0 %7586 }
0x2da3   : > { %v7591_v34 = vmul.f32 0.03125, %v7587_v33 }
0x2da4   : > { %v7594_v31 = vsub.f32 %v14553_v47, %v7592_v57 }
0x2da5   : > { %v7593_v5 = vsub.f32 %v14556_v7, %v7591_v34  ;;  %v12089_v16 = vpop.permute.xlu1 %12088 }
0x2da6   : > { %v7596_v9 = vmul.f32 %v7594_v31, %v7594_v31  ;;  %v12091_v63 = vunpack.i.h.bf16 %v12089_v16  ;;  %v12090_v52 = vunpack.i.l.bf16 %v12089_v16 }
0x2da7   : > { %v7595_v25 = vmul.f32 %v7593_v5, %v7593_v5 }
0x2da8   : > { %v7600_v17 = vsel %vm3965_vm12, %v7596_v9, 0.0  ;;  %v11602_v23 = vpack.c.bf16 %v12091_v63, %v12090_v52 }
0x2da9   : > { %7601 = vadd.xlane.f32.xlu0 %v7600_v17  ;;  %v7597_v24 = vsel %vm539_vm0, %v7595_v25, 0.0  ;;  %v7612_v3 = vpop.permute.xlu1 %7611 }
0x2daa   : > { %11603 = vmatprep.subr.bf16.mxu1 %v11602_v23 }
0x2dab   : > { %11605 = vmatpush3.bf16.msra.mxu1 %v11602_v23 }
0x2dad   : > { %7598 = vadd.xlane.f32.xlu0 %v7597_v24  ;;  %v7617_v51 = vpop.permute.xlu1 %7616 }
0x2db1   : > { %v7745_v10 = vpop.permute.xlu1 %7744 }
0x2dc3   : > { %12093 = vrot.lane.b32.xlu0 %v14586_v28, %s12500_s21 }
0x2dc7   : > { %7742 = vrot.lane.b32.xlu0 %v7719_v6, %s12503_s15 }
0x2dcb   : > { %7621 = vrot.lane.b32.xlu0 %v9597_v30, %s12502_s14 }
0x2e36   : > { %v7602_v18 = vpop.xlane.xlu0 %7601 }
0x2e37   : > { %v7604_v42 = vmul.f32 0.03125, %v7602_v18 }
0x2e39   : > { %v7606_v50 = vadd.f32 1e-05, %v7604_v42 }
0x2e3a   : > { %v7599_v61 = vpop.xlane.xlu0 %7598 }
0x2e3b   : > { %12439 = vrsqrt.f32 %v7606_v50  ;;  %v7603_v29 = vmul.f32 0.03125, %v7599_v61 }
0x2e3d   : > { %v7605_v55 = vadd.f32 1e-05, %v7603_v29 }
0x2e3e   : > { %v12094_v26 = vpop.permute.xlu0 %12093 }
0x2e3f   : > { %12441 = vrsqrt.f32 %v7605_v55  ;;  %v12096_v62 = vunpack.i.h.bf16 %v12094_v26  ;;  %v12095_v22 = vunpack.i.l.bf16 %v12094_v26 }
0x2e41   : > { %v11606_v60 = vpack.c.bf16 %v12096_v62, %v12095_v22 }
0x2e42   : > { %v7743_v15 = vpop.permute.xlu0 %7742 }
0x2e43   : > { %11607 = vmatprep.subr.bf16.mxu1 %v11606_v60 }
0x2e44   : > { %11609 = vmatpush3.bf16.msra.mxu1 %v11606_v60 }
0x2e45   : > { %v12440_v12 = vpop.eup %12439 }
0x2e46   : > { %v7610_v53 = vmul.f32 %v12440_v12, %v7594_v31  ;;  %v7622_v18 = vpop.permute.xlu0 %7621 }
0x2e47   : > { %10882 = vmatmul.mubr.msk.f32.vlgmr.msra.gmra.mrb[60].mxu1 %vm539_vm0, %v14012_v0  ;;  %v7746_v0 = vsel %vm539_vm0, %v7743_v15, %v7745_v10 }
0x2e48   : > { %10884 = vmatprep.mubr.msk.f32.mxu1 %vm539_vm0, %v14016_v27  ;;  %v7615_v32 = vmul.f32 %v7612_v3, %v7610_v53 }
0x2e49   : > { %v12442_v30 = vpop.eup %12441 }
0x2e4a   : > { %v7609_v21 = vmul.f32 %v12442_v30, %v7593_v5  ;;  %v7620_v45 = vadd.f32 %v7617_v51, %v7615_v32 }
0x2e4b   : > { %10885 = vmatmul.mubr.msk.f32.gmra.mrb[62].mxu1 %vm539_vm0, %v14024_v56 }
0x2e4c   : > { %v7614_v20 = vmul.f32 %v7612_v3, %v7609_v21 }
0x2e4e   : > { %v7619_v39 = vadd.f32 %v7617_v51, %v7614_v20 }
0x2e50   : > { %10870 = vmatprep.mubr.msk.f32.mxu0 %vm539_vm0, %v7619_v39 }
0x2e51   : > { %10871 = vmatmul.mubr.msk.f32.vlgmr.msra.gmra.mrb[62].mxu0 %vm539_vm0, %v7620_v45 }
0x2f1a   : > { %v10883_v13 = vpop.f32.mrb[60].mxu1 }
0x2f1b   : > { %v7820_v27 = vadd.f32 %v10883_v13, %v7746_v0  ;;  %v7814_v11 = vpop.f32.mrb[61].mxu1 }
0x2f1c   : > { %v7815_v57 = vadd.f32 %v7814_v11, %v7746_v0 }
0x2f1d   : > { %v8062_v33 = vmul.f32 %v14122_v40, %v7820_v27  ;;  %v14611_v56 = vmul.f32 %v14120_v35, %v7820_v27  ;;  %v14614_v34 = vmul.f32 %v14144_v14, %v7820_v27  ;;  %v14627_v46 = vmul.f32 %v14185_v58, %v7820_v27 }
0x2f1e   : > { %v11610_v31 = vpack.c.bf16 %v7820_v27, %v7815_v57  ;;  %v10886_v5 = vpop.f32.mrb[62].mxu1  ;;  %v8061_v9 = vmul.f32 %v14122_v40, %v7815_v57  ;;  %v14618_v17 = vmul.f32 %v14120_v35, %v7815_v57  ;;  %v14621_v25 = vmul.f32 %v14144_v14, %v7815_v57 }
0x2f1f   : > { %v7830_v24 = vadd.f32 %v10886_v5, %v7746_v0  ;;  %v7824_v16 = vpop.f32.mrb[63].mxu1  ;;  %v14624_v19 = vmul.f32 %v14185_v58, %v7815_v57 }
0x2f20   : > { %v7825_v63 = vadd.f32 %v7824_v16, %v7746_v0  ;;  %11612 = vmatprep.subr.msk.bf16.mxu0 %vm12730_vm11, %v11610_v31  ;;  %11624 = vmatprep.subr.msk.bf16.mxu1 %vm12730_vm11, %v11610_v31  ;;  %v12097_v52 = vpack.i.bf16 %v8062_v33, %v8061_v9  ;;  %v12107_v23 = vpack.i.bf16 %v14611_v56, %v14618_v17 }
0x2f21   : > { %11615 = vmatpush3.bf16.xpose.msk.msra.mxu0 %vm12730_vm11, %v11610_v31  ;;  %11627 = vmatpush3.bf16.xpose.msk.msra.mxu1 %vm12730_vm11, %v11610_v31  ;;  %v14640_v43 = vmul.f32 %v14122_v40, %v7830_v24  ;;  %v14643_v1 = vmul.f32 %v14120_v35, %v7830_v24  ;;  %v12117_v38 = vpack.i.bf16 %v14614_v34, %v14621_v25 }
0x2f22   : > { %v11616_v4 = vpack.c.bf16 %v7830_v24, %v7825_v63  ;;  %12098 = vrot.lane.b32.xlu0 %v12097_v52, %s12500_s21  ;;  %v14649_v54 = vmul.f32 %v14122_v40, %v7825_v63  ;;  %v14652_v2 = vmul.f32 %v14120_v35, %v7825_v63  ;;  %v14655_v6 = vmul.f32 %v14144_v14, %v7825_v63 }
0x2f23   : > { %v14658_v42 = vmul.f32 %v14144_v14, %v7830_v24  ;;  %v12127_v50 = vpack.i.bf16 %v14627_v46, %v14624_v19  ;;  %v14663_v61 = vmul.f32 %v14185_v58, %v7825_v63  ;;  %v14666_v29 = vmul.f32 %v14185_v58, %v7830_v24 }
0x2f24   : > { %v10872_v40 = vpop.f32.mrb[62].mxu0  ;;  %11618 = vmatprep.subr.msk.bf16.mxu0 %vm12730_vm11, %v11616_v4  ;;  %11630 = vmatprep.subr.msk.bf16.mxu1 %vm12730_vm11, %v11616_v4  ;;  %v12102_v35 = vpack.i.bf16 %v14640_v43, %v14649_v54  ;;  %v12112_v14 = vpack.i.bf16 %v14643_v1, %v14652_v2 }
0x2f25   : > { %v7696_v55 = vpop.f32.mrb[63].mxu0  ;;  %v12122_v26 = vpack.i.bf16 %v14658_v42, %v14655_v6  ;;  %v12132_v58 = vpack.i.bf16 %v14666_v29, %v14663_v61  ;;  %v7702_v62 = vadd.f32 %v10872_v40, %v7622_v18 }
0x2f26   : > { %v7697_v22 = vadd.f32 %v7696_v55, %v7622_v18 }
0x2f27   : > { %v7834_v12 = vmul.f32 0.35355338, %v7702_v62 }
0x2f28   : > { %v7833_v60 = vmul.f32 0.35355338, %v7697_v22 }
0x2f29   : > { %11621 = vmatpush3.bf16.xpose.msk.msra.mxu0 %vm12730_vm11, %v11616_v4  ;;  %11633 = vmatpush3.bf16.xpose.msk.msra.mxu1 %vm12730_vm11, %v11616_v4  ;;  %v7836_v30 = vmul.f32 %v12682_v36, %v7834_v12  ;;  %v7957_v21 = vmul.f32 %v12685_v37, %v7834_v12  ;;  %v8468_v20 = vmul.f32 %v12717_v49, %v7834_v12 }
0x2f2a   : > { %v7835_v3 = vmul.f32 %v12682_v36, %v7833_v60  ;;  %v7956_v53 = vmul.f32 %v12685_v37, %v7833_v60  ;;  %11652 = vmatprep.subr.msk.bf16.mxu1 %vm12730_vm11, %v11610_v31  ;;  %v8259_v32 = vmul.f32 %v12714_v48, %v7833_v60  ;;  %v8260_v36 = vmul.f32 %v12714_v48, %v7834_v12 }
0x2f2b   : > { %v8467_v37 = vmul.f32 %v12717_v49, %v7833_v60 }
0x2f2c   : > { %10895 = vmatprep.mubr.msk.f32.mxu0 %vm539_vm0, %v7835_v3  ;;  %10906 = vmatprep.mubr.msk.f32.mxu1 %vm539_vm0, %v7956_v53 }
0x2f30   : > { %10896 = vmatmul.mubr.msk.f32.vlgmr.msra.gmra.mrb[64].mxu0 %vm539_vm0, %v7836_v30  ;;  %10907 = vmatmul.mubr.msk.f32.vlgmr.msra.gmra.mrb[64].mxu1 %vm539_vm0, %v7957_v21 }
0x2f31   : > { %11655 = vmatpush3.bf16.xpose.msk.msra.mxu1 %vm12730_vm11, %v11610_v31  ;;  %10939 = vmatprep.mubr.msk.f32.mxu1 %vm539_vm0, %v8259_v32 }
0x2f32   : > { %11658 = vmatprep.subr.msk.bf16.mxu1 %vm12730_vm11, %v11616_v4 }
0x2f39   : > { %11661 = vmatpush3.bf16.xpose.msk.msra.mxu1 %vm12730_vm11, %v11616_v4 }
0x2f3a   : > { %11672 = vmatprep.subr.msk.bf16.mxu1 %vm12730_vm11, %v11610_v31 }
0x2f40   : > { %10940 = vmatmul.mubr.msk.f32.vlgmr.msra.gmra.mrb[66].mxu1 %vm539_vm0, %v8260_v36 }
0x2f41   : > { %11675 = vmatpush3.bf16.xpose.msk.msra.mxu1 %vm12730_vm11, %v11610_v31  ;;  %10961 = vmatprep.mubr.msk.f32.mxu1 %vm539_vm0, %v8467_v37 }
0x2f42   : > { %11678 = vmatprep.subr.msk.bf16.mxu1 %vm12730_vm11, %v11616_v4 }
0x2f49   : > { %11681 = vmatpush3.bf16.xpose.msk.msra.mxu1 %vm12730_vm11, %v11616_v4 }
0x2f50   : > { %10962 = vmatmul.mubr.msk.f32.vlgmr.msra.gmra.mrb[68].mxu1 %vm539_vm0, %v8468_v20 }
0x2f94   : > { %v12099_v48 = vpop.permute.xlu0 %12098 }
0x2f95   : > { %v12101_v51 = vunpack.i.h.bf16 %v12099_v48  ;;  %v12100_v39 = vunpack.i.l.bf16 %v12099_v48 }
0x2f97   : > { %v11634_v45 = vpack.c.bf16 %v12101_v51, %v12100_v39 }
0x2f99   : > { %11635 = vmatprep.subr.bf16.mxu0 %v11634_v45 }
0x2f9a   : > { %11637 = vmatpush3.bf16.msra.mxu0 %v11634_v45 }
0x3003   : > { %v10897_v10 = vpop.f32.mrb[64].mxu0  ;;  %v10908_v15 = vpop.f32.mrb[64].mxu1 }
0x3004   : > { %v14716_v0 = vpop.f32.mrb[65].mxu0  ;;  %v7933_v13 = vsel %vm3965_vm12, %v10897_v10, -inf  ;;  %v8030_v27 = vpop.f32.mrb[65].mxu1  ;;  %v8042_v59 = vsel %vm3965_vm12, %v10908_v15, -inf }
0x3005   : > { %7934 = vmax.xlane.f32.xlu1 %v7933_v13  ;;  %8043 = vmax.xlane.f32.xlu0 %v8042_v59  ;;  %v8039_v49 = vsel %vm539_vm0, %v8030_v27, -inf  ;;  %v7930_v11 = vsel %vm539_vm0, %v14716_v0, -inf }
0x3009   : > { %8040 = vmax.xlane.f32.xlu1 %v8039_v49  ;;  %7931 = vmax.xlane.f32.xlu0 %v7930_v11 }
0x3013   : > { %v10941_v57 = vpop.f32.mrb[66].mxu1 }
0x3014   : > { %v14723_v33 = vpop.f32.mrb[67].mxu1  ;;  %v8345_v31 = vsel %vm3965_vm12, %v10941_v57, -inf }
0x3015   : > { %8346 = vmax.xlane.f32.xlu1 %v8345_v31  ;;  %v8342_v5 = vsel %vm539_vm0, %v14723_v33, -inf }
0x3016   : > { %8343 = vmax.xlane.f32.xlu0 %v8342_v5 }
0x3023   : > { %v14728_v9 = vpop.f32.mrb[68].mxu1 }
0x3024   : > { %v8541_v24 = vpop.f32.mrb[69].mxu1  ;;  %v8553_v63 = vsel %vm3965_vm12, %v14728_v9, -inf }
0x3025   : > { %v8550_v16 = vsel %vm539_vm0, %v8541_v24, -inf }
0x3026   : > { %12103 = vrot.lane.b32.xlu1 %v12102_v35, %s12500_s21  ;;  %8551 = vmax.xlane.f32.xlu0 %v8550_v16 }
0x303c   : > { %12108 = vrot.lane.b32.xlu0 %v12107_v23, %s12500_s21 }
0x304a   : > { %8554 = vmax.xlane.f32.xlu1 %v8553_v63 }
0x305b   : > { %12113 = vrot.lane.b32.xlu1 %v12112_v14, %s12500_s21 }
0x305f   : > { %12118 = vrot.lane.b32.xlu1 %v12117_v38, %s12500_s21 }
0x3092   : > { %v7935_v52 = vpop.xlane.xlu1 %7934  ;;  %v8044_v43 = vpop.xlane.xlu0 %8043 }
0x3093   : > { %v7937_v4 = vsub.f32 %v10897_v10, %v7935_v52  ;;  %v8046_v54 = vsub.f32 %v10908_v15, %v8044_v43 }
0x3095   : > { %v8049_v56 = vmul.f32 1.442695, %v8046_v54  ;;  %v7940_v17 = vmul.f32 1.442695, %v7937_v4 }
0x3096   : > { %v8041_v23 = vpop.xlane.xlu1 %8040  ;;  %v7932_v53 = vpop.xlane.xlu0 %7931 }
0x3097   : > { %v8045_v18 = vsub.f32 %v8030_v27, %v8041_v23  ;;  %12443 = vpow2.f32 %v8049_v56  ;;  %v7936_v13 = vsub.f32 %v14716_v0, %v7932_v53 }
0x3098   : > { %12445 = vpow2.f32 %v7940_v17 }
0x3099   : > { %v8047_v40 = vmul.f32 1.442695, %v8045_v18  ;;  %v7938_v27 = vmul.f32 1.442695, %v7936_v13 }
0x309b   : > { %12447 = vpow2.f32 %v8047_v40 }
0x30a1   : > { %v14746_v35 = vpop.eup %12443 }
0x30a2   : > { %v8347_v1 = vpop.xlane.xlu1 %8346  ;;  %v8054_v2 = vsel %vm3965_vm12, %v14746_v35, 0.0  ;;  %v14750_v34 = vpop.eup %12445 }
0x30a3   : > { %v8349_v25 = vsub.f32 %v10941_v57, %v8347_v1  ;;  %8055 = vadd.xlane.f32.xlu1 %v8054_v2  ;;  %v7945_v22 = vsel %vm3965_vm12, %v14750_v34, 0.0  ;;  %v8344_v30 = vpop.xlane.xlu0 %8343 }
0x30a4   : > { %v8348_v59 = vsub.f32 %v14723_v33, %v8344_v30 }
0x30a5   : > { %v14752_v38 = vpop.eup %12447  ;;  %v8352_v14 = vmul.f32 1.442695, %v8349_v25 }
0x30a6   : > { %v8051_v55 = vsel %vm539_vm0, %v14752_v38, 0.0  ;;  %v12104_v62 = vpop.permute.xlu1 %12103  ;;  %v8350_v49 = vmul.f32 1.442695, %v8348_v59 }
0x30a7   : > { %8052 = vadd.xlane.f32.xlu0 %v8051_v55  ;;  %12449 = vpow2.f32 %v8352_v14  ;;  %v12106_v60 = vunpack.i.h.bf16 %v12104_v62  ;;  %v12105_v12 = vunpack.i.l.bf16 %v12104_v62  ;;  %7946 = vadd.xlane.f32.xlu1 %v7945_v22 }
0x30a9   : > { %v11638_v3 = vpack.c.bf16 %v12106_v60, %v12105_v12 }
0x30ab   : > { %11639 = vmatprep.subr.bf16.mxu0 %v11638_v3 }
0x30ac   : > { %11641 = vmatpush3.bf16.msra.mxu0 %v11638_v3 }
0x30b1   : > { %v14758_v21 = vpop.eup %12449 }
0x30b2   : > { %v8357_v32 = vsel %vm3965_vm12, %v14758_v21, 0.0 }
0x30b3   : > { %8358 = vadd.xlane.f32.xlu1 %v8357_v32  ;;  %v8552_v36 = vpop.xlane.xlu0 %8551 }
0x30b4   : > { %v8556_v37 = vsub.f32 %v8541_v24, %v8552_v36 }
0x30b6   : > { %v8558_v20 = vmul.f32 1.442695, %v8556_v37 }
0x30b7   : > { %v12109_v48 = vpop.permute.xlu0 %12108 }
0x30b8   : > { %12451 = vpow2.f32 %v8558_v20  ;;  %v12111_v51 = vunpack.i.h.bf16 %v12109_v48  ;;  %v12110_v39 = vunpack.i.l.bf16 %v12109_v48 }
0x30b9   : > { %12453 = vpow2.f32 %v7938_v27 }
0x30ba   : > { %v11642_v45 = vpack.c.bf16 %v12111_v51, %v12110_v39  ;;  %12455 = vpow2.f32 %v8350_v49 }
0x30bc   : > { %11643 = vmatprep.subr.bf16.mxu0 %v11642_v45 }
0x30bd   : > { %12123 = vrot.lane.b32.xlu0 %v12122_v26, %s12500_s21 }
0x30c2   : > { %v14766_v10 = vpop.eup %12451 }
0x30c3   : > { %v8562_v15 = vsel %vm539_vm0, %v14766_v10, 0.0  ;;  %v12454_v6 = vpop.eup %12453 }
0x30c4   : > { %8563 = vadd.xlane.f32.xlu1 %v8562_v15  ;;  %v7942_v57 = vsel %vm539_vm0, %v12454_v6, 0.0  ;;  %v12456_v31 = vpop.eup %12455 }
0x30c5   : > { %v8354_v0 = vsel %vm539_vm0, %v12456_v31, 0.0 }
0x30d5   : > { %12128 = vrot.lane.b32.xlu1 %v12127_v50, %s12500_s21 }
0x30d7   : > { %v8555_v42 = vpop.xlane.xlu1 %8554 }
0x30d8   : > { %v8557_v26 = vsub.f32 %v14728_v9, %v8555_v42 }
0x30d9   : > { %12138 = vrot.lane.b32.xlu1 %v14568_v44, %s12503_s15 }
0x30da   : > { %v8560_v11 = vmul.f32 1.442695, %v8557_v26 }
0x30db   : > { %v12114_v19 = vpop.permute.xlu1 %12113 }
0x30dc   : > { %7943 = vadd.xlane.f32.xlu0 %v7942_v57  ;;  %12457 = vpow2.f32 %v8560_v11  ;;  %v12116_v63 = vunpack.i.h.bf16 %v12114_v19  ;;  %v12115_v52 = vunpack.i.l.bf16 %v12114_v19 }
0x30de   : > { %v11646_v44 = vpack.c.bf16 %v12116_v63, %v12115_v52 }
0x30df   : > { %v12119_v46 = vpop.permute.xlu1 %12118 }
0x30e0   : > { %8355 = vadd.xlane.f32.xlu0 %v8354_v0  ;;  %v12121_v29 = vunpack.i.h.bf16 %v12119_v46 }
0x30e6   : > { %v14779_v33 = vpop.eup %12457 }
0x30e7   : > { %v8565_v5 = vsel %vm3965_vm12, %v14779_v33, 0.0 }
0x30e8   : > { %8566 = vadd.xlane.f32.xlu0 %v8565_v5 }
0x30fe   : > { %12133 = vrot.lane.b32.xlu0 %v12132_v58, %s12500_s21  ;;  %v12120_v58 = vunpack.i.l.bf16 %v12119_v46 }
0x3102   : > { %12143 = vrot.lane.b32.xlu0 %v14586_v28, %s12503_s15  ;;  %v11662_v28 = vpack.c.bf16 %v12121_v29, %v12120_v58 }
0x3130   : > { %v8056_v50 = vpop.xlane.xlu1 %8055 }
0x3131   : > { %12459 = vrcp.f32 %v8056_v50 }
0x3134   : > { %v8053_v9 = vpop.xlane.xlu0 %8052  ;;  %v7947_v54 = vpop.xlane.xlu1 %7946 }
0x3135   : > { %12461 = vrcp.f32 %v8053_v9 }
0x3136   : > { %12463 = vrcp.f32 %v7947_v54 }
0x3138   : > { %v12124_v4 = vpop.permute.xlu0 %12123 }
0x3139   : > { %v12126_v1 = vunpack.i.h.bf16 %v12124_v4  ;;  %v12125_v2 = vunpack.i.l.bf16 %v12124_v4 }
0x313b   : > { %v12460_v24 = vpop.eup %12459  ;;  %v11666_v22 = vpack.c.bf16 %v12126_v1, %v12125_v2 }
0x313c   : > { %v8060_v61 = vmul.f32 %v12460_v24, %v14746_v35  ;;  %v9641_v24 = vld [vmem:[%s14947_s9 + $0x3] ss:$0 sm:$0xff] }
0x313f   : > { %v12462_v16 = vpop.eup %12461 }
0x3140   : > { %v8058_v43 = vmul.f32 %v12462_v16, %v14752_v38  ;;  %v8359_v17 = vpop.xlane.xlu1 %8358  ;;  %v12464_v40 = vpop.eup %12463 }
0x3141   : > { %v7951_v14 = vmul.f32 %v12464_v40, %v14750_v34  ;;  %v9548_v40 = vld [vmem:[%s14945_s7 + $0xa0] sm:$0xff] }
0x3142   : > { %10917 = vmatprep.mubr.msk.f32.mxu0 %vm539_vm0, %v8058_v43 }
0x3143   : > { %10918 = vmatmul.mubr.msk.f32.vlgmr.msra.gmra.mrb[66].mxu0 %vm539_vm0, %v8060_v61 }
0x3144   : > { %11645 = vmatpush3.bf16.msra.mxu0 %v11642_v45 }
0x3145   : > { %11647 = vmatprep.subr.bf16.mxu0 %v11646_v44 }
0x3148   : > { %11649 = vmatpush3.bf16.msra.mxu0 %v11646_v44 }
0x3149   : > { %11663 = vmatprep.subr.bf16.mxu0 %v11662_v28 }
0x3151   : > { %v8564_v18 = vpop.xlane.xlu1 %8563 }
0x3155   : > { %v12129_v25 = vpop.permute.xlu1 %12128 }
0x3156   : > { %v12131_v60 = vunpack.i.h.bf16 %v12129_v25  ;;  %v12130_v12 = vunpack.i.l.bf16 %v12129_v25  ;;  %v9550_v25 = vld [vmem:[%s14946_s8 + $0x80] sm:$0xff] }
0x3158   : > { %v11682_v36 = vpack.c.bf16 %v12131_v60, %v12130_v12 }
0x3159   : > { %v12139_v20 = vpop.permute.xlu1 %12138 }
0x315a   : > { %v12141_v51 = vunpack.i.h.bf16 %v12139_v20  ;;  %v12140_v39 = vunpack.i.l.bf16 %v12139_v20 }
0x315c   : > { %v11690_v27 = vpack.c.bf16 %v12141_v51, %v12140_v39  ;;  %v9552_v51 = vld [vmem:[%s14946_s8 + $0x90] sm:$0xff]  ;;  %v9553_v39 = vld [vmem:[%s14946_s8 + $0x98] sm:$0xff] }
0x3169   : > { %v7944_v56 = vpop.xlane.xlu0 %7943 }
0x316a   : > { %12465 = vrcp.f32 %v7944_v56  ;;  %v9033_v56 = vld [vmem:[%s14948_s10 + $0x22] sm:$0x1] }
0x316d   : > { %v8356_v23 = vpop.xlane.xlu0 %8355 }
0x316e   : > { %12467 = vrcp.f32 %v8356_v23  ;;  %v9547_v23 = vld [vmem:[%s14945_s7 + $0x88] sm:$0xff] }
0x316f   : > { %12469 = vrcp.f32 %v8359_v17  ;;  %v9546_v17 = vld [vmem:[%s14945_s7 + $0x70] sm:$0xff] }
0x3170   : > { %12471 = vrcp.f32 %v8564_v18  ;;  %v11698_v18 = vpack.c.bf16 %v9547_v23, %v9546_v17 }
0x3172   : > { %11699 = vmatprep.subr.bf16.mxu1 %v11698_v18 }
0x3173   : > { %11701 = vmatpush3.bf16.msra.mxu1 %v11698_v18 }
0x3174   : > { %v12466_v35 = vpop.eup %12465 }
0x3175   : > { %v7949_v38 = vmul.f32 %v12466_v35, %v12454_v6  ;;  %v8567_v55 = vpop.xlane.xlu0 %8566  ;;  %v9549_v35 = vld [vmem:[%s14945_s7 + $0xb8] sm:$0xff] }
0x3176   : > { %12473 = vrcp.f32 %v8567_v55  ;;  %v11702_v1 = vpack.c.bf16 %v9549_v35, %v9548_v40 }
0x3177   : > { %10928 = vmatprep.mubr.msk.f32.mxu0 %vm539_vm0, %v7949_v38  ;;  %v9551_v38 = vld [vmem:[%s14946_s8 + $0x88] sm:$0xff] }
0x3178   : > { %v12468_v62 = vpop.eup %12467  ;;  %10929 = vmatmul.mubr.msk.f32.vlgmr.msra.gmra.mrb[66].mxu0 %vm539_vm0, %v7951_v14  ;;  %11703 = vmatprep.subr.bf16.mxu1 %v11702_v1  ;;  %v11706_v14 = vpack.c.bf16 %v9551_v38, %v9550_v25 }
0x3179   : > { %11665 = vmatpush3.bf16.msra.mxu0 %v11662_v28  ;;  %v8361_v3 = vmul.f32 %v12468_v62, %v12456_v31  ;;  %v12134_v53 = vpop.permute.xlu0 %12133  ;;  %v12470_v30 = vpop.eup %12469  ;;  %v6496_v28 = vld [vmem:[%s14947_s9 + $0x7] sm:$0x5]  ;;  %11705 = vmatpush3.bf16.msra.mxu1 %v11702_v1 }
0x317a   : > { %11667 = vmatprep.subr.bf16.mxu0 %v11666_v22  ;;  %v12472_v32 = vpop.eup %12471  ;;  %v12136_v34 = vunpack.i.h.bf16 %v12134_v53  ;;  %v12135_v37 = vunpack.i.l.bf16 %v12134_v53  ;;  %v8363_v48 = vmul.f32 %v12470_v30, %v14758_v21  ;;  %v8820_v4 = vrot.slane %v6496_v28, %v13644_v41 }
0x317b   : > { %10950 = vmatprep.mubr.msk.f32.mxu0 %vm539_vm0, %v8361_v3  ;;  %v8569_v45 = vmul.f32 %v12472_v32, %v14766_v10  ;;  %v9638_v10 = vld [vmem:[%s14947_s9 + $0x7] ss:$0 sm:$0xff]  ;;  %v8824_v2 = vrot.slane %v6496_v28, %v13650_v8 }
0x317c   : > { %v11686_v13 = vpack.c.bf16 %v12136_v34, %v12135_v37  ;;  %8692 = vrot.lane.b32.xlu1 %v9638_v10, %s12500_s21  ;;  %v8830_v54 = vrot.slane %v8820_v4, %v13644_v41 }
0x317d   : > { %11669 = vmatpush3.bf16.msra.mxu0 %v11666_v22  ;;  %v12144_v15 = vpop.permute.xlu0 %12143  ;;  %v8834_v55 = vrot.slane %v8824_v2, %v13644_v41 }
0x317e   : > { %11683 = vmatprep.subr.bf16.mxu0 %v11682_v36  ;;  %v12146_v59 = vunpack.i.h.bf16 %v12144_v15  ;;  %v12145_v49 = vunpack.i.l.bf16 %v12144_v15  ;;  %v9554_v15 = vld [vmem:[%s14946_s8 + $0xa0] sm:$0xff] }
0x3180   : > { %10951 = vmatmul.mubr.msk.f32.vlgmr.msra.gmra.mrb[66].mxu0 %vm539_vm0, %v8363_v48  ;;  %v12474_v6 = vpop.eup %12473  ;;  %v11694_v42 = vpack.c.bf16 %v12146_v59, %v12145_v49  ;;  %v9557_v49 = vld [vmem:[%s14946_s8 + $0xb8] sm:$0xff] }
0x3181   : > { %11685 = vmatpush3.bf16.msra.mxu0 %v11682_v36  ;;  %10972 = vmatprep.mubr.msk.f32.mxu0 %vm539_vm0, %v8569_v45  ;;  %v8571_v21 = vmul.f32 %v12474_v6, %v14779_v33  ;;  %v11710_v45 = vpack.c.bf16 %v9553_v39, %v9552_v51  ;;  %v9645_v51 = vld [vmem:[%s14948_s10 + $0x20] ss:$0 sm:$0xff] }
0x3182   : > { %11687 = vmatprep.subr.bf16.mxu0 %v11686_v13 }
0x3185   : > { %11689 = vmatpush3.bf16.msra.mxu0 %v11686_v13  ;;  %v9555_v13 = vld [vmem:[%s14946_s8 + $0xa8] sm:$0xff] }
0x3186   : > { %11691 = vmatprep.subr.bf16.mxu0 %v11690_v27  ;;  %v11714_v59 = vpack.c.bf16 %v9555_v13, %v9554_v15 }
0x3188   : > { %10973 = vmatmul.mubr.msk.f32.vlgmr.msra.gmra.mrb[66].mxu0 %vm539_vm0, %v8571_v21  ;;  %v9558_v21 = vld [vmem:[%s14946_s8 + $0xc0] sm:$0xff] }
0x3189   : > { %11693 = vmatpush3.bf16.msra.mxu0 %v11690_v27  ;;  %v9556_v27 = vld [vmem:[%s14946_s8 + $0xb0] sm:$0xff] }
0x318a   : > { %11695 = vmatprep.subr.bf16.mxu0 %v11694_v42  ;;  %v11718_v6 = vpack.c.bf16 %v9557_v49, %v9556_v27 }
0x318d   : > { %11697 = vmatpush3.bf16.msra.mxu0 %v11694_v42  ;;  %v9559_v42 = vld [vmem:[%s14946_s8 + $0xc8] sm:$0xff] }
0x318e   : > { %11707 = vmatprep.subr.bf16.mxu0 %v11706_v14  ;;  %v11722_v10 = vpack.c.bf16 %v9559_v42, %v9558_v21 }
0x31ee   : > { %v8693_v57 = vpop.permute.xlu1 %8692 }
0x325b   : > { %v10974_v26 = vpop.f32.mrb[66].mxu0 }
0x325c   : > { %v8664_v11 = vpop.f32.mrb[67].mxu0 }
0x325d   : > { %10983 = vmatprep.mubr.msk.f32.mxu0 %vm539_vm0, %v8664_v11  ;;  %v9561_v11 = vld [vmem:[%s14946_s8 + $0xd8] sm:$0xff] }
0x325e   : > { %10984 = vmatmul.mubr.msk.f32.vlgmr.msra.gmra.mrb[68].mxu0 %vm539_vm0, %v10974_v26  ;;  %v9560_v26 = vld [vmem:[%s14946_s8 + $0xd0] sm:$0xff] }
0x325f   : > { %11709 = vmatpush3.bf16.msra.mxu0 %v11706_v14 }
0x3260   : > { %11711 = vmatprep.subr.bf16.mxu0 %v11710_v45 }
0x3263   : > { %11713 = vmatpush3.bf16.msra.mxu0 %v11710_v45 }
0x3264   : > { %11715 = vmatprep.subr.bf16.mxu0 %v11714_v59 }
0x3267   : > { %11717 = vmatpush3.bf16.msra.mxu0 %v11714_v59 }
0x3268   : > { %11719 = vmatprep.subr.bf16.mxu0 %v11718_v6 }
0x326b   : > { %11721 = vmatpush3.bf16.msra.mxu0 %v11718_v6 }
0x326c   : > { %11723 = vmatprep.subr.bf16.mxu0 %v11722_v10 }
0x326f   : > { %11725 = vmatpush3.bf16.msra.mxu0 %v11722_v10 }
0x3331   : > { %v10985_v31 = vpop.f32.mrb[68].mxu0 }
0x3332   : > { %v8773_v0 = vadd.f32 %v10985_v31, %v8693_v57  ;;  %v8767_v33 = vpop.f32.mrb[69].mxu0  ;;  %v9562_v31 = vld [vmem:[%s14946_s8 + $0xe0] sm:$0xff] }
0x3333   : > { %v8768_v5 = vadd.f32 %v8767_v33, %v8693_v57  ;;  %v11726_v57 = vpack.c.bf16 %v9561_v11, %v9560_v26 }
0x3334   : > { %v14812_v19 = vadd.f32 %v8773_v0, %v14553_v47  ;;  %v9563_v0 = vld [vmem:[%s14946_s8 + $0xe8] sm:$0xff] }
0x3335   : > { %v14815_v46 = vadd.f32 %v8768_v5, %v14556_v7  ;;  %11727 = vmatprep.subr.bf16.mxu0 %v11726_v57  ;;  %v11730_v33 = vpack.c.bf16 %v9563_v0, %v9562_v31  ;;  %v9564_v5 = vld [vmem:[%s14946_s8 + $0xf0] sm:$0xff] }
0x3336   : > { %v8781_v50 = vsel %vm3965_vm12, %v14812_v19, 0.0  ;;  %11729 = vmatpush3.bf16.msra.mxu0 %v11726_v57 }
0x3337   : > { %8782 = vadd.xlane.f32.xlu1 %v8781_v50  ;;  %v8778_v9 = vsel %vm539_vm0, %v14815_v46, 0.0  ;;  %v9565_v50 = vld [vmem:[%s14946_s8 + $0xf8] sm:$0xff]  ;;  %11731 = vmatprep.subr.bf16.mxu0 %v11730_v33 }
0x3338   : > { %8779 = vadd.xlane.f32.xlu0 %v8778_v9  ;;  %v11734_v9 = vpack.c.bf16 %v9565_v50, %v9564_v5 }
0x333a   : > { %11733 = vmatpush3.bf16.msra.mxu0 %v11730_v33 }
0x333b   : > { %11735 = vmatprep.subr.bf16.mxu0 %v11734_v9 }
0x333e   : > { %11737 = vmatpush3.bf16.msra.mxu0 %v11734_v9 }
0x3348   : > { %8811 = vrot.lane.b32.xlu1 %v9641_v24, %s12500_s21 }
0x334c   : > { %8839 = vrot.lane.b32.xlu1 %v8834_v55, %s12502_s14 }
0x33c4   : > { %v8783_v16 = vpop.xlane.xlu1 %8782 }
0x33c5   : > { %v8785_v47 = vmul.f32 0.03125, %v8783_v16  ;;  %v8780_v63 = vpop.xlane.xlu0 %8779  ;;  %v9027_v16 = vld [vmem:[%s14948_s10] sm:$0xff] }
0x33c6   : > { %v8784_v52 = vmul.f32 0.03125, %v8780_v63 }
0x33c7   : > { %v8787_v7 = vsub.f32 %v14812_v19, %v8785_v47  ;;  %v9028_v47 = vld [vmem:[%s14948_s10 + $0x8] sm:$0xff] }
0x33c8   : > { %v8786_v43 = vsub.f32 %v14815_v46, %v8784_v52  ;;  %v8812_v32 = vpop.permute.xlu1 %8811  ;;  %v11738_v63 = vpack.c.bf16 %v9028_v47, %v9027_v16  ;;  %v9032_v16 = vld [vmem:[%s14948_s10 + $0x21] sm:$0x1] }
0x33c9   : > { %v8789_v29 = vmul.f32 %v8787_v7, %v8787_v7 }
0x33ca   : > { %v8788_v61 = vmul.f32 %v8786_v43, %v8786_v43  ;;  %11739 = vmatprep.subr.bf16.mxu1 %v11738_v63 }
0x33cb   : > { %v8793_v58 = vsel %vm3965_vm12, %v8789_v29, 0.0 }
0x33cc   : > { %v8790_v44 = vsel %vm539_vm0, %v8788_v61, 0.0  ;;  %v8840_v52 = vpop.permute.xlu1 %8839 }
0x33cd   : > { %8791 = vadd.xlane.f32.xlu0 %v8790_v44 }
0x33d1   : > { %8794 = vadd.xlane.f32.xlu0 %v8793_v58 }
0x33e7   : > { %8837 = vrot.lane.b32.xlu0 %v8830_v54, %s12502_s14 }
0x33eb   : > { %9139 = vperm.xlu0 %11815, %v9033_v56  }
0x345a   : > { %v8792_v62 = vpop.xlane.xlu0 %8791 }
0x345b   : > { %v8796_v22 = vmul.f32 0.03125, %v8792_v62 }
0x345d   : > { %v8798_v8 = vadd.f32 1e-05, %v8796_v22 }
0x345e   : > { %v8795_v60 = vpop.xlane.xlu0 %8794 }
0x345f   : > { %12475 = vrsqrt.f32 %v8798_v8  ;;  %v8797_v12 = vmul.f32 0.03125, %v8795_v60  ;;  %v9029_v60 = vld [vmem:[%s14948_s10 + $0x10] sm:$0xff] }
0x3461   : > { %v8799_v3 = vadd.f32 1e-05, %v8797_v12  ;;  %v9030_v12 = vld [vmem:[%s14948_s10 + $0x18] sm:$0xff] }
0x3463   : > { %12477 = vrsqrt.f32 %v8799_v3  ;;  %v11742_v3 = vpack.c.bf16 %v9030_v12, %v9029_v60 }
0x3469   : > { %v12476_v53 = vpop.eup %12475 }
0x346a   : > { %v8802_v30 = vmul.f32 %v12476_v53, %v8786_v43 }
0x346c   : > { %v8808_v36 = vmul.f32 %v9641_v24, %v8802_v30 }
0x346d   : > { %v12478_v34 = vpop.eup %12477 }
0x346e   : > { %v8803_v37 = vmul.f32 %v12478_v34, %v8787_v7  ;;  %v8814_v20 = vadd.f32 %v8812_v32, %v8808_v36  ;;  %v8838_v7 = vpop.permute.xlu0 %8837 }
0x346f   : > { %v8841_v43 = vsel %vm4026_vm13, %v8838_v7, %v8840_v52 }
0x3470   : > { %v8809_v41 = vmul.f32 %v9641_v24, %v8803_v37  ;;  %10994 = vmatprep.mubr.msk.f32.mxu1 %vm539_vm0, %v8814_v20  ;;  %v9644_v24 = vld [vmem:[%s14947_s9 + $0x9] ss:$0 sm:$0xff] }
0x3471   : > { %8947 = vrot.lane.b32.xlu1 %v9644_v24, %s12502_s14 }
0x3472   : > { %v8815_v48 = vadd.f32 %v8812_v32, %v8809_v41  ;;  %v12506_v41 = vmov 0.0|0.0   ;;  %v9140_v47 = vpop.permute.xlu0 %9139 }
0x3474   : > { %10995 = vmatmul.mubr.msk.f32.vlgmr.msra.gmra.mrb[70].mxu1 %vm539_vm0, %v8815_v48  ;;  %v14970_v48 = vmov 0.0  }
0x3475   : > { %11741 = vmatpush3.bf16.msra.mxu1 %v11738_v63 }
0x3476   : > { %11743 = vmatprep.subr.bf16.mxu1 %v11742_v3 }
0x3479   : > { %11745 = vmatpush3.bf16.msra.mxu1 %v11742_v3 }
0x347a   : > { %11746 = vmatprep.subr.bf16.mxu1 %v12506_v41 }
0x34e3   : > { %v8948_v53 = vpop.permute.xlu1 %8947 }
0x3547   : > { %v10996_v61 = vpop.f32.mrb[70].mxu1 }
0x3548   : > { %v8921_v44 = vadd.f32 %v10996_v61, %v8841_v43  ;;  %v8915_v29 = vpop.f32.mrb[71].mxu1 }
0x3549   : > { %v8916_v58 = vadd.f32 %v8915_v29, %v8841_v43 }
0x354a   : > { %v8927_v28 = vmul.f32 0.044715, %v8921_v44  ;;  %v8925_v62 = vmul.f32 0.5, %v8921_v44 }
0x354b   : > { %v8926_v4 = vmul.f32 0.044715, %v8916_v58  ;;  %v8924_v14 = vmul.f32 0.5, %v8916_v58 }
0x354c   : > { %v8929_v54 = vmul.f32 %v8927_v28, %v8921_v44 }
0x354d   : > { %v8928_v56 = vmul.f32 %v8926_v4, %v8916_v58 }
0x354e   : > { %v8931_v17 = vmul.f32 %v8929_v54, %v8921_v44 }
0x354f   : > { %v8930_v23 = vmul.f32 %v8928_v56, %v8916_v58 }
0x3550   : > { %v8933_v18 = vadd.f32 %v8931_v17, %v8921_v44 }
0x3551   : > { %v8932_v40 = vadd.f32 %v8930_v23, %v8916_v58 }
0x3552   : > { %v8935_v35 = vmul.f32 0.7978846, %v8933_v18 }
0x3553   : > { %v8934_v1 = vmul.f32 0.7978846, %v8932_v40 }
0x3554   : > { %12479 = vtanh.f32 %v8935_v35 }
0x3555   : > { %12481 = vtanh.f32 %v8934_v1 }
0x355e   : > { %v12480_v2 = vpop.eup %12479 }
0x355f   : > { %v12482_v25 = vpop.eup %12481  ;;  %v8939_v38 = vadd.f32 1.0, %v12480_v2 }
0x3560   : > { %v8938_v55 = vadd.f32 1.0, %v12482_v25 }
0x3561   : > { %v8941_v8 = vmul.f32 %v8939_v38, %v8925_v62 }
0x3562   : > { %v8940_v22 = vmul.f32 %v8938_v55, %v8924_v14 }
0x3564   : > { %11029 = vmatprep.mubr.f32.mxu0 %v8940_v22 }
0x3565   : > { %11030 = vmatmul.mubr.f32.vlgmr.msra.gmra.mrb[70].mxu0 %v8941_v8 }
0x3638   : > { %v11031_v30 = vpop.f32.mrb[70].mxu0 }
0x3639   : > { %v9022_v32 = vadd.f32 %v11031_v30, %v8948_v53  ;;  %v9016_v36 = vpop.f32.mrb[71].mxu0 }
0x363a   : > { %v9017_v34 = vadd.f32 %v9016_v36, %v8948_v53 }
0x363b   : > { %v9026_v20 = vadd.f32 %v9022_v32, %v14812_v19 }
0x363c   : > { %v9025_v37 = vadd.f32 %v9017_v34, %v14815_v46 }
0x363e   : > { %11040 = vmatprep.mubr.msk.f32.mxu1 %vm539_vm0, %v9025_v37 }
0x363f   : > { %11041 = vmatmul.mubr.msk.f32.vlgmr.msra.gmra.mrb[72].mxu1 %vm539_vm0, %v9026_v20  ;;  %vm9142_vm0 = vcmask 130048  }
0x3640   : > { %11047 = vmatprep.mubr.msk.f32.mxu1 %vm12507_vm6, %v14970_v48  ;;  %vm11748_vm7 = vmpackc.low %vm9142_vm0, %vm9142_vm0 }
0x3712   : > { %v11042_v39 = vpop.f32.mrb[72].mxu1 }
0x3713   : > { %v9116_v45 = vadd.f32 %v11042_v39, %v9645_v51  ;;  %v9110_v15 = vpop.f32.mrb[73].mxu1 }
0x3714   : > { %v9111_v13 = vadd.f32 %v9645_v51, %v9110_v15 }
0x3715   : > { %v9122_v46 = vmul.f32 0.044715, %v9116_v45  ;;  %v9120_v31 = vmul.f32 0.5, %v9116_v45 }
0x3716   : > { %v9121_v27 = vmul.f32 0.044715, %v9111_v13  ;;  %v9119_v33 = vmul.f32 0.5, %v9111_v13 }
0x3717   : > { %v9124_v19 = vmul.f32 %v9122_v46, %v9116_v45 }
0x3718   : > { %v9123_v59 = vmul.f32 %v9121_v27, %v9111_v13 }
0x3719   : > { %v9126_v49 = vmul.f32 %v9124_v19, %v9116_v45 }
0x371a   : > { %v9125_v6 = vmul.f32 %v9123_v59, %v9111_v13 }
0x371b   : > { %v9128_v21 = vadd.f32 %v9126_v49, %v9116_v45 }
0x371c   : > { %v9127_v42 = vadd.f32 %v9125_v6, %v9111_v13 }
0x371d   : > { %v9130_v10 = vmul.f32 0.7978846, %v9128_v21 }
0x371e   : > { %v9129_v26 = vmul.f32 0.7978846, %v9127_v42 }
0x371f   : > { %12483 = vtanh.f32 %v9130_v10 }
0x3720   : > { %12485 = vtanh.f32 %v9129_v26 }
0x3729   : > { %v12484_v11 = vpop.eup %12483 }
0x372a   : > { %v12486_v57 = vpop.eup %12485  ;;  %v9134_v0 = vadd.f32 1.0, %v12484_v11 }
0x372b   : > { %v9133_v5 = vadd.f32 1.0, %v12486_v57 }
0x372c   : > { %v9136_v50 = vmul.f32 %v9134_v0, %v9120_v31 }
0x372d   : > { %v9135_v9 = vmul.f32 %v9133_v5, %v9119_v33 }
0x372f   : > { %v11747_v24 = vpack.c.bf16 %v9136_v50, %v9135_v9 }
0x3731   : > { %11749 = vmatpush3.bf16.xpose.msk.msra.mxu1 %vm11748_vm7, %v11747_v24 }
0x3738   : > { %11048 = vmatmul.mubr.msk.f32.vlgmr.msra.gmra.mrb[74].mxu1 %vm9142_vm0, %v9032_v16 }
0x380b   : > { %v9218_v63 = vpop.f32.mrb[74].mxu1 }
0x380c   : > { %v9219_v52 = vadd.f32 %v9218_v63, %v9140_v47  ;;  %v11049_v7 = vpop.f32.mrb[75].mxu1 }
0x380e   : > { %9223 = vst.msk [vmem:[%s416_s22] sm:$0x1] %vm9222_vm8, %v9219_v52 }
0x380f PF: > { %s21_s17 = sadd.s32 1, %s12497_s17  }
0x3810   : > { %p18_p4 = scmp.ge.s32.totalorder %s21_s17, 4  }
0x3812   :  { %20 = sbr.rel (!%p18_p4) target bundleno = 1 (0x1), region = 104 }

</bundles_post_ra>
